<compile_context>
chip_gen: v7x
topology: tpu7x:2x2x1
jax: 0.10.0
libtpu: 0.0.40
codegen_flags: <defaults>
</compile_context>

<pallas_src>
import functools

import jax
import jax.numpy as jnp
from jax.experimental import pallas as pl
from jax.experimental.pallas import tpu as pltpu


# ---------------------------------------------------------------------------
# Fused conv3x3(pad=1) + folded-BN + ReLU + maxpool2x2 kernel.
# The wrapper builds im2col rows once, tap-major over the 2x2 pool window:
# patches[t, m, :] is the 3x3 neighborhood of pooled row m at pool tap t.
# ---------------------------------------------------------------------------
def _conv_bn_relu_pool_kernel(p_ref, w_ref, shift_ref, o_ref):
    # p_ref:     (4, TM, K)  bf16   im2col rows, one slab per 2x2-pool tap
    # w_ref:     (K, CT)     bf16   conv weights with BN scale folded in
    # shift_ref: (1, CT)     f32    folded BN shift (absorbs conv bias & mean)
    # o_ref:     (TM, CT)    bf16   pooled output rows
    w = w_ref[...]
    m = jnp.dot(p_ref[0], w, preferred_element_type=jnp.float32)
    for t in range(1, 4):
        m = jnp.maximum(m, jnp.dot(p_ref[t], w, preferred_element_type=jnp.float32))
    # max/(+shift)/relu commute (same shift for all taps, relu monotone).
    o_ref[...] = jnp.maximum(m + shift_ref[...], 0.0).astype(o_ref.dtype)


def _round_up(x, m):
    return (x + m - 1) // m * m


def _conv_vmem_bytes(tm, k, ct):
    return (2 * 4 * tm * k * 2      # double-buffered patch tile (bf16)
            + 2 * k * ct * 2        # double-buffered weight tile (bf16)
            + 2 * tm * ct * 2       # double-buffered output tile (bf16)
            + 3 * tm * ct * 4       # f32 running max + current tap (+ slack)
            + 2 * ct * 4)           # folded shift


def _pick_row_tile(M, k, ct, cap=1024, budget=36 * 1024 * 1024):
    """Output-row tile: large (HBM-roofline friendly) but within a VMEM budget,
    and >= 2 grid steps when possible so both v7x TensorCores get work."""
    g = pl.cdiv(M, cap)
    if M >= 32:
        g = max(g, 2)
    tm = _round_up(pl.cdiv(M, g), 8)
    while tm > 16 and _conv_vmem_bytes(tm, k, ct) > budget:
        tm = _round_up(pl.cdiv(tm, 2), 8)
    return max(tm, 8)


def conv_bn_relu_pool(x_nhwc, w_folded, shift):
    """x_nhwc: (N,H,W,Cin) bf16 (H, W even). w_folded: (Kp, Cout) bf16 with BN
    scale folded (Kp >= 9*Cin, zero-padded). shift: (1, Cout) f32."""
    N, H, W, Cin = x_nhwc.shape
    Kp, Cout = w_folded.shape
    K = 9 * Cin
    OH, OW = H // 2, W // 2
    M = N * OH * OW

    # im2col in bf16 (single XLA fusion): 3x3 neighborhoods, tap-major over the
    # 2x2 pool window. No per-tile regrouping copy (kernel indexes taps itself).
    xp = jnp.pad(x_nhwc, ((0, 0), (1, 1), (1, 1), (0, 0)))
    cols = [xp[:, kh:kh + H, kw:kw + W, :] for kh in range(3) for kw in range(3)]
    if Kp > K:                                   # cheap lane-alignment padding
        cols.append(jnp.zeros((N, H, W, Kp - K), x_nhwc.dtype))
    patches = jnp.concatenate(cols, axis=-1)             # (N, H, W, Kp)
    patches = patches.reshape(N, OH, 2, OW, 2, Kp)
    patches = patches.transpose(2, 4, 0, 1, 3, 5)        # (2, 2, N, OH, OW, Kp)
    patches = patches.reshape(4, M, Kp)                  # tap t = 2*dh + dw

    ct = 256 if Cout > 256 else Cout             # Cout split for the deep block
    CG = Cout // ct
    tm = _pick_row_tile(M, Kp, ct)
    G = pl.cdiv(M, tm)
    Mp = G * tm
    if Mp != M:                                  # pad rows so tm always divides
        patches = jnp.pad(patches, ((0, 0), (0, Mp - M), (0, 0)))

    need = _conv_vmem_bytes(tm, Kp, ct)
    vmem_limit = int(min(max(2 * need, 32 * 1024 * 1024), 56 * 1024 * 1024))

    out = pl.pallas_call(
        _conv_bn_relu_pool_kernel,
        out_shape=jax.ShapeDtypeStruct((Mp, Cout), jnp.bfloat16),
        grid=(G, CG),
        in_specs=[
            pl.BlockSpec((4, tm, Kp), lambda i, j: (0, i, 0)),
            pl.BlockSpec((Kp, ct), lambda i, j: (0, j)),
            pl.BlockSpec((1, ct), lambda i, j: (0, j)),
        ],
        out_specs=pl.BlockSpec((tm, ct), lambda i, j: (i, j)),
        compiler_params=pltpu.CompilerParams(
            dimension_semantics=("parallel", "parallel"),
            vmem_limit_bytes=vmem_limit),
    )(patches, w_folded, shift)
    if Mp != M:
        out = out[:M]
    return out.reshape(N, OH, OW, Cout)


# ---------------------------------------------------------------------------
# Fused classifier head: global-avg-pool + fc1 + relu + (dropout id) + fc2.
# fc2 is pre-padded to 128 output lanes; wrapper slices back to num_classes.
# ---------------------------------------------------------------------------
def _gap_mlp_kernel(x_ref, w1_ref, b1_ref, w2_ref, b2_ref, o_ref):
    # x_ref: (N, S, C) bf16 ; w1: (C, Hd) bf16 ; w2: (Hd, Kp) bf16 ; biases f32
    S = x_ref.shape[1]
    g = jnp.sum(x_ref[...].astype(jnp.float32), axis=1) * (1.0 / S)   # GAP, f32
    h = jnp.dot(g.astype(jnp.bfloat16), w1_ref[...],
                preferred_element_type=jnp.float32) + b1_ref[...]
    h = jnp.maximum(h, 0.0)
    # TODO(synk): dropout(p=0.5) is identity in eval mode; training-mode RNG
    # masking not implemented.
    o_ref[...] = jnp.dot(h.astype(jnp.bfloat16), w2_ref[...],
                         preferred_element_type=jnp.float32) + b2_ref[...]


def gap_mlp_head(x_nhwc, w1, b1, w2, b2):
    N, OH, OW, C = x_nhwc.shape
    S = OH * OW
    Hd = w1.shape[-1]
    Kp = w2.shape[-1]                    # lane-padded class dim (multiple of 128)
    x = x_nhwc.reshape(N, S, C)
    return pl.pallas_call(
        _gap_mlp_kernel,
        out_shape=jax.ShapeDtypeStruct((N, Kp), jnp.float32),
        grid=(1,),
        in_specs=[
            pl.BlockSpec((N, S, C), lambda i: (0, 0, 0)),
            pl.BlockSpec((C, Hd), lambda i: (0, 0)),
            pl.BlockSpec((1, Hd), lambda i: (0, 0)),
            pl.BlockSpec((Hd, Kp), lambda i: (0, 0)),
            pl.BlockSpec((1, Kp), lambda i: (0, 0)),
        ],
        out_specs=pl.BlockSpec((N, Kp), lambda i: (0, 0)),
        compiler_params=pltpu.CompilerParams(
            dimension_semantics=("arbitrary",)),
    )(x, w1, b1, w2, b2)


# ---------------------------------------------------------------------------
# Parameters (PyTorch-like f32) and one-time inference folding.
# ---------------------------------------------------------------------------
def init_params(key, num_classes):
    chans = [3, 64, 128, 256, 512]
    keys = jax.random.split(key, 6)
    params = {}
    for i in range(4):
        cin, cout = chans[i], chans[i + 1]
        fan_in = cin * 9
        w = jax.random.normal(keys[i], (3, 3, cin, cout),
                              jnp.float32) * (2.0 / fan_in) ** 0.5
        params[f"block{i + 1}"] = dict(
            w=w,
            b=jnp.full((cout,), 0.01, jnp.float32),
            gamma=jnp.ones((cout,), jnp.float32),
            beta=jnp.zeros((cout,), jnp.float32),
            mean=jnp.zeros((cout,), jnp.float32),
            var=jnp.ones((cout,), jnp.float32),
        )
    w1 = jax.random.normal(keys[4], (512, 512), jnp.float32) * (2.0 / 512) ** 0.5
    w2 = jax.random.normal(keys[5], (512, num_classes),
                           jnp.float32) * (1.0 / 512) ** 0.5
    params["fc"] = dict(
        w1=w1, b1=jnp.zeros((1, 512), jnp.float32),
        w2=w2, b2=jnp.zeros((1, num_classes), jnp.float32),
    )
    return params


def fold_params(params, eps=1e-5):
    """One-time inference prep: fold eval-mode BN into conv weights, cast MXU
    operands to bf16, pad K to a lane multiple when cheap, pad fc2 to 128 lanes."""
    folded = {}
    for i in range(1, 5):
        p = params[f"block{i}"]
        kh, kw, cin, cout = p["w"].shape
        K = kh * kw * cin
        scale = p["gamma"] / jnp.sqrt(p["var"] + eps)
        w = (p["w"].reshape(K, cout) * scale[None, :]).astype(jnp.bfloat16)
        Kp = _round_up(K, 128)
        if Kp != K and (Kp - K) * 4 <= K:        # pad only if <=25% overhead
            w = jnp.pad(w, ((0, Kp - K), (0, 0)))
        shift = (p["beta"] + (p["b"] - p["mean"]) * scale)
        folded[f"block{i}"] = dict(
            w=w, shift=shift.astype(jnp.float32).reshape(1, cout))
    f = params["fc"]
    nc = f["w2"].shape[-1]
    ncp = _round_up(nc, 128)
    folded["fc"] = dict(
        w1=f["w1"].astype(jnp.bfloat16),
        b1=f["b1"].reshape(1, -1).astype(jnp.float32),
        w2=jnp.pad(f["w2"], ((0, 0), (0, ncp - nc))).astype(jnp.bfloat16),
        b2=jnp.pad(f["b2"].reshape(1, -1), ((0, 0), (0, ncp - nc))).astype(jnp.float32),
    )
    return folded


# ---------------------------------------------------------------------------
# Full model forward (eval mode)
# ---------------------------------------------------------------------------
@functools.partial(jax.jit, static_argnames=("num_classes",))
def cnn_forward(x_nchw, folded, *, num_classes):
    # layout: NCHW (PyTorch) -> NHWC for the TPU kernels; cast to bf16 once.
    x = jnp.transpose(x_nchw, (0, 2, 3, 1)).astype(jnp.bfloat16)
    for i in range(1, 5):
        fp = folded[f"block{i}"]
        x = conv_bn_relu_pool(x, fp["w"], fp["shift"])
    f = folded["fc"]
    logits = gap_mlp_head(x, f["w1"], f["b1"], f["w2"], f["b2"])
    return logits[:, :num_classes]           # drop lane padding -> (N, classes)


if __name__ == "__main__":
    key = jax.random.PRNGKey(0)
    k_x, k_p = jax.random.split(key)

    N, num_classes = 2, 10
    x = jax.random.normal(k_x, (N, 3, 32, 32), jnp.float32)  # NCHW like PyTorch
    params = init_params(k_p, num_classes)
    folded = fold_params(params)                              # one-time BN fold

    out = cnn_forward(x, folded, num_classes=num_classes)
    jax.block_until_ready(out)
    assert out.shape == (N, num_classes) and out.dtype == jnp.float32
    assert bool(jnp.all(jnp.isfinite(out)))
    print("KERNEL_OK")
</pallas_src>

<mosaic_0001>
module attributes {stable_mosaic.version = 11 : i64} {
  func.func @_conv_bn_relu_pool_kernel(%arg0: i32, %arg1: i32, %arg2: memref<4x256x27xbf16, #tpu.memory_space<vmem>>, %arg3: memref<27x64xbf16, #tpu.memory_space<vmem>>, %arg4: memref<1x64xf32, #tpu.memory_space<vmem>>, %arg5: memref<256x64xbf16, #tpu.memory_space<vmem>>) attributes {dimension_semantics = [#tpu.dimension_semantics<parallel>, #tpu.dimension_semantics<parallel>], iteration_bounds = array<i64: 2, 1>, scalar_prefetch = 0 : i64, scratch_operands = 0 : i64, tpu.core_type = #tpu.core_type<tc>, window_params = [{transform_indices = @transform_0, window_bounds = array<i64: 4, 256, 27>}, {transform_indices = @transform_1, window_bounds = array<i64: 27, 64>}, {transform_indices = @transform_2, window_bounds = array<i64: 1, 64>}, {transform_indices = @transform_3, window_bounds = array<i64: 256, 64>}]} {
    %c0 = arith.constant 0 : index
    %c0_0 = arith.constant 0 : index
    %0 = vector.load %arg3[%c0, %c0_0] : memref<27x64xbf16, #tpu.memory_space<vmem>>, vector<27x64xbf16>
    %c0_1 = arith.constant 0 : index
    %c0_2 = arith.constant 0 : index
    %c0_3 = arith.constant 0 : index
    %1 = vector.load %arg2[%c0_1, %c0_2, %c0_3] : memref<4x256x27xbf16, #tpu.memory_space<vmem>>, vector<1x256x27xbf16>
    %2 = vector.shape_cast %1 : vector<1x256x27xbf16> to vector<256x27xbf16>
    %cst = arith.constant dense<0.000000e+00> : vector<256x64xf32>
    %3 = tpu.matmul %2, %0, %cst {dimension_numbers = #tpu.dot_dimension_numbers<[1], [0], [0], [1], [0, 0, 1, 1], [], []>} : vector<256x27xbf16>, vector<27x64xbf16>, vector<256x64xf32> -> vector<256x64xf32>
    %c1 = arith.constant 1 : index
    %c0_4 = arith.constant 0 : index
    %c0_5 = arith.constant 0 : index
    %4 = vector.load %arg2[%c1, %c0_4, %c0_5] : memref<4x256x27xbf16, #tpu.memory_space<vmem>>, vector<1x256x27xbf16>
    %5 = vector.shape_cast %4 : vector<1x256x27xbf16> to vector<256x27xbf16>
    %cst_6 = arith.constant dense<0.000000e+00> : vector<256x64xf32>
    %6 = tpu.matmul %5, %0, %cst_6 {dimension_numbers = #tpu.dot_dimension_numbers<[1], [0], [0], [1], [0, 0, 1, 1], [], []>} : vector<256x27xbf16>, vector<27x64xbf16>, vector<256x64xf32> -> vector<256x64xf32>
    %7 = arith.maximumf %3, %6 : vector<256x64xf32>
    %c2 = arith.constant 2 : index
    %c0_7 = arith.constant 0 : index
    %c0_8 = arith.constant 0 : index
    %8 = vector.load %arg2[%c2, %c0_7, %c0_8] : memref<4x256x27xbf16, #tpu.memory_space<vmem>>, vector<1x256x27xbf16>
    %9 = vector.shape_cast %8 : vector<1x256x27xbf16> to vector<256x27xbf16>
    %cst_9 = arith.constant dense<0.000000e+00> : vector<256x64xf32>
    %10 = tpu.matmul %9, %0, %cst_9 {dimension_numbers = #tpu.dot_dimension_numbers<[1], [0], [0], [1], [0, 0, 1, 1], [], []>} : vector<256x27xbf16>, vector<27x64xbf16>, vector<256x64xf32> -> vector<256x64xf32>
    %11 = arith.maximumf %7, %10 : vector<256x64xf32>
    %c3 = arith.constant 3 : index
    %c0_10 = arith.constant 0 : index
    %c0_11 = arith.constant 0 : index
    %12 = vector.load %arg2[%c3, %c0_10, %c0_11] : memref<4x256x27xbf16, #tpu.memory_space<vmem>>, vector<1x256x27xbf16>
    %13 = vector.shape_cast %12 : vector<1x256x27xbf16> to vector<256x27xbf16>
    %cst_12 = arith.constant dense<0.000000e+00> : vector<256x64xf32>
    %14 = tpu.matmul %13, %0, %cst_12 {dimension_numbers = #tpu.dot_dimension_numbers<[1], [0], [0], [1], [0, 0, 1, 1], [], []>} : vector<256x27xbf16>, vector<27x64xbf16>, vector<256x64xf32> -> vector<256x64xf32>
    %15 = arith.maximumf %11, %14 : vector<256x64xf32>
    %c0_13 = arith.constant 0 : index
    %c0_14 = arith.constant 0 : index
    %16 = vector.load %arg4[%c0_13, %c0_14] : memref<1x64xf32, #tpu.memory_space<vmem>>, vector<1x64xf32>
    %17 = vector.broadcast %16 : vector<1x64xf32> to vector<256x64xf32>
    %18 = arith.addf %15, %17 : vector<256x64xf32>
    %cst_15 = arith.constant 0.000000e+00 : f32
    %19 = vector.broadcast %cst_15 : f32 to vector<256x64xf32>
    %20 = arith.maximumf %18, %19 : vector<256x64xf32>
    %21 = arith.truncf %20 : vector<256x64xf32> to vector<256x64xbf16>
    %c0_16 = arith.constant 0 : index
    %c0_17 = arith.constant 0 : index
    %22 = vector.load %arg5[%c0_16, %c0_17] : memref<256x64xbf16, #tpu.memory_space<vmem>>, vector<256x64xbf16>
    tpu.vector_store %arg5[%c0_16, %c0_17], %21 {strides = array<i32>} : memref<256x64xbf16, #tpu.memory_space<vmem>>, vector<256x64xbf16>,
    return
  }
  func.func @transform_0(%arg0: i32, %arg1: i32) -> (i32, i32, i32) {
    %c0_i32 = arith.constant 0 : i32
    %c0_i32_0 = arith.constant 0 : i32
    %c0_i32_1 = arith.constant 0 : i32
    return %c0_i32, %arg0, %c0_i32_0 : i32, i32, i32
  }
  func.func @transform_1(%arg0: i32, %arg1: i32) -> (i32, i32) {
    %c0_i32 = arith.constant 0 : i32
    %c0_i32_0 = arith.constant 0 : i32
    return %c0_i32, %arg1 : i32, i32
  }
  func.func @transform_2(%arg0: i32, %arg1: i32) -> (i32, i32) {
    %c0_i32 = arith.constant 0 : i32
    %c0_i32_0 = arith.constant 0 : i32
    return %c0_i32, %arg1 : i32, i32
  }
  func.func @transform_3(%arg0: i32, %arg1: i32) -> (i32, i32) {
    %c0_i32 = arith.constant 0 : i32
    return %arg0, %arg1 : i32, i32
  }
}

module attributes {stable_mosaic.version = 11 : i64} {
  func.func @_conv_bn_relu_pool_kernel(%arg0: i32, %arg1: i32, %arg2: memref<4x64x640xbf16, #tpu.memory_space<vmem>>, %arg3: memref<640x128xbf16, #tpu.memory_space<vmem>>, %arg4: memref<1x128xf32, #tpu.memory_space<vmem>>, %arg5: memref<64x128xbf16, #tpu.memory_space<vmem>>) attributes {dimension_semantics = [#tpu.dimension_semantics<parallel>, #tpu.dimension_semantics<parallel>], iteration_bounds = array<i64: 2, 1>, scalar_prefetch = 0 : i64, scratch_operands = 0 : i64, tpu.core_type = #tpu.core_type<tc>, window_params = [{transform_indices = @transform_0, window_bounds = array<i64: 4, 64, 640>}, {transform_indices = @transform_1, window_bounds = array<i64: 640, 128>}, {transform_indices = @transform_2, window_bounds = array<i64: 1, 128>}, {transform_indices = @transform_3, window_bounds = array<i64: 64, 128>}]} {
    %c0 = arith.constant 0 : index
    %c0_0 = arith.constant 0 : index
    %0 = vector.load %arg3[%c0, %c0_0] : memref<640x128xbf16, #tpu.memory_space<vmem>>, vector<640x128xbf16>
    %c0_1 = arith.constant 0 : index
    %c0_2 = arith.constant 0 : index
    %c0_3 = arith.constant 0 : index
    %1 = vector.load %arg2[%c0_1, %c0_2, %c0_3] : memref<4x64x640xbf16, #tpu.memory_space<vmem>>, vector<1x64x640xbf16>
    %2 = vector.shape_cast %1 : vector<1x64x640xbf16> to vector<64x640xbf16>
    %cst = arith.constant dense<0.000000e+00> : vector<64x128xf32>
    %3 = tpu.matmul %2, %0, %cst {dimension_numbers = #tpu.dot_dimension_numbers<[1], [0], [0], [1], [0, 0, 1, 1], [], []>} : vector<64x640xbf16>, vector<640x128xbf16>, vector<64x128xf32> -> vector<64x128xf32>
    %c1 = arith.constant 1 : index
    %c0_4 = arith.constant 0 : index
    %c0_5 = arith.constant 0 : index
    %4 = vector.load %arg2[%c1, %c0_4, %c0_5] : memref<4x64x640xbf16, #tpu.memory_space<vmem>>, vector<1x64x640xbf16>
    %5 = vector.shape_cast %4 : vector<1x64x640xbf16> to vector<64x640xbf16>
    %cst_6 = arith.constant dense<0.000000e+00> : vector<64x128xf32>
    %6 = tpu.matmul %5, %0, %cst_6 {dimension_numbers = #tpu.dot_dimension_numbers<[1], [0], [0], [1], [0, 0, 1, 1], [], []>} : vector<64x640xbf16>, vector<640x128xbf16>, vector<64x128xf32> -> vector<64x128xf32>
    %7 = arith.maximumf %3, %6 : vector<64x128xf32>
    %c2 = arith.constant 2 : index
    %c0_7 = arith.constant 0 : index
    %c0_8 = arith.constant 0 : index
    %8 = vector.load %arg2[%c2, %c0_7, %c0_8] : memref<4x64x640xbf16, #tpu.memory_space<vmem>>, vector<1x64x640xbf16>
    %9 = vector.shape_cast %8 : vector<1x64x640xbf16> to vector<64x640xbf16>
    %cst_9 = arith.constant dense<0.000000e+00> : vector<64x128xf32>
    %10 = tpu.matmul %9, %0, %cst_9 {dimension_numbers = #tpu.dot_dimension_numbers<[1], [0], [0], [1], [0, 0, 1, 1], [], []>} : vector<64x640xbf16>, vector<640x128xbf16>, vector<64x128xf32> -> vector<64x128xf32>
    %11 = arith.maximumf %7, %10 : vector<64x128xf32>
    %c3 = arith.constant 3 : index
    %c0_10 = arith.constant 0 : index
    %c0_11 = arith.constant 0 : index
    %12 = vector.load %arg2[%c3, %c0_10, %c0_11] : memref<4x64x640xbf16, #tpu.memory_space<vmem>>, vector<1x64x640xbf16>
    %13 = vector.shape_cast %12 : vector<1x64x640xbf16> to vector<64x640xbf16>
    %cst_12 = arith.constant dense<0.000000e+00> : vector<64x128xf32>
    %14 = tpu.matmul %13, %0, %cst_12 {dimension_numbers = #tpu.dot_dimension_numbers<[1], [0], [0], [1], [0, 0, 1, 1], [], []>} : vector<64x640xbf16>, vector<640x128xbf16>, vector<64x128xf32> -> vector<64x128xf32>
    %15 = arith.maximumf %11, %14 : vector<64x128xf32>
    %c0_13 = arith.constant 0 : index
    %c0_14 = arith.constant 0 : index
    %16 = vector.load %arg4[%c0_13, %c0_14] : memref<1x128xf32, #tpu.memory_space<vmem>>, vector<1x128xf32>
    %17 = vector.broadcast %16 : vector<1x128xf32> to vector<64x128xf32>
    %18 = arith.addf %15, %17 : vector<64x128xf32>
    %cst_15 = arith.constant 0.000000e+00 : f32
    %19 = vector.broadcast %cst_15 : f32 to vector<64x128xf32>
    %20 = arith.maximumf %18, %19 : vector<64x128xf32>
    %21 = arith.truncf %20 : vector<64x128xf32> to vector<64x128xbf16>
    %c0_16 = arith.constant 0 : index
    %c0_17 = arith.constant 0 : index
    %22 = vector.load %arg5[%c0_16, %c0_17] : memref<64x128xbf16, #tpu.memory_space<vmem>>, vector<64x128xbf16>
    tpu.vector_store %arg5[%c0_16, %c0_17], %21 {strides = array<i32>} : memref<64x128xbf16, #tpu.memory_space<vmem>>, vector<64x128xbf16>,
    return
  }
  func.func @transform_0(%arg0: i32, %arg1: i32) -> (i32, i32, i32) {
    %c0_i32 = arith.constant 0 : i32
    %c0_i32_0 = arith.constant 0 : i32
    %c0_i32_1 = arith.constant 0 : i32
    return %c0_i32, %arg0, %c0_i32_0 : i32, i32, i32
  }
  func.func @transform_1(%arg0: i32, %arg1: i32) -> (i32, i32) {
    %c0_i32 = arith.constant 0 : i32
    %c0_i32_0 = arith.constant 0 : i32
    return %c0_i32, %arg1 : i32, i32
  }
  func.func @transform_2(%arg0: i32, %arg1: i32) -> (i32, i32) {
    %c0_i32 = arith.constant 0 : i32
    %c0_i32_0 = arith.constant 0 : i32
    return %c0_i32, %arg1 : i32, i32
  }
  func.func @transform_3(%arg0: i32, %arg1: i32) -> (i32, i32) {
    %c0_i32 = arith.constant 0 : i32
    return %arg0, %arg1 : i32, i32
  }
}

module attributes {stable_mosaic.version = 11 : i64} {
  func.func @_conv_bn_relu_pool_kernel(%arg0: i32, %arg1: i32, %arg2: memref<4x16x1152xbf16, #tpu.memory_space<vmem>>, %arg3: memref<1152x256xbf16, #tpu.memory_space<vmem>>, %arg4: memref<1x256xf32, #tpu.memory_space<vmem>>, %arg5: memref<16x256xbf16, #tpu.memory_space<vmem>>) attributes {dimension_semantics = [#tpu.dimension_semantics<parallel>, #tpu.dimension_semantics<parallel>], iteration_bounds = array<i64: 2, 1>, scalar_prefetch = 0 : i64, scratch_operands = 0 : i64, tpu.core_type = #tpu.core_type<tc>, window_params = [{transform_indices = @transform_0, window_bounds = array<i64: 4, 16, 1152>}, {transform_indices = @transform_1, window_bounds = array<i64: 1152, 256>}, {transform_indices = @transform_2, window_bounds = array<i64: 1, 256>}, {transform_indices = @transform_3, window_bounds = array<i64: 16, 256>}]} {
    %c0 = arith.constant 0 : index
    %c0_0 = arith.constant 0 : index
    %0 = vector.load %arg3[%c0, %c0_0] : memref<1152x256xbf16, #tpu.memory_space<vmem>>, vector<1152x256xbf16>
    %c0_1 = arith.constant 0 : index
    %c0_2 = arith.constant 0 : index
    %c0_3 = arith.constant 0 : index
    %1 = vector.load %arg2[%c0_1, %c0_2, %c0_3] : memref<4x16x1152xbf16, #tpu.memory_space<vmem>>, vector<1x16x1152xbf16>
    %2 = vector.shape_cast %1 : vector<1x16x1152xbf16> to vector<16x1152xbf16>
    %cst = arith.constant dense<0.000000e+00> : vector<16x256xf32>
    %3 = tpu.matmul %2, %0, %cst {dimension_numbers = #tpu.dot_dimension_numbers<[1], [0], [0], [1], [0, 0, 1, 1], [], []>} : vector<16x1152xbf16>, vector<1152x256xbf16>, vector<16x256xf32> -> vector<16x256xf32>
    %c1 = arith.constant 1 : index
    %c0_4 = arith.constant 0 : index
    %c0_5 = arith.constant 0 : index
    %4 = vector.load %arg2[%c1, %c0_4, %c0_5] : memref<4x16x1152xbf16, #tpu.memory_space<vmem>>, vector<1x16x1152xbf16>
    %5 = vector.shape_cast %4 : vector<1x16x1152xbf16> to vector<16x1152xbf16>
    %cst_6 = arith.constant dense<0.000000e+00> : vector<16x256xf32>
    %6 = tpu.matmul %5, %0, %cst_6 {dimension_numbers = #tpu.dot_dimension_numbers<[1], [0], [0], [1], [0, 0, 1, 1], [], []>} : vector<16x1152xbf16>, vector<1152x256xbf16>, vector<16x256xf32> -> vector<16x256xf32>
    %7 = arith.maximumf %3, %6 : vector<16x256xf32>
    %c2 = arith.constant 2 : index
    %c0_7 = arith.constant 0 : index
    %c0_8 = arith.constant 0 : index
    %8 = vector.load %arg2[%c2, %c0_7, %c0_8] : memref<4x16x1152xbf16, #tpu.memory_space<vmem>>, vector<1x16x1152xbf16>
    %9 = vector.shape_cast %8 : vector<1x16x1152xbf16> to vector<16x1152xbf16>
    %cst_9 = arith.constant dense<0.000000e+00> : vector<16x256xf32>
    %10 = tpu.matmul %9, %0, %cst_9 {dimension_numbers = #tpu.dot_dimension_numbers<[1], [0], [0], [1], [0, 0, 1, 1], [], []>} : vector<16x1152xbf16>, vector<1152x256xbf16>, vector<16x256xf32> -> vector<16x256xf32>
    %11 = arith.maximumf %7, %10 : vector<16x256xf32>
    %c3 = arith.constant 3 : index
    %c0_10 = arith.constant 0 : index
    %c0_11 = arith.constant 0 : index
    %12 = vector.load %arg2[%c3, %c0_10, %c0_11] : memref<4x16x1152xbf16, #tpu.memory_space<vmem>>, vector<1x16x1152xbf16>
    %13 = vector.shape_cast %12 : vector<1x16x1152xbf16> to vector<16x1152xbf16>
    %cst_12 = arith.constant dense<0.000000e+00> : vector<16x256xf32>
    %14 = tpu.matmul %13, %0, %cst_12 {dimension_numbers = #tpu.dot_dimension_numbers<[1], [0], [0], [1], [0, 0, 1, 1], [], []>} : vector<16x1152xbf16>, vector<1152x256xbf16>, vector<16x256xf32> -> vector<16x256xf32>
    %15 = arith.maximumf %11, %14 : vector<16x256xf32>
    %c0_13 = arith.constant 0 : index
    %c0_14 = arith.constant 0 : index
    %16 = vector.load %arg4[%c0_13, %c0_14] : memref<1x256xf32, #tpu.memory_space<vmem>>, vector<1x256xf32>
    %17 = vector.broadcast %16 : vector<1x256xf32> to vector<16x256xf32>
    %18 = arith.addf %15, %17 : vector<16x256xf32>
    %cst_15 = arith.constant 0.000000e+00 : f32
    %19 = vector.broadcast %cst_15 : f32 to vector<16x256xf32>
    %20 = arith.maximumf %18, %19 : vector<16x256xf32>
    %21 = arith.truncf %20 : vector<16x256xf32> to vector<16x256xbf16>
    %c0_16 = arith.constant 0 : index
    %c0_17 = arith.constant 0 : index
    %22 = vector.load %arg5[%c0_16, %c0_17] : memref<16x256xbf16, #tpu.memory_space<vmem>>, vector<16x256xbf16>
    tpu.vector_store %arg5[%c0_16, %c0_17], %21 {strides = array<i32>} : memref<16x256xbf16, #tpu.memory_space<vmem>>, vector<16x256xbf16>,
    return
  }
  func.func @transform_0(%arg0: i32, %arg1: i32) -> (i32, i32, i32) {
    %c0_i32 = arith.constant 0 : i32
    %c0_i32_0 = arith.constant 0 : i32
    %c0_i32_1 = arith.constant 0 : i32
    return %c0_i32, %arg0, %c0_i32_0 : i32, i32, i32
  }
  func.func @transform_1(%arg0: i32, %arg1: i32) -> (i32, i32) {
    %c0_i32 = arith.constant 0 : i32
    %c0_i32_0 = arith.constant 0 : i32
    return %c0_i32, %arg1 : i32, i32
  }
  func.func @transform_2(%arg0: i32, %arg1: i32) -> (i32, i32) {
    %c0_i32 = arith.constant 0 : i32
    %c0_i32_0 = arith.constant 0 : i32
    return %c0_i32, %arg1 : i32, i32
  }
  func.func @transform_3(%arg0: i32, %arg1: i32) -> (i32, i32) {
    %c0_i32 = arith.constant 0 : i32
    return %arg0, %arg1 : i32, i32
  }
}

module attributes {stable_mosaic.version = 11 : i64} {
  func.func @_conv_bn_relu_pool_kernel(%arg0: i32, %arg1: i32, %arg2: memref<4x8x2304xbf16, #tpu.memory_space<vmem>>, %arg3: memref<2304x256xbf16, #tpu.memory_space<vmem>>, %arg4: memref<1x256xf32, #tpu.memory_space<vmem>>, %arg5: memref<8x256xbf16, #tpu.memory_space<vmem>>) attributes {dimension_semantics = [#tpu.dimension_semantics<parallel>, #tpu.dimension_semantics<parallel>], iteration_bounds = array<i64: 1, 2>, scalar_prefetch = 0 : i64, scratch_operands = 0 : i64, tpu.core_type = #tpu.core_type<tc>, window_params = [{transform_indices = @transform_0, window_bounds = array<i64: 4, 8, 2304>}, {transform_indices = @transform_1, window_bounds = array<i64: 2304, 256>}, {transform_indices = @transform_2, window_bounds = array<i64: 1, 256>}, {transform_indices = @transform_3, window_bounds = array<i64: 8, 256>}]} {
    %c0 = arith.constant 0 : index
    %c0_0 = arith.constant 0 : index
    %0 = vector.load %arg3[%c0, %c0_0] : memref<2304x256xbf16, #tpu.memory_space<vmem>>, vector<2304x256xbf16>
    %c0_1 = arith.constant 0 : index
    %c0_2 = arith.constant 0 : index
    %c0_3 = arith.constant 0 : index
    %1 = vector.load %arg2[%c0_1, %c0_2, %c0_3] : memref<4x8x2304xbf16, #tpu.memory_space<vmem>>, vector<1x8x2304xbf16>
    %2 = vector.shape_cast %1 : vector<1x8x2304xbf16> to vector<8x2304xbf16>
    %cst = arith.constant dense<0.000000e+00> : vector<8x256xf32>
    %3 = tpu.matmul %2, %0, %cst {dimension_numbers = #tpu.dot_dimension_numbers<[1], [0], [0], [1], [0, 0, 1, 1], [], []>} : vector<8x2304xbf16>, vector<2304x256xbf16>, vector<8x256xf32> -> vector<8x256xf32>
    %c1 = arith.constant 1 : index
    %c0_4 = arith.constant 0 : index
    %c0_5 = arith.constant 0 : index
    %4 = vector.load %arg2[%c1, %c0_4, %c0_5] : memref<4x8x2304xbf16, #tpu.memory_space<vmem>>, vector<1x8x2304xbf16>
    %5 = vector.shape_cast %4 : vector<1x8x2304xbf16> to vector<8x2304xbf16>
    %cst_6 = arith.constant dense<0.000000e+00> : vector<8x256xf32>
    %6 = tpu.matmul %5, %0, %cst_6 {dimension_numbers = #tpu.dot_dimension_numbers<[1], [0], [0], [1], [0, 0, 1, 1], [], []>} : vector<8x2304xbf16>, vector<2304x256xbf16>, vector<8x256xf32> -> vector<8x256xf32>
    %7 = arith.maximumf %3, %6 : vector<8x256xf32>
    %c2 = arith.constant 2 : index
    %c0_7 = arith.constant 0 : index
    %c0_8 = arith.constant 0 : index
    %8 = vector.load %arg2[%c2, %c0_7, %c0_8] : memref<4x8x2304xbf16, #tpu.memory_space<vmem>>, vector<1x8x2304xbf16>
    %9 = vector.shape_cast %8 : vector<1x8x2304xbf16> to vector<8x2304xbf16>
    %cst_9 = arith.constant dense<0.000000e+00> : vector<8x256xf32>
    %10 = tpu.matmul %9, %0, %cst_9 {dimension_numbers = #tpu.dot_dimension_numbers<[1], [0], [0], [1], [0, 0, 1, 1], [], []>} : vector<8x2304xbf16>, vector<2304x256xbf16>, vector<8x256xf32> -> vector<8x256xf32>
    %11 = arith.maximumf %7, %10 : vector<8x256xf32>
    %c3 = arith.constant 3 : index
    %c0_10 = arith.constant 0 : index
    %c0_11 = arith.constant 0 : index
    %12 = vector.load %arg2[%c3, %c0_10, %c0_11] : memref<4x8x2304xbf16, #tpu.memory_space<vmem>>, vector<1x8x2304xbf16>
    %13 = vector.shape_cast %12 : vector<1x8x2304xbf16> to vector<8x2304xbf16>
    %cst_12 = arith.constant dense<0.000000e+00> : vector<8x256xf32>
    %14 = tpu.matmul %13, %0, %cst_12 {dimension_numbers = #tpu.dot_dimension_numbers<[1], [0], [0], [1], [0, 0, 1, 1], [], []>} : vector<8x2304xbf16>, vector<2304x256xbf16>, vector<8x256xf32> -> vector<8x256xf32>
    %15 = arith.maximumf %11, %14 : vector<8x256xf32>
    %c0_13 = arith.constant 0 : index
    %c0_14 = arith.constant 0 : index
    %16 = vector.load %arg4[%c0_13, %c0_14] : memref<1x256xf32, #tpu.memory_space<vmem>>, vector<1x256xf32>
    %17 = vector.broadcast %16 : vector<1x256xf32> to vector<8x256xf32>
    %18 = arith.addf %15, %17 : vector<8x256xf32>
    %cst_15 = arith.constant 0.000000e+00 : f32
    %19 = vector.broadcast %cst_15 : f32 to vector<8x256xf32>
    %20 = arith.maximumf %18, %19 : vector<8x256xf32>
    %21 = arith.truncf %20 : vector<8x256xf32> to vector<8x256xbf16>
    %c0_16 = arith.constant 0 : index
    %c0_17 = arith.constant 0 : index
    %22 = vector.load %arg5[%c0_16, %c0_17] : memref<8x256xbf16, #tpu.memory_space<vmem>>, vector<8x256xbf16>
    tpu.vector_store %arg5[%c0_16, %c0_17], %21 {strides = array<i32>} : memref<8x256xbf16, #tpu.memory_space<vmem>>, vector<8x256xbf16>,
    return
  }
  func.func @transform_0(%arg0: i32, %arg1: i32) -> (i32, i32, i32) {
    %c0_i32 = arith.constant 0 : i32
    %c0_i32_0 = arith.constant 0 : i32
    %c0_i32_1 = arith.constant 0 : i32
    return %c0_i32, %arg0, %c0_i32_0 : i32, i32, i32
  }
  func.func @transform_1(%arg0: i32, %arg1: i32) -> (i32, i32) {
    %c0_i32 = arith.constant 0 : i32
    %c0_i32_0 = arith.constant 0 : i32
    return %c0_i32, %arg1 : i32, i32
  }
  func.func @transform_2(%arg0: i32, %arg1: i32) -> (i32, i32) {
    %c0_i32 = arith.constant 0 : i32
    %c0_i32_0 = arith.constant 0 : i32
    return %c0_i32, %arg1 : i32, i32
  }
  func.func @transform_3(%arg0: i32, %arg1: i32) -> (i32, i32) {
    %c0_i32 = arith.constant 0 : i32
    return %arg0, %arg1 : i32, i32
  }
}

module attributes {stable_mosaic.version = 11 : i64} {
  func.func @_gap_mlp_kernel(%arg0: i32, %arg1: memref<2x4x512xbf16, #tpu.memory_space<vmem>>, %arg2: memref<512x512xbf16, #tpu.memory_space<vmem>>, %arg3: memref<1x512xf32, #tpu.memory_space<vmem>>, %arg4: memref<512x128xbf16, #tpu.memory_space<vmem>>, %arg5: memref<1x128xf32, #tpu.memory_space<vmem>>, %arg6: memref<2x128xf32, #tpu.memory_space<vmem>>) attributes {dimension_semantics = [#tpu.dimension_semantics<arbitrary>], iteration_bounds = array<i64: 1>, scalar_prefetch = 0 : i64, scratch_operands = 0 : i64, tpu.core_type = #tpu.core_type<tc>, window_params = [{pipeline_mode = #tpu.pipeline_mode<synchronous>, transform_indices = @transform_0, window_bounds = array<i64: 2, 4, 512>}, {pipeline_mode = #tpu.pipeline_mode<synchronous>, transform_indices = @transform_1, window_bounds = array<i64: 512, 512>}, {pipeline_mode = #tpu.pipeline_mode<synchronous>, transform_indices = @transform_2, window_bounds = array<i64: 1, 512>}, {pipeline_mode = #tpu.pipeline_mode<synchronous>, transform_indices = @transform_3, window_bounds = array<i64: 512, 128>}, {pipeline_mode = #tpu.pipeline_mode<synchronous>, transform_indices = @transform_4, window_bounds = array<i64: 1, 128>}, {pipeline_mode = #tpu.pipeline_mode<synchronous>, transform_indices = @transform_5, window_bounds = array<i64: 2, 128>}]} {
    %c0 = arith.constant 0 : index
    %c0_0 = arith.constant 0 : index
    %c0_1 = arith.constant 0 : index
    %0 = vector.load %arg1[%c0, %c0_0, %c0_1] : memref<2x4x512xbf16, #tpu.memory_space<vmem>>, vector<2x4x512xbf16>
    %1 = arith.extf %0 : vector<2x4x512xbf16> to vector<2x4x512xf32>
    %cst = arith.constant dense<0.000000e+00> : vector<2x512xf32>
    %2 = vector.multi_reduction <add>, %1, %cst [1] : vector<2x4x512xf32> to vector<2x512xf32>
    %cst_2 = arith.constant 2.500000e-01 : f32
    %3 = vector.broadcast %cst_2 : f32 to vector<2x512xf32>
    %4 = arith.mulf %2, %3 : vector<2x512xf32>
    %5 = arith.truncf %4 : vector<2x512xf32> to vector<2x512xbf16>
    %c0_3 = arith.constant 0 : index
    %c0_4 = arith.constant 0 : index
    %6 = vector.load %arg2[%c0_3, %c0_4] : memref<512x512xbf16, #tpu.memory_space<vmem>>, vector<512x512xbf16>
    %cst_5 = arith.constant dense<0.000000e+00> : vector<2x512xf32>
    %7 = tpu.matmul %5, %6, %cst_5 {dimension_numbers = #tpu.dot_dimension_numbers<[1], [0], [0], [1], [0, 0, 1, 1], [], []>} : vector<2x512xbf16>, vector<512x512xbf16>, vector<2x512xf32> -> vector<2x512xf32>
    %c0_6 = arith.constant 0 : index
    %c0_7 = arith.constant 0 : index
    %8 = vector.load %arg3[%c0_6, %c0_7] : memref<1x512xf32, #tpu.memory_space<vmem>>, vector<1x512xf32>
    %9 = vector.broadcast %8 : vector<1x512xf32> to vector<2x512xf32>
    %10 = arith.addf %7, %9 : vector<2x512xf32>
    %cst_8 = arith.constant 0.000000e+00 : f32
    %11 = vector.broadcast %cst_8 : f32 to vector<2x512xf32>
    %12 = arith.maximumf %10, %11 : vector<2x512xf32>
    %13 = arith.truncf %12 : vector<2x512xf32> to vector<2x512xbf16>
    %c0_9 = arith.constant 0 : index
    %c0_10 = arith.constant 0 : index
    %14 = vector.load %arg4[%c0_9, %c0_10] : memref<512x128xbf16, #tpu.memory_space<vmem>>, vector<512x128xbf16>
    %cst_11 = arith.constant dense<0.000000e+00> : vector<2x128xf32>
    %15 = tpu.matmul %13, %14, %cst_11 {dimension_numbers = #tpu.dot_dimension_numbers<[1], [0], [0], [1], [0, 0, 1, 1], [], []>} : vector<2x512xbf16>, vector<512x128xbf16>, vector<2x128xf32> -> vector<2x128xf32>
    %c0_12 = arith.constant 0 : index
    %c0_13 = arith.constant 0 : index
    %16 = vector.load %arg5[%c0_12, %c0_13] : memref<1x128xf32, #tpu.memory_space<vmem>>, vector<1x128xf32>
    %17 = vector.broadcast %16 : vector<1x128xf32> to vector<2x128xf32>
    %18 = arith.addf %15, %17 : vector<2x128xf32>
    %c0_14 = arith.constant 0 : index
    %c0_15 = arith.constant 0 : index
    %19 = vector.load %arg6[%c0_14, %c0_15] : memref<2x128xf32, #tpu.memory_space<vmem>>, vector<2x128xf32>
    tpu.vector_store %arg6[%c0_14, %c0_15], %18 {strides = array<i32>} : memref<2x128xf32, #tpu.memory_space<vmem>>, vector<2x128xf32>,
    return
  }
  func.func @transform_0(%arg0: i32) -> (i32, i32, i32) {
    %c0_i32 = arith.constant 0 : i32
    %c0_i32_0 = arith.constant 0 : i32
    %c0_i32_1 = arith.constant 0 : i32
    %c0_i32_2 = arith.constant 0 : i32
    return %c0_i32, %c0_i32_0, %c0_i32_1 : i32, i32, i32
  }
  func.func @transform_1(%arg0: i32) -> (i32, i32) {
    %c0_i32 = arith.constant 0 : i32
    %c0_i32_0 = arith.constant 0 : i32
    %c0_i32_1 = arith.constant 0 : i32
    return %c0_i32, %c0_i32_0 : i32, i32
  }
  func.func @transform_2(%arg0: i32) -> (i32, i32) {
    %c0_i32 = arith.constant 0 : i32
    %c0_i32_0 = arith.constant 0 : i32
    %c0_i32_1 = arith.constant 0 : i32
    return %c0_i32, %c0_i32_0 : i32, i32
  }
  func.func @transform_3(%arg0: i32) -> (i32, i32) {
    %c0_i32 = arith.constant 0 : i32
    %c0_i32_0 = arith.constant 0 : i32
    %c0_i32_1 = arith.constant 0 : i32
    return %c0_i32, %c0_i32_0 : i32, i32
  }
  func.func @transform_4(%arg0: i32) -> (i32, i32) {
    %c0_i32 = arith.constant 0 : i32
    %c0_i32_0 = arith.constant 0 : i32
    %c0_i32_1 = arith.constant 0 : i32
    return %c0_i32, %c0_i32_0 : i32, i32
  }
  func.func @transform_5(%arg0: i32) -> (i32, i32) {
    %c0_i32 = arith.constant 0 : i32
    %c0_i32_0 = arith.constant 0 : i32
    %c0_i32_1 = arith.constant 0 : i32
    return %c0_i32, %c0_i32_0 : i32, i32
  }
}

</mosaic_0001>

<bundles_post_ra>
// kernel: cnn_forward.5
= control target key start
LH: loop header
LB: loop body
LE: loop exit
PB: predicated region body
PF: predicated region fallthrough
CT: control target
= control target key end

     0   :  { %s3212_s12 = smov 0   ;;  %s3214_s13 = smov 0   ;;  %s3936_s0 = inlined_call_operand.vmem [shape: bf16[4,512,27], index: 0, kind: input, shape index: {}]   ;;  %s3937_s1 = inlined_call_operand.vmem [shape: bf16[27,64], index: 1, kind: input, shape index: {}]   ;;  %s3938_s2 = inlined_call_operand.vmem [shape: f32[1,64], index: 2, kind: input, shape index: {}]   ;;  %s3939_s3 = inlined_call_operand.vmem [shape: bf16[512,64], index: 3, kind: output, shape index: {}]  }
   0x1   :  { %s3216_s14 = smov 0   ;;  %s3218_s15 = smov 0  }
   0x2   :  { %s3220_s16 = smov 0  }
   0x3 LB: > { %s25_s17 = sadd.s32 1, %s3185_s15  ;;  %p39_p1 = scmp.ne.s32.totalorder %s3177_s13, %s3173_s12  ;;  %s3189_s16 = sphi %s3220_s16, %s13_s16   ;;  %s3185_s15 = sphi %s3218_s15, %s4026_s15   ;;  %s3181_s14 = sphi %s3216_s14, %s4025_s14   ;;  %s3177_s13 = sphi %s3214_s13, %s4024_s13   ;;  %s3173_s12 = sphi %s3212_s12, %s4023_s12  }
   0x4   : > { %p27_p0 = scmp.ge.s32.totalorder %s25_s17, 2  ;;  %p40_p2 = scmp.eq.s32.totalorder %s3189_s16, 0 }
   0x5   : > { %s32_s19 = sadd.s32 1, %s3177_s13  ;;  %p2526_p5 = scmp.ge.s32.totalorder %s3189_s16, 2 }
   0x6   : > { %s4028_s17 = smov (%p27_p0, %s25_s17), 0  ;;  %p41_p3 = por %p40_p2, %p39_p1 }
   0x7   : > { %s29_s18 = ssub.s32 %s3185_s15, %s4028_s17  ;;  %158 = sbr.rel (%p2526_p5) target bundleno = 50 (0x32), region = 24 }
   0x8   : > { %p30_p4 = scmp.eq.s32.totalorder %s29_s18, 0 }
   0xa   : > { %s3247_s20 = scalar_select %p30_p4, %s3177_s13, %s32_s19  }
   0xe   : > { %161 = sbr.rel (!%p41_p3) target bundleno = 50 (0x32), region = 28  ;;  %s163_s21 = sand.u32 (%p41_p3), 1, %s3177_s13  }
   0xf   : > { %s2795_s22 = sshll.u32 (%p41_p3), %s3185_s15, 7  ;;  %s2527_s23 = sshll.u32 (%p41_p3), %s163_s21, 9 }
  0x10   : > { %s3255_s26 = scalar_lea.vmem (%p41_p3), %s3936_s0, %s2795_s22  ;;  %s3260_s27 = scalar_lea.vmem (%p41_p3), [#allocation2], %s2527_s23 }
  0x11   : > { %v184_v0 = vld [vmem:[%s3255_s26] sm:$0xff] (%p41_p3)   ;;  %v188_v1 = vld [vmem:[%s3255_s26 + $0x8] sm:$0xff] (%p41_p3)   ;;  %v192_v2 = vld [vmem:[%s3255_s26 + $0x10] sm:$0xff] (%p41_p3)  }
  0x12   : > { %185 = vst [vmem:[%s3260_s27] sm:$0xff] (%p41_p3), %v184_v0   ;;  %189 = vst [vmem:[%s3260_s27 + $0x8] sm:$0xff] (%p41_p3), %v188_v1   ;;  %v196_v3 = vld [vmem:[%s3255_s26 + $0x18] sm:$0xff] (%p41_p3)   ;;  %v200_v4 = vld [vmem:[%s3255_s26 + $0x20] sm:$0xff] (%p41_p3)  }
  0x13   : > { %193 = vst [vmem:[%s3260_s27 + $0x10] sm:$0xff] (%p41_p3), %v192_v2   ;;  %v204_v5 = vld [vmem:[%s3255_s26 + $0x28] sm:$0xff] (%p41_p3)   ;;  %197 = vst [vmem:[%s3260_s27 + $0x18] sm:$0xff] (%p41_p3), %v196_v3   ;;  %v208_v6 = vld [vmem:[%s3255_s26 + $0x30] sm:$0xff] (%p41_p3)  }
  0x14   : > { %201 = vst [vmem:[%s3260_s27 + $0x20] sm:$0xff] (%p41_p3), %v200_v4   ;;  %205 = vst [vmem:[%s3260_s27 + $0x28] sm:$0xff] (%p41_p3), %v204_v5   ;;  %v212_v7 = vld [vmem:[%s3255_s26 + $0x38] sm:$0xff] (%p41_p3)   ;;  %v216_v8 = vld [vmem:[%s3255_s26 + $0x40] sm:$0xff] (%p41_p3)  }
  0x15   : > { %209 = vst [vmem:[%s3260_s27 + $0x30] sm:$0xff] %v208_v6   ;;  %213 = vst [vmem:[%s3260_s27 + $0x38] sm:$0xff] %v212_v7   ;;  %v220_v9 = vld [vmem:[%s3255_s26 + $0x48] sm:$0xff]   ;;  %v224_v10 = vld [vmem:[%s3255_s26 + $0x50] sm:$0xff]  }
  0x16   : > { %217 = vst [vmem:[%s3260_s27 + $0x40] sm:$0xff] %v216_v8   ;;  %v228_v11 = vld [vmem:[%s3255_s26 + $0x58] sm:$0xff]   ;;  %221 = vst [vmem:[%s3260_s27 + $0x48] sm:$0xff] %v220_v9   ;;  %v232_v12 = vld [vmem:[%s3255_s26 + $0x60] sm:$0xff]  }
  0x17   : > { %225 = vst [vmem:[%s3260_s27 + $0x50] sm:$0xff] %v224_v10   ;;  %229 = vst [vmem:[%s3260_s27 + $0x58] sm:$0xff] %v228_v11   ;;  %v236_v13 = vld [vmem:[%s3255_s26 + $0x68] sm:$0xff]   ;;  %v240_v14 = vld [vmem:[%s3255_s26 + $0x70] sm:$0xff]  }
  0x18   : > { %233 = vst [vmem:[%s3260_s27 + $0x60] sm:$0xff] %v232_v12   ;;  %237 = vst [vmem:[%s3260_s27 + $0x68] sm:$0xff] %v236_v13   ;;  %v244_v15 = vld [vmem:[%s3255_s26 + $0x78] sm:$0xff]   ;;  %v248_v16 = vld [vmem:[%s3255_s26 + $0x100] sm:$0xff]  }
  0x19   : > { %241 = vst [vmem:[%s3260_s27 + $0x70] sm:$0xff] %v240_v14   ;;  %v252_v17 = vld [vmem:[%s3255_s26 + $0x108] sm:$0xff]   ;;  %245 = vst [vmem:[%s3260_s27 + $0x78] sm:$0xff] %v244_v15   ;;  %v256_v18 = vld [vmem:[%s3255_s26 + $0x110] sm:$0xff]  }
  0x1a   : > { %249 = vst [vmem:[%s3260_s27 + $0x80] sm:$0xff] %v248_v16   ;;  %253 = vst [vmem:[%s3260_s27 + $0x88] sm:$0xff] %v252_v17   ;;  %v260_v19 = vld [vmem:[%s3255_s26 + $0x118] sm:$0xff]   ;;  %v264_v20 = vld [vmem:[%s3255_s26 + $0x120] sm:$0xff]  }
  0x1b   : > { %257 = vst [vmem:[%s3260_s27 + $0x90] sm:$0xff] %v256_v18   ;;  %261 = vst [vmem:[%s3260_s27 + $0x98] sm:$0xff] %v260_v19   ;;  %v268_v21 = vld [vmem:[%s3255_s26 + $0x128] sm:$0xff]   ;;  %v272_v22 = vld [vmem:[%s3255_s26 + $0x130] sm:$0xff]  }
  0x1c   : > { %265 = vst [vmem:[%s3260_s27 + $0xa0] sm:$0xff] %v264_v20   ;;  %v276_v23 = vld [vmem:[%s3255_s26 + $0x138] sm:$0xff]   ;;  %269 = vst [vmem:[%s3260_s27 + $0xa8] sm:$0xff] %v268_v21   ;;  %v280_v24 = vld [vmem:[%s3255_s26 + $0x140] sm:$0xff]  }
  0x1d   : > { %273 = vst [vmem:[%s3260_s27 + $0xb0] sm:$0xff] %v272_v22   ;;  %277 = vst [vmem:[%s3260_s27 + $0xb8] sm:$0xff] %v276_v23   ;;  %v284_v25 = vld [vmem:[%s3255_s26 + $0x148] sm:$0xff]   ;;  %v288_v26 = vld [vmem:[%s3255_s26 + $0x150] sm:$0xff]  }
  0x1e   : > { %281 = vst [vmem:[%s3260_s27 + $0xc0] sm:$0xff] %v280_v24   ;;  %285 = vst [vmem:[%s3260_s27 + $0xc8] sm:$0xff] %v284_v25   ;;  %v292_v27 = vld [vmem:[%s3255_s26 + $0x158] sm:$0xff]   ;;  %v296_v28 = vld [vmem:[%s3255_s26 + $0x160] sm:$0xff]  }
  0x1f   : > { %289 = vst [vmem:[%s3260_s27 + $0xd0] sm:$0xff] %v288_v26   ;;  %v300_v29 = vld [vmem:[%s3255_s26 + $0x168] sm:$0xff]   ;;  %293 = vst [vmem:[%s3260_s27 + $0xd8] sm:$0xff] %v292_v27   ;;  %v304_v30 = vld [vmem:[%s3255_s26 + $0x170] sm:$0xff]  }
  0x20   : > { %297 = vst [vmem:[%s3260_s27 + $0xe0] sm:$0xff] %v296_v28   ;;  %301 = vst [vmem:[%s3260_s27 + $0xe8] sm:$0xff] %v300_v29   ;;  %v308_v31 = vld [vmem:[%s3255_s26 + $0x178] sm:$0xff]   ;;  %v312_v32 = vld [vmem:[%s3255_s26 + $0x200] sm:$0xff]  }
  0x21   : > { %305 = vst [vmem:[%s3260_s27 + $0xf0] sm:$0xff] %v304_v30   ;;  %309 = vst [vmem:[%s3260_s27 + $0xf8] sm:$0xff] %v308_v31   ;;  %v316_v33 = vld [vmem:[%s3255_s26 + $0x208] sm:$0xff]   ;;  %v320_v34 = vld [vmem:[%s3255_s26 + $0x210] sm:$0xff]  }
  0x22   : > { %313 = vst [vmem:[%s3260_s27 + $0x100] sm:$0xff] %v312_v32   ;;  %v324_v35 = vld [vmem:[%s3255_s26 + $0x218] sm:$0xff]   ;;  %317 = vst [vmem:[%s3260_s27 + $0x108] sm:$0xff] %v316_v33   ;;  %v328_v36 = vld [vmem:[%s3255_s26 + $0x220] sm:$0xff]  }
  0x23   : > { %321 = vst [vmem:[%s3260_s27 + $0x110] sm:$0xff] %v320_v34   ;;  %325 = vst [vmem:[%s3260_s27 + $0x118] sm:$0xff] %v324_v35   ;;  %v332_v37 = vld [vmem:[%s3255_s26 + $0x228] sm:$0xff]   ;;  %v336_v38 = vld [vmem:[%s3255_s26 + $0x230] sm:$0xff]  }
  0x24   : > { %329 = vst [vmem:[%s3260_s27 + $0x120] sm:$0xff] %v328_v36   ;;  %333 = vst [vmem:[%s3260_s27 + $0x128] sm:$0xff] %v332_v37   ;;  %v340_v39 = vld [vmem:[%s3255_s26 + $0x238] sm:$0xff]   ;;  %v344_v40 = vld [vmem:[%s3255_s26 + $0x240] sm:$0xff]  }
  0x25   : > { %337 = vst [vmem:[%s3260_s27 + $0x130] sm:$0xff] %v336_v38   ;;  %v348_v41 = vld [vmem:[%s3255_s26 + $0x248] sm:$0xff]   ;;  %341 = vst [vmem:[%s3260_s27 + $0x138] sm:$0xff] %v340_v39   ;;  %v352_v42 = vld [vmem:[%s3255_s26 + $0x250] sm:$0xff]  }
  0x26   : > { %345 = vst [vmem:[%s3260_s27 + $0x140] sm:$0xff] %v344_v40   ;;  %349 = vst [vmem:[%s3260_s27 + $0x148] sm:$0xff] %v348_v41   ;;  %v356_v43 = vld [vmem:[%s3255_s26 + $0x258] sm:$0xff]   ;;  %v360_v44 = vld [vmem:[%s3255_s26 + $0x260] sm:$0xff]  }
  0x27   : > { %353 = vst [vmem:[%s3260_s27 + $0x150] sm:$0xff] %v352_v42   ;;  %357 = vst [vmem:[%s3260_s27 + $0x158] sm:$0xff] %v356_v43   ;;  %v364_v45 = vld [vmem:[%s3255_s26 + $0x268] sm:$0xff]   ;;  %v368_v46 = vld [vmem:[%s3255_s26 + $0x270] sm:$0xff]  }
  0x28   : > { %361 = vst [vmem:[%s3260_s27 + $0x160] sm:$0xff] %v360_v44   ;;  %v372_v47 = vld [vmem:[%s3255_s26 + $0x278] sm:$0xff]   ;;  %365 = vst [vmem:[%s3260_s27 + $0x168] sm:$0xff] %v364_v45   ;;  %v376_v48 = vld [vmem:[%s3255_s26 + $0x300] sm:$0xff]  }
  0x29   : > { %369 = vst [vmem:[%s3260_s27 + $0x170] sm:$0xff] %v368_v46   ;;  %373 = vst [vmem:[%s3260_s27 + $0x178] sm:$0xff] %v372_v47   ;;  %v380_v49 = vld [vmem:[%s3255_s26 + $0x308] sm:$0xff]   ;;  %v384_v50 = vld [vmem:[%s3255_s26 + $0x310] sm:$0xff]  }
  0x2a   : > { %377 = vst [vmem:[%s3260_s27 + $0x180] sm:$0xff] %v376_v48   ;;  %381 = vst [vmem:[%s3260_s27 + $0x188] sm:$0xff] %v380_v49   ;;  %v388_v51 = vld [vmem:[%s3255_s26 + $0x318] sm:$0xff]   ;;  %v392_v52 = vld [vmem:[%s3255_s26 + $0x320] sm:$0xff]  }
  0x2b   : > { %385 = vst [vmem:[%s3260_s27 + $0x190] sm:$0xff] %v384_v50   ;;  %v396_v53 = vld [vmem:[%s3255_s26 + $0x328] sm:$0xff]   ;;  %389 = vst [vmem:[%s3260_s27 + $0x198] sm:$0xff] %v388_v51   ;;  %v400_v54 = vld [vmem:[%s3255_s26 + $0x330] sm:$0xff]  }
  0x2c   : > { %393 = vst [vmem:[%s3260_s27 + $0x1a0] sm:$0xff] %v392_v52   ;;  %397 = vst [vmem:[%s3260_s27 + $0x1a8] sm:$0xff] %v396_v53   ;;  %v404_v55 = vld [vmem:[%s3255_s26 + $0x338] sm:$0xff]   ;;  %v408_v56 = vld [vmem:[%s3255_s26 + $0x340] sm:$0xff]  }
  0x2d   : > { %401 = vst [vmem:[%s3260_s27 + $0x1b0] sm:$0xff] %v400_v54   ;;  %405 = vst [vmem:[%s3260_s27 + $0x1b8] sm:$0xff] %v404_v55   ;;  %v412_v57 = vld [vmem:[%s3255_s26 + $0x348] sm:$0xff]   ;;  %v416_v58 = vld [vmem:[%s3255_s26 + $0x350] sm:$0xff]  }
  0x2e   : > { %409 = vst [vmem:[%s3260_s27 + $0x1c0] sm:$0xff] %v408_v56   ;;  %v420_v59 = vld [vmem:[%s3255_s26 + $0x358] sm:$0xff]   ;;  %413 = vst [vmem:[%s3260_s27 + $0x1c8] sm:$0xff] %v412_v57   ;;  %v424_v60 = vld [vmem:[%s3255_s26 + $0x360] sm:$0xff]  }
  0x2f   : > { %417 = vst [vmem:[%s3260_s27 + $0x1d0] sm:$0xff] %v416_v58   ;;  %421 = vst [vmem:[%s3260_s27 + $0x1d8] sm:$0xff] %v420_v59   ;;  %v428_v61 = vld [vmem:[%s3255_s26 + $0x368] sm:$0xff]   ;;  %v432_v62 = vld [vmem:[%s3255_s26 + $0x370] sm:$0xff]  }
  0x30   : > { %425 = vst [vmem:[%s3260_s27 + $0x1e0] sm:$0xff] %v424_v60   ;;  %429 = vst [vmem:[%s3260_s27 + $0x1e8] sm:$0xff] %v428_v61   ;;  %v436_v63 = vld [vmem:[%s3255_s26 + $0x378] sm:$0xff]  }
  0x31   : > { %433 = vst [vmem:[%s3260_s27 + $0x1f0] sm:$0xff] %v432_v62   ;;  %437 = vst [vmem:[%s3260_s27 + $0x1f8] sm:$0xff] %v436_v63  }
  0x32 PF: > { %p2530_p6 = scmp.ge.s32.totalorder %s3189_s16, 1  ;;  %p717_p7 = scmp.lt.s32.totalorder %s3189_s16, 3 }
  0x34   : > { %p718_p8 = pnand %p2530_p6, %p717_p7 }
  0x36   : > { %721 = sbr.rel (%p718_p8) target bundleno = 417 (0x1a1), region = 69 }
  0x3d   : > { %v3085_v0 = vld [vmem:[%s3937_s1] sm:$0xff]   ;;  %vm951_vm0 = vcmask 1044480   ;;  %v3086_v1 = vld [vmem:[%s3937_s1 + $0x8] sm:$0x3f]   ;;  %vm952_vm1 = vcmask 1045504   ;;  %s724_s5 = sand.u32 1, %s3173_s12  }
  0x3e   : > { %2900 = vmatprep.subr.bf16.mxu0 %v3085_v0  ;;  %2936 = vmatprep.subr.bf16.mxu1 %v3085_v0  ;;  %v3191_v2 = vmov 65535   ;;  %s2531_s6 = sshll.u32 %s724_s5, 9  ;;  %vm902_vm2 = vcmask 220160   ;;  %s2532_s8 = sshll.u32 %s3181_s14, 5  ;;  %vm2380_vm3 = vcmask 519168  }
  0x3f   : > { %2901 = vmatpush3.bf16.msra.mxu0 %v3085_v0  ;;  %2937 = vmatpush3.bf16.msra.mxu1 %v3085_v0  ;;  %v953_v3 = vsel %vm951_vm0, 4294967295, %v3191_v2  ;;  %s3396_s7 = scalar_lea.vmem [#allocation2], %s2531_s6  ;;  %p766_p9 = scmp.lt.s32.totalorder %s2532_s8, 63 }
  0x40   : > { %v954_v4 = vsel %vm952_vm1, %v953_v3, 0  ;;  %v3087_v6 = vld [vmem:[%s3396_s7] sm:$0xff]   ;;  %v3089_v8 = vld [vmem:[%s3396_s7 + $0x8] sm:$0xff]   ;;  %v3091_v10 = vld [vmem:[%s3396_s7 + $0x10] sm:$0xff]  }
  0x41   : > { %v956_v5 = vand.u32 %v3086_v1, %v954_v4  ;;  %v3088_v7 = vld [vmem:[%s3396_s7 + $0x80] sm:$0xff]   ;;  %v3090_v9 = vld [vmem:[%s3396_s7 + $0x88] sm:$0xff]   ;;  %2904 = vmatprep.mubr.msk.bf16.mxu0 %vm902_vm2, %v3087_v6  ;;  %v3092_v11 = vld [vmem:[%s3396_s7 + $0x90] sm:$0xff]   ;;  %s4030_s8 = smov (!%p766_p9, %s2532_s8), 63 }
  0x42   : > { %2940 = vmatprep.mubr.msk.bf16.mxu1 %vm902_vm2, %v3088_v7  ;;  %v3093_v12 = vld [vmem:[%s3396_s7 + $0x18] sm:$0xff]   ;;  %v3095_v14 = vld [vmem:[%s3396_s7 + $0x20] sm:$0xff]   ;;  %v3097_v16 = vld [vmem:[%s3396_s7 + $0x28] sm:$0xff]   ;;  %s2533_s11 = sshll.u32 %s4030_s8, 2 }
  0x43   : > { %2902 = vmatprep.subr.bf16.mxu0 %v956_v5  ;;  %2938 = vmatprep.subr.bf16.mxu1 %v956_v5  ;;  %v3094_v13 = vld [vmem:[%s3396_s7 + $0x98] sm:$0xff]   ;;  %v3096_v15 = vld [vmem:[%s3396_s7 + $0xa0] sm:$0xff]   ;;  %v3098_v17 = vld [vmem:[%s3396_s7 + $0xa8] sm:$0xff]   ;;  %s3742_s18 = scalar_lea.vmem %s3939_s3, %s2533_s11 }
  0x44   : > { %2903 = vmatpush3.bf16.msra.mxu0 %v956_v5  ;;  %2939 = vmatpush3.bf16.msra.mxu1 %v956_v5  ;;  %v3099_v18 = vld [vmem:[%s3396_s7 + $0x30] sm:$0xff]   ;;  %v3101_v20 = vld [vmem:[%s3396_s7 + $0x38] sm:$0xff]   ;;  %v3103_v22 = vld [vmem:[%s3396_s7 + $0x40] sm:$0xff]  }
  0x45   : > { %2972 = vmatprep.subr.bf16.mxu0 %v3085_v0  ;;  %3008 = vmatprep.subr.bf16.mxu1 %v3085_v0  ;;  %v3100_v19 = vld [vmem:[%s3396_s7 + $0xb0] sm:$0xff]   ;;  %v3102_v21 = vld [vmem:[%s3396_s7 + $0xb8] sm:$0xff]   ;;  %v3104_v23 = vld [vmem:[%s3396_s7 + $0xc0] sm:$0xff]  }
  0x46   : > { %v3105_v24 = vld [vmem:[%s3396_s7 + $0x48] sm:$0xff]   ;;  %v3107_v26 = vld [vmem:[%s3396_s7 + $0x50] sm:$0xff]   ;;  %v3109_v28 = vld [vmem:[%s3396_s7 + $0x58] sm:$0xff]  }
  0x47   : > { %2905 = vmatmul.mubr.msk.bf16.vlgmr.msra.gmra.mrb[0].mxu0 %vm902_vm2, %v3089_v8  ;;  %2941 = vmatmul.mubr.msk.bf16.vlgmr.msra.gmra.mrb[0].mxu1 %vm902_vm2, %v3090_v9  ;;  %v3106_v25 = vld [vmem:[%s3396_s7 + $0xc8] sm:$0xff]   ;;  %v3108_v27 = vld [vmem:[%s3396_s7 + $0xd0] sm:$0xff]   ;;  %v3110_v29 = vld [vmem:[%s3396_s7 + $0xd8] sm:$0xff]  }
  0x48   : > { %2973 = vmatpush3.bf16.msra.mxu0 %v3085_v0  ;;  %3009 = vmatpush3.bf16.msra.mxu1 %v3085_v0  ;;  %v3111_v30 = vld [vmem:[%s3396_s7 + $0x60] sm:$0xff]   ;;  %v3113_v32 = vld [vmem:[%s3396_s7 + $0x68] sm:$0xff]   ;;  %v3115_v34 = vld [vmem:[%s3396_s7 + $0x70] sm:$0xff]  }
  0x49   : > { %2908 = vmatprep.mubr.msk.bf16.mxu0 %vm902_vm2, %v3091_v10  ;;  %2944 = vmatprep.mubr.msk.bf16.mxu1 %vm902_vm2, %v3092_v11  ;;  %v3112_v31 = vld [vmem:[%s3396_s7 + $0xe0] sm:$0xff]   ;;  %v3114_v33 = vld [vmem:[%s3396_s7 + $0xe8] sm:$0xff]   ;;  %v3116_v35 = vld [vmem:[%s3396_s7 + $0xf0] sm:$0xff]  }
  0x4a   : > { %2974 = vmatprep.subr.bf16.mxu0 %v956_v5  ;;  %3010 = vmatprep.subr.bf16.mxu1 %v956_v5  ;;  %v3117_v36 = vld [vmem:[%s3396_s7 + $0x78] sm:$0xff]   ;;  %v3119_v38 = vld [vmem:[%s3396_s7 + $0x100] sm:$0xff]   ;;  %v3121_v40 = vld [vmem:[%s3396_s7 + $0x108] sm:$0xff]  }
  0x4b   : > { %v3118_v37 = vld [vmem:[%s3396_s7 + $0xf8] sm:$0xff]   ;;  %v3120_v39 = vld [vmem:[%s3396_s7 + $0x180] sm:$0xff]   ;;  %v3122_v41 = vld [vmem:[%s3396_s7 + $0x188] sm:$0xff]  }
  0x4c   : > { %2975 = vmatpush3.bf16.msra.mxu0 %v956_v5  ;;  %3011 = vmatpush3.bf16.msra.mxu1 %v956_v5  ;;  %v3123_v42 = vld [vmem:[%s3396_s7 + $0x110] sm:$0xff]   ;;  %v3125_v44 = vld [vmem:[%s3396_s7 + $0x118] sm:$0xff]   ;;  %v3127_v46 = vld [vmem:[%s3396_s7 + $0x120] sm:$0xff]  }
  0x4d   : > { %v3124_v43 = vld [vmem:[%s3396_s7 + $0x190] sm:$0xff]   ;;  %v3126_v45 = vld [vmem:[%s3396_s7 + $0x198] sm:$0xff]   ;;  %v3128_v47 = vld [vmem:[%s3396_s7 + $0x1a0] sm:$0xff]  }
  0x4e   : > { %v3129_v48 = vld [vmem:[%s3396_s7 + $0x128] sm:$0xff]   ;;  %v3131_v50 = vld [vmem:[%s3396_s7 + $0x130] sm:$0xff]   ;;  %v3133_v52 = vld [vmem:[%s3396_s7 + $0x138] sm:$0xff]  }
  0x4f   : > { %2909 = vmatmul.mubr.msk.bf16.gmra.mrb[4].mxu0 %vm902_vm2, %v3093_v12  ;;  %2945 = vmatmul.mubr.msk.bf16.gmra.mrb[4].mxu1 %vm902_vm2, %v3094_v13  ;;  %v3130_v49 = vld [vmem:[%s3396_s7 + $0x1a8] sm:$0xff]   ;;  %v3132_v51 = vld [vmem:[%s3396_s7 + $0x1b0] sm:$0xff]   ;;  %v3134_v53 = vld [vmem:[%s3396_s7 + $0x1b8] sm:$0xff]  }
  0x50   : > { %2912 = vmatprep.mubr.msk.bf16.mxu0 %vm902_vm2, %v3095_v14  ;;  %2948 = vmatprep.mubr.msk.bf16.mxu1 %vm902_vm2, %v3096_v15  ;;  %v3135_v54 = vld [vmem:[%s3396_s7 + $0x140] sm:$0xff]   ;;  %v3137_v56 = vld [vmem:[%s3396_s7 + $0x148] sm:$0xff]   ;;  %v3139_v58 = vld [vmem:[%s3396_s7 + $0x150] sm:$0xff]  }
  0x51   : > { %v3136_v55 = vld [vmem:[%s3396_s7 + $0x1c0] sm:$0xff]   ;;  %v3138_v57 = vld [vmem:[%s3396_s7 + $0x1c8] sm:$0xff]   ;;  %v3140_v59 = vld [vmem:[%s3396_s7 + $0x1d0] sm:$0xff]  }
  0x52   : > { %v3141_v60 = vld [vmem:[%s3396_s7 + $0x158] sm:$0xff]   ;;  %v3143_v62 = vld [vmem:[%s3396_s7 + $0x160] sm:$0xff]   ;;  %v3145_v0 = vld [vmem:[%s3396_s7 + $0x168] sm:$0xff]  }
  0x53   : > { %v3142_v61 = vld [vmem:[%s3396_s7 + $0x1d8] sm:$0xff]   ;;  %v3144_v63 = vld [vmem:[%s3396_s7 + $0x1e0] sm:$0xff]   ;;  %v3146_v1 = vld [vmem:[%s3396_s7 + $0x1e8] sm:$0xff]  }
  0x54   : > { %v3147_v2 = vld [vmem:[%s3396_s7 + $0x170] sm:$0xff]   ;;  %v3149_v4 = vld [vmem:[%s3396_s7 + $0x178] sm:$0xff]  }
  0x55   : > { %v3148_v3 = vld [vmem:[%s3396_s7 + $0x1f0] sm:$0xff]   ;;  %v3150_v5 = vld [vmem:[%s3396_s7 + $0x1f8] sm:$0xff]  }
  0x57   : > { %2913 = vmatmul.mubr.msk.bf16.gmra.mrb[8].mxu0 %vm902_vm2, %v3097_v16  ;;  %2949 = vmatmul.mubr.msk.bf16.gmra.mrb[8].mxu1 %vm902_vm2, %v3098_v17 }
  0x58   : > { %2916 = vmatprep.mubr.msk.bf16.mxu0 %vm902_vm2, %v3099_v18  ;;  %2952 = vmatprep.mubr.msk.bf16.mxu1 %vm902_vm2, %v3100_v19 }
  0x5f   : > { %2917 = vmatmul.mubr.msk.bf16.gmra.mrb[12].mxu0 %vm902_vm2, %v3101_v20  ;;  %2953 = vmatmul.mubr.msk.bf16.gmra.mrb[12].mxu1 %vm902_vm2, %v3102_v21 }
  0x60   : > { %2920 = vmatprep.mubr.msk.bf16.mxu0 %vm902_vm2, %v3103_v22  ;;  %2956 = vmatprep.mubr.msk.bf16.mxu1 %vm902_vm2, %v3104_v23 }
  0x67   : > { %2921 = vmatmul.mubr.msk.bf16.gmra.mrb[16].mxu0 %vm902_vm2, %v3105_v24  ;;  %2957 = vmatmul.mubr.msk.bf16.gmra.mrb[16].mxu1 %vm902_vm2, %v3106_v25 }
  0x68   : > { %2924 = vmatprep.mubr.msk.bf16.mxu0 %vm902_vm2, %v3107_v26  ;;  %2960 = vmatprep.mubr.msk.bf16.mxu1 %vm902_vm2, %v3108_v27 }
  0x6f   : > { %2925 = vmatmul.mubr.msk.bf16.gmra.mrb[20].mxu0 %vm902_vm2, %v3109_v28  ;;  %2961 = vmatmul.mubr.msk.bf16.gmra.mrb[20].mxu1 %vm902_vm2, %v3110_v29 }
  0x70   : > { %2928 = vmatprep.mubr.msk.bf16.mxu0 %vm902_vm2, %v3111_v30  ;;  %2964 = vmatprep.mubr.msk.bf16.mxu1 %vm902_vm2, %v3112_v31 }
  0x77   : > { %2929 = vmatmul.mubr.msk.bf16.gmra.mrb[24].mxu0 %vm902_vm2, %v3113_v32  ;;  %2965 = vmatmul.mubr.msk.bf16.gmra.mrb[24].mxu1 %vm902_vm2, %v3114_v33 }
  0x78   : > { %2932 = vmatprep.mubr.msk.bf16.mxu0 %vm902_vm2, %v3115_v34  ;;  %2968 = vmatprep.mubr.msk.bf16.mxu1 %vm902_vm2, %v3116_v35 }
  0x7f   : > { %2933 = vmatmul.mubr.msk.bf16.gmra.mrb[28].mxu0 %vm902_vm2, %v3117_v36  ;;  %2969 = vmatmul.mubr.msk.bf16.gmra.mrb[28].mxu1 %vm902_vm2, %v3118_v37 }
  0x80   : > { %2976 = vmatprep.mubr.msk.bf16.mxu0 %vm902_vm2, %v3119_v38  ;;  %3012 = vmatprep.mubr.msk.bf16.mxu1 %vm902_vm2, %v3120_v39 }
  0x87   : > { %2977 = vmatmul.mubr.msk.bf16.vlgmr.msra.gmra.mrb[32].mxu0 %vm902_vm2, %v3121_v40  ;;  %3013 = vmatmul.mubr.msk.bf16.vlgmr.msra.gmra.mrb[32].mxu1 %vm902_vm2, %v3122_v41 }
  0x88   : > { %2980 = vmatprep.mubr.msk.bf16.mxu0 %vm902_vm2, %v3123_v42  ;;  %3016 = vmatprep.mubr.msk.bf16.mxu1 %vm902_vm2, %v3124_v43 }
  0x8f   : > { %2981 = vmatmul.mubr.msk.bf16.gmra.mrb[36].mxu0 %vm902_vm2, %v3125_v44  ;;  %3017 = vmatmul.mubr.msk.bf16.gmra.mrb[36].mxu1 %vm902_vm2, %v3126_v45 }
  0x90   : > { %2984 = vmatprep.mubr.msk.bf16.mxu0 %vm902_vm2, %v3127_v46  ;;  %3020 = vmatprep.mubr.msk.bf16.mxu1 %vm902_vm2, %v3128_v47 }
  0x97   : > { %2985 = vmatmul.mubr.msk.bf16.gmra.mrb[40].mxu0 %vm902_vm2, %v3129_v48  ;;  %3021 = vmatmul.mubr.msk.bf16.gmra.mrb[40].mxu1 %vm902_vm2, %v3130_v49 }
  0x98   : > { %2988 = vmatprep.mubr.msk.bf16.mxu0 %vm902_vm2, %v3131_v50  ;;  %3024 = vmatprep.mubr.msk.bf16.mxu1 %vm902_vm2, %v3132_v51 }
  0x9f   : > { %2989 = vmatmul.mubr.msk.bf16.gmra.mrb[44].mxu0 %vm902_vm2, %v3133_v52  ;;  %3025 = vmatmul.mubr.msk.bf16.gmra.mrb[44].mxu1 %vm902_vm2, %v3134_v53 }
  0xa0   : > { %2992 = vmatprep.mubr.msk.bf16.mxu0 %vm902_vm2, %v3135_v54  ;;  %3028 = vmatprep.mubr.msk.bf16.mxu1 %vm902_vm2, %v3136_v55 }
  0xa7   : > { %2993 = vmatmul.mubr.msk.bf16.gmra.mrb[48].mxu0 %vm902_vm2, %v3137_v56  ;;  %3029 = vmatmul.mubr.msk.bf16.gmra.mrb[48].mxu1 %vm902_vm2, %v3138_v57 }
  0xa8   : > { %2996 = vmatprep.mubr.msk.bf16.mxu0 %vm902_vm2, %v3139_v58  ;;  %3032 = vmatprep.mubr.msk.bf16.mxu1 %vm902_vm2, %v3140_v59 }
  0xaf   : > { %2997 = vmatmul.mubr.msk.bf16.gmra.mrb[52].mxu0 %vm902_vm2, %v3141_v60  ;;  %3033 = vmatmul.mubr.msk.bf16.gmra.mrb[52].mxu1 %vm902_vm2, %v3142_v61 }
  0xb0   : > { %3000 = vmatprep.mubr.msk.bf16.mxu0 %vm902_vm2, %v3143_v62  ;;  %3036 = vmatprep.mubr.msk.bf16.mxu1 %vm902_vm2, %v3144_v63  ;;  %v3725_v62 = vld [vmem:[%s3938_s2] ss:$0 sm:$0xff] }
  0xb7   : > { %3001 = vmatmul.mubr.msk.bf16.gmra.mrb[56].mxu0 %vm902_vm2, %v3145_v0  ;;  %3037 = vmatmul.mubr.msk.bf16.gmra.mrb[56].mxu1 %vm902_vm2, %v3146_v1 }
  0xb8   : > { %3004 = vmatprep.mubr.msk.bf16.mxu0 %vm902_vm2, %v3147_v2  ;;  %3040 = vmatprep.mubr.msk.bf16.mxu1 %vm902_vm2, %v3148_v3 }
  0xbf   : > { %3005 = vmatmul.mubr.msk.bf16.gmra.mrb[60].mxu0 %vm902_vm2, %v3149_v4  ;;  %3041 = vmatmul.mubr.msk.bf16.gmra.mrb[60].mxu1 %vm902_vm2, %v3150_v5 }
 0x11a   : > { %v3526_v6 = vpop.f32.mrb[0].mxu0  ;;  %v3528_v7 = vpop.f32.mrb[0].mxu1 }
 0x11b   : > { %v3532_v9 = vpop.f32.mrb[1].mxu0  ;;  %v3534_v10 = vpop.f32.mrb[1].mxu1  ;;  %v3974_v4 = vmax.f32 %v3526_v6, %v3528_v7 }
 0x11c   : > { %v3538_v12 = vpop.f32.mrb[2].mxu0  ;;  %v3540_v13 = vpop.f32.mrb[2].mxu1 }
 0x11d   : > { %v3544_v15 = vpop.f32.mrb[3].mxu0  ;;  %v3546_v16 = vpop.f32.mrb[3].mxu1 }
 0x122   : > { %v3550_v18 = vpop.f32.mrb[4].mxu0  ;;  %v3552_v19 = vpop.f32.mrb[4].mxu1 }
 0x123   : > { %v3556_v21 = vpop.f32.mrb[5].mxu0  ;;  %v3558_v22 = vpop.f32.mrb[5].mxu1 }
 0x124   : > { %v3562_v24 = vpop.f32.mrb[6].mxu0  ;;  %v3564_v25 = vpop.f32.mrb[6].mxu1 }
 0x125   : > { %v3568_v27 = vpop.f32.mrb[7].mxu0  ;;  %v3570_v28 = vpop.f32.mrb[7].mxu1 }
 0x12a   : > { %v3574_v30 = vpop.f32.mrb[8].mxu0  ;;  %v3576_v31 = vpop.f32.mrb[8].mxu1 }
 0x12b   : > { %v3580_v33 = vpop.f32.mrb[9].mxu0  ;;  %v3582_v34 = vpop.f32.mrb[9].mxu1 }
 0x12c   : > { %v3586_v36 = vpop.f32.mrb[10].mxu0  ;;  %v3588_v37 = vpop.f32.mrb[10].mxu1 }
 0x12d   : > { %v3592_v39 = vpop.f32.mrb[11].mxu0  ;;  %v3594_v40 = vpop.f32.mrb[11].mxu1 }
 0x132   : > { %v3598_v42 = vpop.f32.mrb[12].mxu0  ;;  %v3600_v43 = vpop.f32.mrb[12].mxu1 }
 0x133   : > { %v3604_v45 = vpop.f32.mrb[13].mxu0  ;;  %v3606_v46 = vpop.f32.mrb[13].mxu1 }
 0x134   : > { %v3610_v48 = vpop.f32.mrb[14].mxu0  ;;  %v3612_v49 = vpop.f32.mrb[14].mxu1 }
 0x135   : > { %v3616_v51 = vpop.f32.mrb[15].mxu0  ;;  %v3618_v52 = vpop.f32.mrb[15].mxu1 }
 0x13a   : > { %v3622_v54 = vpop.f32.mrb[16].mxu0  ;;  %v3624_v55 = vpop.f32.mrb[16].mxu1 }
 0x13b   : > { %v3628_v57 = vpop.f32.mrb[17].mxu0  ;;  %v3630_v58 = vpop.f32.mrb[17].mxu1 }
 0x13c   : > { %v3634_v60 = vpop.f32.mrb[18].mxu0  ;;  %v3636_v61 = vpop.f32.mrb[18].mxu1 }
 0x13d   : > { %v3640_v63 = vpop.f32.mrb[19].mxu0  ;;  %v3642_v0 = vpop.f32.mrb[19].mxu1 }
 0x142   : > { %v3646_v2 = vpop.f32.mrb[20].mxu0  ;;  %v3648_v3 = vpop.f32.mrb[20].mxu1 }
 0x143   : > { %v3652_v5 = vpop.f32.mrb[21].mxu0  ;;  %v3654_v59 = vpop.f32.mrb[21].mxu1 }
 0x144   : > { %v3658_v56 = vpop.f32.mrb[22].mxu0  ;;  %v3660_v53 = vpop.f32.mrb[22].mxu1 }
 0x145   : > { %v3664_v50 = vpop.f32.mrb[23].mxu0  ;;  %v3666_v47 = vpop.f32.mrb[23].mxu1 }
 0x146   : > { %3957 = vst [vmem:[#allocation3_spill] sm:$0xff] %v3666_v47 }
 0x14a   : > { %v3670_v44 = vpop.f32.mrb[24].mxu0  ;;  %v3672_v41 = vpop.f32.mrb[24].mxu1 }
 0x14b   : > { %3958 = vst [vmem:[#allocation4_spill] sm:$0xff] %v3670_v44  ;;  %3959 = vst [vmem:[#allocation5_spill] sm:$0xff] %v3672_v41  ;;  %v3676_v38 = vpop.f32.mrb[25].mxu0  ;;  %v3678_v35 = vpop.f32.mrb[25].mxu1 }
 0x14c   : > { %3960 = vst [vmem:[#allocation6_spill] sm:$0xff] %v3676_v38  ;;  %3961 = vst [vmem:[#allocation7_spill] sm:$0xff] %v3678_v35  ;;  %v3682_v32 = vpop.f32.mrb[26].mxu0  ;;  %v3684_v29 = vpop.f32.mrb[26].mxu1  ;;  %v3976_v35 = vmax.f32 %v3538_v12, %v3540_v13  ;;  %v3977_v38 = vmax.f32 %v3544_v15, %v3546_v16 }
 0x14d   : > { %3962 = vst [vmem:[#allocation8_spill] sm:$0xff] %v3682_v32  ;;  %3963 = vst [vmem:[#allocation9_spill] sm:$0xff] %v3684_v29  ;;  %v3688_v26 = vpop.f32.mrb[27].mxu0  ;;  %v3690_v23 = vpop.f32.mrb[27].mxu1 }
 0x14e   : > { %3964 = vst [vmem:[#allocation10_spill] sm:$0xff] %v3688_v26  ;;  %3965 = vst [vmem:[#allocation11_spill] sm:$0xff] %v3690_v23 }
 0x152   : > { %v3694_v20 = vpop.f32.mrb[28].mxu0  ;;  %v3696_v17 = vpop.f32.mrb[28].mxu1 }
 0x153   : > { %3966 = vst [vmem:[#allocation12_spill] sm:$0xff] %v3694_v20  ;;  %3967 = vst [vmem:[#allocation13_spill] sm:$0xff] %v3696_v17  ;;  %v3700_v14 = vpop.f32.mrb[29].mxu0  ;;  %v3702_v11 = vpop.f32.mrb[29].mxu1 }
 0x154   : > { %3968 = vst [vmem:[#allocation14_spill] sm:$0xff] %v3700_v14  ;;  %3969 = vst [vmem:[#allocation15_spill] sm:$0xff] %v3702_v11  ;;  %v3706_v8 = vpop.f32.mrb[30].mxu0  ;;  %v3708_v29 = vpop.f32.mrb[30].mxu1 }
 0x155   : > { %3970 = vst [vmem:[#allocation16_spill] sm:$0xff] %v3706_v8  ;;  %3971 = vst [vmem:[#allocation17_spill] sm:$0xff] %v3708_v29  ;;  %v3713_v23 = vpop.f32.mrb[31].mxu0  ;;  %v3715_v26 = vpop.f32.mrb[31].mxu1  ;;  %v3975_v29 = vmax.f32 %v3532_v9, %v3534_v10 }
 0x156   : > { %3972 = vst [vmem:[#allocation18_spill] sm:$0xff] %v3713_v23  ;;  %3973 = vst [vmem:[#allocation19_spill] sm:$0xff] %v3715_v26 }
 0x15a   : > { %v2978_v17 = vpop.f32.mrb[32].mxu0  ;;  %v3014_v20 = vpop.f32.mrb[32].mxu1 }
 0x15b   : > { %v1797_v11 = vmax.f32 %v3974_v4, %v2978_v17  ;;  %v1668_v14 = vpop.f32.mrb[33].mxu0  ;;  %v2022_v32 = vpop.f32.mrb[33].mxu1 }
 0x15c   : > { %v1795_v8 = vmax.f32 %v3975_v29, %v1668_v14  ;;  %v2979_v1 = vpop.f32.mrb[34].mxu0  ;;  %v3015_v26 = vpop.f32.mrb[34].mxu1 }
 0x15d   : > { %v2151_v23 = vmax.f32 %v1797_v11, %v3014_v20  ;;  %v1798_v6 = vmax.f32 %v3976_v35, %v2979_v1  ;;  %v1671_v7 = vpop.f32.mrb[35].mxu0  ;;  %v2025_v17 = vpop.f32.mrb[35].mxu1 }
 0x15e   : > { %v2149_v4 = vmax.f32 %v1795_v8, %v2022_v32  ;;  %v1796_v41 = vmax.f32 %v3977_v38, %v1671_v7 }
 0x15f   : > { %v2190_v44 = vadd.f32 %v3725_v62, %v2151_v23  ;;  %v2152_v47 = vmax.f32 %v1798_v6, %v3015_v26  ;;  %v3978_v23 = vmax.f32 %v3550_v18, %v3552_v19  ;;  %v3980_v18 = vmax.f32 %v3562_v24, %v3564_v25 }
 0x160   : > { %v2188_v9 = vadd.f32 %v3725_v62, %v2149_v4  ;;  %v2150_v10 = vmax.f32 %v1796_v41, %v2025_v17  ;;  %v3979_v41 = vmax.f32 %v3556_v21, %v3558_v22  ;;  %v3981_v21 = vmax.f32 %v3568_v27, %v3570_v28 }
 0x161   : > { %v2222_v14 = vmax.f32 %v2190_v44, 0.0  ;;  %v2191_v11 = vadd.f32 %v3725_v62, %v2152_v47 }
 0x162   : > { %v2220_v8 = vmax.f32 %v2188_v9, 0.0  ;;  %v2189_v12 = vadd.f32 %v3725_v62, %v2150_v10  ;;  %v2982_v13 = vpop.f32.mrb[36].mxu0  ;;  %v3018_v15 = vpop.f32.mrb[36].mxu1 }
 0x163   : > { %v2798_v16 = vpack.c.bf16 %v2222_v14, %v2222_v14  ;;  %v2223_v20 = vmax.f32 %v2191_v11, 0.0  ;;  %v1801_v26 = vmax.f32 %v3978_v23, %v2982_v13  ;;  %v1684_v29 = vpop.f32.mrb[37].mxu0  ;;  %v2038_v32 = vpop.f32.mrb[37].mxu1  ;;  %v3982_v23 = vmax.f32 %v3574_v30, %v3576_v31 }
 0x164   : > { %v2796_v35 = vpack.c.bf16 %v2220_v8, %v2220_v8  ;;  %v2221_v38 = vmax.f32 %v2189_v12, 0.0  ;;  %v1799_v44 = vmax.f32 %v3979_v41, %v1684_v29  ;;  %v2983_v47 = vpop.f32.mrb[38].mxu0  ;;  %v3019_v1 = vpop.f32.mrb[38].mxu1  ;;  %v3983_v41 = vmax.f32 %v3580_v33, %v3582_v34 }
 0x165   : > { %2383 = vst.msk [vmem:[%s3742_s18 + $0x8] sm:$0xf] %vm2380_vm3, %v2798_v16  ;;  %v2799_v6 = vpack.c.bf16 %v2223_v20, %v2223_v20  ;;  %v2155_v7 = vmax.f32 %v1801_v26, %v3018_v15  ;;  %v1802_v19 = vmax.f32 %v3980_v18, %v2983_v47  ;;  %v1687_v17 = vpop.f32.mrb[39].mxu0  ;;  %v2041_v4 = vpop.f32.mrb[39].mxu1  ;;  %v3984_v30 = vmax.f32 %v3586_v36, %v3588_v37 }
 0x166   : > { %2381 = vst.msk [vmem:[%s3742_s18] sm:$0xf] %vm2380_vm3, %v2796_v35  ;;  %v2797_v9 = vpack.c.bf16 %v2221_v38, %v2221_v38  ;;  %v2153_v10 = vmax.f32 %v1799_v44, %v2038_v32  ;;  %v1800_v22 = vmax.f32 %v3981_v21, %v1687_v17  ;;  %v3985_v33 = vmax.f32 %v3592_v39, %v3594_v40 }
 0x167   : > { %2384 = vst.msk [vmem:[%s3742_s18 + $0xc] sm:$0xf] %vm2380_vm3, %v2799_v6  ;;  %v2194_v14 = vadd.f32 %v3725_v62, %v2155_v7  ;;  %v2156_v11 = vmax.f32 %v1802_v19, %v3019_v1 }
 0x168   : > { %2382 = vst.msk [vmem:[%s3742_s18 + $0x4] sm:$0xf] %vm2380_vm3, %v2797_v9  ;;  %v2192_v24 = vadd.f32 %v3725_v62, %v2153_v10  ;;  %v2154_v25 = vmax.f32 %v1800_v22, %v2041_v4 }
 0x169   : > { %v2226_v8 = vmax.f32 %v2194_v14, 0.0  ;;  %v2195_v12 = vadd.f32 %v3725_v62, %v2156_v11 }
 0x16a   : > { %v2224_v13 = vmax.f32 %v2192_v24, 0.0  ;;  %v2193_v15 = vadd.f32 %v3725_v62, %v2154_v25  ;;  %v2986_v16 = vpop.f32.mrb[40].mxu0  ;;  %v3022_v27 = vpop.f32.mrb[40].mxu1 }
 0x16b   : > { %v2802_v28 = vpack.c.bf16 %v2226_v8, %v2226_v8  ;;  %v2227_v20 = vmax.f32 %v2195_v12, 0.0  ;;  %v1805_v26 = vmax.f32 %v3982_v23, %v2986_v16  ;;  %v1700_v29 = vpop.f32.mrb[41].mxu0  ;;  %v2054_v32 = vpop.f32.mrb[41].mxu1  ;;  %v3986_v8 = vmax.f32 %v3598_v42, %v3600_v43 }
 0x16c   : > { %v2800_v35 = vpack.c.bf16 %v2224_v13, %v2224_v13  ;;  %v2225_v38 = vmax.f32 %v2193_v15, 0.0  ;;  %v1803_v44 = vmax.f32 %v3983_v41, %v1700_v29  ;;  %v2987_v47 = vpop.f32.mrb[42].mxu0  ;;  %v3023_v1 = vpop.f32.mrb[42].mxu1  ;;  %v3988_v42 = vmax.f32 %v3610_v48, %v3612_v49 }
 0x16d   : > { %2387 = vst.msk [vmem:[%s3742_s18 + $0x18] sm:$0xf] %vm2380_vm3, %v2802_v28  ;;  %v2803_v6 = vpack.c.bf16 %v2227_v20, %v2227_v20  ;;  %v2159_v7 = vmax.f32 %v1805_v26, %v3022_v27  ;;  %v1806_v31 = vmax.f32 %v3984_v30, %v2987_v47  ;;  %v1703_v18 = vpop.f32.mrb[43].mxu0  ;;  %v2057_v19 = vpop.f32.mrb[43].mxu1  ;;  %v3987_v28 = vmax.f32 %v3604_v45, %v3606_v46 }
 0x16e   : > { %2385 = vst.msk [vmem:[%s3742_s18 + $0x10] sm:$0xf] %vm2380_vm3, %v2800_v35  ;;  %v2801_v17 = vpack.c.bf16 %v2225_v38, %v2225_v38  ;;  %v2157_v4 = vmax.f32 %v1803_v44, %v2054_v32  ;;  %v1804_v34 = vmax.f32 %v3985_v33, %v1703_v18  ;;  %v3989_v45 = vmax.f32 %v3616_v51, %v3618_v52 }
 0x16f   : > { %2388 = vst.msk [vmem:[%s3742_s18 + $0x1c] sm:$0xf] %vm2380_vm3, %v2803_v6  ;;  %v2198_v9 = vadd.f32 %v3725_v62, %v2159_v7  ;;  %v2160_v10 = vmax.f32 %v1806_v31, %v3023_v1 }
 0x170   : > { %2386 = vst.msk [vmem:[%s3742_s18 + $0x14] sm:$0xf] %vm2380_vm3, %v2801_v17  ;;  %v2196_v36 = vadd.f32 %v3725_v62, %v2157_v4  ;;  %v2158_v37 = vmax.f32 %v1804_v34, %v2057_v19  ;;  %v3990_v17 = vmax.f32 %v3622_v54, %v3624_v55  ;;  %v3992_v54 = vmax.f32 %v3634_v60, %v3636_v61 }
 0x171   : > { %v2230_v21 = vmax.f32 %v2198_v9, 0.0  ;;  %v2199_v22 = vadd.f32 %v3725_v62, %v2160_v10 }
 0x172   : > { %v2228_v14 = vmax.f32 %v2196_v36, 0.0  ;;  %v2197_v11 = vadd.f32 %v3725_v62, %v2158_v37  ;;  %v2990_v24 = vpop.f32.mrb[44].mxu0  ;;  %v3026_v39 = vpop.f32.mrb[44].mxu1  ;;  %v3991_v36 = vmax.f32 %v3628_v57, %v3630_v58  ;;  %v3993_v57 = vmax.f32 %v3640_v63, %v3642_v0 }
 0x173   : > { %v2806_v40 = vpack.c.bf16 %v2230_v21, %v2230_v21  ;;  %v2231_v25 = vmax.f32 %v2199_v22, 0.0  ;;  %v1809_v12 = vmax.f32 %v3986_v8, %v2990_v24  ;;  %v1716_v13 = vpop.f32.mrb[45].mxu0  ;;  %v2070_v15 = vpop.f32.mrb[45].mxu1 }
 0x174   : > { %v2804_v16 = vpack.c.bf16 %v2228_v14, %v2228_v14  ;;  %v2229_v27 = vmax.f32 %v2197_v11, 0.0  ;;  %v1807_v20 = vmax.f32 %v3987_v28, %v1716_v13  ;;  %v2991_v23 = vpop.f32.mrb[46].mxu0  ;;  %v3027_v26 = vpop.f32.mrb[46].mxu1 }
 0x175   : > { %2391 = vst.msk [vmem:[%s3742_s18 + $0x28] sm:$0xf] %vm2380_vm3, %v2806_v40  ;;  %v2807_v29 = vpack.c.bf16 %v2231_v25, %v2231_v25  ;;  %v2163_v32 = vmax.f32 %v1809_v12, %v3026_v39  ;;  %v1810_v43 = vmax.f32 %v3988_v42, %v2991_v23  ;;  %v1719_v35 = vpop.f32.mrb[47].mxu0  ;;  %v2073_v38 = vpop.f32.mrb[47].mxu1  ;;  %v3994_v23 = vmax.f32 %v3646_v2, %v3648_v3 }
 0x176   : > { %2389 = vst.msk [vmem:[%s3742_s18 + $0x20] sm:$0xf] %vm2380_vm3, %v2804_v16  ;;  %v2805_v41 = vpack.c.bf16 %v2229_v27, %v2229_v27  ;;  %v2161_v44 = vmax.f32 %v1807_v20, %v2070_v15  ;;  %v1808_v46 = vmax.f32 %v3989_v45, %v1719_v35  ;;  %v3995_v35 = vmax.f32 %v3652_v5, %v3654_v59  ;;  %v3997_v59 = vld [vmem:[#allocation3_spill] sm:$0xff] }
 0x177   : > { %2392 = vst.msk [vmem:[%s3742_s18 + $0x2c] sm:$0xf] %vm2380_vm3, %v2807_v29  ;;  %v2202_v47 = vadd.f32 %v3725_v62, %v2163_v32  ;;  %v2164_v1 = vmax.f32 %v1810_v43, %v3027_v26  ;;  %v3996_v2 = vmax.f32 %v3658_v56, %v3660_v53  ;;  %v3998_v5 = vmax.f32 %v3664_v50, %v3997_v59  ;;  %v4014_v59 = vld [vmem:[#allocation14_spill] sm:$0xff] }
 0x178   : > { %2390 = vst.msk [vmem:[%s3742_s18 + $0x24] sm:$0xf] %vm2380_vm3, %v2805_v41  ;;  %v2200_v48 = vadd.f32 %v3725_v62, %v2161_v44  ;;  %v2162_v49 = vmax.f32 %v1808_v46, %v2073_v38 }
 0x179   : > { %v2234_v6 = vmax.f32 %v2202_v47, 0.0  ;;  %v2203_v7 = vadd.f32 %v3725_v62, %v2164_v1 }
 0x17a   : > { %v2232_v30 = vmax.f32 %v2200_v48, 0.0  ;;  %v2201_v31 = vadd.f32 %v3725_v62, %v2162_v49  ;;  %v2994_v18 = vpop.f32.mrb[48].mxu0  ;;  %v3030_v51 = vpop.f32.mrb[48].mxu1 }
 0x17b   : > { %v2810_v52 = vpack.c.bf16 %v2234_v6, %v2234_v6  ;;  %v2235_v19 = vmax.f32 %v2203_v7, 0.0  ;;  %v1813_v4 = vmax.f32 %v3990_v17, %v2994_v18  ;;  %v1732_v33 = vpop.f32.mrb[49].mxu0  ;;  %v2086_v34 = vpop.f32.mrb[49].mxu1 }
 0x17c   : > { %v2808_v9 = vpack.c.bf16 %v2232_v30, %v2232_v30  ;;  %v2233_v10 = vmax.f32 %v2201_v31, 0.0  ;;  %v1811_v37 = vmax.f32 %v3991_v36, %v1732_v33  ;;  %v2995_v21 = vpop.f32.mrb[50].mxu0  ;;  %v3031_v22 = vpop.f32.mrb[50].mxu1  ;;  %v3999_v33 = vld [vmem:[#allocation4_spill] sm:$0xff] }
 0x17d   : > { %2395 = vst.msk [vmem:[%s3742_s18 + $0x38] sm:$0xf] %vm2380_vm3, %v2810_v52  ;;  %v2811_v14 = vpack.c.bf16 %v2235_v19, %v2235_v19  ;;  %v2167_v11 = vmax.f32 %v1813_v4, %v3030_v51  ;;  %v1814_v55 = vmax.f32 %v3992_v54, %v2995_v21  ;;  %v1735_v24 = vpop.f32.mrb[51].mxu0  ;;  %v2089_v39 = vpop.f32.mrb[51].mxu1 }
 0x17e   : > { %2393 = vst.msk [vmem:[%s3742_s18 + $0x30] sm:$0xf] %vm2380_vm3, %v2808_v9  ;;  %v2809_v40 = vpack.c.bf16 %v2233_v10, %v2233_v10  ;;  %v2165_v25 = vmax.f32 %v1811_v37, %v2086_v34  ;;  %v1812_v58 = vmax.f32 %v3993_v57, %v1735_v24  ;;  %v4000_v34 = vld [vmem:[#allocation5_spill] sm:$0xff]  ;;  %v4005_v57 = vld [vmem:[#allocation8_spill] sm:$0xff] }
 0x17f   : > { %2396 = vst.msk [vmem:[%s3742_s18 + $0x3c] sm:$0xf] %vm2380_vm3, %v2811_v14  ;;  %v2206_v8 = vadd.f32 %v3725_v62, %v2167_v11  ;;  %v2168_v12 = vmax.f32 %v1814_v55, %v3031_v22  ;;  %v4001_v9 = vmax.f32 %v3999_v33, %v4000_v34  ;;  %v4002_v14 = vld [vmem:[#allocation6_spill] sm:$0xff]  ;;  %v4003_v11 = vld [vmem:[#allocation7_spill] sm:$0xff] }
 0x180   : > { %2394 = vst.msk [vmem:[%s3742_s18 + $0x34] sm:$0xf] %vm2380_vm3, %v2809_v40  ;;  %v2204_v60 = vadd.f32 %v3725_v62, %v2165_v25  ;;  %v2166_v61 = vmax.f32 %v1812_v58, %v2089_v39  ;;  %v4004_v54 = vmax.f32 %v4002_v14, %v4003_v11  ;;  %v4006_v58 = vld [vmem:[#allocation9_spill] sm:$0xff]  ;;  %v4020_v34 = vld [vmem:[#allocation18_spill] sm:$0xff] }
 0x181   : > { %v2238_v13 = vmax.f32 %v2206_v8, 0.0  ;;  %v2207_v15 = vadd.f32 %v3725_v62, %v2168_v12  ;;  %v4007_v8 = vmax.f32 %v4005_v57, %v4006_v58 }
 0x182   : > { %v2236_v16 = vmax.f32 %v2204_v60, 0.0  ;;  %v2205_v27 = vadd.f32 %v3725_v62, %v2166_v61  ;;  %v2998_v28 = vpop.f32.mrb[52].mxu0  ;;  %v3034_v63 = vpop.f32.mrb[52].mxu1 }
 0x183   : > { %v2814_v0 = vpack.c.bf16 %v2238_v13, %v2238_v13  ;;  %v2239_v20 = vmax.f32 %v2207_v15, 0.0  ;;  %v1817_v26 = vmax.f32 %v3994_v23, %v2998_v28  ;;  %v1748_v29 = vpop.f32.mrb[53].mxu0  ;;  %v2102_v32 = vpop.f32.mrb[53].mxu1 }
 0x184   : > { %v2812_v42 = vpack.c.bf16 %v2236_v16, %v2236_v16  ;;  %v2237_v43 = vmax.f32 %v2205_v27, 0.0  ;;  %v1815_v38 = vmax.f32 %v3995_v35, %v1748_v29  ;;  %v2999_v41 = vpop.f32.mrb[54].mxu0  ;;  %v3035_v44 = vpop.f32.mrb[54].mxu1  ;;  %v4008_v16 = vld [vmem:[#allocation10_spill] sm:$0xff]  ;;  %v4009_v27 = vld [vmem:[#allocation11_spill] sm:$0xff] }
 0x185   : > { %2399 = vst.msk [vmem:[%s3742_s18 + $0x48] sm:$0xf] %vm2380_vm3, %v2814_v0  ;;  %v2815_v45 = vpack.c.bf16 %v2239_v20, %v2239_v20  ;;  %v2171_v46 = vmax.f32 %v1817_v26, %v3034_v63  ;;  %v1818_v3 = vmax.f32 %v3996_v2, %v2999_v41  ;;  %v1751_v47 = vpop.f32.mrb[55].mxu0  ;;  %v2105_v1 = vpop.f32.mrb[55].mxu1  ;;  %v4010_v28 = vmax.f32 %v4008_v16, %v4009_v27 }
 0x186   : > { %2397 = vst.msk [vmem:[%s3742_s18 + $0x40] sm:$0xf] %vm2380_vm3, %v2812_v42  ;;  %v2813_v48 = vpack.c.bf16 %v2237_v43, %v2237_v43  ;;  %v2169_v49 = vmax.f32 %v1815_v38, %v2102_v32  ;;  %v1816_v6 = vmax.f32 %v3998_v5, %v1751_v47  ;;  %v4015_v5 = vld [vmem:[#allocation15_spill] sm:$0xff] }
 0x187   : > { %2400 = vst.msk [vmem:[%s3742_s18 + $0x4c] sm:$0xf] %vm2380_vm3, %v2815_v45  ;;  %v2210_v7 = vadd.f32 %v3725_v62, %v2171_v46  ;;  %v2172_v30 = vmax.f32 %v1818_v3, %v3035_v44  ;;  %v4011_v45 = vld [vmem:[#allocation12_spill] sm:$0xff]  ;;  %v4012_v46 = vld [vmem:[#allocation13_spill] sm:$0xff] }
 0x188   : > { %2398 = vst.msk [vmem:[%s3742_s18 + $0x44] sm:$0xf] %vm2380_vm3, %v2813_v48  ;;  %v2208_v53 = vadd.f32 %v3725_v62, %v2169_v49  ;;  %v2170_v56 = vmax.f32 %v1816_v6, %v2105_v1  ;;  %v4013_v2 = vmax.f32 %v4011_v45, %v4012_v46  ;;  %v4016_v6 = vmax.f32 %v4014_v59, %v4015_v5 }
 0x189   : > { %v2242_v31 = vmax.f32 %v2210_v7, 0.0  ;;  %v2211_v18 = vadd.f32 %v3725_v62, %v2172_v30 }
 0x18a   : > { %v2240_v51 = vmax.f32 %v2208_v53, 0.0  ;;  %v2209_v52 = vadd.f32 %v3725_v62, %v2170_v56  ;;  %v3002_v19 = vpop.f32.mrb[56].mxu0  ;;  %v3038_v50 = vpop.f32.mrb[56].mxu1 }
 0x18b   : > { %v2818_v17 = vpack.c.bf16 %v2242_v31, %v2242_v31  ;;  %v2243_v4 = vmax.f32 %v2211_v18, 0.0  ;;  %v1821_v10 = vmax.f32 %v4001_v9, %v3002_v19  ;;  %v1764_v36 = vpop.f32.mrb[57].mxu0  ;;  %v2118_v37 = vpop.f32.mrb[57].mxu1  ;;  %v4017_v18 = vld [vmem:[#allocation16_spill] sm:$0xff]  ;;  %v4021_v9 = vld [vmem:[#allocation19_spill] sm:$0xff] }
 0x18c   : > { %v2816_v21 = vpack.c.bf16 %v2240_v51, %v2240_v51  ;;  %v2241_v22 = vmax.f32 %v2209_v52, 0.0  ;;  %v1819_v55 = vmax.f32 %v4004_v54, %v1764_v36  ;;  %v3003_v24 = vpop.f32.mrb[58].mxu0  ;;  %v3039_v39 = vpop.f32.mrb[58].mxu1  ;;  %v4018_v51 = vld [vmem:[#allocation17_spill] sm:$0xff] }
 0x18d   : > { %2403 = vst.msk [vmem:[%s3742_s18 + $0x58] sm:$0xf] %vm2380_vm3, %v2818_v17  ;;  %v2819_v40 = vpack.c.bf16 %v2243_v4, %v2243_v4  ;;  %v2175_v25 = vmax.f32 %v1821_v10, %v3038_v50  ;;  %v1822_v12 = vmax.f32 %v4007_v8, %v3003_v24  ;;  %v1767_v60 = vpop.f32.mrb[59].mxu0  ;;  %v2121_v61 = vpop.f32.mrb[59].mxu1  ;;  %v4019_v52 = vmax.f32 %v4017_v18, %v4018_v51 }
 0x18e   : > { %2401 = vst.msk [vmem:[%s3742_s18 + $0x50] sm:$0xf] %vm2380_vm3, %v2816_v21  ;;  %v2817_v13 = vpack.c.bf16 %v2241_v22, %v2241_v22  ;;  %v2173_v15 = vmax.f32 %v1819_v55, %v2118_v37  ;;  %v1820_v63 = vmax.f32 %v4010_v28, %v1767_v60  ;;  %v4022_v10 = vmax.f32 %v4020_v34, %v4021_v9 }
 0x18f   : > { %2404 = vst.msk [vmem:[%s3742_s18 + $0x5c] sm:$0xf] %vm2380_vm3, %v2819_v40  ;;  %v2214_v0 = vadd.f32 %v3725_v62, %v2175_v25  ;;  %v2176_v20 = vmax.f32 %v1822_v12, %v3039_v39 }
 0x190   : > { %2402 = vst.msk [vmem:[%s3742_s18 + $0x54] sm:$0xf] %vm2380_vm3, %v2817_v13  ;;  %v2212_v23 = vadd.f32 %v3725_v62, %v2173_v15  ;;  %v2174_v26 = vmax.f32 %v1820_v63, %v2121_v61 }
 0x191   : > { %v2246_v29 = vmax.f32 %v2214_v0, 0.0  ;;  %v2215_v32 = vadd.f32 %v3725_v62, %v2176_v20 }
 0x192   : > { %v2244_v42 = vmax.f32 %v2212_v23, 0.0  ;;  %v2213_v43 = vadd.f32 %v3725_v62, %v2174_v26  ;;  %v3006_v35 = vpop.f32.mrb[60].mxu0  ;;  %v3042_v38 = vpop.f32.mrb[60].mxu1 }
 0x193   : > { %v2822_v41 = vpack.c.bf16 %v2246_v29, %v2246_v29  ;;  %v2247_v44 = vmax.f32 %v2215_v32, 0.0  ;;  %v1825_v3 = vmax.f32 %v4013_v2, %v3006_v35  ;;  %v1780_v47 = vpop.f32.mrb[61].mxu0  ;;  %v2134_v1 = vpop.f32.mrb[61].mxu1 }
 0x194   : > { %v2820_v48 = vpack.c.bf16 %v2244_v42, %v2244_v42  ;;  %v2245_v49 = vmax.f32 %v2213_v43, 0.0  ;;  %v1823_v7 = vmax.f32 %v4016_v6, %v1780_v47  ;;  %v3007_v30 = vpop.f32.mrb[62].mxu0  ;;  %v3043_v53 = vpop.f32.mrb[62].mxu1 }
 0x195   : > { %2407 = vst.msk [vmem:[%s3742_s18 + $0x68] sm:$0xf] %vm2380_vm3, %v2822_v41  ;;  %v2823_v56 = vpack.c.bf16 %v2247_v44, %v2247_v44  ;;  %v2179_v31 = vmax.f32 %v1825_v3, %v3042_v38  ;;  %v1826_v19 = vmax.f32 %v4019_v52, %v3007_v30  ;;  %v1783_v50 = vpop.f32.mrb[63].mxu0  ;;  %v2137_v17 = vpop.f32.mrb[63].mxu1 }
 0x196   : > { %2405 = vst.msk [vmem:[%s3742_s18 + $0x60] sm:$0xf] %vm2380_vm3, %v2820_v48  ;;  %v2821_v4 = vpack.c.bf16 %v2245_v49, %v2245_v49  ;;  %v2177_v33 = vmax.f32 %v1823_v7, %v2134_v1  ;;  %v1824_v36 = vmax.f32 %v4022_v10, %v1783_v50 }
 0x197   : > { %2408 = vst.msk [vmem:[%s3742_s18 + $0x6c] sm:$0xf] %vm2380_vm3, %v2823_v56  ;;  %v2218_v37 = vadd.f32 %v3725_v62, %v2179_v31  ;;  %v2180_v21 = vmax.f32 %v1826_v19, %v3043_v53 }
 0x198   : > { %2406 = vst.msk [vmem:[%s3742_s18 + $0x64] sm:$0xf] %vm2380_vm3, %v2821_v4  ;;  %v2216_v22 = vadd.f32 %v3725_v62, %v2177_v33  ;;  %v2178_v14 = vmax.f32 %v1824_v36, %v2137_v17 }
 0x199   : > { %v2250_v11 = vmax.f32 %v2218_v37, 0.0  ;;  %v2219_v54 = vadd.f32 %v3725_v62, %v2180_v21 }
 0x19a   : > { %v2248_v55 = vmax.f32 %v2216_v22, 0.0  ;;  %v2217_v24 = vadd.f32 %v3725_v62, %v2178_v14 }
 0x19b   : > { %v2826_v39 = vpack.c.bf16 %v2250_v11, %v2250_v11  ;;  %v2251_v40 = vmax.f32 %v2219_v54, 0.0 }
 0x19c   : > { %v2824_v25 = vpack.c.bf16 %v2248_v55, %v2248_v55  ;;  %v2249_v57 = vmax.f32 %v2217_v24, 0.0 }
 0x19d   : > { %2411 = vst.msk [vmem:[%s3742_s18 + $0x78] sm:$0xf] %vm2380_vm3, %v2826_v39  ;;  %v2827_v58 = vpack.c.bf16 %v2251_v40, %v2251_v40 }
 0x19e   : > { %2409 = vst.msk [vmem:[%s3742_s18 + $0x70] sm:$0xf] %vm2380_vm3, %v2824_v25  ;;  %v2825_v8 = vpack.c.bf16 %v2249_v57, %v2249_v57 }
 0x19f   : > { %2412 = vst.msk [vmem:[%s3742_s18 + $0x7c] sm:$0xf] %vm2380_vm3, %v2827_v58 }
 0x1a0   : > { %2410 = vst.msk [vmem:[%s3742_s18 + $0x74] sm:$0xf] %vm2380_vm3, %v2825_v8 }
 0x1a1 PF: > { %s13_s16 = sadd.s32 1, %s3189_s16   ;;  %s4023_s12 = smov %s3177_s13 }
 0x1a2   : > { %p10_p10 = scmp.ge.s32.totalorder %s13_s16, 4   ;;  %s4024_s13 = smov %s3247_s20 }
 0x1a3   : > { %s4025_s14 = smov %s3185_s15  ;;  %s4026_s15 = smov %s4028_s17 }
 0x1a4   :  { %12 = sbr.rel (!%p10_p10) target bundleno = 3 (0x3), region = 117 }

// kernel: cnn_forward.6
= control target key start
LH: loop header
LB: loop body
LE: loop exit
PB: predicated region body
PF: predicated region fallthrough
CT: control target
= control target key end

     0   :  { %s3288_s12 = smov 0   ;;  %s3290_s13 = smov 0   ;;  %s4144_s0 = inlined_call_operand.vmem [shape: bf16[4,128,640], index: 0, kind: input, shape index: {}]   ;;  %s4145_s1 = inlined_call_operand.vmem [shape: bf16[640,128], index: 1, kind: input, shape index: {}]   ;;  %s4146_s2 = inlined_call_operand.vmem [shape: f32[1,128], index: 2, kind: input, shape index: {}]   ;;  %s4147_s3 = inlined_call_operand.vmem [shape: bf16[128,128], index: 3, kind: output, shape index: {}]  }
   0x1   :  { %s3292_s14 = smov 0   ;;  %s3294_s15 = smov 0  }
   0x2   :  { %s3296_s16 = smov 0  }
   0x3 LB: > { %s25_s17 = sadd.s32 1, %s3262_s15  ;;  %p39_p1 = scmp.ne.s32.totalorder %s3254_s13, %s3250_s12  ;;  %s3266_s16 = sphi %s3296_s16, %s13_s16   ;;  %s3262_s15 = sphi %s3294_s15, %s4151_s15   ;;  %s3258_s14 = sphi %s3292_s14, %s4150_s14   ;;  %s3254_s13 = sphi %s3290_s13, %s4149_s13   ;;  %s3250_s12 = sphi %s3288_s12, %s4148_s12  }
   0x4   : > { %p27_p0 = scmp.ge.s32.totalorder %s25_s17, 2  ;;  %p40_p2 = scmp.eq.s32.totalorder %s3266_s16, 0 }
   0x5   : > { %s32_s19 = sadd.s32 1, %s3254_s13  ;;  %p2264_p5 = scmp.ge.s32.totalorder %s3266_s16, 2 }
   0x6   : > { %s4153_s17 = smov (%p27_p0, %s25_s17), 0  ;;  %p41_p3 = por %p40_p2, %p39_p1 }
   0x7   : > { %s29_s18 = ssub.s32 %s3262_s15, %s4153_s17  ;;  %158 = sbr.rel (%p2264_p5) target bundleno = 72 (0x48), region = 24 }
   0x8   : > { %p30_p4 = scmp.eq.s32.totalorder %s29_s18, 0 }
   0xa   : > { %s3323_s20 = scalar_select %p30_p4, %s3254_s13, %s32_s19  }
   0xe   : > { %161 = sbr.rel (!%p41_p3) target bundleno = 72 (0x48), region = 28  ;;  %s163_s21 = sand.u32 (%p41_p3), 1, %s3254_s13  }
   0xf   : > { %s3034_s22 = smul.u32 (%p41_p3), 160, %s3262_s15 }
  0x10   : > { %s3033_s23 = smul.u32 (%p41_p3), 640, %s163_s21 }
  0x11   : > { %s3331_s26 = scalar_lea.vmem (%p41_p3), %s4144_s0, %s3034_s22 }
  0x12   : > { %v184_v0 = vld [vmem:[%s3331_s26] sm:$0xff] (%p41_p3)  ;;  %v186_v1 = vld [vmem:[%s3331_s26 + $0x8] sm:$0xff] (%p41_p3)  ;;  %v188_v2 = vld [vmem:[%s3331_s26 + $0x14] sm:$0xff] (%p41_p3)  ;;  %s3336_s27 = scalar_lea.vmem (%p41_p3), [#allocation2], %s3033_s23 }
  0x13   : > { %185 = vst [vmem:[%s3336_s27] sm:$0xff] (%p41_p3), %v184_v0  ;;  %187 = vst [vmem:[%s3336_s27 + $0x8] sm:$0xff] (%p41_p3), %v186_v1  ;;  %v190_v3 = vld [vmem:[%s3331_s26 + $0x1c] sm:$0xff] (%p41_p3)  ;;  %v192_v4 = vld [vmem:[%s3331_s26 + $0x28] sm:$0xff] (%p41_p3) }
  0x14   : > { %189 = vst [vmem:[%s3336_s27 + $0x14] sm:$0xff] (%p41_p3), %v188_v2  ;;  %v194_v5 = vld [vmem:[%s3331_s26 + $0x30] sm:$0xff] (%p41_p3)  ;;  %191 = vst [vmem:[%s3336_s27 + $0x1c] sm:$0xff] (%p41_p3), %v190_v3  ;;  %v196_v6 = vld [vmem:[%s3331_s26 + $0x3c] sm:$0xff] (%p41_p3) }
  0x15   : > { %193 = vst [vmem:[%s3336_s27 + $0x28] sm:$0xff] %v192_v4  ;;  %195 = vst [vmem:[%s3336_s27 + $0x30] sm:$0xff] %v194_v5  ;;  %v198_v7 = vld [vmem:[%s3331_s26 + $0x44] sm:$0xff]  ;;  %v200_v8 = vld [vmem:[%s3331_s26 + $0x50] sm:$0xff] }
  0x16   : > { %197 = vst [vmem:[%s3336_s27 + $0x3c] sm:$0xff] %v196_v6  ;;  %199 = vst [vmem:[%s3336_s27 + $0x44] sm:$0xff] %v198_v7  ;;  %v202_v9 = vld [vmem:[%s3331_s26 + $0x58] sm:$0xff]  ;;  %v204_v10 = vld [vmem:[%s3331_s26 + $0x64] sm:$0xff] }
  0x17   : > { %201 = vst [vmem:[%s3336_s27 + $0x50] sm:$0xff] %v200_v8  ;;  %v206_v11 = vld [vmem:[%s3331_s26 + $0x6c] sm:$0xff]  ;;  %203 = vst [vmem:[%s3336_s27 + $0x58] sm:$0xff] %v202_v9  ;;  %v208_v12 = vld [vmem:[%s3331_s26 + $0x78] sm:$0xff] }
  0x18   : > { %205 = vst [vmem:[%s3336_s27 + $0x64] sm:$0xff] %v204_v10  ;;  %207 = vst [vmem:[%s3336_s27 + $0x6c] sm:$0xff] %v206_v11  ;;  %v210_v13 = vld [vmem:[%s3331_s26 + $0x80] sm:$0xff]  ;;  %v212_v14 = vld [vmem:[%s3331_s26 + $0x8c] sm:$0xff] }
  0x19   : > { %209 = vst [vmem:[%s3336_s27 + $0x78] sm:$0xff] %v208_v12  ;;  %211 = vst [vmem:[%s3336_s27 + $0x80] sm:$0xff] %v210_v13  ;;  %v214_v15 = vld [vmem:[%s3331_s26 + $0x94] sm:$0xff]  ;;  %v216_v16 = vld [vmem:[%s3331_s26 + $0x140] sm:$0xff] }
  0x1a   : > { %213 = vst [vmem:[%s3336_s27 + $0x8c] sm:$0xff] %v212_v14  ;;  %v218_v17 = vld [vmem:[%s3331_s26 + $0x148] sm:$0xff]  ;;  %215 = vst [vmem:[%s3336_s27 + $0x94] sm:$0xff] %v214_v15  ;;  %v220_v18 = vld [vmem:[%s3331_s26 + $0x154] sm:$0xff] }
  0x1b   : > { %217 = vst [vmem:[%s3336_s27 + $0xa0] sm:$0xff] %v216_v16  ;;  %219 = vst [vmem:[%s3336_s27 + $0xa8] sm:$0xff] %v218_v17  ;;  %v222_v19 = vld [vmem:[%s3331_s26 + $0x15c] sm:$0xff]  ;;  %v224_v20 = vld [vmem:[%s3331_s26 + $0x168] sm:$0xff] }
  0x1c   : > { %221 = vst [vmem:[%s3336_s27 + $0xb4] sm:$0xff] %v220_v18  ;;  %223 = vst [vmem:[%s3336_s27 + $0xbc] sm:$0xff] %v222_v19  ;;  %v226_v21 = vld [vmem:[%s3331_s26 + $0x170] sm:$0xff]  ;;  %v228_v22 = vld [vmem:[%s3331_s26 + $0x17c] sm:$0xff] }
  0x1d   : > { %225 = vst [vmem:[%s3336_s27 + $0xc8] sm:$0xff] %v224_v20  ;;  %v230_v23 = vld [vmem:[%s3331_s26 + $0x184] sm:$0xff]  ;;  %227 = vst [vmem:[%s3336_s27 + $0xd0] sm:$0xff] %v226_v21  ;;  %v232_v24 = vld [vmem:[%s3331_s26 + $0x190] sm:$0xff] }
  0x1e   : > { %229 = vst [vmem:[%s3336_s27 + $0xdc] sm:$0xff] %v228_v22  ;;  %231 = vst [vmem:[%s3336_s27 + $0xe4] sm:$0xff] %v230_v23  ;;  %v234_v25 = vld [vmem:[%s3331_s26 + $0x198] sm:$0xff]  ;;  %v236_v26 = vld [vmem:[%s3331_s26 + $0x1a4] sm:$0xff] }
  0x1f   : > { %233 = vst [vmem:[%s3336_s27 + $0xf0] sm:$0xff] %v232_v24  ;;  %235 = vst [vmem:[%s3336_s27 + $0xf8] sm:$0xff] %v234_v25  ;;  %v238_v27 = vld [vmem:[%s3331_s26 + $0x1ac] sm:$0xff]  ;;  %v240_v28 = vld [vmem:[%s3331_s26 + $0x1b8] sm:$0xff] }
  0x20   : > { %237 = vst [vmem:[%s3336_s27 + $0x104] sm:$0xff] %v236_v26  ;;  %v242_v29 = vld [vmem:[%s3331_s26 + $0x1c0] sm:$0xff]  ;;  %239 = vst [vmem:[%s3336_s27 + $0x10c] sm:$0xff] %v238_v27  ;;  %v244_v30 = vld [vmem:[%s3331_s26 + $0x1cc] sm:$0xff] }
  0x21   : > { %241 = vst [vmem:[%s3336_s27 + $0x118] sm:$0xff] %v240_v28  ;;  %243 = vst [vmem:[%s3336_s27 + $0x120] sm:$0xff] %v242_v29  ;;  %v246_v31 = vld [vmem:[%s3331_s26 + $0x1d4] sm:$0xff]  ;;  %v248_v32 = vld [vmem:[%s3331_s26 + $0x280] sm:$0xff] }
  0x22   : > { %245 = vst [vmem:[%s3336_s27 + $0x12c] sm:$0xff] %v244_v30  ;;  %247 = vst [vmem:[%s3336_s27 + $0x134] sm:$0xff] %v246_v31  ;;  %v250_v33 = vld [vmem:[%s3331_s26 + $0x288] sm:$0xff]  ;;  %v252_v34 = vld [vmem:[%s3331_s26 + $0x294] sm:$0xff] }
  0x23   : > { %249 = vst [vmem:[%s3336_s27 + $0x140] sm:$0xff] %v248_v32  ;;  %v254_v35 = vld [vmem:[%s3331_s26 + $0x29c] sm:$0xff]  ;;  %251 = vst [vmem:[%s3336_s27 + $0x148] sm:$0xff] %v250_v33  ;;  %v256_v36 = vld [vmem:[%s3331_s26 + $0x2a8] sm:$0xff] }
  0x24   : > { %253 = vst [vmem:[%s3336_s27 + $0x154] sm:$0xff] %v252_v34  ;;  %255 = vst [vmem:[%s3336_s27 + $0x15c] sm:$0xff] %v254_v35  ;;  %v258_v37 = vld [vmem:[%s3331_s26 + $0x2b0] sm:$0xff]  ;;  %v260_v38 = vld [vmem:[%s3331_s26 + $0x2bc] sm:$0xff] }
  0x25   : > { %257 = vst [vmem:[%s3336_s27 + $0x168] sm:$0xff] %v256_v36  ;;  %259 = vst [vmem:[%s3336_s27 + $0x170] sm:$0xff] %v258_v37  ;;  %v262_v39 = vld [vmem:[%s3331_s26 + $0x2c4] sm:$0xff]  ;;  %v264_v40 = vld [vmem:[%s3331_s26 + $0x2d0] sm:$0xff] }
  0x26   : > { %261 = vst [vmem:[%s3336_s27 + $0x17c] sm:$0xff] %v260_v38  ;;  %v266_v41 = vld [vmem:[%s3331_s26 + $0x2d8] sm:$0xff]  ;;  %263 = vst [vmem:[%s3336_s27 + $0x184] sm:$0xff] %v262_v39  ;;  %v268_v42 = vld [vmem:[%s3331_s26 + $0x2e4] sm:$0xff] }
  0x27   : > { %265 = vst [vmem:[%s3336_s27 + $0x190] sm:$0xff] %v264_v40  ;;  %267 = vst [vmem:[%s3336_s27 + $0x198] sm:$0xff] %v266_v41  ;;  %v270_v43 = vld [vmem:[%s3331_s26 + $0x2ec] sm:$0xff]  ;;  %v272_v44 = vld [vmem:[%s3331_s26 + $0x2f8] sm:$0xff] }
  0x28   : > { %269 = vst [vmem:[%s3336_s27 + $0x1a4] sm:$0xff] %v268_v42  ;;  %271 = vst [vmem:[%s3336_s27 + $0x1ac] sm:$0xff] %v270_v43  ;;  %v274_v45 = vld [vmem:[%s3331_s26 + $0x300] sm:$0xff]  ;;  %v276_v46 = vld [vmem:[%s3331_s26 + $0x30c] sm:$0xff] }
  0x29   : > { %273 = vst [vmem:[%s3336_s27 + $0x1b8] sm:$0xff] %v272_v44  ;;  %v278_v47 = vld [vmem:[%s3331_s26 + $0x314] sm:$0xff]  ;;  %275 = vst [vmem:[%s3336_s27 + $0x1c0] sm:$0xff] %v274_v45  ;;  %v280_v48 = vld [vmem:[%s3331_s26 + $0x3c0] sm:$0xff] }
  0x2a   : > { %277 = vst [vmem:[%s3336_s27 + $0x1cc] sm:$0xff] %v276_v46  ;;  %279 = vst [vmem:[%s3336_s27 + $0x1d4] sm:$0xff] %v278_v47  ;;  %v282_v49 = vld [vmem:[%s3331_s26 + $0x3c8] sm:$0xff]  ;;  %v284_v50 = vld [vmem:[%s3331_s26 + $0x3d4] sm:$0xff] }
  0x2b   : > { %281 = vst [vmem:[%s3336_s27 + $0x1e0] sm:$0xff] %v280_v48  ;;  %283 = vst [vmem:[%s3336_s27 + $0x1e8] sm:$0xff] %v282_v49  ;;  %v286_v51 = vld [vmem:[%s3331_s26 + $0x3dc] sm:$0xff]  ;;  %v288_v52 = vld [vmem:[%s3331_s26 + $0x3e8] sm:$0xff] }
  0x2c   : > { %285 = vst [vmem:[%s3336_s27 + $0x1f4] sm:$0xff] %v284_v50  ;;  %v290_v53 = vld [vmem:[%s3331_s26 + $0x3f0] sm:$0xff]  ;;  %287 = vst [vmem:[%s3336_s27 + $0x1fc] sm:$0xff] %v286_v51  ;;  %v292_v54 = vld [vmem:[%s3331_s26 + $0x3fc] sm:$0xff] }
  0x2d   : > { %289 = vst [vmem:[%s3336_s27 + $0x208] sm:$0xff] %v288_v52  ;;  %291 = vst [vmem:[%s3336_s27 + $0x210] sm:$0xff] %v290_v53  ;;  %v294_v55 = vld [vmem:[%s3331_s26 + $0x404] sm:$0xff]  ;;  %v296_v56 = vld [vmem:[%s3331_s26 + $0x410] sm:$0xff] }
  0x2e   : > { %293 = vst [vmem:[%s3336_s27 + $0x21c] sm:$0xff] %v292_v54  ;;  %295 = vst [vmem:[%s3336_s27 + $0x224] sm:$0xff] %v294_v55  ;;  %v298_v57 = vld [vmem:[%s3331_s26 + $0x418] sm:$0xff]  ;;  %v300_v58 = vld [vmem:[%s3331_s26 + $0x424] sm:$0xff] }
  0x2f   : > { %297 = vst [vmem:[%s3336_s27 + $0x230] sm:$0xff] %v296_v56  ;;  %v302_v59 = vld [vmem:[%s3331_s26 + $0x42c] sm:$0xff]  ;;  %299 = vst [vmem:[%s3336_s27 + $0x238] sm:$0xff] %v298_v57  ;;  %v304_v60 = vld [vmem:[%s3331_s26 + $0x438] sm:$0xff] }
  0x30   : > { %301 = vst [vmem:[%s3336_s27 + $0x244] sm:$0xff] %v300_v58  ;;  %303 = vst [vmem:[%s3336_s27 + $0x24c] sm:$0xff] %v302_v59  ;;  %v306_v61 = vld [vmem:[%s3331_s26 + $0x440] sm:$0xff]  ;;  %v308_v62 = vld [vmem:[%s3331_s26 + $0x44c] sm:$0xff] }
  0x31   : > { %305 = vst [vmem:[%s3336_s27 + $0x258] sm:$0xff] %v304_v60  ;;  %307 = vst [vmem:[%s3336_s27 + $0x260] sm:$0xff] %v306_v61  ;;  %v310_v63 = vld [vmem:[%s3331_s26 + $0x454] sm:$0xff]  ;;  %v2268_v0 = vld [vmem:[%s3331_s26 + $0x10] sm:$0xf] }
  0x32   : > { %309 = vst [vmem:[%s3336_s27 + $0x26c] sm:$0xff] %v308_v62  ;;  %v2270_v1 = vld [vmem:[%s3331_s26 + $0x24] sm:$0xf]  ;;  %311 = vst [vmem:[%s3336_s27 + $0x274] sm:$0xff] %v310_v63  ;;  %v2272_v2 = vld [vmem:[%s3331_s26 + $0x38] sm:$0xf] }
  0x33   : > { %2269 = vst [vmem:[%s3336_s27 + $0x10] sm:$0xf] %v2268_v0  ;;  %2271 = vst [vmem:[%s3336_s27 + $0x24] sm:$0xf] %v2270_v1  ;;  %v2274_v3 = vld [vmem:[%s3331_s26 + $0x4c] sm:$0xf] }
  0x34   : > { %v2276_v4 = vld [vmem:[%s3331_s26 + $0x60] sm:$0xf]  ;;  %2273 = vst [vmem:[%s3336_s27 + $0x38] sm:$0xf] %v2272_v2  ;;  %2275 = vst [vmem:[%s3336_s27 + $0x4c] sm:$0xf] %v2274_v3 }
  0x35   : > { %2277 = vst [vmem:[%s3336_s27 + $0x60] sm:$0xf] %v2276_v4  ;;  %v2278_v5 = vld [vmem:[%s3331_s26 + $0x74] sm:$0xf]  ;;  %v2280_v6 = vld [vmem:[%s3331_s26 + $0x88] sm:$0xf] }
  0x36   : > { %v2282_v7 = vld [vmem:[%s3331_s26 + $0x9c] sm:$0xf]  ;;  %2279 = vst [vmem:[%s3336_s27 + $0x74] sm:$0xf] %v2278_v5  ;;  %2281 = vst [vmem:[%s3336_s27 + $0x88] sm:$0xf] %v2280_v6 }
  0x37   : > { %2283 = vst [vmem:[%s3336_s27 + $0x9c] sm:$0xf] %v2282_v7  ;;  %v2284_v8 = vld [vmem:[%s3331_s26 + $0x150] sm:$0xf]  ;;  %v2286_v9 = vld [vmem:[%s3331_s26 + $0x164] sm:$0xf] }
  0x38   : > { %v2288_v10 = vld [vmem:[%s3331_s26 + $0x178] sm:$0xf]  ;;  %2285 = vst [vmem:[%s3336_s27 + $0xb0] sm:$0xf] %v2284_v8  ;;  %2287 = vst [vmem:[%s3336_s27 + $0xc4] sm:$0xf] %v2286_v9 }
  0x39   : > { %2289 = vst [vmem:[%s3336_s27 + $0xd8] sm:$0xf] %v2288_v10  ;;  %v2290_v11 = vld [vmem:[%s3331_s26 + $0x18c] sm:$0xf]  ;;  %v2292_v12 = vld [vmem:[%s3331_s26 + $0x1a0] sm:$0xf] }
  0x3a   : > { %v2294_v13 = vld [vmem:[%s3331_s26 + $0x1b4] sm:$0xf]  ;;  %2291 = vst [vmem:[%s3336_s27 + $0xec] sm:$0xf] %v2290_v11  ;;  %2293 = vst [vmem:[%s3336_s27 + $0x100] sm:$0xf] %v2292_v12 }
  0x3b   : > { %2295 = vst [vmem:[%s3336_s27 + $0x114] sm:$0xf] %v2294_v13  ;;  %v2296_v14 = vld [vmem:[%s3331_s26 + $0x1c8] sm:$0xf]  ;;  %v2298_v15 = vld [vmem:[%s3331_s26 + $0x1dc] sm:$0xf] }
  0x3c   : > { %v2300_v16 = vld [vmem:[%s3331_s26 + $0x290] sm:$0xf]  ;;  %2297 = vst [vmem:[%s3336_s27 + $0x128] sm:$0xf] %v2296_v14  ;;  %2299 = vst [vmem:[%s3336_s27 + $0x13c] sm:$0xf] %v2298_v15 }
  0x3d   : > { %2301 = vst [vmem:[%s3336_s27 + $0x150] sm:$0xf] %v2300_v16  ;;  %v2302_v17 = vld [vmem:[%s3331_s26 + $0x2a4] sm:$0xf]  ;;  %v2304_v18 = vld [vmem:[%s3331_s26 + $0x2b8] sm:$0xf] }
  0x3e   : > { %v2306_v19 = vld [vmem:[%s3331_s26 + $0x2cc] sm:$0xf]  ;;  %2303 = vst [vmem:[%s3336_s27 + $0x164] sm:$0xf] %v2302_v17  ;;  %2305 = vst [vmem:[%s3336_s27 + $0x178] sm:$0xf] %v2304_v18 }
  0x3f   : > { %2307 = vst [vmem:[%s3336_s27 + $0x18c] sm:$0xf] %v2306_v19  ;;  %v2308_v20 = vld [vmem:[%s3331_s26 + $0x2e0] sm:$0xf]  ;;  %v2310_v21 = vld [vmem:[%s3331_s26 + $0x2f4] sm:$0xf] }
  0x40   : > { %v2312_v22 = vld [vmem:[%s3331_s26 + $0x308] sm:$0xf]  ;;  %2309 = vst [vmem:[%s3336_s27 + $0x1a0] sm:$0xf] %v2308_v20  ;;  %2311 = vst [vmem:[%s3336_s27 + $0x1b4] sm:$0xf] %v2310_v21 }
  0x41   : > { %2313 = vst [vmem:[%s3336_s27 + $0x1c8] sm:$0xf] %v2312_v22  ;;  %v2314_v23 = vld [vmem:[%s3331_s26 + $0x31c] sm:$0xf]  ;;  %v2316_v24 = vld [vmem:[%s3331_s26 + $0x3d0] sm:$0xf] }
  0x42   : > { %v2318_v25 = vld [vmem:[%s3331_s26 + $0x3e4] sm:$0xf]  ;;  %2315 = vst [vmem:[%s3336_s27 + $0x1dc] sm:$0xf] %v2314_v23  ;;  %2317 = vst [vmem:[%s3336_s27 + $0x1f0] sm:$0xf] %v2316_v24 }
  0x43   : > { %2319 = vst [vmem:[%s3336_s27 + $0x204] sm:$0xf] %v2318_v25  ;;  %v2320_v26 = vld [vmem:[%s3331_s26 + $0x3f8] sm:$0xf]  ;;  %v2322_v27 = vld [vmem:[%s3331_s26 + $0x40c] sm:$0xf] }
  0x44   : > { %v2324_v28 = vld [vmem:[%s3331_s26 + $0x420] sm:$0xf]  ;;  %2321 = vst [vmem:[%s3336_s27 + $0x218] sm:$0xf] %v2320_v26  ;;  %2323 = vst [vmem:[%s3336_s27 + $0x22c] sm:$0xf] %v2322_v27 }
  0x45   : > { %2325 = vst [vmem:[%s3336_s27 + $0x240] sm:$0xf] %v2324_v28  ;;  %v2326_v29 = vld [vmem:[%s3331_s26 + $0x434] sm:$0xf]  ;;  %v2328_v30 = vld [vmem:[%s3331_s26 + $0x448] sm:$0xf] }
  0x46   : > { %v2330_v31 = vld [vmem:[%s3331_s26 + $0x45c] sm:$0xf]  ;;  %2327 = vst [vmem:[%s3336_s27 + $0x254] sm:$0xf] %v2326_v29  ;;  %2329 = vst [vmem:[%s3336_s27 + $0x268] sm:$0xf] %v2328_v30 }
  0x47   : > { %2331 = vst [vmem:[%s3336_s27 + $0x27c] sm:$0xf] %v2330_v31 }
  0x48 PF: > { %p2332_p6 = scmp.ge.s32.totalorder %s3266_s16, 1  ;;  %p387_p7 = scmp.lt.s32.totalorder %s3266_s16, 3 }
  0x4a   : > { %p388_p8 = pnand %p2332_p6, %p387_p7 }
  0x4b   : > { %v3532_v32 = vld [vmem:[%s4145_s1 + $0x40] sm:$0xff] (!%p388_p8)   ;;  %v3555_v36 = vld [vmem:[%s4145_s1 + $0x48] sm:$0xff] (!%p388_p8)   ;;  %v3579_v40 = vld [vmem:[%s4145_s1 + $0x50] sm:$0xff] (!%p388_p8)   ;;  %s394_s7 = sand.u32 (!%p388_p8), 1, %s3250_s12   ;;  %s2333_s29 = sshll.u32 (!%p388_p8), %s3258_s14, 3 }
  0x4c   : > { %391 = sbr.rel (%p388_p8) target bundleno = 524 (0x20c), region = 54  ;;  %v3537_v33 = vld [vmem:[%s4145_s1 + $0xc0] sm:$0xff] (!%p388_p8)   ;;  %2569 = vmatprep.subr.bf16.mxu0 (!%p388_p8), %v3532_v32  ;;  %v3561_v37 = vld [vmem:[%s4145_s1 + $0xc8] sm:$0xff] (!%p388_p8)   ;;  %v3585_v41 = vld [vmem:[%s4145_s1 + $0xd0] sm:$0xff] (!%p388_p8)   ;;  %p436_p9 = scmp.lt.s32.totalorder (!%p388_p8), %s2333_s29, 15 }
  0x4d   : > { %v3543_v34 = vld [vmem:[%s4145_s1] sm:$0xff] (!%p388_p8)   ;;  %2609 = vmatprep.subr.bf16.mxu1 (!%p388_p8), %v3537_v33  ;;  %v3567_v38 = vld [vmem:[%s4145_s1 + $0x8] sm:$0xff] (!%p388_p8)   ;;  %v3591_v42 = vld [vmem:[%s4145_s1 + $0x10] sm:$0xff] (!%p388_p8)   ;;  %s3035_s12 = smul.u32 (!%p388_p8), 640, %s394_s7 }
  0x4e   : > { %v3549_v35 = vld [vmem:[%s4145_s1 + $0x80] sm:$0xff] (!%p388_p8)   ;;  %2570 = vmatpush3.bf16.msra.mxu0 (!%p388_p8), %v3543_v34  ;;  %v3573_v39 = vld [vmem:[%s4145_s1 + $0x88] sm:$0xff] (!%p388_p8)   ;;  %v3597_v43 = vld [vmem:[%s4145_s1 + $0x90] sm:$0xff] (!%p388_p8)  }
  0x4f   : > { %2610 = vmatpush3.bf16.msra.mxu1 (!%p388_p8), %v3549_v35  ;;  %2571 = vmatprep.subr.bf16.mxu0 (!%p388_p8), %v3555_v36  ;;  %v3603_v44 = vld [vmem:[%s4145_s1 + $0x58] sm:$0xff] (!%p388_p8)   ;;  %v3627_v48 = vld [vmem:[%s4145_s1 + $0x60] sm:$0xff] (!%p388_p8)   ;;  %v3651_v52 = vld [vmem:[%s4145_s1 + $0x68] sm:$0xff] (!%p388_p8)   ;;  %s3721_s6 = scalar_lea.vmem (!%p388_p8), [#allocation2], %s3035_s12 }
  0x50   : > { %2611 = vmatprep.subr.bf16.mxu1 (!%p388_p8), %v3561_v37  ;;  %v3609_v45 = vld [vmem:[%s4145_s1 + $0xd8] sm:$0xff] (!%p388_p8)   ;;  %v3633_v49 = vld [vmem:[%s4145_s1 + $0xe0] sm:$0xff] (!%p388_p8)   ;;  %v3657_v53 = vld [vmem:[%s4145_s1 + $0xe8] sm:$0xff] (!%p388_p8)  }
  0x51   : > { %v3615_v46 = vld [vmem:[%s4145_s1 + $0x18] sm:$0xff] (!%p388_p8)   ;;  %v3639_v50 = vld [vmem:[%s4145_s1 + $0x20] sm:$0xff] (!%p388_p8)   ;;  %v3663_v54 = vld [vmem:[%s4145_s1 + $0x28] sm:$0xff] (!%p388_p8)  }
  0x52   : > { %2572 = vmatpush3.bf16.msra.mxu0 (!%p388_p8), %v3567_v38  ;;  %v3621_v47 = vld [vmem:[%s4145_s1 + $0x98] sm:$0xff] (!%p388_p8)   ;;  %v3645_v51 = vld [vmem:[%s4145_s1 + $0xa0] sm:$0xff] (!%p388_p8)   ;;  %v3670_v55 = vld [vmem:[%s4145_s1 + $0xa8] sm:$0xff] (!%p388_p8)  }
  0x53   : > { %2612 = vmatpush3.bf16.msra.mxu1 %v3573_v39  ;;  %2573 = vmatprep.subr.bf16.mxu0 %v3579_v40  ;;  %v3676_v56 = vld [vmem:[%s4145_s1 + $0x70] sm:$0xff]   ;;  %v3700_v60 = vld [vmem:[%s4145_s1 + $0x78] sm:$0xff]   ;;  %v3113_v3 = vld [vmem:[%s3721_s6 + $0xc] ss:$20 sps:$4 sm:$0xff]   ;;  %s4155_s29 = smov (!%p436_p9, %s2333_s29), 15 }
  0x54   : > { %2613 = vmatprep.subr.bf16.mxu1 %v3585_v41  ;;  %v3682_v57 = vld [vmem:[%s4145_s1 + $0xf0] sm:$0xff]   ;;  %v3706_v61 = vld [vmem:[%s4145_s1 + $0xf8] sm:$0xff]   ;;  %v3732_v4 = vld [vmem:[%s4145_s1 + $0x100] sm:$0xff]   ;;  %990 = vmatprep.mubr.bf16.mxu1 %v3113_v3  ;;  %s2334_s14 = sshll.u32 %s4155_s29, 2 }
  0x55   : > { %v3688_v58 = vld [vmem:[%s4145_s1 + $0x30] sm:$0xff]   ;;  %v3712_v62 = vld [vmem:[%s4145_s1 + $0x38] sm:$0xff]   ;;  %v3737_v5 = vld [vmem:[%s4145_s1 + $0x108] sm:$0xff]   ;;  %s4108_s7 = scalar_lea.vmem %s4147_s3, %s2334_s14 }
  0x56   : > { %2574 = vmatpush3.bf16.msra.mxu0 %v3591_v42  ;;  %v3694_v59 = vld [vmem:[%s4145_s1 + $0xb0] sm:$0xff]   ;;  %v3718_v63 = vld [vmem:[%s4145_s1 + $0xb8] sm:$0xff]   ;;  %v3116_v6 = vld [vmem:[%s3721_s6 + $0x2c] ss:$20 sps:$4 sm:$0xff]  }
  0x57   : > { %2614 = vmatpush3.bf16.msra.mxu1 %v3597_v43  ;;  %2575 = vmatprep.subr.bf16.mxu0 %v3603_v44  ;;  %v3108_v0 = vld [vmem:[%s3721_s6] ss:$20 sps:$4 sm:$0xff]   ;;  %v3110_v1 = vld [vmem:[%s3721_s6 + $0x4] ss:$20 sps:$4 sm:$0xff]   ;;  %v3111_v2 = vld [vmem:[%s3721_s6 + $0x8] ss:$20 sps:$4 sm:$0xff]  }
  0x58   : > { %2615 = vmatprep.subr.bf16.mxu1 %v3609_v45  ;;  %925 = vmatprep.mubr.bf16.mxu0 %v3110_v1  ;;  %v3118_v7 = vld [vmem:[%s3721_s6 + $0x34] ss:$20 sps:$4 sm:$0xff]   ;;  %v3121_v10 = vld [vmem:[%s3721_s6 + $0x30] ss:$20 sps:$4 sm:$0xff]   ;;  %v3761_v12 = vld [vmem:[%s4145_s1 + $0x118] sm:$0xff]  }
  0x59   : > { %v3120_v8 = vld [vmem:[%s3721_s6 + $0x28] ss:$20 sps:$4 sm:$0xff]   ;;  %v3750_v9 = vld [vmem:[%s4145_s1 + $0x110] sm:$0xff]   ;;  %v3771_v14 = vld [vmem:[%s4145_s1 + $0x120] sm:$0xff]  }
  0x5a   : > { %2576 = vmatpush3.bf16.msra.mxu0 %v3615_v46  ;;  %v3124_v11 = vld [vmem:[%s3721_s6 + $0x54] ss:$20 sps:$4 sm:$0xff]   ;;  %v3126_v13 = vld [vmem:[%s3721_s6 + $0x5c] ss:$20 sps:$4 sm:$0xff]   ;;  %v3129_v16 = vld [vmem:[%s3721_s6 + $0x58] ss:$20 sps:$4 sm:$0xff]  }
  0x5b   : > { %2616 = vmatpush3.bf16.msra.mxu1 %v3621_v47  ;;  %2577 = vmatprep.subr.bf16.mxu0 %v3627_v48  ;;  %v3128_v15 = vld [vmem:[%s3721_s6 + $0x50] ss:$20 sps:$4 sm:$0xff]   ;;  %v3783_v18 = vld [vmem:[%s4145_s1 + $0x128] sm:$0xff]   ;;  %v3137_v22 = vld [vmem:[%s3721_s6 + $0x80] ss:$20 sps:$4 sm:$0xff]  }
  0x5c   : > { %2617 = vmatprep.subr.bf16.mxu1 %v3633_v49  ;;  %v3132_v17 = vld [vmem:[%s3721_s6 + $0x7c] ss:$20 sps:$4 sm:$0xff]   ;;  %v3134_v19 = vld [vmem:[%s3721_s6 + $0x84] ss:$20 sps:$4 sm:$0xff]   ;;  %v3142_v27 = vld [vmem:[%s3721_s6 + $0xa0] ss:$20 sps:$4 sm:$0xff]  }
  0x5d   : > { %v3136_v20 = vld [vmem:[%s3721_s6 + $0x78] ss:$20 sps:$4 sm:$0xff]   ;;  %v3794_v21 = vld [vmem:[%s4145_s1 + $0x130] sm:$0xff]   ;;  %v3146_v30 = vld [vmem:[%s3721_s6 + $0x88] ss:$20 sps:$4 sm:$0xff]  }
  0x5e   : > { %2578 = vmatpush3.bf16.msra.mxu0 %v3639_v50  ;;  %v3140_v23 = vld [vmem:[%s3721_s6 + $0x10] ss:$20 sps:$4 sm:$0xff]   ;;  %v3805_v24 = vld [vmem:[%s4145_s1 + $0x138] sm:$0xff]   ;;  %v3145_v28 = vld [vmem:[%s3721_s6 + $0x60] ss:$20 sps:$4 sm:$0xff]  }
  0x5f   : > { %2618 = vmatpush3.bf16.msra.mxu1 %v3645_v51  ;;  %2579 = vmatprep.subr.bf16.mxu0 %v3651_v52  ;;  %v3144_v25 = vld [vmem:[%s3721_s6 + $0xa4] ss:$20 sps:$4 sm:$0xff]   ;;  %v3147_v29 = vld [vmem:[%s3721_s6 + $0xcc] ss:$20 sps:$4 sm:$0xff]   ;;  %v3149_v31 = vld [vmem:[%s3721_s6 + $0xc8] ss:$20 sps:$4 sm:$0xff]  }
  0x60   : > { %2619 = vmatprep.subr.bf16.mxu1 %v3657_v53  ;;  %v3141_v26 = vld [vmem:[%s3721_s6 + $0x38] ss:$20 sps:$4 sm:$0xff]   ;;  %v3153_v3 = vld [vmem:[%s3721_s6 + $0x11c] ss:$20 sps:$4 sm:$0xff]  }
  0x61   : > { %v3158_v1 = vld [vmem:[%s3721_s6 + $0xac] ss:$20 sps:$4 sm:$0xff]  }
  0x62   : > { %2580 = vmatpush3.bf16.msra.mxu0 %v3663_v54 }
  0x63   : > { %2620 = vmatpush3.bf16.msra.mxu1 %v3670_v55  ;;  %2581 = vmatprep.subr.bf16.mxu0 %v3676_v56 }
  0x64   : > { %2621 = vmatprep.subr.bf16.mxu1 %v3682_v57 }
  0x66   : > { %2582 = vmatpush3.bf16.msra.mxu0 %v3688_v58 }
  0x67   : > { %2622 = vmatpush3.bf16.msra.mxu1 %v3694_v59  ;;  %2583 = vmatprep.subr.bf16.mxu0 %v3700_v60 }
  0x68   : > { %2623 = vmatprep.subr.bf16.mxu1 %v3706_v61 }
  0x6a   : > { %2584 = vmatpush3.bf16.msra.mxu0 %v3712_v62 }
  0x6b   : > { %2624 = vmatpush3.bf16.msra.mxu1 %v3718_v63  ;;  %2937 = vmatprep.subr.bf16.mxu0 %v3732_v4 }
  0x6c   : > { %2661 = vmatprep.subr.bf16.mxu1 %v3532_v32 }
  0x6d   : > { %926 = vmatmul.mubr.bf16.vlgmr.msra.gmra.mrb[0].mxu0 %v3108_v0  ;;  %v3150_v0 = vld [vmem:[%s3721_s6 + $0xf4] ss:$20 sps:$4 sm:$0xff]  }
  0x6e   : > { %991 = vmatmul.mubr.bf16.vlgmr.msra.gmra.mrb[0].mxu1 %v3111_v2  ;;  %2938 = vmatpush3.bf16.msra.mxu0 %v3732_v4  ;;  %v3152_v2 = vld [vmem:[%s3721_s6 + $0xf0] ss:$20 sps:$4 sm:$0xff]  }
  0x6f   : > { %2662 = vmatpush3.bf16.msra.mxu1 %v3543_v34  ;;  %2939 = vmatprep.subr.bf16.mxu0 %v3737_v5 }
  0x70   : > { %2663 = vmatprep.subr.bf16.mxu1 %v3555_v36  ;;  %933 = vmatprep.mubr.bf16.mxu0 %v3116_v6  ;;  %v3155_v6 = vld [vmem:[%s3721_s6 + $0x118] ss:$20 sps:$4 sm:$0xff]  }
  0x71   : > { %998 = vmatprep.mubr.bf16.mxu1 %v3118_v7  ;;  %v3159_v7 = vld [vmem:[%s3721_s6 + $0xb0] ss:$20 sps:$4 sm:$0xff]  }
  0x72   : > { %2940 = vmatpush3.bf16.msra.mxu0 %v3737_v5 }
  0x73   : > { %2664 = vmatpush3.bf16.msra.mxu1 %v3567_v38  ;;  %2941 = vmatprep.subr.bf16.mxu0 %v3750_v9 }
  0x74   : > { %2665 = vmatprep.subr.bf16.mxu1 %v3579_v40 }
  0x75   : > { %934 = vmatmul.mubr.bf16.gmra.mrb[4].mxu0 %v3120_v8  ;;  %v3156_v8 = vld [vmem:[%s3721_s6 + $0xa8] ss:$20 sps:$4 sm:$0xff]  }
  0x76   : > { %999 = vmatmul.mubr.bf16.gmra.mrb[4].mxu1 %v3121_v10  ;;  %941 = vmatprep.mubr.bf16.mxu0 %v3124_v11  ;;  %v3160_v10 = vld [vmem:[%s3721_s6 + $0xd8] ss:$20 sps:$4 sm:$0xff]   ;;  %v3161_v11 = vld [vmem:[%s3721_s6 + $0xd4] ss:$20 sps:$4 sm:$0xff]  }
  0x77   : > { %2942 = vmatpush3.bf16.msra.mxu0 %v3750_v9  ;;  %2666 = vmatpush3.bf16.msra.mxu1 %v3591_v42 }
  0x78   : > { %2943 = vmatprep.subr.bf16.mxu0 %v3761_v12  ;;  %2667 = vmatprep.subr.bf16.mxu1 %v3603_v44 }
  0x79   : > { %1006 = vmatprep.mubr.bf16.mxu1 %v3126_v13  ;;  %v3167_v13 = vld [vmem:[%s3721_s6 + $0x100] ss:$20 sps:$4 sm:$0xff]  }
  0x7b   : > { %2944 = vmatpush3.bf16.msra.mxu0 %v3761_v12  ;;  %2668 = vmatpush3.bf16.msra.mxu1 %v3615_v46 }
  0x7c   : > { %2945 = vmatprep.subr.bf16.mxu0 %v3771_v14  ;;  %2669 = vmatprep.subr.bf16.mxu1 %v3627_v48 }
  0x7d   : > { %942 = vmatmul.mubr.bf16.gmra.mrb[8].mxu0 %v3128_v15  ;;  %v3163_v15 = vld [vmem:[%s3721_s6 + $0xd0] ss:$20 sps:$4 sm:$0xff]  }
  0x7e   : > { %1007 = vmatmul.mubr.bf16.gmra.mrb[8].mxu1 %v3129_v16  ;;  %949 = vmatprep.mubr.bf16.mxu0 %v3132_v17  ;;  %v3168_v16 = vld [vmem:[%s3721_s6 + $0x128] ss:$20 sps:$4 sm:$0xff]  }
  0x7f   : > { %2946 = vmatpush3.bf16.msra.mxu0 %v3771_v14  ;;  %2670 = vmatpush3.bf16.msra.mxu1 %v3639_v50  ;;  %v3164_v17 = vld [vmem:[%s3721_s6 + $0xfc] ss:$20 sps:$4 sm:$0xff]  }
  0x80   : > { %2947 = vmatprep.subr.bf16.mxu0 %v3783_v18  ;;  %2671 = vmatprep.subr.bf16.mxu1 %v3651_v52 }
  0x81   : > { %1014 = vmatprep.mubr.bf16.mxu1 %v3134_v19  ;;  %v3177_v19 = vld [vmem:[%s3721_s6 + $0x14c] ss:$20 sps:$4 sm:$0xff]  }
  0x83   : > { %2948 = vmatpush3.bf16.msra.mxu0 %v3783_v18  ;;  %2672 = vmatpush3.bf16.msra.mxu1 %v3663_v54 }
  0x84   : > { %2949 = vmatprep.subr.bf16.mxu0 %v3794_v21  ;;  %2673 = vmatprep.subr.bf16.mxu1 %v3676_v56 }
  0x85   : > { %950 = vmatmul.mubr.bf16.gmra.mrb[12].mxu0 %v3136_v20  ;;  %v3166_v20 = vld [vmem:[%s3721_s6 + $0xf8] ss:$20 sps:$4 sm:$0xff]  }
  0x86   : > { %1015 = vmatmul.mubr.bf16.gmra.mrb[12].mxu1 %v3137_v22  ;;  %2953 = vmatprep.mubr.bf16.mxu0 %v3140_v23  ;;  %v3169_v22 = vld [vmem:[%s3721_s6 + $0x124] ss:$20 sps:$4 sm:$0xff]   ;;  %v3171_v23 = vld [vmem:[%s3721_s6 + $0x120] ss:$20 sps:$4 sm:$0xff]  }
  0x87   : > { %2950 = vmatpush3.bf16.msra.mxu0 %v3794_v21  ;;  %2674 = vmatpush3.bf16.msra.mxu1 %v3688_v58 }
  0x88   : > { %2951 = vmatprep.subr.bf16.mxu0 %v3805_v24  ;;  %2675 = vmatprep.subr.bf16.mxu1 %v3700_v60 }
  0x89   : > { %1249 = vmatprep.mubr.bf16.mxu1 %v3144_v25  ;;  %v3174_v25 = vld [vmem:[%s3721_s6 + $0x144] ss:$20 sps:$4 sm:$0xff]  }
  0x8b   : > { %2952 = vmatpush3.bf16.msra.mxu0 %v3805_v24  ;;  %2676 = vmatpush3.bf16.msra.mxu1 %v3712_v62 }
  0x8c   : > { %2701 = vmatprep.subr.bf16.mxu0 %v3537_v33  ;;  %2961 = vmatprep.subr.bf16.mxu1 %v3732_v4 }
  0x8e   : > { %2954 = vmatmul.mubr.bf16.vlgmr.msra.gmra.mrb[16].mxu0 %v3141_v26  ;;  %1250 = vmatmul.mubr.bf16.vlgmr.msra.gmra.mrb[16].mxu1 %v3142_v27  ;;  %v3172_v26 = vld [vmem:[%s3721_s6 + $0x140] ss:$20 sps:$4 sm:$0xff]   ;;  %v3175_v27 = vld [vmem:[%s3721_s6 + $0x148] ss:$20 sps:$4 sm:$0xff]  }
  0x8f   : > { %2702 = vmatpush3.bf16.msra.mxu0 %v3549_v35  ;;  %2962 = vmatpush3.bf16.msra.mxu1 %v3732_v4 }
  0x90   : > { %2703 = vmatprep.subr.bf16.mxu0 %v3561_v37  ;;  %2963 = vmatprep.subr.bf16.mxu1 %v3737_v5 }
  0x91   : > { %2957 = vmatprep.mubr.bf16.mxu0 %v3145_v28  ;;  %1257 = vmatprep.mubr.bf16.mxu1 %v3147_v29  ;;  %v3178_v28 = vld [vmem:[%s3721_s6 + $0x16c] ss:$20 sps:$4 sm:$0xff]   ;;  %v3180_v29 = vld [vmem:[%s3721_s6 + $0x174] ss:$20 sps:$4 sm:$0xff]  }
  0x93   : > { %2704 = vmatpush3.bf16.msra.mxu0 %v3573_v39  ;;  %2964 = vmatpush3.bf16.msra.mxu1 %v3737_v5 }
  0x94   : > { %2705 = vmatprep.subr.bf16.mxu0 %v3585_v41  ;;  %2965 = vmatprep.subr.bf16.mxu1 %v3750_v9 }
  0x96   : > { %2958 = vmatmul.mubr.bf16.gmra.mrb[20].mxu0 %v3146_v30  ;;  %1258 = vmatmul.mubr.bf16.gmra.mrb[20].mxu1 %v3149_v31  ;;  %v3182_v30 = vld [vmem:[%s3721_s6 + $0x168] ss:$20 sps:$4 sm:$0xff]   ;;  %v3183_v31 = vld [vmem:[%s3721_s6 + $0x170] ss:$20 sps:$4 sm:$0xff]  }
  0x97   : > { %2706 = vmatpush3.bf16.msra.mxu0 %v3597_v43  ;;  %2966 = vmatpush3.bf16.msra.mxu1 %v3750_v9 }
  0x98   : > { %2707 = vmatprep.subr.bf16.mxu0 %v3609_v45  ;;  %2967 = vmatprep.subr.bf16.mxu1 %v3761_v12 }
  0x99   : > { %1265 = vmatprep.mubr.bf16.mxu1 %v3150_v0  ;;  %1314 = vmatprep.mubr.bf16.mxu0 %v3158_v1 }
  0x9b   : > { %2708 = vmatpush3.bf16.msra.mxu0 %v3621_v47  ;;  %2968 = vmatpush3.bf16.msra.mxu1 %v3761_v12 }
  0x9c   : > { %2709 = vmatprep.subr.bf16.mxu0 %v3633_v49  ;;  %2969 = vmatprep.subr.bf16.mxu1 %v3771_v14 }
  0x9e   : > { %1266 = vmatmul.mubr.bf16.gmra.mrb[24].mxu1 %v3152_v2 }
  0x9f   : > { %2710 = vmatpush3.bf16.msra.mxu0 %v3645_v51  ;;  %2970 = vmatpush3.bf16.msra.mxu1 %v3771_v14 }
  0xa0   : > { %2711 = vmatprep.subr.bf16.mxu0 %v3657_v53  ;;  %2971 = vmatprep.subr.bf16.mxu1 %v3783_v18 }
  0xa1   : > { %1273 = vmatprep.mubr.bf16.mxu1 %v3153_v3 }
  0xa3   : > { %2712 = vmatpush3.bf16.msra.mxu0 %v3670_v55  ;;  %2972 = vmatpush3.bf16.msra.mxu1 %v3783_v18 }
  0xa4   : > { %2713 = vmatprep.subr.bf16.mxu0 %v3682_v57  ;;  %2973 = vmatprep.subr.bf16.mxu1 %v3794_v21 }
  0xa6   : > { %1274 = vmatmul.mubr.bf16.gmra.mrb[28].mxu1 %v3155_v6 }
  0xa7   : > { %2714 = vmatpush3.bf16.msra.mxu0 %v3694_v59  ;;  %2974 = vmatpush3.bf16.msra.mxu1 %v3794_v21 }
  0xa8   : > { %2715 = vmatprep.subr.bf16.mxu0 %v3706_v61  ;;  %2975 = vmatprep.subr.bf16.mxu1 %v3805_v24 }
  0xa9   : > { %2977 = vmatprep.mubr.bf16.mxu1 %v3159_v7 }
  0xab   : > { %2716 = vmatpush3.bf16.msra.mxu0 %v3718_v63  ;;  %2976 = vmatpush3.bf16.msra.mxu1 %v3805_v24 }
  0xac   : > { %2753 = vmatprep.subr.bf16.mxu0 %v3532_v32  ;;  %2793 = vmatprep.subr.bf16.mxu1 %v3537_v33 }
  0xae   : > { %1315 = vmatmul.mubr.bf16.vlgmr.msra.gmra.mrb[24].mxu0 %v3156_v8  ;;  %2978 = vmatmul.mubr.bf16.vlgmr.msra.gmra.mrb[32].mxu1 %v3160_v10 }
  0xaf   : > { %2754 = vmatpush3.bf16.msra.mxu0 %v3543_v34  ;;  %2794 = vmatpush3.bf16.msra.mxu1 %v3549_v35 }
  0xb0   : > { %2755 = vmatprep.subr.bf16.mxu0 %v3555_v36  ;;  %2795 = vmatprep.subr.bf16.mxu1 %v3561_v37 }
  0xb1   : > { %1322 = vmatprep.mubr.bf16.mxu0 %v3161_v11  ;;  %2981 = vmatprep.mubr.bf16.mxu1 %v3167_v13 }
  0xb3   : > { %2756 = vmatpush3.bf16.msra.mxu0 %v3567_v38  ;;  %2796 = vmatpush3.bf16.msra.mxu1 %v3573_v39 }
  0xb4   : > { %2757 = vmatprep.subr.bf16.mxu0 %v3579_v40  ;;  %2797 = vmatprep.subr.bf16.mxu1 %v3585_v41 }
  0xb6   : > { %1323 = vmatmul.mubr.bf16.gmra.mrb[28].mxu0 %v3163_v15  ;;  %2982 = vmatmul.mubr.bf16.gmra.mrb[36].mxu1 %v3168_v16 }
  0xb7   : > { %2758 = vmatpush3.bf16.msra.mxu0 %v3591_v42  ;;  %2798 = vmatpush3.bf16.msra.mxu1 %v3597_v43 }
  0xb8   : > { %2759 = vmatprep.subr.bf16.mxu0 %v3603_v44  ;;  %2799 = vmatprep.subr.bf16.mxu1 %v3609_v45 }
  0xb9   : > { %1330 = vmatprep.mubr.bf16.mxu0 %v3164_v17  ;;  %1646 = vmatprep.mubr.bf16.mxu1 %v3177_v19 }
  0xbb   : > { %2760 = vmatpush3.bf16.msra.mxu0 %v3615_v46  ;;  %2800 = vmatpush3.bf16.msra.mxu1 %v3621_v47 }
  0xbc   : > { %2761 = vmatprep.subr.bf16.mxu0 %v3627_v48  ;;  %2801 = vmatprep.subr.bf16.mxu1 %v3633_v49 }
  0xbe   : > { %1331 = vmatmul.mubr.bf16.gmra.mrb[32].mxu0 %v3166_v20 }
  0xbf   : > { %2762 = vmatpush3.bf16.msra.mxu0 %v3639_v50  ;;  %2802 = vmatpush3.bf16.msra.mxu1 %v3645_v51 }
  0xc0   : > { %2763 = vmatprep.subr.bf16.mxu0 %v3651_v52  ;;  %2803 = vmatprep.subr.bf16.mxu1 %v3657_v53 }
  0xc1   : > { %1338 = vmatprep.mubr.bf16.mxu0 %v3169_v22 }
  0xc3   : > { %2764 = vmatpush3.bf16.msra.mxu0 %v3663_v54  ;;  %2804 = vmatpush3.bf16.msra.mxu1 %v3670_v55 }
  0xc4   : > { %2765 = vmatprep.subr.bf16.mxu0 %v3676_v56  ;;  %2805 = vmatprep.subr.bf16.mxu1 %v3682_v57 }
  0xc6   : > { %1339 = vmatmul.mubr.bf16.gmra.mrb[36].mxu0 %v3171_v23 }
  0xc7   : > { %2766 = vmatpush3.bf16.msra.mxu0 %v3688_v58  ;;  %2806 = vmatpush3.bf16.msra.mxu1 %v3694_v59 }
  0xc8   : > { %2767 = vmatprep.subr.bf16.mxu0 %v3700_v60  ;;  %2807 = vmatprep.subr.bf16.mxu1 %v3706_v61 }
  0xc9   : > { %1581 = vmatprep.mubr.bf16.mxu0 %v3174_v25 }
  0xcb   : > { %2768 = vmatpush3.bf16.msra.mxu0 %v3712_v62  ;;  %2808 = vmatpush3.bf16.msra.mxu1 %v3718_v63 }
  0xcc   : > { %2985 = vmatprep.subr.bf16.mxu0 %v3732_v4  ;;  %2845 = vmatprep.subr.bf16.mxu1 %v3532_v32  ;;  %v3184_v32 = vld [vmem:[%s3721_s6 + $0x194] ss:$20 sps:$4 sm:$0xff]  }
  0xce   : > { %1582 = vmatmul.mubr.bf16.vlgmr.msra.gmra.mrb[40].mxu0 %v3172_v26  ;;  %1647 = vmatmul.mubr.bf16.vlgmr.msra.gmra.mrb[40].mxu1 %v3175_v27 }
  0xcf   : > { %2986 = vmatpush3.bf16.msra.mxu0 %v3732_v4  ;;  %2846 = vmatpush3.bf16.msra.mxu1 %v3543_v34  ;;  %v3186_v34 = vld [vmem:[%s3721_s6 + $0x19c] ss:$20 sps:$4 sm:$0xff]  }
  0xd0   : > { %2987 = vmatprep.subr.bf16.mxu0 %v3737_v5  ;;  %1589 = vmatprep.mubr.bf16.mxu0 %v3178_v28 }
  0xd1   : > { %1654 = vmatprep.mubr.bf16.mxu1 %v3180_v29  ;;  %2847 = vmatprep.subr.bf16.mxu1 %v3555_v36  ;;  %v3188_v36 = vld [vmem:[%s3721_s6 + $0x190] ss:$20 sps:$4 sm:$0xff]  }
  0xd3   : > { %2988 = vmatpush3.bf16.msra.mxu0 %v3737_v5  ;;  %2848 = vmatpush3.bf16.msra.mxu1 %v3567_v38  ;;  %v3189_v38 = vld [vmem:[%s3721_s6 + $0x198] ss:$20 sps:$4 sm:$0xff]  }
  0xd4   : > { %2989 = vmatprep.subr.bf16.mxu0 %v3750_v9  ;;  %2849 = vmatprep.subr.bf16.mxu1 %v3579_v40  ;;  %v3190_v40 = vld [vmem:[%s3721_s6 + $0x1bc] ss:$20 sps:$4 sm:$0xff]  }
  0xd6   : > { %1590 = vmatmul.mubr.bf16.gmra.mrb[44].mxu0 %v3182_v30  ;;  %1655 = vmatmul.mubr.bf16.gmra.mrb[44].mxu1 %v3183_v31 }
  0xd7   : > { %2990 = vmatpush3.bf16.msra.mxu0 %v3750_v9  ;;  %2850 = vmatpush3.bf16.msra.mxu1 %v3591_v42  ;;  %v3192_v42 = vld [vmem:[%s3721_s6 + $0x1c4] ss:$20 sps:$4 sm:$0xff]  }
  0xd8   : > { %2991 = vmatprep.subr.bf16.mxu0 %v3761_v12  ;;  %1597 = vmatprep.mubr.bf16.mxu0 %v3184_v32 }
  0xd9   : > { %1662 = vmatprep.mubr.bf16.mxu1 %v3186_v34  ;;  %2851 = vmatprep.subr.bf16.mxu1 %v3603_v44  ;;  %v3194_v44 = vld [vmem:[%s3721_s6 + $0x1b8] ss:$20 sps:$4 sm:$0xff]  }
  0xdb   : > { %2992 = vmatpush3.bf16.msra.mxu0 %v3761_v12  ;;  %2852 = vmatpush3.bf16.msra.mxu1 %v3615_v46  ;;  %v3195_v46 = vld [vmem:[%s3721_s6 + $0x1c0] ss:$20 sps:$4 sm:$0xff]  }
  0xdc   : > { %2993 = vmatprep.subr.bf16.mxu0 %v3771_v14  ;;  %2853 = vmatprep.subr.bf16.mxu1 %v3627_v48  ;;  %v3196_v48 = vld [vmem:[%s3721_s6 + $0x150] ss:$20 sps:$4 sm:$0xff]  }
  0xde   : > { %1598 = vmatmul.mubr.bf16.gmra.mrb[48].mxu0 %v3188_v36  ;;  %1663 = vmatmul.mubr.bf16.gmra.mrb[48].mxu1 %v3189_v38 }
  0xdf   : > { %2994 = vmatpush3.bf16.msra.mxu0 %v3771_v14  ;;  %2854 = vmatpush3.bf16.msra.mxu1 %v3639_v50  ;;  %v3200_v50 = vld [vmem:[%s3721_s6 + $0x1e4] ss:$20 sps:$4 sm:$0xff]  }
  0xe0   : > { %2995 = vmatprep.subr.bf16.mxu0 %v3783_v18  ;;  %1605 = vmatprep.mubr.bf16.mxu0 %v3190_v40 }
  0xe1   : > { %1670 = vmatprep.mubr.bf16.mxu1 %v3192_v42  ;;  %2855 = vmatprep.subr.bf16.mxu1 %v3651_v52  ;;  %v3197_v52 = vld [vmem:[%s3721_s6 + $0x178] ss:$20 sps:$4 sm:$0xff]  }
  0xe3   : > { %2996 = vmatpush3.bf16.msra.mxu0 %v3783_v18  ;;  %2856 = vmatpush3.bf16.msra.mxu1 %v3663_v54  ;;  %v3198_v54 = vld [vmem:[%s3721_s6 + $0x1e0] ss:$20 sps:$4 sm:$0xff]  }
  0xe4   : > { %2997 = vmatprep.subr.bf16.mxu0 %v3794_v21  ;;  %2857 = vmatprep.subr.bf16.mxu1 %v3676_v56  ;;  %v3201_v56 = vld [vmem:[%s3721_s6 + $0x1a0] ss:$20 sps:$4 sm:$0xff]  }
  0xe6   : > { %1606 = vmatmul.mubr.bf16.gmra.mrb[52].mxu0 %v3194_v44  ;;  %1671 = vmatmul.mubr.bf16.gmra.mrb[52].mxu1 %v3195_v46 }
  0xe7   : > { %2998 = vmatpush3.bf16.msra.mxu0 %v3794_v21  ;;  %2858 = vmatpush3.bf16.msra.mxu1 %v3688_v58  ;;  %v3203_v58 = vld [vmem:[%s3721_s6 + $0x20c] ss:$20 sps:$4 sm:$0xff]  }
  0xe8   : > { %2999 = vmatprep.subr.bf16.mxu0 %v3805_v24  ;;  %3001 = vmatprep.mubr.bf16.mxu0 %v3196_v48 }
  0xe9   : > { %2859 = vmatprep.subr.bf16.mxu1 %v3700_v60  ;;  %1913 = vmatprep.mubr.bf16.mxu1 %v3200_v50  ;;  %v3202_v60 = vld [vmem:[%s3721_s6 + $0x1c8] ss:$20 sps:$4 sm:$0xff]  }
  0xeb   : > { %3000 = vmatpush3.bf16.msra.mxu0 %v3805_v24  ;;  %2860 = vmatpush3.bf16.msra.mxu1 %v3712_v62  ;;  %v3214_v62 = vld [vmem:[%s3721_s6 + $0x1ec] ss:$20 sps:$4 sm:$0xff]  }
  0xec   : > { %2885 = vmatprep.subr.bf16.mxu0 %v3537_v33  ;;  %3009 = vmatprep.subr.bf16.mxu1 %v3732_v4  ;;  %v3205_v33 = vld [vmem:[%s3721_s6 + $0x208] ss:$20 sps:$4 sm:$0xff]  }
  0xee   : > { %3002 = vmatmul.mubr.bf16.vlgmr.msra.gmra.mrb[56].mxu0 %v3197_v52  ;;  %1914 = vmatmul.mubr.bf16.vlgmr.msra.gmra.mrb[56].mxu1 %v3198_v54 }
  0xef   : > { %2886 = vmatpush3.bf16.msra.mxu0 %v3549_v35  ;;  %3010 = vmatpush3.bf16.msra.mxu1 %v3732_v4  ;;  %v3206_v35 = vld [vmem:[%s3721_s6 + $0x234] ss:$20 sps:$4 sm:$0xff]  }
  0xf0   : > { %2887 = vmatprep.subr.bf16.mxu0 %v3561_v37  ;;  %3005 = vmatprep.mubr.bf16.mxu0 %v3201_v56  ;;  %v3208_v37 = vld [vmem:[%s3721_s6 + $0x230] ss:$20 sps:$4 sm:$0xff]  }
  0xf1   : > { %3011 = vmatprep.subr.bf16.mxu1 %v3737_v5  ;;  %1921 = vmatprep.mubr.bf16.mxu1 %v3203_v58 }
  0xf3   : > { %2888 = vmatpush3.bf16.msra.mxu0 %v3573_v39  ;;  %3012 = vmatpush3.bf16.msra.mxu1 %v3737_v5  ;;  %v3209_v39 = vld [vmem:[%s3721_s6 + $0x25c] ss:$20 sps:$4 sm:$0xff]  }
  0xf4   : > { %2889 = vmatprep.subr.bf16.mxu0 %v3585_v41  ;;  %3013 = vmatprep.subr.bf16.mxu1 %v3750_v9  ;;  %v3211_v41 = vld [vmem:[%s3721_s6 + $0x258] ss:$20 sps:$4 sm:$0xff]  }
  0xf6   : > { %3006 = vmatmul.mubr.bf16.gmra.mrb[60].mxu0 %v3202_v60  ;;  %1922 = vmatmul.mubr.bf16.gmra.mrb[60].mxu1 %v3205_v33 }
  0xf7   : > { %2890 = vmatpush3.bf16.msra.mxu0 %v3597_v43  ;;  %3014 = vmatpush3.bf16.msra.mxu1 %v3750_v9  ;;  %v3215_v43 = vld [vmem:[%s3721_s6 + $0x1f0] ss:$20 sps:$4 sm:$0xff]  }
  0xf8   : > { %2891 = vmatprep.subr.bf16.mxu0 %v3609_v45  ;;  %3015 = vmatprep.subr.bf16.mxu1 %v3761_v12  ;;  %v3212_v45 = vld [vmem:[%s3721_s6 + $0x1e8] ss:$20 sps:$4 sm:$0xff]  }
  0xf9   : > { %1929 = vmatprep.mubr.bf16.mxu1 %v3206_v35  ;;  %1978 = vmatprep.mubr.bf16.mxu0 %v3214_v62 }
  0xfb   : > { %2892 = vmatpush3.bf16.msra.mxu0 %v3621_v47  ;;  %3016 = vmatpush3.bf16.msra.mxu1 %v3761_v12  ;;  %v3216_v47 = vld [vmem:[%s3721_s6 + $0x218] ss:$20 sps:$4 sm:$0xff]  }
  0xfc   : > { %2893 = vmatprep.subr.bf16.mxu0 %v3633_v49  ;;  %3017 = vmatprep.subr.bf16.mxu1 %v3771_v14  ;;  %v3217_v49 = vld [vmem:[%s3721_s6 + $0x214] ss:$20 sps:$4 sm:$0xff]  }
  0xfe   : > { %1930 = vmatmul.mubr.bf16.gmra.mrb[64].mxu1 %v3208_v37 }
  0xff   : > { %2894 = vmatpush3.bf16.msra.mxu0 %v3645_v51  ;;  %3018 = vmatpush3.bf16.msra.mxu1 %v3771_v14  ;;  %v3223_v51 = vld [vmem:[%s3721_s6 + $0x240] ss:$20 sps:$4 sm:$0xff]  }
 0x100   : > { %2895 = vmatprep.subr.bf16.mxu0 %v3657_v53  ;;  %3019 = vmatprep.subr.bf16.mxu1 %v3783_v18  ;;  %v3219_v53 = vld [vmem:[%s3721_s6 + $0x210] ss:$20 sps:$4 sm:$0xff]  }
 0x101   : > { %1937 = vmatprep.mubr.bf16.mxu1 %v3209_v39 }
 0x103   : > { %2896 = vmatpush3.bf16.msra.mxu0 %v3670_v55  ;;  %3020 = vmatpush3.bf16.msra.mxu1 %v3783_v18  ;;  %v3224_v55 = vld [vmem:[%s3721_s6 + $0x268] ss:$20 sps:$4 sm:$0xff]  }
 0x104   : > { %2897 = vmatprep.subr.bf16.mxu0 %v3682_v57  ;;  %3021 = vmatprep.subr.bf16.mxu1 %v3794_v21  ;;  %v3220_v57 = vld [vmem:[%s3721_s6 + $0x23c] ss:$20 sps:$4 sm:$0xff]  }
 0x106   : > { %1938 = vmatmul.mubr.bf16.gmra.mrb[68].mxu1 %v3211_v41 }
 0x107   : > { %2898 = vmatpush3.bf16.msra.mxu0 %v3694_v59  ;;  %3022 = vmatpush3.bf16.msra.mxu1 %v3794_v21  ;;  %v3222_v59 = vld [vmem:[%s3721_s6 + $0x238] ss:$20 sps:$4 sm:$0xff]  }
 0x108   : > { %2899 = vmatprep.subr.bf16.mxu0 %v3706_v61  ;;  %3023 = vmatprep.subr.bf16.mxu1 %v3805_v24  ;;  %v3225_v61 = vld [vmem:[%s3721_s6 + $0x264] ss:$20 sps:$4 sm:$0xff]  }
 0x109   : > { %3025 = vmatprep.mubr.bf16.mxu1 %v3215_v43 }
 0x10b   : > { %2900 = vmatpush3.bf16.msra.mxu0 %v3718_v63  ;;  %3024 = vmatpush3.bf16.msra.mxu1 %v3805_v24  ;;  %v3227_v63 = vld [vmem:[%s3721_s6 + $0x260] ss:$20 sps:$4 sm:$0xff]  }
 0x10e   : > { %1979 = vmatmul.mubr.bf16.vlgmr.msra.gmra.mrb[64].mxu0 %v3212_v45  ;;  %3026 = vmatmul.mubr.bf16.vlgmr.msra.gmra.mrb[72].mxu1 %v3216_v47 }
 0x10f   : > { %1986 = vmatprep.mubr.bf16.mxu0 %v3217_v49  ;;  %3029 = vmatprep.mubr.bf16.mxu1 %v3223_v51 }
 0x116   : > { %1987 = vmatmul.mubr.bf16.gmra.mrb[68].mxu0 %v3219_v53  ;;  %3030 = vmatmul.mubr.bf16.gmra.mrb[76].mxu1 %v3224_v55 }
 0x117   : > { %1994 = vmatprep.mubr.bf16.mxu0 %v3220_v57 }
 0x11e   : > { %1995 = vmatmul.mubr.bf16.gmra.mrb[72].mxu0 %v3222_v59 }
 0x11f   : > { %2002 = vmatprep.mubr.bf16.mxu0 %v3225_v61 }
 0x126   : > { %2003 = vmatmul.mubr.bf16.gmra.mrb[76].mxu0 %v3227_v63 }
 0x140   : > { %v2585_v4 = vpop.f32.mrb[0].mxu0 }
 0x141   : > { %v2625_v5 = vpop.f32.mrb[0].mxu1  ;;  %v2586_v9 = vpop.f32.mrb[1].mxu0 }
 0x142   : > { %v2587_v12 = vadd.f32 %v2586_v9, %v2585_v4  ;;  %v2626_v14 = vpop.f32.mrb[1].mxu1  ;;  %v2588_v18 = vpop.f32.mrb[2].mxu0 }
 0x143   : > { %v2627_v21 = vadd.f32 %v2626_v14, %v2625_v5  ;;  %v2628_v24 = vpop.f32.mrb[2].mxu1  ;;  %v2589_v0 = vpop.f32.mrb[3].mxu0 }
 0x144   : > { %v2590_v1 = vadd.f32 %v2589_v0, %v2588_v18  ;;  %v2629_v2 = vpop.f32.mrb[3].mxu1 }
 0x145   : > { %v2630_v3 = vadd.f32 %v2629_v2, %v2628_v24  ;;  %v993_v6 = vadd.f32 %v2627_v21, %v2587_v12 }
 0x147   : > { %v996_v7 = vadd.f32 %v2630_v3, %v2590_v1 }
 0x148   : > { %v2591_v8 = vpop.f32.mrb[4].mxu0 }
 0x149   : > { %v2631_v10 = vpop.f32.mrb[4].mxu1  ;;  %v2592_v11 = vpop.f32.mrb[5].mxu0 }
 0x14a   : > { %v2593_v13 = vadd.f32 %v2592_v11, %v2591_v8  ;;  %v2632_v15 = vpop.f32.mrb[5].mxu1  ;;  %v2594_v16 = vpop.f32.mrb[6].mxu0 }
 0x14b   : > { %v2633_v17 = vadd.f32 %v2632_v15, %v2631_v10  ;;  %v2634_v19 = vpop.f32.mrb[6].mxu1  ;;  %v2595_v20 = vpop.f32.mrb[7].mxu0 }
 0x14c   : > { %v2596_v22 = vadd.f32 %v2595_v20, %v2594_v16  ;;  %v2635_v23 = vpop.f32.mrb[7].mxu1 }
 0x14d   : > { %v2636_v25 = vadd.f32 %v2635_v23, %v2634_v19  ;;  %v1001_v26 = vadd.f32 %v2633_v17, %v2593_v13 }
 0x14f   : > { %v1004_v27 = vadd.f32 %v2636_v25, %v2596_v22 }
 0x150   : > { %v2597_v28 = vpop.f32.mrb[8].mxu0 }
 0x151   : > { %v2637_v29 = vpop.f32.mrb[8].mxu1  ;;  %v2598_v30 = vpop.f32.mrb[9].mxu0 }
 0x152   : > { %v2599_v31 = vadd.f32 %v2598_v30, %v2597_v28  ;;  %v2638_v32 = vpop.f32.mrb[9].mxu1  ;;  %v2600_v34 = vpop.f32.mrb[10].mxu0 }
 0x153   : > { %v2639_v36 = vadd.f32 %v2638_v32, %v2637_v29  ;;  %v2640_v38 = vpop.f32.mrb[10].mxu1  ;;  %v2601_v40 = vpop.f32.mrb[11].mxu0 }
 0x154   : > { %v2602_v42 = vadd.f32 %v2601_v40, %v2600_v34  ;;  %v2641_v44 = vpop.f32.mrb[11].mxu1 }
 0x155   : > { %v2642_v46 = vadd.f32 %v2641_v44, %v2640_v38  ;;  %v1009_v48 = vadd.f32 %v2639_v36, %v2599_v31 }
 0x157   : > { %v1012_v50 = vadd.f32 %v2642_v46, %v2602_v42 }
 0x158   : > { %v2603_v52 = vpop.f32.mrb[12].mxu0 }
 0x159   : > { %v2643_v54 = vpop.f32.mrb[12].mxu1  ;;  %v2604_v56 = vpop.f32.mrb[13].mxu0 }
 0x15a   : > { %v2605_v58 = vadd.f32 %v2604_v56, %v2603_v52  ;;  %v2644_v60 = vpop.f32.mrb[13].mxu1  ;;  %v2606_v33 = vpop.f32.mrb[14].mxu0 }
 0x15b   : > { %v2645_v35 = vadd.f32 %v2644_v60, %v2643_v54  ;;  %v2646_v62 = vpop.f32.mrb[14].mxu1  ;;  %v2607_v37 = vpop.f32.mrb[15].mxu0 }
 0x15c   : > { %v2608_v39 = vadd.f32 %v2607_v37, %v2606_v33  ;;  %v2647_v41 = vpop.f32.mrb[15].mxu1 }
 0x15d   : > { %v2648_v43 = vadd.f32 %v2647_v41, %v2646_v62  ;;  %v1017_v45 = vadd.f32 %v2645_v35, %v2605_v58 }
 0x15f   : > { %v1020_v47 = vadd.f32 %v2648_v43, %v2608_v39 }
 0x161   : > { %v2955_v49 = vpop.f32.mrb[16].mxu0  ;;  %v2677_v51 = vpop.f32.mrb[16].mxu1 }
 0x162   : > { %v4004_v53 = vadd.f32 %v2955_v49, %v1001_v26  ;;  %v1057_v55 = vpop.f32.mrb[17].mxu0  ;;  %v2678_v57 = vpop.f32.mrb[17].mxu1 }
 0x163   : > { %v4006_v59 = vadd.f32 %v1057_v55, %v993_v6  ;;  %v2956_v61 = vpop.f32.mrb[18].mxu0  ;;  %v2679_v63 = vadd.f32 %v2678_v57, %v2677_v51  ;;  %v2680_v4 = vpop.f32.mrb[18].mxu1 }
 0x164   : > { %v4008_v5 = vadd.f32 %v2956_v61, %v1004_v27  ;;  %v1060_v9 = vpop.f32.mrb[19].mxu0  ;;  %v2681_v12 = vpop.f32.mrb[19].mxu1 }
 0x165   : > { %v4010_v14 = vadd.f32 %v1060_v9, %v996_v7  ;;  %v2682_v18 = vadd.f32 %v2681_v12, %v2680_v4 }
 0x169   : > { %v2959_v21 = vpop.f32.mrb[20].mxu0  ;;  %v2683_v24 = vpop.f32.mrb[20].mxu1 }
 0x16a   : > { %v4012_v0 = vadd.f32 %v2959_v21, %v1017_v45  ;;  %v1073_v1 = vpop.f32.mrb[21].mxu0  ;;  %v2684_v2 = vpop.f32.mrb[21].mxu1 }
 0x16b   : > { %v4014_v3 = vadd.f32 %v1073_v1, %v1009_v48  ;;  %v2960_v6 = vpop.f32.mrb[22].mxu0  ;;  %v2685_v8 = vadd.f32 %v2684_v2, %v2683_v24  ;;  %v2686_v10 = vpop.f32.mrb[22].mxu1 }
 0x16c   : > { %v4016_v11 = vadd.f32 %v2960_v6, %v1020_v47  ;;  %v1076_v13 = vpop.f32.mrb[23].mxu0  ;;  %v2687_v15 = vpop.f32.mrb[23].mxu1 }
 0x16d   : > { %v4018_v16 = vadd.f32 %v1076_v13, %v1012_v50  ;;  %v2688_v7 = vadd.f32 %v2687_v15, %v2686_v10 }
 0x171   : > { %v2689_v17 = vpop.f32.mrb[24].mxu1 }
 0x172   : > { %v2690_v19 = vpop.f32.mrb[25].mxu1 }
 0x173   : > { %v2691_v20 = vadd.f32 %v2690_v19, %v2689_v17  ;;  %v2692_v22 = vpop.f32.mrb[26].mxu1 }
 0x174   : > { %v2693_v23 = vpop.f32.mrb[27].mxu1 }
 0x175   : > { %v2694_v25 = vadd.f32 %v2693_v23, %v2692_v22 }
 0x179   : > { %v2695_v26 = vpop.f32.mrb[28].mxu1 }
 0x17a   : > { %v2696_v27 = vpop.f32.mrb[29].mxu1 }
 0x17b   : > { %v2697_v28 = vadd.f32 %v2696_v27, %v2695_v26  ;;  %v2698_v29 = vpop.f32.mrb[30].mxu1 }
 0x17c   : > { %v2699_v30 = vpop.f32.mrb[31].mxu1 }
 0x17d   : > { %v2700_v31 = vadd.f32 %v2699_v30, %v2698_v29 }
 0x181   : > { %v2717_v32 = vpop.f32.mrb[24].mxu0  ;;  %v2979_v34 = vpop.f32.mrb[32].mxu1 }
 0x182   : > { %v2718_v36 = vpop.f32.mrb[25].mxu0  ;;  %v1381_v38 = vpop.f32.mrb[33].mxu1 }
 0x183   : > { %v2719_v40 = vadd.f32 %v2718_v36, %v2717_v32  ;;  %v2720_v42 = vpop.f32.mrb[26].mxu0  ;;  %v2980_v44 = vpop.f32.mrb[34].mxu1 }
 0x184   : > { %v2721_v46 = vpop.f32.mrb[27].mxu0  ;;  %v1384_v48 = vpop.f32.mrb[35].mxu1 }
 0x185   : > { %v2722_v50 = vadd.f32 %v2721_v46, %v2720_v42  ;;  %v1317_v52 = vadd.f32 %v2719_v40, %v2679_v63 }
 0x187   : > { %v4020_v54 = vadd.f32 %v1381_v38, %v1317_v52  ;;  %v1320_v56 = vadd.f32 %v2722_v50, %v2682_v18 }
 0x189   : > { %v1412_v58 = vmax.f32 %v4006_v59, %v4020_v54  ;;  %v4024_v60 = vadd.f32 %v1384_v48, %v1320_v56  ;;  %v2723_v33 = vpop.f32.mrb[28].mxu0  ;;  %v2983_v35 = vpop.f32.mrb[36].mxu1 }
 0x18a   : > { %v2724_v62 = vpop.f32.mrb[29].mxu0  ;;  %v1397_v37 = vpop.f32.mrb[37].mxu1 }
 0x18b   : > { %v1413_v39 = vmax.f32 %v4010_v14, %v4024_v60  ;;  %v2725_v41 = vadd.f32 %v2724_v62, %v2723_v33  ;;  %v2726_v43 = vpop.f32.mrb[30].mxu0  ;;  %v2984_v45 = vpop.f32.mrb[38].mxu1 }
 0x18c   : > { %v2727_v47 = vpop.f32.mrb[31].mxu0  ;;  %v1400_v49 = vpop.f32.mrb[39].mxu1 }
 0x18d   : > { %v1325_v51 = vadd.f32 %v2725_v41, %v2685_v8  ;;  %v2728_v55 = vadd.f32 %v2727_v47, %v2726_v43 }
 0x18f   : > { %v4028_v57 = vadd.f32 %v2979_v34, %v1325_v51  ;;  %v1328_v61 = vadd.f32 %v2728_v55, %v2688_v7 }
 0x191   : > { %v4030_v63 = vadd.f32 %v2980_v44, %v1328_v61  ;;  %v2729_v4 = vpop.f32.mrb[32].mxu0  ;;  %v1414_v9 = vmax.f32 %v4004_v53, %v4028_v57 }
 0x192   : > { %v2730_v12 = vpop.f32.mrb[33].mxu0 }
 0x193   : > { %v2731_v18 = vadd.f32 %v2730_v12, %v2729_v4  ;;  %v2732_v21 = vpop.f32.mrb[34].mxu0  ;;  %v1415_v24 = vmax.f32 %v4008_v5, %v4030_v63 }
 0x194   : > { %v2733_v1 = vpop.f32.mrb[35].mxu0 }
 0x195   : > { %v2734_v2 = vadd.f32 %v2733_v1, %v2732_v21  ;;  %v1333_v6 = vadd.f32 %v2731_v18, %v2691_v20 }
 0x197   : > { %v4036_v8 = vadd.f32 %v1397_v37, %v1333_v6  ;;  %v1336_v10 = vadd.f32 %v2734_v2, %v2694_v25 }
 0x199   : > { %v1416_v13 = vmax.f32 %v4014_v3, %v4036_v8  ;;  %v4040_v15 = vadd.f32 %v1400_v49, %v1336_v10  ;;  %v2735_v7 = vpop.f32.mrb[36].mxu0 }
 0x19a   : > { %v2736_v17 = vpop.f32.mrb[37].mxu0 }
 0x19b   : > { %v1417_v19 = vmax.f32 %v4018_v16, %v4040_v15  ;;  %v2737_v22 = vadd.f32 %v2736_v17, %v2735_v7  ;;  %v2738_v23 = vpop.f32.mrb[38].mxu0 }
 0x19c   : > { %v2739_v26 = vpop.f32.mrb[39].mxu0 }
 0x19d   : > { %v1341_v27 = vadd.f32 %v2737_v22, %v2697_v28  ;;  %v2740_v29 = vadd.f32 %v2739_v26, %v2738_v23 }
 0x19f   : > { %v4044_v30 = vadd.f32 %v2983_v35, %v1341_v27  ;;  %v1344_v20 = vadd.f32 %v2740_v29, %v2700_v31 }
 0x1a1   : > { %v4046_v32 = vadd.f32 %v2984_v45, %v1344_v20  ;;  %v2769_v25 = vpop.f32.mrb[40].mxu0  ;;  %v2809_v34 = vpop.f32.mrb[40].mxu1  ;;  %v1418_v36 = vmax.f32 %v4012_v0, %v4044_v30 }
 0x1a2   : > { %v2770_v38 = vpop.f32.mrb[41].mxu0  ;;  %v2810_v40 = vpop.f32.mrb[41].mxu1 }
 0x1a3   : > { %v2771_v42 = vadd.f32 %v2770_v38, %v2769_v25  ;;  %v2811_v44 = vadd.f32 %v2810_v40, %v2809_v34  ;;  %v2772_v46 = vpop.f32.mrb[42].mxu0  ;;  %v2812_v48 = vpop.f32.mrb[42].mxu1  ;;  %v1419_v28 = vmax.f32 %v4016_v11, %v4046_v32 }
 0x1a4   : > { %v2773_v50 = vpop.f32.mrb[43].mxu0  ;;  %v2813_v52 = vpop.f32.mrb[43].mxu1 }
 0x1a5   : > { %v2774_v56 = vadd.f32 %v2773_v50, %v2772_v46  ;;  %v2814_v31 = vadd.f32 %v2813_v52, %v2812_v48  ;;  %v1649_v33 = vadd.f32 %v2811_v44, %v2771_v42 }
 0x1a7   : > { %v1652_v35 = vadd.f32 %v2814_v31, %v2774_v56 }
 0x1a9   : > { %v2775_v62 = vpop.f32.mrb[44].mxu0  ;;  %v2815_v37 = vpop.f32.mrb[44].mxu1 }
 0x1aa   : > { %v2776_v41 = vpop.f32.mrb[45].mxu0  ;;  %v2816_v43 = vpop.f32.mrb[45].mxu1 }
 0x1ab   : > { %v2777_v45 = vadd.f32 %v2776_v41, %v2775_v62  ;;  %v2817_v47 = vadd.f32 %v2816_v43, %v2815_v37  ;;  %v2778_v49 = vpop.f32.mrb[46].mxu0  ;;  %v2818_v51 = vpop.f32.mrb[46].mxu1 }
 0x1ac   : > { %v2779_v55 = vpop.f32.mrb[47].mxu0  ;;  %v2819_v61 = vpop.f32.mrb[47].mxu1 }
 0x1ad   : > { %v2780_v4 = vadd.f32 %v2779_v55, %v2778_v49  ;;  %v2820_v12 = vadd.f32 %v2819_v61, %v2818_v51  ;;  %v1657_v18 = vadd.f32 %v2817_v47, %v2777_v45 }
 0x1af   : > { %v1660_v21 = vadd.f32 %v2820_v12, %v2780_v4 }
 0x1b1   : > { %v2781_v1 = vpop.f32.mrb[48].mxu0  ;;  %v2821_v2 = vpop.f32.mrb[48].mxu1 }
 0x1b2   : > { %v2782_v6 = vpop.f32.mrb[49].mxu0  ;;  %v2822_v10 = vpop.f32.mrb[49].mxu1 }
 0x1b3   : > { %v2783_v7 = vadd.f32 %v2782_v6, %v2781_v1  ;;  %v2823_v17 = vadd.f32 %v2822_v10, %v2821_v2  ;;  %v2784_v22 = vpop.f32.mrb[50].mxu0  ;;  %v2824_v23 = vpop.f32.mrb[50].mxu1 }
 0x1b4   : > { %v2785_v26 = vpop.f32.mrb[51].mxu0  ;;  %v2825_v27 = vpop.f32.mrb[51].mxu1 }
 0x1b5   : > { %v2786_v29 = vadd.f32 %v2785_v26, %v2784_v22  ;;  %v2826_v20 = vadd.f32 %v2825_v27, %v2824_v23  ;;  %v1665_v25 = vadd.f32 %v2823_v17, %v2783_v7 }
 0x1b7   : > { %v1668_v34 = vadd.f32 %v2826_v20, %v2786_v29 }
 0x1b9   : > { %v2787_v38 = vpop.f32.mrb[52].mxu0  ;;  %v2827_v40 = vpop.f32.mrb[52].mxu1 }
 0x1ba   : > { %v2788_v42 = vpop.f32.mrb[53].mxu0  ;;  %v2828_v44 = vpop.f32.mrb[53].mxu1 }
 0x1bb   : > { %v2789_v46 = vadd.f32 %v2788_v42, %v2787_v38  ;;  %v2829_v48 = vadd.f32 %v2828_v44, %v2827_v40  ;;  %v2790_v50 = vpop.f32.mrb[54].mxu0  ;;  %v2830_v52 = vpop.f32.mrb[54].mxu1 }
 0x1bc   : > { %v2791_v56 = vpop.f32.mrb[55].mxu0  ;;  %v2831_v31 = vpop.f32.mrb[55].mxu1 }
 0x1bd   : > { %v2792_v62 = vadd.f32 %v2791_v56, %v2790_v50  ;;  %v2832_v37 = vadd.f32 %v2831_v31, %v2830_v52  ;;  %v1673_v41 = vadd.f32 %v2829_v48, %v2789_v46 }
 0x1bf   : > { %v1676_v43 = vadd.f32 %v2832_v37, %v2792_v62  ;;  %v4100_v37 = vld [vmem:[%s4146_s2] ss:$0 sm:$0xff] }
 0x1c1   : > { %v3003_v45 = vpop.f32.mrb[56].mxu0  ;;  %v2861_v47 = vpop.f32.mrb[56].mxu1 }
 0x1c2   : > { %v1722_v49 = vadd.f32 %v3003_v45, %v1657_v18  ;;  %v1713_v51 = vpop.f32.mrb[57].mxu0  ;;  %v2862_v55 = vpop.f32.mrb[57].mxu1 }
 0x1c3   : > { %v1714_v61 = vadd.f32 %v1713_v51, %v1649_v33  ;;  %v3004_v4 = vpop.f32.mrb[58].mxu0  ;;  %v2863_v12 = vadd.f32 %v2862_v55, %v2861_v47  ;;  %v2864_v1 = vpop.f32.mrb[58].mxu1 }
 0x1c4   : > { %v4055_v2 = vmax.f32 %v1414_v9, %v1722_v49  ;;  %v1725_v6 = vadd.f32 %v3004_v4, %v1660_v21  ;;  %v1716_v10 = vpop.f32.mrb[59].mxu0  ;;  %v2865_v7 = vpop.f32.mrb[59].mxu1 }
 0x1c5   : > { %v1744_v17 = vmax.f32 %v1412_v58, %v1714_v61  ;;  %v1717_v22 = vadd.f32 %v1716_v10, %v1652_v35  ;;  %v2866_v18 = vadd.f32 %v2865_v7, %v2864_v1 }
 0x1c6   : > { %v4063_v33 = vmax.f32 %v1415_v24, %v1725_v6 }
 0x1c7   : > { %v4068_v53 = vmax.f32 %v1413_v39, %v1717_v22 }
 0x1c9   : > { %v3007_v57 = vpop.f32.mrb[60].mxu0  ;;  %v2867_v9 = vpop.f32.mrb[60].mxu1 }
 0x1ca   : > { %v1738_v21 = vadd.f32 %v3007_v57, %v1673_v41  ;;  %v1729_v23 = vpop.f32.mrb[61].mxu0  ;;  %v2868_v26 = vpop.f32.mrb[61].mxu1 }
 0x1cb   : > { %v1730_v27 = vadd.f32 %v1729_v23, %v1665_v25  ;;  %v3008_v59 = vpop.f32.mrb[62].mxu0  ;;  %v2869_v54 = vadd.f32 %v2868_v26, %v2867_v9  ;;  %v2870_v58 = vpop.f32.mrb[62].mxu1 }
 0x1cc   : > { %v4073_v5 = vmax.f32 %v1418_v36, %v1738_v21  ;;  %v1741_v63 = vadd.f32 %v3008_v59, %v1676_v43  ;;  %v1732_v24 = vpop.f32.mrb[63].mxu0  ;;  %v2871_v35 = vpop.f32.mrb[63].mxu1 }
 0x1cd   : > { %v4078_v14 = vmax.f32 %v1416_v13, %v1730_v27  ;;  %v1733_v60 = vadd.f32 %v1732_v24, %v1668_v34  ;;  %v2872_v39 = vadd.f32 %v2871_v35, %v2870_v58 }
 0x1ce   : > { %v4083_v29 = vmax.f32 %v1419_v28, %v1741_v63 }
 0x1cf   : > { %v4088_v0 = vmax.f32 %v1417_v19, %v1733_v60 }
 0x1d1   : > { %v2873_v30 = vpop.f32.mrb[64].mxu1 }
 0x1d2   : > { %v2874_v36 = vpop.f32.mrb[65].mxu1 }
 0x1d3   : > { %v2875_v20 = vadd.f32 %v2874_v36, %v2873_v30  ;;  %v2876_v25 = vpop.f32.mrb[66].mxu1 }
 0x1d4   : > { %v2877_v3 = vpop.f32.mrb[67].mxu1 }
 0x1d5   : > { %v4090_v8 = vadd.f32 %v2877_v3, %v2876_v25 }
 0x1d9   : > { %v2879_v13 = vpop.f32.mrb[68].mxu1 }
 0x1da   : > { %v2880_v34 = vpop.f32.mrb[69].mxu1 }
 0x1db   : > { %v4092_v38 = vadd.f32 %v2880_v34, %v2879_v13  ;;  %v2882_v11 = vpop.f32.mrb[70].mxu1 }
 0x1dc   : > { %v2883_v32 = vpop.f32.mrb[71].mxu1 }
 0x1dd   : > { %v4094_v28 = vadd.f32 %v2883_v32, %v2882_v11 }
 0x1e1   : > { %v2901_v40 = vpop.f32.mrb[64].mxu0  ;;  %v3027_v16 = vpop.f32.mrb[72].mxu1 }
 0x1e2   : > { %v2902_v15 = vpop.f32.mrb[65].mxu0  ;;  %v2045_v19 = vpop.f32.mrb[73].mxu1 }
 0x1e3   : > { %v2903_v42 = vadd.f32 %v2902_v15, %v2901_v40  ;;  %v2904_v44 = vpop.f32.mrb[66].mxu0  ;;  %v3028_v46 = vpop.f32.mrb[74].mxu1 }
 0x1e4   : > { %v2905_v48 = vpop.f32.mrb[67].mxu0  ;;  %v2048_v50 = vpop.f32.mrb[75].mxu1 }
 0x1e5   : > { %v2906_v52 = vadd.f32 %v2905_v48, %v2904_v44  ;;  %v1981_v56 = vadd.f32 %v2903_v42, %v2863_v12 }
 0x1e7   : > { %v2046_v31 = vadd.f32 %v2045_v19, %v1981_v56  ;;  %v1984_v62 = vadd.f32 %v2906_v52, %v2866_v18 }
 0x1e9   : > { %v2076_v41 = vmax.f32 %v1744_v17, %v2046_v31  ;;  %v2049_v43 = vadd.f32 %v2048_v50, %v1984_v62  ;;  %v2907_v45 = vpop.f32.mrb[68].mxu0  ;;  %v3031_v47 = vpop.f32.mrb[76].mxu1 }
 0x1ea   : > { %v2908_v49 = vpop.f32.mrb[69].mxu0  ;;  %v2061_v51 = vpop.f32.mrb[77].mxu1 }
 0x1eb   : > { %v2091_v55 = vadd.f32 %v4100_v37, %v2076_v41  ;;  %v2077_v61 = vmax.f32 %v4068_v53, %v2049_v43  ;;  %v2909_v4 = vadd.f32 %v2908_v49, %v2907_v45  ;;  %v2910_v12 = vpop.f32.mrb[70].mxu0  ;;  %v3032_v1 = vpop.f32.mrb[78].mxu1 }
 0x1ec   : > { %v2911_v6 = vpop.f32.mrb[71].mxu0  ;;  %v2064_v10 = vpop.f32.mrb[79].mxu1 }
 0x1ed   : > { %v2092_v7 = vadd.f32 %v4100_v37, %v2077_v61  ;;  %v1989_v22 = vadd.f32 %v2909_v4, %v2869_v54  ;;  %v2912_v17 = vadd.f32 %v2911_v6, %v2910_v12  ;;  %v2099_v18 = vmax.f32 %v2091_v55, 0.0 }
 0x1ef   : > { %v2100_v57 = vmax.f32 %v2092_v7, 0.0  ;;  %v2054_v9 = vadd.f32 %v3027_v16, %v1989_v22  ;;  %v1992_v21 = vadd.f32 %v2912_v17, %v2872_v39 }
 0x1f1   : > { %v2549_v53 = vpack.c.bf16 %v2100_v57, %v2099_v18  ;;  %v2078_v23 = vmax.f32 %v4055_v2, %v2054_v9  ;;  %v2057_v26 = vadd.f32 %v3028_v46, %v1992_v21  ;;  %v2913_v27 = vpop.f32.mrb[72].mxu0 }
 0x1f2   : > { %v2914_v59 = vpop.f32.mrb[73].mxu0 }
 0x1f3   : > { %2550 = vst [vmem:[%s4108_s7] sm:$0xff] %v2549_v53   ;;  %v2093_v54 = vadd.f32 %v4100_v37, %v2078_v23  ;;  %v2079_v58 = vmax.f32 %v4063_v33, %v2057_v26  ;;  %v2915_v63 = vadd.f32 %v2914_v59, %v2913_v27  ;;  %v2916_v24 = vpop.f32.mrb[74].mxu0 }
 0x1f4   : > { %v2917_v35 = vpop.f32.mrb[75].mxu0 }
 0x1f5   : > { %v2094_v60 = vadd.f32 %v4100_v37, %v2079_v58  ;;  %v2918_v39 = vadd.f32 %v2917_v35, %v2916_v24  ;;  %v1997_v30 = vadd.f32 %v2915_v63, %v2875_v20  ;;  %v2101_v36 = vmax.f32 %v2093_v54, 0.0 }
 0x1f7   : > { %v2102_v25 = vmax.f32 %v2094_v60, 0.0  ;;  %v2062_v3 = vadd.f32 %v2061_v51, %v1997_v30  ;;  %v2000_v2 = vadd.f32 %v2918_v39, %v4090_v8 }
 0x1f9   : > { %v2554_v13 = vpack.c.bf16 %v2102_v25, %v2101_v36  ;;  %v2080_v34 = vmax.f32 %v4078_v14, %v2062_v3  ;;  %v2065_v11 = vadd.f32 %v2064_v10, %v2000_v2  ;;  %v2919_v32 = vpop.f32.mrb[76].mxu0 }
 0x1fa   : > { %v2920_v40 = vpop.f32.mrb[77].mxu0 }
 0x1fb   : > { %2566 = vst [vmem:[%s4108_s7 + $0x8] sm:$0xff] %v2554_v13   ;;  %v2095_v33 = vadd.f32 %v4100_v37, %v2080_v34  ;;  %v2081_v16 = vmax.f32 %v4088_v0, %v2065_v11  ;;  %v2921_v15 = vadd.f32 %v2920_v40, %v2919_v32  ;;  %v2922_v19 = vpop.f32.mrb[78].mxu0 }
 0x1fc   : > { %v2923_v20 = vpop.f32.mrb[79].mxu0 }
 0x1fd   : > { %v2096_v42 = vadd.f32 %v4100_v37, %v2081_v16  ;;  %v2005_v44 = vadd.f32 %v2921_v15, %v4092_v38  ;;  %v2924_v8 = vadd.f32 %v2923_v20, %v2922_v19  ;;  %v2103_v46 = vmax.f32 %v2095_v33, 0.0 }
 0x1ff   : > { %v2104_v14 = vmax.f32 %v2096_v42, 0.0  ;;  %v2070_v48 = vadd.f32 %v3031_v47, %v2005_v44  ;;  %v2008_v50 = vadd.f32 %v2924_v8, %v4094_v28 }
 0x201   : > { %v2559_v52 = vpack.c.bf16 %v2104_v14, %v2103_v46  ;;  %v2082_v56 = vmax.f32 %v4073_v5, %v2070_v48  ;;  %v2073_v31 = vadd.f32 %v3032_v1, %v2008_v50 }
 0x203   : > { %2567 = vst [vmem:[%s4108_s7 + $0x10] sm:$0xff] %v2559_v52   ;;  %v2097_v0 = vadd.f32 %v4100_v37, %v2082_v56  ;;  %v2083_v62 = vmax.f32 %v4083_v29, %v2073_v31 }
 0x205   : > { %v2098_v41 = vadd.f32 %v4100_v37, %v2083_v62  ;;  %v2105_v43 = vmax.f32 %v2097_v0, 0.0 }
 0x207   : > { %v2106_v38 = vmax.f32 %v2098_v41, 0.0 }
 0x209   : > { %v2564_v45 = vpack.c.bf16 %v2106_v38, %v2105_v43 }
 0x20b   : > { %2568 = vst [vmem:[%s4108_s7 + $0x18] sm:$0xff] %v2564_v45  }
 0x20c PF: > { %s13_s16 = sadd.s32 1, %s3266_s16   ;;  %s4148_s12 = smov %s3254_s13 }
 0x20d   : > { %p10_p10 = scmp.ge.s32.totalorder %s13_s16, 4   ;;  %s4149_s13 = smov %s3323_s20 }
 0x20e   : > { %s4150_s14 = smov %s3262_s15  ;;  %s4151_s15 = smov %s4153_s17 }
 0x20f   :  { %12 = sbr.rel (!%p10_p10) target bundleno = 3 (0x3), region = 108 }

// kernel: cnn_forward.7
= control target key start
LH: loop header
LB: loop body
LE: loop exit
PB: predicated region body
PF: predicated region fallthrough
CT: control target
= control target key end

     0   :  { %s3187_s12 = smov 0   ;;  %s3189_s13 = smov 0   ;;  %s4599_s0 = inlined_call_operand.vmem [shape: bf16[4,32,1152], index: 0, kind: input, shape index: {}]   ;;  %s4600_s1 = inlined_call_operand.vmem [shape: bf16[1152,256], index: 1, kind: input, shape index: {}]   ;;  %s4601_s2 = inlined_call_operand.vmem [shape: f32[1,256], index: 2, kind: input, shape index: {}]   ;;  %s4602_s3 = inlined_call_operand.vmem [shape: bf16[32,256], index: 3, kind: output, shape index: {}]  }
   0x1   :  { %s3191_s14 = smov 0   ;;  %s3193_s15 = smov 0  }
   0x2   :  { %s3195_s16 = smov 0  }
   0x3 LB: > { %s25_s17 = sadd.s32 1, %s3160_s15  ;;  %p39_p1 = scmp.ne.s32.totalorder %s3152_s13, %s3148_s12  ;;  %s3164_s16 = sphi %s3195_s16, %s13_s16   ;;  %s3160_s15 = sphi %s3193_s15, %s4805_s15   ;;  %s3156_s14 = sphi %s3191_s14, %s4804_s14   ;;  %s3152_s13 = sphi %s3189_s13, %s4803_s13   ;;  %s3148_s12 = sphi %s3187_s12, %s4802_s12  }
   0x4   : > { %p27_p0 = scmp.ge.s32.totalorder %s25_s17, 2  ;;  %p40_p2 = scmp.eq.s32.totalorder %s3164_s16, 0 }
   0x5   : > { %s32_s19 = sadd.s32 1, %s3152_s13  ;;  %p2471_p5 = scmp.ge.s32.totalorder %s3164_s16, 2 }
   0x6   : > { %s4807_s17 = smov (%p27_p0, %s25_s17), 0  ;;  %p41_p3 = por %p40_p2, %p39_p1 }
   0x7   : > { %s29_s18 = ssub.s32 %s3160_s15, %s4807_s17  ;;  %162 = sbr.rel (%p2471_p5) target bundleno = 40 (0x28), region = 24 }
   0x8   : > { %p30_p4 = scmp.eq.s32.totalorder %s29_s18, 0 }
   0xa   : > { %s3222_s20 = scalar_select %p30_p4, %s3152_s13, %s32_s19  }
   0xe   : > { %165 = sbr.rel (!%p41_p3) target bundleno = 40 (0x28), region = 28  ;;  %s167_s21 = sand.u32 (%p41_p3), 1, %s3152_s13  }
   0xf   : > { %s2777_s22 = smul.u32 (%p41_p3), 72, %s3160_s15 }
  0x10   : > { %s2776_s23 = smul.u32 (%p41_p3), 288, %s167_s21 }
  0x11   : > { %s3230_s26 = scalar_lea.vmem (%p41_p3), %s4599_s0, %s2777_s22 }
  0x12   : > { %v188_v0 = vld [vmem:[%s3230_s26] sm:$0xff] (%p41_p3)  ;;  %v190_v1 = vld [vmem:[%s3230_s26 + $0x8] sm:$0xff] (%p41_p3)  ;;  %v192_v2 = vld [vmem:[%s3230_s26 + $0x10] sm:$0xff] (%p41_p3)  ;;  %s3235_s27 = scalar_lea.vmem (%p41_p3), [#allocation2], %s2776_s23 }
  0x13   : > { %189 = vst [vmem:[%s3235_s27] sm:$0xff] (%p41_p3), %v188_v0  ;;  %191 = vst [vmem:[%s3235_s27 + $0x8] sm:$0xff] (%p41_p3), %v190_v1  ;;  %v194_v3 = vld [vmem:[%s3230_s26 + $0x18] sm:$0xff] (%p41_p3)  ;;  %v196_v4 = vld [vmem:[%s3230_s26 + $0x24] sm:$0xff] (%p41_p3) }
  0x14   : > { %193 = vst [vmem:[%s3235_s27 + $0x10] sm:$0xff] (%p41_p3), %v192_v2  ;;  %v198_v5 = vld [vmem:[%s3230_s26 + $0x2c] sm:$0xff] (%p41_p3)  ;;  %195 = vst [vmem:[%s3235_s27 + $0x18] sm:$0xff] (%p41_p3), %v194_v3  ;;  %v200_v6 = vld [vmem:[%s3230_s26 + $0x34] sm:$0xff] (%p41_p3) }
  0x15   : > { %197 = vst [vmem:[%s3235_s27 + $0x24] sm:$0xff] %v196_v4  ;;  %199 = vst [vmem:[%s3235_s27 + $0x2c] sm:$0xff] %v198_v5  ;;  %v202_v7 = vld [vmem:[%s3230_s26 + $0x3c] sm:$0xff]  ;;  %v204_v8 = vld [vmem:[%s3230_s26 + $0x90] sm:$0xff] }
  0x16   : > { %201 = vst [vmem:[%s3235_s27 + $0x34] sm:$0xff] %v200_v6  ;;  %203 = vst [vmem:[%s3235_s27 + $0x3c] sm:$0xff] %v202_v7  ;;  %v206_v9 = vld [vmem:[%s3230_s26 + $0x98] sm:$0xff]  ;;  %v208_v10 = vld [vmem:[%s3230_s26 + $0xa0] sm:$0xff] }
  0x17   : > { %205 = vst [vmem:[%s3235_s27 + $0x48] sm:$0xff] %v204_v8  ;;  %v210_v11 = vld [vmem:[%s3230_s26 + $0xa8] sm:$0xff]  ;;  %207 = vst [vmem:[%s3235_s27 + $0x50] sm:$0xff] %v206_v9  ;;  %v212_v12 = vld [vmem:[%s3230_s26 + $0xb4] sm:$0xff] }
  0x18   : > { %209 = vst [vmem:[%s3235_s27 + $0x58] sm:$0xff] %v208_v10  ;;  %211 = vst [vmem:[%s3235_s27 + $0x60] sm:$0xff] %v210_v11  ;;  %v214_v13 = vld [vmem:[%s3230_s26 + $0xbc] sm:$0xff]  ;;  %v216_v14 = vld [vmem:[%s3230_s26 + $0xc4] sm:$0xff] }
  0x19   : > { %213 = vst [vmem:[%s3235_s27 + $0x6c] sm:$0xff] %v212_v12  ;;  %215 = vst [vmem:[%s3235_s27 + $0x74] sm:$0xff] %v214_v13  ;;  %v218_v15 = vld [vmem:[%s3230_s26 + $0xcc] sm:$0xff]  ;;  %v220_v16 = vld [vmem:[%s3230_s26 + $0x120] sm:$0xff] }
  0x1a   : > { %217 = vst [vmem:[%s3235_s27 + $0x7c] sm:$0xff] %v216_v14  ;;  %v222_v17 = vld [vmem:[%s3230_s26 + $0x128] sm:$0xff]  ;;  %219 = vst [vmem:[%s3235_s27 + $0x84] sm:$0xff] %v218_v15  ;;  %v224_v18 = vld [vmem:[%s3230_s26 + $0x130] sm:$0xff] }
  0x1b   : > { %221 = vst [vmem:[%s3235_s27 + $0x90] sm:$0xff] %v220_v16  ;;  %223 = vst [vmem:[%s3235_s27 + $0x98] sm:$0xff] %v222_v17  ;;  %v226_v19 = vld [vmem:[%s3230_s26 + $0x138] sm:$0xff]  ;;  %v228_v20 = vld [vmem:[%s3230_s26 + $0x144] sm:$0xff] }
  0x1c   : > { %225 = vst [vmem:[%s3235_s27 + $0xa0] sm:$0xff] %v224_v18  ;;  %227 = vst [vmem:[%s3235_s27 + $0xa8] sm:$0xff] %v226_v19  ;;  %v230_v21 = vld [vmem:[%s3230_s26 + $0x14c] sm:$0xff]  ;;  %v232_v22 = vld [vmem:[%s3230_s26 + $0x154] sm:$0xff] }
  0x1d   : > { %229 = vst [vmem:[%s3235_s27 + $0xb4] sm:$0xff] %v228_v20  ;;  %v234_v23 = vld [vmem:[%s3230_s26 + $0x15c] sm:$0xff]  ;;  %231 = vst [vmem:[%s3235_s27 + $0xbc] sm:$0xff] %v230_v21  ;;  %v236_v24 = vld [vmem:[%s3230_s26 + $0x1b0] sm:$0xff] }
  0x1e   : > { %233 = vst [vmem:[%s3235_s27 + $0xc4] sm:$0xff] %v232_v22  ;;  %235 = vst [vmem:[%s3235_s27 + $0xcc] sm:$0xff] %v234_v23  ;;  %v238_v25 = vld [vmem:[%s3230_s26 + $0x1b8] sm:$0xff]  ;;  %v240_v26 = vld [vmem:[%s3230_s26 + $0x1c0] sm:$0xff] }
  0x1f   : > { %237 = vst [vmem:[%s3235_s27 + $0xd8] sm:$0xff] %v236_v24  ;;  %239 = vst [vmem:[%s3235_s27 + $0xe0] sm:$0xff] %v238_v25  ;;  %v242_v27 = vld [vmem:[%s3230_s26 + $0x1c8] sm:$0xff]  ;;  %v244_v28 = vld [vmem:[%s3230_s26 + $0x1d4] sm:$0xff] }
  0x20   : > { %241 = vst [vmem:[%s3235_s27 + $0xe8] sm:$0xff] %v240_v26  ;;  %v246_v29 = vld [vmem:[%s3230_s26 + $0x1dc] sm:$0xff]  ;;  %243 = vst [vmem:[%s3235_s27 + $0xf0] sm:$0xff] %v242_v27  ;;  %v248_v30 = vld [vmem:[%s3230_s26 + $0x1e4] sm:$0xff] }
  0x21   : > { %245 = vst [vmem:[%s3235_s27 + $0xfc] sm:$0xff] %v244_v28  ;;  %247 = vst [vmem:[%s3235_s27 + $0x104] sm:$0xff] %v246_v29  ;;  %v250_v31 = vld [vmem:[%s3230_s26 + $0x1ec] sm:$0xff]  ;;  %v2475_v32 = vld [vmem:[%s3230_s26 + $0x20] sm:$0xf] }
  0x22   : > { %249 = vst [vmem:[%s3235_s27 + $0x10c] sm:$0xff] %v248_v30  ;;  %251 = vst [vmem:[%s3235_s27 + $0x114] sm:$0xff] %v250_v31  ;;  %v2477_v33 = vld [vmem:[%s3230_s26 + $0x44] sm:$0xf]  ;;  %v2479_v34 = vld [vmem:[%s3230_s26 + $0xb0] sm:$0xf] }
  0x23   : > { %2476 = vst [vmem:[%s3235_s27 + $0x20] sm:$0xf] %v2475_v32  ;;  %v2481_v35 = vld [vmem:[%s3230_s26 + $0xd4] sm:$0xf]  ;;  %2478 = vst [vmem:[%s3235_s27 + $0x44] sm:$0xf] %v2477_v33 }
  0x24   : > { %2480 = vst [vmem:[%s3235_s27 + $0x68] sm:$0xf] %v2479_v34  ;;  %2482 = vst [vmem:[%s3235_s27 + $0x8c] sm:$0xf] %v2481_v35  ;;  %v2483_v36 = vld [vmem:[%s3230_s26 + $0x140] sm:$0xf] }
  0x25   : > { %v2485_v37 = vld [vmem:[%s3230_s26 + $0x164] sm:$0xf]  ;;  %v2487_v38 = vld [vmem:[%s3230_s26 + $0x1d0] sm:$0xf]  ;;  %2484 = vst [vmem:[%s3235_s27 + $0xb0] sm:$0xf] %v2483_v36 }
  0x26   : > { %2486 = vst [vmem:[%s3235_s27 + $0xd4] sm:$0xf] %v2485_v37  ;;  %2488 = vst [vmem:[%s3235_s27 + $0xf8] sm:$0xf] %v2487_v38  ;;  %v2489_v39 = vld [vmem:[%s3230_s26 + $0x1f4] sm:$0xf] }
  0x27   : > { %2490 = vst [vmem:[%s3235_s27 + $0x11c] sm:$0xf] %v2489_v39 }
  0x28 PF: > { %p2491_p6 = scmp.ge.s32.totalorder %s3164_s16, 1  ;;  %p279_p7 = scmp.lt.s32.totalorder %s3164_s16, 3 }
  0x2a   : > { %p280_p8 = pnand %p2491_p6, %p279_p7 }
  0x2c   : > { %283 = sbr.rel (%p280_p8) target bundleno = 854 (0x356), region = 54 }
  0x33   : > { %v2820_v40 = vld [vmem:[%s4600_s1 + $0x4] ss:$8 sps:$4 sm:$0xff]   ;;  %v2822_v41 = vld [vmem:[%s4600_s1] ss:$8 sps:$4 sm:$0xff]   ;;  %v2823_v42 = vld [vmem:[%s4600_s1 + $0x14] ss:$8 sps:$4 sm:$0xff]  }
  0x34   : > { %1268 = vmatprep.subr.bf16.mxu0 %v2820_v40  ;;  %1540 = vmatprep.subr.bf16.mxu1 %v2820_v40  ;;  %v2825_v43 = vld [vmem:[%s4600_s1 + $0x10] ss:$8 sps:$4 sm:$0xff]   ;;  %v2826_v44 = vld [vmem:[%s4600_s1 + $0x24] ss:$8 sps:$4 sm:$0xff]   ;;  %v2828_v45 = vld [vmem:[%s4600_s1 + $0x20] ss:$8 sps:$4 sm:$0xff]  }
  0x35   : > { %1269 = vmatpush1.bf16.msra.mxu0 %v2822_v41  ;;  %1541 = vmatpush1.bf16.msra.mxu1 %v2822_v41  ;;  %v2829_v46 = vld [vmem:[%s4600_s1 + $0x34] ss:$8 sps:$4 sm:$0xff]   ;;  %v2831_v47 = vld [vmem:[%s4600_s1 + $0x30] ss:$8 sps:$4 sm:$0xff]   ;;  %v2832_v48 = vld [vmem:[%s4600_s1 + $0x44] ss:$8 sps:$4 sm:$0xff]  }
  0x36   : > { %1270 = vmatprep.subr.bf16.mxu0 %v2823_v42  ;;  %1542 = vmatprep.subr.bf16.mxu1 %v2823_v42  ;;  %s286_s26 = sand.u32 1, %s3148_s12   ;;  %v2834_v49 = vld [vmem:[%s4600_s1 + $0x40] ss:$8 sps:$4 sm:$0xff]   ;;  %v2835_v50 = vld [vmem:[%s4600_s1 + $0x54] ss:$8 sps:$4 sm:$0xff]   ;;  %s2492_s12 = sshll.u32 %s3156_s14, 1 }
  0x37   : > { %s2778_s29 = smul.u32 288, %s286_s26  ;;  %v2837_v51 = vld [vmem:[%s4600_s1 + $0x50] ss:$8 sps:$4 sm:$0xff]   ;;  %v2838_v52 = vld [vmem:[%s4600_s1 + $0x64] ss:$8 sps:$4 sm:$0xff]   ;;  %p337_p9 = scmp.lt.s32.totalorder %s2492_s12, 3 }
  0x38   : > { %v2840_v54 = vld [vmem:[%s4600_s1 + $0x60] ss:$8 sps:$4 sm:$0xff]   ;;  %v2841_v55 = vld [vmem:[%s4600_s1 + $0x74] ss:$8 sps:$4 sm:$0xff]   ;;  %v2843_v57 = vld [vmem:[%s4600_s1 + $0x70] ss:$8 sps:$4 sm:$0xff]  }
  0x39   : > { %1271 = vmatpush1.bf16.msra.mxu0 %v2825_v43  ;;  %1543 = vmatpush1.bf16.msra.mxu1 %v2825_v43  ;;  %s3356_s8 = scalar_lea.vmem [#allocation2], %s2778_s29  ;;  %v2844_v58 = vld [vmem:[%s4600_s1 + $0x84] ss:$8 sps:$4 sm:$0xff]   ;;  %v2846_v59 = vld [vmem:[%s4600_s1 + $0x80] ss:$8 sps:$4 sm:$0xff]   ;;  %s4809_s12 = smov (!%p337_p9, %s2492_s12), 3 }
  0x3a   : > { %1272 = vmatprep.subr.bf16.mxu0 %v2826_v44  ;;  %1544 = vmatprep.subr.bf16.mxu1 %v2826_v44  ;;  %v2870_v53 = vld [vmem:[%s3356_s8 + $0x4] ss:$36 sps:$4 sm:$0xff]   ;;  %v2875_v56 = vld [vmem:[%s3356_s8 + $0x4c] ss:$36 sps:$4 sm:$0xff]   ;;  %v2847_v60 = vld [vmem:[%s4600_s1 + $0x94] ss:$8 sps:$4 sm:$0xff]  }
  0x3b   : > { %1300 = vmatprep.mubr.bf16.mxu0 %v2870_v53  ;;  %1572 = vmatprep.mubr.bf16.mxu1 %v2875_v56  ;;  %v2849_v61 = vld [vmem:[%s4600_s1 + $0x90] ss:$8 sps:$4 sm:$0xff]   ;;  %v2850_v62 = vld [vmem:[%s4600_s1 + $0xa4] ss:$8 sps:$4 sm:$0xff]   ;;  %v2852_v63 = vld [vmem:[%s4600_s1 + $0xa0] ss:$8 sps:$4 sm:$0xff]  }
  0x3c   : > { %v2853_v0 = vld [vmem:[%s4600_s1 + $0xb4] ss:$8 sps:$4 sm:$0xff]   ;;  %v2855_v1 = vld [vmem:[%s4600_s1 + $0xb0] ss:$8 sps:$4 sm:$0xff]   ;;  %v2856_v2 = vld [vmem:[%s4600_s1 + $0xc4] ss:$8 sps:$4 sm:$0xff]  }
  0x3d   : > { %1273 = vmatpush1.bf16.msra.mxu0 %v2828_v45  ;;  %1545 = vmatpush1.bf16.msra.mxu1 %v2828_v45  ;;  %v2858_v3 = vld [vmem:[%s4600_s1 + $0xc0] ss:$8 sps:$4 sm:$0xff]   ;;  %v2859_v4 = vld [vmem:[%s4600_s1 + $0xd4] ss:$8 sps:$4 sm:$0xff]   ;;  %v2861_v5 = vld [vmem:[%s4600_s1 + $0xd0] ss:$8 sps:$4 sm:$0xff]  }
  0x3e   : > { %1274 = vmatprep.subr.bf16.mxu0 %v2829_v46  ;;  %1546 = vmatprep.subr.bf16.mxu1 %v2829_v46  ;;  %v2862_v6 = vld [vmem:[%s4600_s1 + $0xe4] ss:$8 sps:$4 sm:$0xff]   ;;  %v2864_v7 = vld [vmem:[%s4600_s1 + $0xe0] ss:$8 sps:$4 sm:$0xff]   ;;  %v2865_v8 = vld [vmem:[%s4600_s1 + $0xf4] ss:$8 sps:$4 sm:$0xff]  }
  0x3f   : > { %v2867_v9 = vld [vmem:[%s4600_s1 + $0xf0] ss:$8 sps:$4 sm:$0xff]   ;;  %v2871_v10 = vld [vmem:[%s4600_s1 + $0x104] ss:$8 sps:$4 sm:$0xff]   ;;  %v2876_v13 = vld [vmem:[%s4600_s1 + $0x100] ss:$8 sps:$4 sm:$0xff]  }
  0x40   : > { %v2868_v11 = vld [vmem:[%s3356_s8] ss:$36 sps:$4 sm:$0xff]   ;;  %v2873_v12 = vld [vmem:[%s3356_s8 + $0x48] ss:$36 sps:$4 sm:$0xff]   ;;  %v2877_v14 = vld [vmem:[%s4600_s1 + $0x114] ss:$8 sps:$4 sm:$0xff]  }
  0x41   : > { %1275 = vmatpush1.bf16.msra.mxu0 %v2831_v47  ;;  %1547 = vmatpush1.bf16.msra.mxu1 %v2831_v47  ;;  %v2924_v15 = vld [vmem:[%s3356_s8 + $0xc] ss:$36 sps:$4 sm:$0xff]   ;;  %v2929_v16 = vld [vmem:[%s3356_s8 + $0x54] ss:$36 sps:$4 sm:$0xff]   ;;  %v2882_v19 = vld [vmem:[%s4600_s1 + $0x120] ss:$8 sps:$4 sm:$0xff]  }
  0x42   : > { %1276 = vmatprep.subr.bf16.mxu0 %v2832_v48  ;;  %1548 = vmatprep.subr.bf16.mxu1 %v2832_v48  ;;  %v2879_v17 = vld [vmem:[%s4600_s1 + $0x110] ss:$8 sps:$4 sm:$0xff]   ;;  %v2880_v18 = vld [vmem:[%s4600_s1 + $0x124] ss:$8 sps:$4 sm:$0xff]   ;;  %v3442_v20 = vld [vmem:[%s4600_s1 + $0x134] ss:$8 sps:$4 sm:$0xff]  }
  0x43   : > { %v3447_v21 = vld [vmem:[%s4600_s1 + $0x130] ss:$8 sps:$4 sm:$0xff]   ;;  %v3454_v22 = vld [vmem:[%s4600_s1 + $0x144] ss:$8 sps:$4 sm:$0xff]   ;;  %v3461_v23 = vld [vmem:[%s4600_s1 + $0x140] ss:$8 sps:$4 sm:$0xff]  }
  0x44   : > { %v3468_v24 = vld [vmem:[%s4600_s1 + $0x154] ss:$8 sps:$4 sm:$0xff]   ;;  %v3475_v25 = vld [vmem:[%s4600_s1 + $0x150] ss:$8 sps:$4 sm:$0xff]   ;;  %v3482_v26 = vld [vmem:[%s4600_s1 + $0x164] ss:$8 sps:$4 sm:$0xff]  }
  0x45   : > { %1277 = vmatpush1.bf16.msra.mxu0 %v2834_v49  ;;  %1549 = vmatpush1.bf16.msra.mxu1 %v2834_v49  ;;  %v3489_v27 = vld [vmem:[%s4600_s1 + $0x160] ss:$8 sps:$4 sm:$0xff]   ;;  %v3496_v28 = vld [vmem:[%s4600_s1 + $0x174] ss:$8 sps:$4 sm:$0xff]   ;;  %v3503_v29 = vld [vmem:[%s4600_s1 + $0x170] ss:$8 sps:$4 sm:$0xff]  }
  0x46   : > { %1278 = vmatprep.subr.bf16.mxu0 %v2835_v50  ;;  %1550 = vmatprep.subr.bf16.mxu1 %v2835_v50  ;;  %v3510_v30 = vld [vmem:[%s4600_s1 + $0x184] ss:$8 sps:$4 sm:$0xff]   ;;  %v3517_v31 = vld [vmem:[%s4600_s1 + $0x180] ss:$8 sps:$4 sm:$0xff]   ;;  %v3524_v32 = vld [vmem:[%s4600_s1 + $0x194] ss:$8 sps:$4 sm:$0xff]  }
  0x47   : > { %v3531_v33 = vld [vmem:[%s4600_s1 + $0x190] ss:$8 sps:$4 sm:$0xff]   ;;  %v3538_v34 = vld [vmem:[%s4600_s1 + $0x1a4] ss:$8 sps:$4 sm:$0xff]   ;;  %v3545_v35 = vld [vmem:[%s4600_s1 + $0x1a0] ss:$8 sps:$4 sm:$0xff]  }
  0x48   : > { %v3552_v36 = vld [vmem:[%s4600_s1 + $0x1b4] ss:$8 sps:$4 sm:$0xff]   ;;  %v3559_v37 = vld [vmem:[%s4600_s1 + $0x1b0] ss:$8 sps:$4 sm:$0xff]   ;;  %v3566_v38 = vld [vmem:[%s4600_s1 + $0x1c4] ss:$8 sps:$4 sm:$0xff]  }
  0x49   : > { %1279 = vmatpush1.bf16.msra.mxu0 %v2837_v51  ;;  %1551 = vmatpush1.bf16.msra.mxu1 %v2837_v51  ;;  %v3573_v39 = vld [vmem:[%s4600_s1 + $0x1c0] ss:$8 sps:$4 sm:$0xff]   ;;  %v3580_v40 = vld [vmem:[%s4600_s1 + $0x1d4] ss:$8 sps:$4 sm:$0xff]   ;;  %v3587_v41 = vld [vmem:[%s4600_s1 + $0x1d0] ss:$8 sps:$4 sm:$0xff]  }
  0x4a   : > { %1280 = vmatprep.subr.bf16.mxu0 %v2838_v52  ;;  %1552 = vmatprep.subr.bf16.mxu1 %v2838_v52  ;;  %v3594_v42 = vld [vmem:[%s4600_s1 + $0x1e4] ss:$8 sps:$4 sm:$0xff]   ;;  %v3601_v43 = vld [vmem:[%s4600_s1 + $0x1e0] ss:$8 sps:$4 sm:$0xff]   ;;  %v3608_v44 = vld [vmem:[%s4600_s1 + $0x1f4] ss:$8 sps:$4 sm:$0xff]  }
  0x4b   : > { %v3615_v45 = vld [vmem:[%s4600_s1 + $0x1f0] ss:$8 sps:$4 sm:$0xff]   ;;  %v3622_v46 = vld [vmem:[%s4600_s1 + $0x204] ss:$8 sps:$4 sm:$0xff]   ;;  %v3631_v49 = vld [vmem:[%s4600_s1 + $0x200] ss:$8 sps:$4 sm:$0xff]  }
  0x4c   : > { %v2922_v47 = vld [vmem:[%s3356_s8 + $0x8] ss:$36 sps:$4 sm:$0xff]   ;;  %v2927_v48 = vld [vmem:[%s3356_s8 + $0x50] ss:$36 sps:$4 sm:$0xff]   ;;  %v2983_v52 = vld [vmem:[%s3356_s8 + $0x5c] ss:$36 sps:$4 sm:$0xff]  }
  0x4d   : > { %1281 = vmatpush1.bf16.msra.mxu0 %v2840_v54  ;;  %1553 = vmatpush1.bf16.msra.mxu1 %v2840_v54  ;;  %v3638_v50 = vld [vmem:[%s4600_s1 + $0x214] ss:$8 sps:$4 sm:$0xff]   ;;  %v3647_v53 = vld [vmem:[%s4600_s1 + $0x210] ss:$8 sps:$4 sm:$0xff]   ;;  %v3654_v54 = vld [vmem:[%s4600_s1 + $0x224] ss:$8 sps:$4 sm:$0xff]  }
  0x4e   : > { %1282 = vmatprep.subr.bf16.mxu0 %v2841_v55  ;;  %1554 = vmatprep.subr.bf16.mxu1 %v2841_v55  ;;  %v2978_v51 = vld [vmem:[%s3356_s8 + $0x14] ss:$36 sps:$4 sm:$0xff]   ;;  %v3661_v55 = vld [vmem:[%s4600_s1 + $0x220] ss:$8 sps:$4 sm:$0xff]   ;;  %s2709_s14 = sshll.u32 %s4809_s12, 3 }
  0x4f   : > { %v3668_v56 = vld [vmem:[%s4600_s1 + $0x234] ss:$8 sps:$4 sm:$0xff]   ;;  %s344_s11 = scalar_lea.vmem %s4602_s3, %s2709_s14 }
  0x51   : > { %1283 = vmatpush1.bf16.msra.mxu0 %v2843_v57  ;;  %1555 = vmatpush1.bf16.msra.mxu1 %v2843_v57  ;;  %v3675_v57 = vld [vmem:[%s4600_s1 + $0x230] ss:$8 sps:$4 sm:$0xff]  }
  0x52   : > { %1284 = vmatprep.subr.bf16.mxu0 %v2844_v58  ;;  %1556 = vmatprep.subr.bf16.mxu1 %v2844_v58  ;;  %v3682_v58 = vld [vmem:[%s4600_s1 + $0x244] ss:$8 sps:$4 sm:$0xff]  }
  0x55   : > { %1285 = vmatpush1.bf16.msra.mxu0 %v2846_v59  ;;  %1557 = vmatpush1.bf16.msra.mxu1 %v2846_v59  ;;  %v3689_v59 = vld [vmem:[%s4600_s1 + $0x240] ss:$8 sps:$4 sm:$0xff]  }
  0x56   : > { %1286 = vmatprep.subr.bf16.mxu0 %v2847_v60  ;;  %1558 = vmatprep.subr.bf16.mxu1 %v2847_v60  ;;  %v3696_v60 = vld [vmem:[%s4600_s1 + $0x254] ss:$8 sps:$4 sm:$0xff]  }
  0x59   : > { %1287 = vmatpush1.bf16.msra.mxu0 %v2849_v61  ;;  %1559 = vmatpush1.bf16.msra.mxu1 %v2849_v61  ;;  %v3703_v61 = vld [vmem:[%s4600_s1 + $0x250] ss:$8 sps:$4 sm:$0xff]  }
  0x5a   : > { %1288 = vmatprep.subr.bf16.mxu0 %v2850_v62  ;;  %1560 = vmatprep.subr.bf16.mxu1 %v2850_v62  ;;  %v3710_v62 = vld [vmem:[%s4600_s1 + $0x264] ss:$8 sps:$4 sm:$0xff]  }
  0x5d   : > { %1289 = vmatpush1.bf16.msra.mxu0 %v2852_v63  ;;  %1561 = vmatpush1.bf16.msra.mxu1 %v2852_v63  ;;  %v3717_v63 = vld [vmem:[%s4600_s1 + $0x260] ss:$8 sps:$4 sm:$0xff]  }
  0x5e   : > { %1290 = vmatprep.subr.bf16.mxu0 %v2853_v0  ;;  %1562 = vmatprep.subr.bf16.mxu1 %v2853_v0  ;;  %v3724_v0 = vld [vmem:[%s4600_s1 + $0x274] ss:$8 sps:$4 sm:$0xff]  }
  0x61   : > { %1291 = vmatpush1.bf16.msra.mxu0 %v2855_v1  ;;  %1563 = vmatpush1.bf16.msra.mxu1 %v2855_v1  ;;  %v3731_v1 = vld [vmem:[%s4600_s1 + $0x270] ss:$8 sps:$4 sm:$0xff]  }
  0x62   : > { %1292 = vmatprep.subr.bf16.mxu0 %v2856_v2  ;;  %1564 = vmatprep.subr.bf16.mxu1 %v2856_v2  ;;  %v3738_v2 = vld [vmem:[%s4600_s1 + $0x284] ss:$8 sps:$4 sm:$0xff]  }
  0x65   : > { %1293 = vmatpush1.bf16.msra.mxu0 %v2858_v3  ;;  %1565 = vmatpush1.bf16.msra.mxu1 %v2858_v3  ;;  %v3745_v3 = vld [vmem:[%s4600_s1 + $0x280] ss:$8 sps:$4 sm:$0xff]  }
  0x66   : > { %1294 = vmatprep.subr.bf16.mxu0 %v2859_v4  ;;  %1566 = vmatprep.subr.bf16.mxu1 %v2859_v4  ;;  %v3752_v4 = vld [vmem:[%s4600_s1 + $0x294] ss:$8 sps:$4 sm:$0xff]  }
  0x69   : > { %1295 = vmatpush1.bf16.msra.mxu0 %v2861_v5  ;;  %1567 = vmatpush1.bf16.msra.mxu1 %v2861_v5  ;;  %v3759_v5 = vld [vmem:[%s4600_s1 + $0x290] ss:$8 sps:$4 sm:$0xff]  }
  0x6a   : > { %1296 = vmatprep.subr.bf16.mxu0 %v2862_v6  ;;  %1568 = vmatprep.subr.bf16.mxu1 %v2862_v6  ;;  %v3766_v6 = vld [vmem:[%s4600_s1 + $0x2a4] ss:$8 sps:$4 sm:$0xff]  }
  0x6d   : > { %1297 = vmatpush1.bf16.msra.mxu0 %v2864_v7  ;;  %1569 = vmatpush1.bf16.msra.mxu1 %v2864_v7  ;;  %v3773_v7 = vld [vmem:[%s4600_s1 + $0x2a0] ss:$8 sps:$4 sm:$0xff]  }
  0x6e   : > { %1298 = vmatprep.subr.bf16.mxu0 %v2865_v8  ;;  %1570 = vmatprep.subr.bf16.mxu1 %v2865_v8  ;;  %v3780_v8 = vld [vmem:[%s4600_s1 + $0x2b4] ss:$8 sps:$4 sm:$0xff]  }
  0x71   : > { %1299 = vmatpush1.bf16.msra.mxu0 %v2867_v9  ;;  %1571 = vmatpush1.bf16.msra.mxu1 %v2867_v9  ;;  %v3787_v9 = vld [vmem:[%s4600_s1 + $0x2b0] ss:$8 sps:$4 sm:$0xff]  }
  0x72   : > { %1311 = vmatprep.subr.bf16.mxu0 %v2871_v10  ;;  %1583 = vmatprep.subr.bf16.mxu1 %v2871_v10  ;;  %v3794_v10 = vld [vmem:[%s4600_s1 + $0x2c4] ss:$8 sps:$4 sm:$0xff]  }
  0x74   : > { %1301 = vmatmul.mubr.bf16.vlgmr.msra.gmra.mrb[0].mxu0 %v2868_v11  ;;  %1573 = vmatmul.mubr.bf16.vlgmr.msra.gmra.mrb[0].mxu1 %v2873_v12  ;;  %v3801_v11 = vld [vmem:[%s4600_s1 + $0x2c0] ss:$8 sps:$4 sm:$0xff]   ;;  %v3808_v12 = vld [vmem:[%s4600_s1 + $0x2d4] ss:$8 sps:$4 sm:$0xff]  }
  0x75   : > { %1312 = vmatpush1.bf16.msra.mxu0 %v2876_v13  ;;  %1584 = vmatpush1.bf16.msra.mxu1 %v2876_v13  ;;  %v3815_v13 = vld [vmem:[%s4600_s1 + $0x2d0] ss:$8 sps:$4 sm:$0xff]  }
  0x76   : > { %1313 = vmatprep.subr.bf16.mxu0 %v2877_v14  ;;  %1585 = vmatprep.subr.bf16.mxu1 %v2877_v14  ;;  %v3822_v14 = vld [vmem:[%s4600_s1 + $0x2e4] ss:$8 sps:$4 sm:$0xff]  }
  0x77   : > { %1343 = vmatprep.mubr.bf16.mxu0 %v2924_v15  ;;  %1615 = vmatprep.mubr.bf16.mxu1 %v2929_v16  ;;  %v3829_v15 = vld [vmem:[%s4600_s1 + $0x2e0] ss:$8 sps:$4 sm:$0xff]   ;;  %v3836_v16 = vld [vmem:[%s4600_s1 + $0x2f4] ss:$8 sps:$4 sm:$0xff]  }
  0x78   : > { %4703 = vst [vmem:[#allocation3_spill] sm:$0xff] %v3836_v16 }
  0x79   : > { %1314 = vmatpush1.bf16.msra.mxu0 %v2879_v17  ;;  %1586 = vmatpush1.bf16.msra.mxu1 %v2879_v17  ;;  %v3843_v17 = vld [vmem:[%s4600_s1 + $0x2f0] ss:$8 sps:$4 sm:$0xff]  }
  0x7a   : > { %1315 = vmatprep.subr.bf16.mxu0 %v2880_v18  ;;  %1587 = vmatprep.subr.bf16.mxu1 %v2880_v18  ;;  %4704 = vst [vmem:[#allocation4_spill] sm:$0xff] %v3843_v17  ;;  %v3850_v18 = vld [vmem:[%s4600_s1 + $0x304] ss:$8 sps:$4 sm:$0xff]  }
  0x7b   : > { %4705 = vst [vmem:[#allocation5_spill] sm:$0xff] %v3850_v18 }
  0x7d   : > { %1316 = vmatpush1.bf16.msra.mxu0 %v2882_v19  ;;  %1588 = vmatpush1.bf16.msra.mxu1 %v2882_v19  ;;  %v2976_v19 = vld [vmem:[%s3356_s8 + $0x10] ss:$36 sps:$4 sm:$0xff]  }
  0x7e   : > { %1317 = vmatprep.subr.bf16.mxu0 %v3442_v20  ;;  %1589 = vmatprep.subr.bf16.mxu1 %v3442_v20 }
  0x81   : > { %1318 = vmatpush1.bf16.msra.mxu0 %v3447_v21  ;;  %1590 = vmatpush1.bf16.msra.mxu1 %v3447_v21 }
  0x82   : > { %1319 = vmatprep.subr.bf16.mxu0 %v3454_v22  ;;  %1591 = vmatprep.subr.bf16.mxu1 %v3454_v22 }
  0x85   : > { %1320 = vmatpush1.bf16.msra.mxu0 %v3461_v23  ;;  %1592 = vmatpush1.bf16.msra.mxu1 %v3461_v23 }
  0x86   : > { %1321 = vmatprep.subr.bf16.mxu0 %v3468_v24  ;;  %1593 = vmatprep.subr.bf16.mxu1 %v3468_v24 }
  0x89   : > { %1322 = vmatpush1.bf16.msra.mxu0 %v3475_v25  ;;  %1594 = vmatpush1.bf16.msra.mxu1 %v3475_v25 }
  0x8a   : > { %1323 = vmatprep.subr.bf16.mxu0 %v3482_v26  ;;  %1595 = vmatprep.subr.bf16.mxu1 %v3482_v26 }
  0x8d   : > { %1324 = vmatpush1.bf16.msra.mxu0 %v3489_v27  ;;  %1596 = vmatpush1.bf16.msra.mxu1 %v3489_v27 }
  0x8e   : > { %1325 = vmatprep.subr.bf16.mxu0 %v3496_v28  ;;  %1597 = vmatprep.subr.bf16.mxu1 %v3496_v28 }
  0x91   : > { %1326 = vmatpush1.bf16.msra.mxu0 %v3503_v29  ;;  %1598 = vmatpush1.bf16.msra.mxu1 %v3503_v29 }
  0x92   : > { %1327 = vmatprep.subr.bf16.mxu0 %v3510_v30  ;;  %1599 = vmatprep.subr.bf16.mxu1 %v3510_v30 }
  0x95   : > { %1328 = vmatpush1.bf16.msra.mxu0 %v3517_v31  ;;  %1600 = vmatpush1.bf16.msra.mxu1 %v3517_v31 }
  0x96   : > { %1329 = vmatprep.subr.bf16.mxu0 %v3524_v32  ;;  %1601 = vmatprep.subr.bf16.mxu1 %v3524_v32 }
  0x99   : > { %1330 = vmatpush1.bf16.msra.mxu0 %v3531_v33  ;;  %1602 = vmatpush1.bf16.msra.mxu1 %v3531_v33 }
  0x9a   : > { %1331 = vmatprep.subr.bf16.mxu0 %v3538_v34  ;;  %1603 = vmatprep.subr.bf16.mxu1 %v3538_v34 }
  0x9d   : > { %1332 = vmatpush1.bf16.msra.mxu0 %v3545_v35  ;;  %1604 = vmatpush1.bf16.msra.mxu1 %v3545_v35 }
  0x9e   : > { %1333 = vmatprep.subr.bf16.mxu0 %v3552_v36  ;;  %1605 = vmatprep.subr.bf16.mxu1 %v3552_v36 }
  0xa1   : > { %1334 = vmatpush1.bf16.msra.mxu0 %v3559_v37  ;;  %1606 = vmatpush1.bf16.msra.mxu1 %v3559_v37 }
  0xa2   : > { %1335 = vmatprep.subr.bf16.mxu0 %v3566_v38  ;;  %1607 = vmatprep.subr.bf16.mxu1 %v3566_v38 }
  0xa5   : > { %1336 = vmatpush1.bf16.msra.mxu0 %v3573_v39  ;;  %1608 = vmatpush1.bf16.msra.mxu1 %v3573_v39 }
  0xa6   : > { %1337 = vmatprep.subr.bf16.mxu0 %v3580_v40  ;;  %1609 = vmatprep.subr.bf16.mxu1 %v3580_v40 }
  0xa9   : > { %1338 = vmatpush1.bf16.msra.mxu0 %v3587_v41  ;;  %1610 = vmatpush1.bf16.msra.mxu1 %v3587_v41 }
  0xaa   : > { %1339 = vmatprep.subr.bf16.mxu0 %v3594_v42  ;;  %1611 = vmatprep.subr.bf16.mxu1 %v3594_v42 }
  0xad   : > { %1340 = vmatpush1.bf16.msra.mxu0 %v3601_v43  ;;  %1612 = vmatpush1.bf16.msra.mxu1 %v3601_v43 }
  0xae   : > { %1341 = vmatprep.subr.bf16.mxu0 %v3608_v44  ;;  %1613 = vmatprep.subr.bf16.mxu1 %v3608_v44 }
  0xb1   : > { %1342 = vmatpush1.bf16.msra.mxu0 %v3615_v45  ;;  %1614 = vmatpush1.bf16.msra.mxu1 %v3615_v45 }
  0xb2   : > { %1354 = vmatprep.subr.bf16.mxu0 %v3622_v46  ;;  %1626 = vmatprep.subr.bf16.mxu1 %v3622_v46 }
  0xb4   : > { %1344 = vmatmul.mubr.bf16.vlgmr.msra.gmra.mrb[0].mxu0 %v2922_v47  ;;  %1616 = vmatmul.mubr.bf16.vlgmr.msra.gmra.mrb[0].mxu1 %v2927_v48  ;;  %v2981_v47 = vld [vmem:[%s3356_s8 + $0x58] ss:$36 sps:$4 sm:$0xff]   ;;  %v3859_v48 = vld [vmem:[%s4600_s1 + $0x300] ss:$8 sps:$4 sm:$0xff]  }
  0xb5   : > { %1355 = vmatpush1.bf16.msra.mxu0 %v3631_v49  ;;  %1627 = vmatpush1.bf16.msra.mxu1 %v3631_v49 }
  0xb6   : > { %1356 = vmatprep.subr.bf16.mxu0 %v3638_v50  ;;  %1628 = vmatprep.subr.bf16.mxu1 %v3638_v50 }
  0xb7   : > { %1386 = vmatprep.mubr.bf16.mxu0 %v2978_v51  ;;  %1658 = vmatprep.mubr.bf16.mxu1 %v2983_v52  ;;  %v3866_v51 = vld [vmem:[%s4600_s1 + $0x314] ss:$8 sps:$4 sm:$0xff]  }
  0xb8   : > { %4706 = vst [vmem:[#allocation6_spill] sm:$0xff] %v3866_v51  ;;  %v3032_v52 = vld [vmem:[%s3356_s8 + $0x1c] ss:$36 sps:$4 sm:$0xff]  }
  0xb9   : > { %1357 = vmatpush1.bf16.msra.mxu0 %v3647_v53  ;;  %1629 = vmatpush1.bf16.msra.mxu1 %v3647_v53 }
  0xba   : > { %1358 = vmatprep.subr.bf16.mxu0 %v3654_v54  ;;  %1630 = vmatprep.subr.bf16.mxu1 %v3654_v54 }
  0xbd   : > { %1359 = vmatpush1.bf16.msra.mxu0 %v3661_v55  ;;  %1631 = vmatpush1.bf16.msra.mxu1 %v3661_v55 }
  0xbe   : > { %1360 = vmatprep.subr.bf16.mxu0 %v3668_v56  ;;  %1632 = vmatprep.subr.bf16.mxu1 %v3668_v56 }
  0xc1   : > { %1361 = vmatpush1.bf16.msra.mxu0 %v3675_v57  ;;  %1633 = vmatpush1.bf16.msra.mxu1 %v3675_v57 }
  0xc2   : > { %1362 = vmatprep.subr.bf16.mxu0 %v3682_v58  ;;  %1634 = vmatprep.subr.bf16.mxu1 %v3682_v58 }
  0xc5   : > { %1363 = vmatpush1.bf16.msra.mxu0 %v3689_v59  ;;  %1635 = vmatpush1.bf16.msra.mxu1 %v3689_v59 }
  0xc6   : > { %1364 = vmatprep.subr.bf16.mxu0 %v3696_v60  ;;  %1636 = vmatprep.subr.bf16.mxu1 %v3696_v60 }
  0xc9   : > { %1365 = vmatpush1.bf16.msra.mxu0 %v3703_v61  ;;  %1637 = vmatpush1.bf16.msra.mxu1 %v3703_v61 }
  0xca   : > { %1366 = vmatprep.subr.bf16.mxu0 %v3710_v62  ;;  %1638 = vmatprep.subr.bf16.mxu1 %v3710_v62 }
  0xcd   : > { %1367 = vmatpush1.bf16.msra.mxu0 %v3717_v63  ;;  %1639 = vmatpush1.bf16.msra.mxu1 %v3717_v63 }
  0xce   : > { %1368 = vmatprep.subr.bf16.mxu0 %v3724_v0  ;;  %1640 = vmatprep.subr.bf16.mxu1 %v3724_v0 }
  0xd1   : > { %1369 = vmatpush1.bf16.msra.mxu0 %v3731_v1  ;;  %1641 = vmatpush1.bf16.msra.mxu1 %v3731_v1 }
  0xd2   : > { %1370 = vmatprep.subr.bf16.mxu0 %v3738_v2  ;;  %1642 = vmatprep.subr.bf16.mxu1 %v3738_v2 }
  0xd5   : > { %1371 = vmatpush1.bf16.msra.mxu0 %v3745_v3  ;;  %1643 = vmatpush1.bf16.msra.mxu1 %v3745_v3 }
  0xd6   : > { %1372 = vmatprep.subr.bf16.mxu0 %v3752_v4  ;;  %1644 = vmatprep.subr.bf16.mxu1 %v3752_v4 }
  0xd9   : > { %1373 = vmatpush1.bf16.msra.mxu0 %v3759_v5  ;;  %1645 = vmatpush1.bf16.msra.mxu1 %v3759_v5 }
  0xda   : > { %1374 = vmatprep.subr.bf16.mxu0 %v3766_v6  ;;  %1646 = vmatprep.subr.bf16.mxu1 %v3766_v6 }
  0xdd   : > { %1375 = vmatpush1.bf16.msra.mxu0 %v3773_v7  ;;  %1647 = vmatpush1.bf16.msra.mxu1 %v3773_v7 }
  0xde   : > { %1376 = vmatprep.subr.bf16.mxu0 %v3780_v8  ;;  %1648 = vmatprep.subr.bf16.mxu1 %v3780_v8 }
  0xe1   : > { %1377 = vmatpush1.bf16.msra.mxu0 %v3787_v9  ;;  %1649 = vmatpush1.bf16.msra.mxu1 %v3787_v9 }
  0xe2   : > { %1378 = vmatprep.subr.bf16.mxu0 %v3794_v10  ;;  %1650 = vmatprep.subr.bf16.mxu1 %v3794_v10 }
  0xe5   : > { %1379 = vmatpush1.bf16.msra.mxu0 %v3801_v11  ;;  %1651 = vmatpush1.bf16.msra.mxu1 %v3801_v11 }
  0xe6   : > { %1380 = vmatprep.subr.bf16.mxu0 %v3808_v12  ;;  %1652 = vmatprep.subr.bf16.mxu1 %v3808_v12 }
  0xe9   : > { %1381 = vmatpush1.bf16.msra.mxu0 %v3815_v13  ;;  %1653 = vmatpush1.bf16.msra.mxu1 %v3815_v13 }
  0xea   : > { %1382 = vmatprep.subr.bf16.mxu0 %v3822_v14  ;;  %1654 = vmatprep.subr.bf16.mxu1 %v3822_v14 }
  0xed   : > { %1383 = vmatpush1.bf16.msra.mxu0 %v3829_v15  ;;  %1655 = vmatpush1.bf16.msra.mxu1 %v3829_v15 }
  0xee   : > { %1384 = vmatprep.subr.bf16.mxu0 %v3836_v16  ;;  %1656 = vmatprep.subr.bf16.mxu1 %v3836_v16  ;;  %v3037_v16 = vld [vmem:[%s3356_s8 + $0x64] ss:$36 sps:$4 sm:$0xff]  }
  0xf1   : > { %1385 = vmatpush1.bf16.msra.mxu0 %v3843_v17  ;;  %1657 = vmatpush1.bf16.msra.mxu1 %v3843_v17  ;;  %v3875_v17 = vld [vmem:[%s4600_s1 + $0x310] ss:$8 sps:$4 sm:$0xff]  }
  0xf2   : > { %1397 = vmatprep.subr.bf16.mxu0 %v3850_v18  ;;  %1669 = vmatprep.subr.bf16.mxu1 %v3850_v18  ;;  %4707 = vst [vmem:[#allocation7_spill] sm:$0xff] %v3875_v17  ;;  %v3882_v18 = vld [vmem:[%s4600_s1 + $0x324] ss:$8 sps:$4 sm:$0xff]  }
  0xf3   : > { %4708 = vst [vmem:[#allocation8_spill] sm:$0xff] %v3882_v18 }
  0xf4   : > { %1387 = vmatmul.mubr.bf16.vlgmr.msra.gmra.mrb[0].mxu0 %v2976_v19  ;;  %1659 = vmatmul.mubr.bf16.vlgmr.msra.gmra.mrb[0].mxu1 %v2981_v47  ;;  %v3889_v19 = vld [vmem:[%s4600_s1 + $0x320] ss:$8 sps:$4 sm:$0xff]   ;;  %v3896_v47 = vld [vmem:[%s4600_s1 + $0x334] ss:$8 sps:$4 sm:$0xff]  }
  0xf5   : > { %1398 = vmatpush1.bf16.msra.mxu0 %v3859_v48  ;;  %1670 = vmatpush1.bf16.msra.mxu1 %v3859_v48  ;;  %4709 = vst [vmem:[#allocation9_spill] sm:$0xff] %v3889_v19  ;;  %4710 = vst [vmem:[#allocation10_spill] sm:$0xff] %v3896_v47 }
  0xf6   : > { %1399 = vmatprep.subr.bf16.mxu0 %v3866_v51  ;;  %1671 = vmatprep.subr.bf16.mxu1 %v3866_v51  ;;  %v3067_v51 = vld [vmem:[%s3356_s8 + $0xdc] ss:$36 sps:$4 sm:$0xff]  }
  0xf7   : > { %1429 = vmatprep.mubr.bf16.mxu0 %v3032_v52  ;;  %1701 = vmatprep.mubr.bf16.mxu1 %v3037_v16  ;;  %v3903_v16 = vld [vmem:[%s4600_s1 + $0x330] ss:$8 sps:$4 sm:$0xff]   ;;  %v3910_v52 = vld [vmem:[%s4600_s1 + $0x344] ss:$8 sps:$4 sm:$0xff]  }
  0xf8   : > { %4711 = vst [vmem:[#allocation11_spill] sm:$0xff] %v3903_v16  ;;  %4712 = vst [vmem:[#allocation12_spill] sm:$0xff] %v3910_v52 }
  0xf9   : > { %1400 = vmatpush1.bf16.msra.mxu0 %v3875_v17  ;;  %1672 = vmatpush1.bf16.msra.mxu1 %v3875_v17  ;;  %v3035_v17 = vld [vmem:[%s3356_s8 + $0x60] ss:$36 sps:$4 sm:$0xff]  }
  0xfa   : > { %1401 = vmatprep.subr.bf16.mxu0 %v3882_v18  ;;  %1673 = vmatprep.subr.bf16.mxu1 %v3882_v18  ;;  %v3030_v18 = vld [vmem:[%s3356_s8 + $0x18] ss:$36 sps:$4 sm:$0xff]  }
  0xfd   : > { %1402 = vmatpush1.bf16.msra.mxu0 %v3889_v19  ;;  %1674 = vmatpush1.bf16.msra.mxu1 %v3889_v19  ;;  %v3917_v19 = vld [vmem:[%s4600_s1 + $0x340] ss:$8 sps:$4 sm:$0xff]  }
  0xfe   : > { %1403 = vmatprep.subr.bf16.mxu0 %v3896_v47  ;;  %1675 = vmatprep.subr.bf16.mxu1 %v3896_v47  ;;  %4713 = vst [vmem:[#allocation13_spill] sm:$0xff] %v3917_v19  ;;  %v3924_v47 = vld [vmem:[%s4600_s1 + $0x354] ss:$8 sps:$4 sm:$0xff]  }
  0xff   : > { %4714 = vst [vmem:[#allocation14_spill] sm:$0xff] %v3924_v47 }
 0x101   : > { %1404 = vmatpush1.bf16.msra.mxu0 %v3903_v16  ;;  %1676 = vmatpush1.bf16.msra.mxu1 %v3903_v16  ;;  %v3931_v16 = vld [vmem:[%s4600_s1 + $0x350] ss:$8 sps:$4 sm:$0xff]  }
 0x102   : > { %1405 = vmatprep.subr.bf16.mxu0 %v3910_v52  ;;  %1677 = vmatprep.subr.bf16.mxu1 %v3910_v52  ;;  %4715 = vst [vmem:[#allocation15_spill] sm:$0xff] %v3931_v16  ;;  %v3938_v52 = vld [vmem:[%s4600_s1 + $0x364] ss:$8 sps:$4 sm:$0xff]  }
 0x103   : > { %4716 = vst [vmem:[#allocation16_spill] sm:$0xff] %v3938_v52 }
 0x105   : > { %1406 = vmatpush1.bf16.msra.mxu0 %v3917_v19  ;;  %1678 = vmatpush1.bf16.msra.mxu1 %v3917_v19  ;;  %v3945_v19 = vld [vmem:[%s4600_s1 + $0x360] ss:$8 sps:$4 sm:$0xff]  }
 0x106   : > { %1407 = vmatprep.subr.bf16.mxu0 %v3924_v47  ;;  %1679 = vmatprep.subr.bf16.mxu1 %v3924_v47  ;;  %4717 = vst [vmem:[#allocation17_spill] sm:$0xff] %v3945_v19  ;;  %v3952_v47 = vld [vmem:[%s4600_s1 + $0x374] ss:$8 sps:$4 sm:$0xff]  }
 0x107   : > { %4718 = vst [vmem:[#allocation18_spill] sm:$0xff] %v3952_v47 }
 0x109   : > { %1408 = vmatpush1.bf16.msra.mxu0 %v3931_v16  ;;  %1680 = vmatpush1.bf16.msra.mxu1 %v3931_v16  ;;  %v3959_v16 = vld [vmem:[%s4600_s1 + $0x370] ss:$8 sps:$4 sm:$0xff]  }
 0x10a   : > { %1409 = vmatprep.subr.bf16.mxu0 %v3938_v52  ;;  %1681 = vmatprep.subr.bf16.mxu1 %v3938_v52  ;;  %4719 = vst [vmem:[#allocation19_spill] sm:$0xff] %v3959_v16  ;;  %v3966_v52 = vld [vmem:[%s4600_s1 + $0x384] ss:$8 sps:$4 sm:$0xff]  }
 0x10b   : > { %4720 = vst [vmem:[#allocation20_spill] sm:$0xff] %v3966_v52 }
 0x10d   : > { %1410 = vmatpush1.bf16.msra.mxu0 %v3945_v19  ;;  %1682 = vmatpush1.bf16.msra.mxu1 %v3945_v19  ;;  %v3973_v19 = vld [vmem:[%s4600_s1 + $0x380] ss:$8 sps:$4 sm:$0xff]  }
 0x10e   : > { %1411 = vmatprep.subr.bf16.mxu0 %v3952_v47  ;;  %1683 = vmatprep.subr.bf16.mxu1 %v3952_v47  ;;  %4721 = vst [vmem:[#allocation21_spill] sm:$0xff] %v3973_v19  ;;  %v3980_v47 = vld [vmem:[%s4600_s1 + $0x394] ss:$8 sps:$4 sm:$0xff]  }
 0x10f   : > { %4722 = vst [vmem:[#allocation22_spill] sm:$0xff] %v3980_v47 }
 0x111   : > { %1412 = vmatpush1.bf16.msra.mxu0 %v3959_v16  ;;  %1684 = vmatpush1.bf16.msra.mxu1 %v3959_v16  ;;  %v3987_v16 = vld [vmem:[%s4600_s1 + $0x390] ss:$8 sps:$4 sm:$0xff]  }
 0x112   : > { %1413 = vmatprep.subr.bf16.mxu0 %v3966_v52  ;;  %1685 = vmatprep.subr.bf16.mxu1 %v3966_v52  ;;  %4723 = vst [vmem:[#allocation23_spill] sm:$0xff] %v3987_v16  ;;  %v3994_v52 = vld [vmem:[%s4600_s1 + $0x3a4] ss:$8 sps:$4 sm:$0xff]  }
 0x113   : > { %4724 = vst [vmem:[#allocation24_spill] sm:$0xff] %v3994_v52 }
 0x115   : > { %1414 = vmatpush1.bf16.msra.mxu0 %v3973_v19  ;;  %1686 = vmatpush1.bf16.msra.mxu1 %v3973_v19  ;;  %v4001_v19 = vld [vmem:[%s4600_s1 + $0x3a0] ss:$8 sps:$4 sm:$0xff]  }
 0x116   : > { %1415 = vmatprep.subr.bf16.mxu0 %v3980_v47  ;;  %1687 = vmatprep.subr.bf16.mxu1 %v3980_v47  ;;  %4725 = vst [vmem:[#allocation25_spill] sm:$0xff] %v4001_v19  ;;  %v4008_v47 = vld [vmem:[%s4600_s1 + $0x3b4] ss:$8 sps:$4 sm:$0xff]  }
 0x117   : > { %4726 = vst [vmem:[#allocation26_spill] sm:$0xff] %v4008_v47 }
 0x119   : > { %1416 = vmatpush1.bf16.msra.mxu0 %v3987_v16  ;;  %1688 = vmatpush1.bf16.msra.mxu1 %v3987_v16  ;;  %v4015_v16 = vld [vmem:[%s4600_s1 + $0x3b0] ss:$8 sps:$4 sm:$0xff]  }
 0x11a   : > { %1417 = vmatprep.subr.bf16.mxu0 %v3994_v52  ;;  %1689 = vmatprep.subr.bf16.mxu1 %v3994_v52  ;;  %4727 = vst [vmem:[#allocation27_spill] sm:$0xff] %v4015_v16  ;;  %v4022_v52 = vld [vmem:[%s4600_s1 + $0x3c4] ss:$8 sps:$4 sm:$0xff]  }
 0x11b   : > { %4728 = vst [vmem:[#allocation28_spill] sm:$0xff] %v4022_v52 }
 0x11d   : > { %1418 = vmatpush1.bf16.msra.mxu0 %v4001_v19  ;;  %1690 = vmatpush1.bf16.msra.mxu1 %v4001_v19  ;;  %v4029_v19 = vld [vmem:[%s4600_s1 + $0x3c0] ss:$8 sps:$4 sm:$0xff]  }
 0x11e   : > { %1419 = vmatprep.subr.bf16.mxu0 %v4008_v47  ;;  %1691 = vmatprep.subr.bf16.mxu1 %v4008_v47  ;;  %4729 = vst [vmem:[#allocation29_spill] sm:$0xff] %v4029_v19  ;;  %v4036_v47 = vld [vmem:[%s4600_s1 + $0x3d4] ss:$8 sps:$4 sm:$0xff]  }
 0x11f   : > { %4730 = vst [vmem:[#allocation30_spill] sm:$0xff] %v4036_v47 }
 0x121   : > { %1420 = vmatpush1.bf16.msra.mxu0 %v4015_v16  ;;  %1692 = vmatpush1.bf16.msra.mxu1 %v4015_v16  ;;  %v4043_v16 = vld [vmem:[%s4600_s1 + $0x3d0] ss:$8 sps:$4 sm:$0xff]  }
 0x122   : > { %1421 = vmatprep.subr.bf16.mxu0 %v4022_v52  ;;  %1693 = vmatprep.subr.bf16.mxu1 %v4022_v52  ;;  %4731 = vst [vmem:[#allocation31_spill] sm:$0xff] %v4043_v16  ;;  %v4050_v52 = vld [vmem:[%s4600_s1 + $0x3e4] ss:$8 sps:$4 sm:$0xff]  }
 0x123   : > { %4732 = vst [vmem:[#allocation32_spill] sm:$0xff] %v4050_v52 }
 0x125   : > { %1422 = vmatpush1.bf16.msra.mxu0 %v4029_v19  ;;  %1694 = vmatpush1.bf16.msra.mxu1 %v4029_v19  ;;  %v4057_v19 = vld [vmem:[%s4600_s1 + $0x3e0] ss:$8 sps:$4 sm:$0xff]  }
 0x126   : > { %1423 = vmatprep.subr.bf16.mxu0 %v4036_v47  ;;  %1695 = vmatprep.subr.bf16.mxu1 %v4036_v47  ;;  %4733 = vst [vmem:[#allocation33_spill] sm:$0xff] %v4057_v19  ;;  %v4064_v47 = vld [vmem:[%s4600_s1 + $0x3f4] ss:$8 sps:$4 sm:$0xff]  }
 0x127   : > { %4734 = vst [vmem:[#allocation34_spill] sm:$0xff] %v4064_v47 }
 0x129   : > { %1424 = vmatpush1.bf16.msra.mxu0 %v4043_v16  ;;  %1696 = vmatpush1.bf16.msra.mxu1 %v4043_v16  ;;  %v4071_v16 = vld [vmem:[%s4600_s1 + $0x3f0] ss:$8 sps:$4 sm:$0xff]  }
 0x12a   : > { %1425 = vmatprep.subr.bf16.mxu0 %v4050_v52  ;;  %1697 = vmatprep.subr.bf16.mxu1 %v4050_v52  ;;  %4735 = vst [vmem:[#allocation35_spill] sm:$0xff] %v4071_v16  ;;  %v4078_v52 = vld [vmem:[%s4600_s1 + $0x404] ss:$8 sps:$4 sm:$0xff]  }
 0x12b   : > { %4736 = vst [vmem:[#allocation36_spill] sm:$0xff] %v4078_v52 }
 0x12d   : > { %1426 = vmatpush1.bf16.msra.mxu0 %v4057_v19  ;;  %1698 = vmatpush1.bf16.msra.mxu1 %v4057_v19  ;;  %v4087_v19 = vld [vmem:[%s4600_s1 + $0x400] ss:$8 sps:$4 sm:$0xff]  }
 0x12e   : > { %1427 = vmatprep.subr.bf16.mxu0 %v4064_v47  ;;  %1699 = vmatprep.subr.bf16.mxu1 %v4064_v47  ;;  %4737 = vst [vmem:[#allocation37_spill] sm:$0xff] %v4087_v19  ;;  %v4094_v47 = vld [vmem:[%s4600_s1 + $0x414] ss:$8 sps:$4 sm:$0xff]  }
 0x12f   : > { %4738 = vst [vmem:[#allocation38_spill] sm:$0xff] %v4094_v47 }
 0x131   : > { %1428 = vmatpush1.bf16.msra.mxu0 %v4071_v16  ;;  %1700 = vmatpush1.bf16.msra.mxu1 %v4071_v16  ;;  %v4101_v16 = vld [vmem:[%s4600_s1 + $0x410] ss:$8 sps:$4 sm:$0xff]  }
 0x132   : > { %1440 = vmatprep.subr.bf16.mxu0 %v4078_v52  ;;  %1712 = vmatprep.subr.bf16.mxu1 %v4078_v52  ;;  %4739 = vst [vmem:[#allocation39_spill] sm:$0xff] %v4101_v16  ;;  %v4108_v52 = vld [vmem:[%s4600_s1 + $0x424] ss:$8 sps:$4 sm:$0xff]  }
 0x133   : > { %4740 = vst [vmem:[#allocation40_spill] sm:$0xff] %v4108_v52 }
 0x134   : > { %1430 = vmatmul.mubr.bf16.vlgmr.msra.gmra.mrb[0].mxu0 %v3030_v18  ;;  %1702 = vmatmul.mubr.bf16.vlgmr.msra.gmra.mrb[0].mxu1 %v3035_v17  ;;  %v4671_v18 = vmov 0   ;;  %v4117_v17 = vld [vmem:[%s4600_s1 + $0x420] ss:$8 sps:$4 sm:$0xff]  }
 0x135   : > { %1441 = vmatpush1.bf16.msra.mxu0 %v4087_v19  ;;  %1713 = vmatpush1.bf16.msra.mxu1 %v4087_v19  ;;  %4741 = vst [vmem:[#allocation41_spill] sm:$0xff] %v4117_v17  ;;  %v3088_v19 = vld [vmem:[%s4600_s1 + $0x4] ss:$8 sps:$4 sm:$0xff]  }
 0x136   : > { %1442 = vmatprep.subr.bf16.mxu0 %v4094_v47  ;;  %1714 = vmatprep.subr.bf16.mxu1 %v4094_v47  ;;  %v4124_v47 = vld [vmem:[%s4600_s1 + $0x434] ss:$8 sps:$4 sm:$0xff]  }
 0x137   : > { %1472 = vmatprep.mubr.bf16.mxu0 %v4671_v18  ;;  %1744 = vmatprep.mubr.bf16.mxu1 %v4671_v18  ;;  %4742 = vst [vmem:[#allocation42_spill] sm:$0xff] %v4124_v47  ;;  %v4131_v18 = vld [vmem:[%s4600_s1 + $0x430] ss:$8 sps:$4 sm:$0xff]  }
 0x138   : > { %4743 = vst [vmem:[#allocation43_spill] sm:$0xff] %v4131_v18 }
 0x139   : > { %1443 = vmatpush1.bf16.msra.mxu0 %v4101_v16  ;;  %1715 = vmatpush1.bf16.msra.mxu1 %v4101_v16  ;;  %v3060_v16 = vld [vmem:[%s3356_s8 + $0x20] ss:$36 sps:$4 sm:$0xff]  }
 0x13a   : > { %1444 = vmatprep.subr.bf16.mxu0 %v4108_v52  ;;  %1716 = vmatprep.subr.bf16.mxu1 %v4108_v52  ;;  %v4138_v52 = vld [vmem:[%s4600_s1 + $0x444] ss:$8 sps:$4 sm:$0xff]  }
 0x13b   : > { %4744 = vst [vmem:[#allocation44_spill] sm:$0xff] %v4138_v52 }
 0x13d   : > { %1445 = vmatpush1.bf16.msra.mxu0 %v4117_v17  ;;  %1717 = vmatpush1.bf16.msra.mxu1 %v4117_v17  ;;  %v4145_v17 = vld [vmem:[%s4600_s1 + $0x440] ss:$8 sps:$4 sm:$0xff]  }
 0x13e   : > { %1446 = vmatprep.subr.bf16.mxu0 %v4124_v47  ;;  %1718 = vmatprep.subr.bf16.mxu1 %v4124_v47  ;;  %4745 = vst [vmem:[#allocation45_spill] sm:$0xff] %v4145_v17  ;;  %v4152_v47 = vld [vmem:[%s4600_s1 + $0x454] ss:$8 sps:$4 sm:$0xff]  }
 0x13f   : > { %4746 = vst [vmem:[#allocation46_spill] sm:$0xff] %v4152_v47 }
 0x141   : > { %1447 = vmatpush1.bf16.msra.mxu0 %v4131_v18  ;;  %1719 = vmatpush1.bf16.msra.mxu1 %v4131_v18  ;;  %v4159_v18 = vld [vmem:[%s4600_s1 + $0x450] ss:$8 sps:$4 sm:$0xff]  }
 0x142   : > { %1448 = vmatprep.subr.bf16.mxu0 %v4138_v52  ;;  %1720 = vmatprep.subr.bf16.mxu1 %v4138_v52  ;;  %4747 = vst [vmem:[#allocation47_spill] sm:$0xff] %v4159_v18  ;;  %v4166_v52 = vld [vmem:[%s4600_s1 + $0x464] ss:$8 sps:$4 sm:$0xff]  }
 0x143   : > { %4748 = vst [vmem:[#allocation48_spill] sm:$0xff] %v4166_v52 }
 0x145   : > { %1449 = vmatpush1.bf16.msra.mxu0 %v4145_v17  ;;  %1721 = vmatpush1.bf16.msra.mxu1 %v4145_v17  ;;  %v4173_v17 = vld [vmem:[%s4600_s1 + $0x460] ss:$8 sps:$4 sm:$0xff]  }
 0x146   : > { %1450 = vmatprep.subr.bf16.mxu0 %v4152_v47  ;;  %1722 = vmatprep.subr.bf16.mxu1 %v4152_v47  ;;  %4749 = vst [vmem:[#allocation49_spill] sm:$0xff] %v4173_v17  ;;  %v4180_v47 = vld [vmem:[%s4600_s1 + $0x474] ss:$8 sps:$4 sm:$0xff]  }
 0x147   : > { %4750 = vst [vmem:[#allocation50_spill] sm:$0xff] %v4180_v47 }
 0x149   : > { %1451 = vmatpush1.bf16.msra.mxu0 %v4159_v18  ;;  %1723 = vmatpush1.bf16.msra.mxu1 %v4159_v18  ;;  %v4187_v18 = vld [vmem:[%s4600_s1 + $0x470] ss:$8 sps:$4 sm:$0xff]  }
 0x14a   : > { %1452 = vmatprep.subr.bf16.mxu0 %v4166_v52  ;;  %1724 = vmatprep.subr.bf16.mxu1 %v4166_v52  ;;  %4751 = vst [vmem:[#allocation51_spill] sm:$0xff] %v4187_v18  ;;  %v3061_v52 = vld [vmem:[%s3356_s8 + $0x68] ss:$36 sps:$4 sm:$0xff]  }
 0x14d   : > { %1453 = vmatpush1.bf16.msra.mxu0 %v4173_v17  ;;  %1725 = vmatpush1.bf16.msra.mxu1 %v4173_v17  ;;  %v3064_v17 = vld [vmem:[%s3356_s8 + $0x94] ss:$36 sps:$4 sm:$0xff]  }
 0x14e   : > { %1454 = vmatprep.subr.bf16.mxu0 %v4180_v47  ;;  %1726 = vmatprep.subr.bf16.mxu1 %v4180_v47  ;;  %v3089_v47 = vld [vmem:[%s4600_s1] ss:$8 sps:$4 sm:$0xff]  }
 0x151   : > { %1455 = vmatpush1.bf16.msra.mxu0 %v4187_v18  ;;  %1727 = vmatpush1.bf16.msra.mxu1 %v4187_v18  ;;  %v3090_v18 = vld [vmem:[%s4600_s1 + $0x14] ss:$8 sps:$4 sm:$0xff]  }
 0x152   : > { %1816 = vmatprep.subr.bf16.mxu0 %v3088_v19  ;;  %2092 = vmatprep.subr.bf16.mxu1 %v3088_v19  ;;  %v3091_v19 = vld [vmem:[%s4600_s1 + $0x10] ss:$8 sps:$4 sm:$0xff]  }
 0x154   : > { %1473 = vmatmul.mubr.bf16.vlgmr.msra.gmra.mrb[0].mxu0 %v3060_v16  ;;  %1745 = vmatmul.mubr.bf16.vlgmr.msra.gmra.mrb[0].mxu1 %v3061_v52  ;;  %v3092_v16 = vld [vmem:[%s4600_s1 + $0x24] ss:$8 sps:$4 sm:$0xff]   ;;  %v3095_v52 = vld [vmem:[%s4600_s1 + $0x30] ss:$8 sps:$4 sm:$0xff]  }
 0x155   : > { %1817 = vmatpush1.bf16.msra.mxu0 %v3089_v47  ;;  %2093 = vmatpush1.bf16.msra.mxu1 %v3089_v47  ;;  %v3093_v47 = vld [vmem:[%s4600_s1 + $0x20] ss:$8 sps:$4 sm:$0xff]  }
 0x156   : > { %1818 = vmatprep.subr.bf16.mxu0 %v3090_v18  ;;  %2094 = vmatprep.subr.bf16.mxu1 %v3090_v18  ;;  %v3096_v18 = vld [vmem:[%s4600_s1 + $0x44] ss:$8 sps:$4 sm:$0xff]  }
 0x157   : > { %1848 = vmatprep.mubr.bf16.mxu0 %v3064_v17  ;;  %2124 = vmatprep.mubr.bf16.mxu1 %v3067_v51  ;;  %v3094_v51 = vld [vmem:[%s4600_s1 + $0x34] ss:$8 sps:$4 sm:$0xff]   ;;  %v3097_v17 = vld [vmem:[%s4600_s1 + $0x40] ss:$8 sps:$4 sm:$0xff]  }
 0x159   : > { %1819 = vmatpush1.bf16.msra.mxu0 %v3091_v19  ;;  %2095 = vmatpush1.bf16.msra.mxu1 %v3091_v19  ;;  %v3098_v19 = vld [vmem:[%s4600_s1 + $0x54] ss:$8 sps:$4 sm:$0xff]  }
 0x15a   : > { %1820 = vmatprep.subr.bf16.mxu0 %v3092_v16  ;;  %2096 = vmatprep.subr.bf16.mxu1 %v3092_v16  ;;  %v3099_v16 = vld [vmem:[%s4600_s1 + $0x50] ss:$8 sps:$4 sm:$0xff]  }
 0x15d   : > { %1821 = vmatpush1.bf16.msra.mxu0 %v3093_v47  ;;  %2097 = vmatpush1.bf16.msra.mxu1 %v3093_v47  ;;  %v3100_v47 = vld [vmem:[%s4600_s1 + $0x64] ss:$8 sps:$4 sm:$0xff]  }
 0x15e   : > { %1822 = vmatprep.subr.bf16.mxu0 %v3094_v51  ;;  %2098 = vmatprep.subr.bf16.mxu1 %v3094_v51  ;;  %v3101_v51 = vld [vmem:[%s4600_s1 + $0x60] ss:$8 sps:$4 sm:$0xff]  }
 0x161   : > { %1823 = vmatpush1.bf16.msra.mxu0 %v3095_v52  ;;  %2099 = vmatpush1.bf16.msra.mxu1 %v3095_v52  ;;  %v3102_v52 = vld [vmem:[%s4600_s1 + $0x74] ss:$8 sps:$4 sm:$0xff]  }
 0x162   : > { %1824 = vmatprep.subr.bf16.mxu0 %v3096_v18  ;;  %2100 = vmatprep.subr.bf16.mxu1 %v3096_v18  ;;  %v3103_v18 = vld [vmem:[%s4600_s1 + $0x70] ss:$8 sps:$4 sm:$0xff]  }
 0x165   : > { %1825 = vmatpush1.bf16.msra.mxu0 %v3097_v17  ;;  %2101 = vmatpush1.bf16.msra.mxu1 %v3097_v17  ;;  %v3104_v17 = vld [vmem:[%s4600_s1 + $0x84] ss:$8 sps:$4 sm:$0xff]  }
 0x166   : > { %1826 = vmatprep.subr.bf16.mxu0 %v3098_v19  ;;  %2102 = vmatprep.subr.bf16.mxu1 %v3098_v19  ;;  %v3105_v19 = vld [vmem:[%s4600_s1 + $0x80] ss:$8 sps:$4 sm:$0xff]  }
 0x169   : > { %1827 = vmatpush1.bf16.msra.mxu0 %v3099_v16  ;;  %2103 = vmatpush1.bf16.msra.mxu1 %v3099_v16  ;;  %v3106_v16 = vld [vmem:[%s4600_s1 + $0x94] ss:$8 sps:$4 sm:$0xff]  }
 0x16a   : > { %1828 = vmatprep.subr.bf16.mxu0 %v3100_v47  ;;  %2104 = vmatprep.subr.bf16.mxu1 %v3100_v47  ;;  %v3107_v47 = vld [vmem:[%s4600_s1 + $0x90] ss:$8 sps:$4 sm:$0xff]  }
 0x16d   : > { %1829 = vmatpush1.bf16.msra.mxu0 %v3101_v51  ;;  %2105 = vmatpush1.bf16.msra.mxu1 %v3101_v51  ;;  %v3108_v51 = vld [vmem:[%s4600_s1 + $0xa4] ss:$8 sps:$4 sm:$0xff]  }
 0x16e   : > { %1830 = vmatprep.subr.bf16.mxu0 %v3102_v52  ;;  %2106 = vmatprep.subr.bf16.mxu1 %v3102_v52  ;;  %v3109_v52 = vld [vmem:[%s4600_s1 + $0xa0] ss:$8 sps:$4 sm:$0xff]  }
 0x171   : > { %1831 = vmatpush1.bf16.msra.mxu0 %v3103_v18  ;;  %2107 = vmatpush1.bf16.msra.mxu1 %v3103_v18  ;;  %v3110_v18 = vld [vmem:[%s4600_s1 + $0xb4] ss:$8 sps:$4 sm:$0xff]  }
 0x172   : > { %1832 = vmatprep.subr.bf16.mxu0 %v3104_v17  ;;  %2108 = vmatprep.subr.bf16.mxu1 %v3104_v17  ;;  %v3111_v17 = vld [vmem:[%s4600_s1 + $0xb0] ss:$8 sps:$4 sm:$0xff]  }
 0x175   : > { %1833 = vmatpush1.bf16.msra.mxu0 %v3105_v19  ;;  %2109 = vmatpush1.bf16.msra.mxu1 %v3105_v19  ;;  %v3112_v19 = vld [vmem:[%s4600_s1 + $0xc4] ss:$8 sps:$4 sm:$0xff]  }
 0x176   : > { %1834 = vmatprep.subr.bf16.mxu0 %v3106_v16  ;;  %2110 = vmatprep.subr.bf16.mxu1 %v3106_v16  ;;  %v3113_v16 = vld [vmem:[%s4600_s1 + $0xc0] ss:$8 sps:$4 sm:$0xff]  }
 0x179   : > { %1835 = vmatpush1.bf16.msra.mxu0 %v3107_v47  ;;  %2111 = vmatpush1.bf16.msra.mxu1 %v3107_v47  ;;  %v3114_v47 = vld [vmem:[%s4600_s1 + $0xd4] ss:$8 sps:$4 sm:$0xff]  }
 0x17a   : > { %1836 = vmatprep.subr.bf16.mxu0 %v3108_v51  ;;  %2112 = vmatprep.subr.bf16.mxu1 %v3108_v51  ;;  %v3115_v51 = vld [vmem:[%s4600_s1 + $0xd0] ss:$8 sps:$4 sm:$0xff]  }
 0x17d   : > { %1837 = vmatpush1.bf16.msra.mxu0 %v3109_v52  ;;  %2113 = vmatpush1.bf16.msra.mxu1 %v3109_v52  ;;  %v3116_v52 = vld [vmem:[%s4600_s1 + $0xe4] ss:$8 sps:$4 sm:$0xff]  }
 0x17e   : > { %1838 = vmatprep.subr.bf16.mxu0 %v3110_v18  ;;  %2114 = vmatprep.subr.bf16.mxu1 %v3110_v18  ;;  %v3117_v18 = vld [vmem:[%s4600_s1 + $0xe0] ss:$8 sps:$4 sm:$0xff]  }
 0x181   : > { %1839 = vmatpush1.bf16.msra.mxu0 %v3111_v17  ;;  %2115 = vmatpush1.bf16.msra.mxu1 %v3111_v17  ;;  %v3118_v17 = vld [vmem:[%s4600_s1 + $0xf4] ss:$8 sps:$4 sm:$0xff]  }
 0x182   : > { %1840 = vmatprep.subr.bf16.mxu0 %v3112_v19  ;;  %2116 = vmatprep.subr.bf16.mxu1 %v3112_v19  ;;  %v3062_v19 = vld [vmem:[%s3356_s8 + $0x90] ss:$36 sps:$4 sm:$0xff]  }
 0x185   : > { %1841 = vmatpush1.bf16.msra.mxu0 %v3113_v16  ;;  %2117 = vmatpush1.bf16.msra.mxu1 %v3113_v16  ;;  %v3065_v16 = vld [vmem:[%s3356_s8 + $0xd8] ss:$36 sps:$4 sm:$0xff]  }
 0x186   : > { %1842 = vmatprep.subr.bf16.mxu0 %v3114_v47  ;;  %2118 = vmatprep.subr.bf16.mxu1 %v3114_v47  ;;  %v3119_v47 = vld [vmem:[%s4600_s1 + $0xf0] ss:$8 sps:$4 sm:$0xff]  }
 0x189   : > { %1843 = vmatpush1.bf16.msra.mxu0 %v3115_v51  ;;  %2119 = vmatpush1.bf16.msra.mxu1 %v3115_v51  ;;  %v3120_v51 = vld [vmem:[%s4600_s1 + $0x104] ss:$8 sps:$4 sm:$0xff]  }
 0x18a   : > { %1844 = vmatprep.subr.bf16.mxu0 %v3116_v52  ;;  %2120 = vmatprep.subr.bf16.mxu1 %v3116_v52  ;;  %v3070_v52 = vld [vmem:[%s3356_s8 + $0x9c] ss:$36 sps:$4 sm:$0xff]  }
 0x18d   : > { %1845 = vmatpush1.bf16.msra.mxu0 %v3117_v18  ;;  %2121 = vmatpush1.bf16.msra.mxu1 %v3117_v18  ;;  %v3073_v18 = vld [vmem:[%s3356_s8 + $0xe4] ss:$36 sps:$4 sm:$0xff]  }
 0x18e   : > { %1846 = vmatprep.subr.bf16.mxu0 %v3118_v17  ;;  %2122 = vmatprep.subr.bf16.mxu1 %v3118_v17  ;;  %v3121_v17 = vld [vmem:[%s4600_s1 + $0x100] ss:$8 sps:$4 sm:$0xff]  }
 0x191   : > { %1847 = vmatpush1.bf16.msra.mxu0 %v3119_v47  ;;  %2123 = vmatpush1.bf16.msra.mxu1 %v3119_v47  ;;  %v3122_v47 = vld [vmem:[%s4600_s1 + $0x114] ss:$8 sps:$4 sm:$0xff]  }
 0x192   : > { %1859 = vmatprep.subr.bf16.mxu0 %v3120_v51  ;;  %2135 = vmatprep.subr.bf16.mxu1 %v3120_v51  ;;  %v3123_v51 = vld [vmem:[%s4600_s1 + $0x110] ss:$8 sps:$4 sm:$0xff]  }
 0x194   : > { %1849 = vmatmul.mubr.bf16.vlgmr.msra.gmra.mrb[4].mxu0 %v3062_v19  ;;  %2125 = vmatmul.mubr.bf16.vlgmr.msra.gmra.mrb[4].mxu1 %v3065_v16  ;;  %v3124_v19 = vld [vmem:[%s4600_s1 + $0x124] ss:$8 sps:$4 sm:$0xff]   ;;  %v3125_v16 = vld [vmem:[%s4600_s1 + $0x120] ss:$8 sps:$4 sm:$0xff]  }
 0x195   : > { %1860 = vmatpush1.bf16.msra.mxu0 %v3121_v17  ;;  %2136 = vmatpush1.bf16.msra.mxu1 %v3121_v17  ;;  %v4789_v17 = vld [vmem:[#allocation39_spill] sm:$0xff] }
 0x196   : > { %1861 = vmatprep.subr.bf16.mxu0 %v3122_v47  ;;  %2137 = vmatprep.subr.bf16.mxu1 %v3122_v47  ;;  %v4790_v47 = vld [vmem:[#allocation40_spill] sm:$0xff] }
 0x197   : > { %1891 = vmatprep.mubr.bf16.mxu0 %v3070_v52  ;;  %2167 = vmatprep.mubr.bf16.mxu1 %v3073_v18  ;;  %v4787_v52 = vld [vmem:[#allocation38_spill] sm:$0xff]  ;;  %v4788_v18 = vmov 0  }
 0x199   : > { %1862 = vmatpush1.bf16.msra.mxu0 %v3123_v51  ;;  %2138 = vmatpush1.bf16.msra.mxu1 %v3123_v51  ;;  %v4791_v51 = vld [vmem:[#allocation41_spill] sm:$0xff] }
 0x19a   : > { %1863 = vmatprep.subr.bf16.mxu0 %v3124_v19  ;;  %2139 = vmatprep.subr.bf16.mxu1 %v3124_v19  ;;  %v4792_v19 = vld [vmem:[#allocation42_spill] sm:$0xff] }
 0x19d   : > { %1864 = vmatpush1.bf16.msra.mxu0 %v3125_v16  ;;  %2140 = vmatpush1.bf16.msra.mxu1 %v3125_v16  ;;  %v4793_v16 = vld [vmem:[#allocation43_spill] sm:$0xff] }
 0x19e   : > { %1865 = vmatprep.subr.bf16.mxu0 %v3442_v20  ;;  %2141 = vmatprep.subr.bf16.mxu1 %v3442_v20  ;;  %v3068_v20 = vld [vmem:[%s3356_s8 + $0x98] ss:$36 sps:$4 sm:$0xff]  }
 0x1a1   : > { %1866 = vmatpush1.bf16.msra.mxu0 %v3447_v21  ;;  %2142 = vmatpush1.bf16.msra.mxu1 %v3447_v21  ;;  %v3071_v21 = vld [vmem:[%s3356_s8 + $0xe0] ss:$36 sps:$4 sm:$0xff]  }
 0x1a2   : > { %1867 = vmatprep.subr.bf16.mxu0 %v3454_v22  ;;  %2143 = vmatprep.subr.bf16.mxu1 %v3454_v22  ;;  %v3076_v22 = vld [vmem:[%s3356_s8 + $0xa4] ss:$36 sps:$4 sm:$0xff]  }
 0x1a5   : > { %1868 = vmatpush1.bf16.msra.mxu0 %v3461_v23  ;;  %2144 = vmatpush1.bf16.msra.mxu1 %v3461_v23  ;;  %v3079_v23 = vld [vmem:[%s3356_s8 + $0xec] ss:$36 sps:$4 sm:$0xff]  }
 0x1a6   : > { %1869 = vmatprep.subr.bf16.mxu0 %v3468_v24  ;;  %2145 = vmatprep.subr.bf16.mxu1 %v3468_v24  ;;  %v4752_v24 = vld [vmem:[#allocation3_spill] sm:$0xff] }
 0x1a9   : > { %1870 = vmatpush1.bf16.msra.mxu0 %v3475_v25  ;;  %2146 = vmatpush1.bf16.msra.mxu1 %v3475_v25  ;;  %v3074_v25 = vld [vmem:[%s3356_s8 + $0xa0] ss:$36 sps:$4 sm:$0xff]  }
 0x1aa   : > { %1871 = vmatprep.subr.bf16.mxu0 %v3482_v26  ;;  %2147 = vmatprep.subr.bf16.mxu1 %v3482_v26  ;;  %v3077_v26 = vld [vmem:[%s3356_s8 + $0xe8] ss:$36 sps:$4 sm:$0xff]  }
 0x1ad   : > { %1872 = vmatpush1.bf16.msra.mxu0 %v3489_v27  ;;  %2148 = vmatpush1.bf16.msra.mxu1 %v3489_v27  ;;  %v4753_v27 = vld [vmem:[#allocation4_spill] sm:$0xff] }
 0x1ae   : > { %1873 = vmatprep.subr.bf16.mxu0 %v3496_v28  ;;  %2149 = vmatprep.subr.bf16.mxu1 %v3496_v28  ;;  %v4754_v28 = vld [vmem:[#allocation5_spill] sm:$0xff] }
 0x1b1   : > { %1874 = vmatpush1.bf16.msra.mxu0 %v3503_v29  ;;  %2150 = vmatpush1.bf16.msra.mxu1 %v3503_v29  ;;  %v3082_v29 = vld [vmem:[%s3356_s8 + $0xac] ss:$36 sps:$4 sm:$0xff]  }
 0x1b2   : > { %1875 = vmatprep.subr.bf16.mxu0 %v3510_v30  ;;  %2151 = vmatprep.subr.bf16.mxu1 %v3510_v30  ;;  %v3085_v30 = vld [vmem:[%s3356_s8 + $0xf4] ss:$36 sps:$4 sm:$0xff]  }
 0x1b5   : > { %1876 = vmatpush1.bf16.msra.mxu0 %v3517_v31  ;;  %2152 = vmatpush1.bf16.msra.mxu1 %v3517_v31  ;;  %v4755_v31 = vld [vmem:[#allocation6_spill] sm:$0xff] }
 0x1b6   : > { %1877 = vmatprep.subr.bf16.mxu0 %v3524_v32  ;;  %2153 = vmatprep.subr.bf16.mxu1 %v3524_v32  ;;  %v4756_v32 = vld [vmem:[#allocation7_spill] sm:$0xff] }
 0x1b9   : > { %1878 = vmatpush1.bf16.msra.mxu0 %v3531_v33  ;;  %2154 = vmatpush1.bf16.msra.mxu1 %v3531_v33  ;;  %v4757_v33 = vld [vmem:[#allocation8_spill] sm:$0xff] }
 0x1ba   : > { %1879 = vmatprep.subr.bf16.mxu0 %v3538_v34  ;;  %2155 = vmatprep.subr.bf16.mxu1 %v3538_v34  ;;  %v4758_v34 = vld [vmem:[#allocation9_spill] sm:$0xff] }
 0x1bd   : > { %1880 = vmatpush1.bf16.msra.mxu0 %v3545_v35  ;;  %2156 = vmatpush1.bf16.msra.mxu1 %v3545_v35  ;;  %v4759_v35 = vld [vmem:[#allocation10_spill] sm:$0xff] }
 0x1be   : > { %1881 = vmatprep.subr.bf16.mxu0 %v3552_v36  ;;  %2157 = vmatprep.subr.bf16.mxu1 %v3552_v36  ;;  %v4760_v36 = vld [vmem:[#allocation11_spill] sm:$0xff] }
 0x1c1   : > { %1882 = vmatpush1.bf16.msra.mxu0 %v3559_v37  ;;  %2158 = vmatpush1.bf16.msra.mxu1 %v3559_v37  ;;  %v4761_v37 = vld [vmem:[#allocation12_spill] sm:$0xff] }
 0x1c2   : > { %1883 = vmatprep.subr.bf16.mxu0 %v3566_v38  ;;  %2159 = vmatprep.subr.bf16.mxu1 %v3566_v38  ;;  %v4762_v38 = vld [vmem:[#allocation13_spill] sm:$0xff] }
 0x1c5   : > { %1884 = vmatpush1.bf16.msra.mxu0 %v3573_v39  ;;  %2160 = vmatpush1.bf16.msra.mxu1 %v3573_v39  ;;  %v4763_v39 = vld [vmem:[#allocation14_spill] sm:$0xff] }
 0x1c6   : > { %1885 = vmatprep.subr.bf16.mxu0 %v3580_v40  ;;  %2161 = vmatprep.subr.bf16.mxu1 %v3580_v40 }
 0x1c9   : > { %1886 = vmatpush1.bf16.msra.mxu0 %v3587_v41  ;;  %2162 = vmatpush1.bf16.msra.mxu1 %v3587_v41 }
 0x1ca   : > { %1887 = vmatprep.subr.bf16.mxu0 %v3594_v42  ;;  %2163 = vmatprep.subr.bf16.mxu1 %v3594_v42 }
 0x1cd   : > { %1888 = vmatpush1.bf16.msra.mxu0 %v3601_v43  ;;  %2164 = vmatpush1.bf16.msra.mxu1 %v3601_v43 }
 0x1ce   : > { %1889 = vmatprep.subr.bf16.mxu0 %v3608_v44  ;;  %2165 = vmatprep.subr.bf16.mxu1 %v3608_v44 }
 0x1d1   : > { %1890 = vmatpush1.bf16.msra.mxu0 %v3615_v45  ;;  %2166 = vmatpush1.bf16.msra.mxu1 %v3615_v45 }
 0x1d2   : > { %1902 = vmatprep.subr.bf16.mxu0 %v3622_v46  ;;  %2178 = vmatprep.subr.bf16.mxu1 %v3622_v46 }
 0x1d4   : > { %1892 = vmatmul.mubr.bf16.vlgmr.msra.gmra.mrb[4].mxu0 %v3068_v20  ;;  %2168 = vmatmul.mubr.bf16.vlgmr.msra.gmra.mrb[4].mxu1 %v3071_v21  ;;  %v4794_v20 = vld [vmem:[#allocation44_spill] sm:$0xff]  ;;  %v4795_v21 = vld [vmem:[#allocation45_spill] sm:$0xff] }
 0x1d5   : > { %1903 = vmatpush1.bf16.msra.mxu0 %v3631_v49  ;;  %2179 = vmatpush1.bf16.msra.mxu1 %v3631_v49 }
 0x1d6   : > { %1904 = vmatprep.subr.bf16.mxu0 %v3638_v50  ;;  %2180 = vmatprep.subr.bf16.mxu1 %v3638_v50  ;;  %v4764_v50 = vld [vmem:[#allocation15_spill] sm:$0xff] }
 0x1d7   : > { %1934 = vmatprep.mubr.bf16.mxu0 %v3076_v22  ;;  %2210 = vmatprep.mubr.bf16.mxu1 %v3079_v23  ;;  %v4796_v22 = vld [vmem:[#allocation46_spill] sm:$0xff]  ;;  %v4797_v23 = vld [vmem:[#allocation47_spill] sm:$0xff] }
 0x1d9   : > { %1905 = vmatpush1.bf16.msra.mxu0 %v3647_v53  ;;  %2181 = vmatpush1.bf16.msra.mxu1 %v3647_v53 }
 0x1da   : > { %1906 = vmatprep.subr.bf16.mxu0 %v3654_v54  ;;  %2182 = vmatprep.subr.bf16.mxu1 %v3654_v54 }
 0x1dd   : > { %1907 = vmatpush1.bf16.msra.mxu0 %v3661_v55  ;;  %2183 = vmatpush1.bf16.msra.mxu1 %v3661_v55 }
 0x1de   : > { %1908 = vmatprep.subr.bf16.mxu0 %v3668_v56  ;;  %2184 = vmatprep.subr.bf16.mxu1 %v3668_v56  ;;  %v4765_v56 = vld [vmem:[#allocation16_spill] sm:$0xff] }
 0x1e1   : > { %1909 = vmatpush1.bf16.msra.mxu0 %v3675_v57  ;;  %2185 = vmatpush1.bf16.msra.mxu1 %v3675_v57 }
 0x1e2   : > { %1910 = vmatprep.subr.bf16.mxu0 %v3682_v58  ;;  %2186 = vmatprep.subr.bf16.mxu1 %v3682_v58  ;;  %v4766_v58 = vld [vmem:[#allocation17_spill] sm:$0xff] }
 0x1e5   : > { %1911 = vmatpush1.bf16.msra.mxu0 %v3689_v59  ;;  %2187 = vmatpush1.bf16.msra.mxu1 %v3689_v59  ;;  %v4767_v59 = vld [vmem:[#allocation18_spill] sm:$0xff] }
 0x1e6   : > { %1912 = vmatprep.subr.bf16.mxu0 %v3696_v60  ;;  %2188 = vmatprep.subr.bf16.mxu1 %v3696_v60  ;;  %v4768_v60 = vld [vmem:[#allocation19_spill] sm:$0xff] }
 0x1e9   : > { %1913 = vmatpush1.bf16.msra.mxu0 %v3703_v61  ;;  %2189 = vmatpush1.bf16.msra.mxu1 %v3703_v61  ;;  %v4769_v61 = vld [vmem:[#allocation20_spill] sm:$0xff] }
 0x1ea   : > { %1914 = vmatprep.subr.bf16.mxu0 %v3710_v62  ;;  %2190 = vmatprep.subr.bf16.mxu1 %v3710_v62  ;;  %v4770_v62 = vld [vmem:[#allocation21_spill] sm:$0xff] }
 0x1ed   : > { %1915 = vmatpush1.bf16.msra.mxu0 %v3717_v63  ;;  %2191 = vmatpush1.bf16.msra.mxu1 %v3717_v63  ;;  %v4771_v63 = vld [vmem:[#allocation22_spill] sm:$0xff] }
 0x1ee   : > { %1916 = vmatprep.subr.bf16.mxu0 %v3724_v0  ;;  %2192 = vmatprep.subr.bf16.mxu1 %v3724_v0  ;;  %v4772_v0 = vld [vmem:[#allocation23_spill] sm:$0xff] }
 0x1f1   : > { %1917 = vmatpush1.bf16.msra.mxu0 %v3731_v1  ;;  %2193 = vmatpush1.bf16.msra.mxu1 %v3731_v1  ;;  %v4773_v1 = vld [vmem:[#allocation24_spill] sm:$0xff] }
 0x1f2   : > { %1918 = vmatprep.subr.bf16.mxu0 %v3738_v2  ;;  %2194 = vmatprep.subr.bf16.mxu1 %v3738_v2  ;;  %v4774_v2 = vld [vmem:[#allocation25_spill] sm:$0xff] }
 0x1f5   : > { %1919 = vmatpush1.bf16.msra.mxu0 %v3745_v3  ;;  %2195 = vmatpush1.bf16.msra.mxu1 %v3745_v3  ;;  %v4775_v3 = vld [vmem:[#allocation26_spill] sm:$0xff] }
 0x1f6   : > { %1920 = vmatprep.subr.bf16.mxu0 %v3752_v4  ;;  %2196 = vmatprep.subr.bf16.mxu1 %v3752_v4  ;;  %v4776_v4 = vld [vmem:[#allocation27_spill] sm:$0xff] }
 0x1f9   : > { %1921 = vmatpush1.bf16.msra.mxu0 %v3759_v5  ;;  %2197 = vmatpush1.bf16.msra.mxu1 %v3759_v5  ;;  %v4777_v5 = vld [vmem:[#allocation28_spill] sm:$0xff] }
 0x1fa   : > { %1922 = vmatprep.subr.bf16.mxu0 %v3766_v6  ;;  %2198 = vmatprep.subr.bf16.mxu1 %v3766_v6  ;;  %v4778_v6 = vld [vmem:[#allocation29_spill] sm:$0xff] }
 0x1fd   : > { %1923 = vmatpush1.bf16.msra.mxu0 %v3773_v7  ;;  %2199 = vmatpush1.bf16.msra.mxu1 %v3773_v7  ;;  %v4779_v7 = vld [vmem:[#allocation30_spill] sm:$0xff] }
 0x1fe   : > { %1924 = vmatprep.subr.bf16.mxu0 %v3780_v8  ;;  %2200 = vmatprep.subr.bf16.mxu1 %v3780_v8  ;;  %v4780_v8 = vld [vmem:[#allocation31_spill] sm:$0xff] }
 0x201   : > { %1925 = vmatpush1.bf16.msra.mxu0 %v3787_v9  ;;  %2201 = vmatpush1.bf16.msra.mxu1 %v3787_v9  ;;  %v4781_v9 = vld [vmem:[#allocation32_spill] sm:$0xff] }
 0x202   : > { %1926 = vmatprep.subr.bf16.mxu0 %v3794_v10  ;;  %2202 = vmatprep.subr.bf16.mxu1 %v3794_v10  ;;  %v4782_v10 = vld [vmem:[#allocation33_spill] sm:$0xff] }
 0x205   : > { %1927 = vmatpush1.bf16.msra.mxu0 %v3801_v11  ;;  %2203 = vmatpush1.bf16.msra.mxu1 %v3801_v11  ;;  %v4783_v11 = vld [vmem:[#allocation34_spill] sm:$0xff] }
 0x206   : > { %1928 = vmatprep.subr.bf16.mxu0 %v3808_v12  ;;  %2204 = vmatprep.subr.bf16.mxu1 %v3808_v12  ;;  %v3080_v12 = vld [vmem:[%s3356_s8 + $0xa8] ss:$36 sps:$4 sm:$0xff]  }
 0x209   : > { %1929 = vmatpush1.bf16.msra.mxu0 %v3815_v13  ;;  %2205 = vmatpush1.bf16.msra.mxu1 %v3815_v13  ;;  %v3083_v13 = vld [vmem:[%s3356_s8 + $0xf0] ss:$36 sps:$4 sm:$0xff]  }
 0x20a   : > { %1930 = vmatprep.subr.bf16.mxu0 %v3822_v14  ;;  %2206 = vmatprep.subr.bf16.mxu1 %v3822_v14  ;;  %v4784_v14 = vld [vmem:[#allocation35_spill] sm:$0xff] }
 0x20d   : > { %1931 = vmatpush1.bf16.msra.mxu0 %v3829_v15  ;;  %2207 = vmatpush1.bf16.msra.mxu1 %v3829_v15  ;;  %v4785_v15 = vld [vmem:[#allocation36_spill] sm:$0xff] }
 0x20e   : > { %1932 = vmatprep.subr.bf16.mxu0 %v4752_v24  ;;  %2208 = vmatprep.subr.bf16.mxu1 %v4752_v24  ;;  %v4798_v24 = vld [vmem:[#allocation48_spill] sm:$0xff] }
 0x211   : > { %1933 = vmatpush1.bf16.msra.mxu0 %v4753_v27  ;;  %2209 = vmatpush1.bf16.msra.mxu1 %v4753_v27  ;;  %v3086_v27 = vld [vmem:[%s3356_s8 + $0xb0] ss:$36 sps:$4 sm:$0xff]  }
 0x212   : > { %1945 = vmatprep.subr.bf16.mxu0 %v4754_v28  ;;  %2221 = vmatprep.subr.bf16.mxu1 %v4754_v28  ;;  %v3087_v28 = vld [vmem:[%s3356_s8 + $0xf8] ss:$36 sps:$4 sm:$0xff]  }
 0x214   : > { %1935 = vmatmul.mubr.bf16.vlgmr.msra.gmra.mrb[4].mxu0 %v3074_v25  ;;  %2211 = vmatmul.mubr.bf16.vlgmr.msra.gmra.mrb[4].mxu1 %v3077_v26  ;;  %v4799_v25 = vld [vmem:[#allocation49_spill] sm:$0xff]  ;;  %v4800_v26 = vld [vmem:[#allocation50_spill] sm:$0xff] }
 0x215   : > { %1946 = vmatpush1.bf16.msra.mxu0 %v3859_v48  ;;  %2222 = vmatpush1.bf16.msra.mxu1 %v3859_v48  ;;  %v4786_v48 = vld [vmem:[#allocation37_spill] sm:$0xff] }
 0x216   : > { %1947 = vmatprep.subr.bf16.mxu0 %v4755_v31  ;;  %2223 = vmatprep.subr.bf16.mxu1 %v4755_v31 }
 0x217   : > { %1977 = vmatprep.mubr.bf16.mxu0 %v3082_v29  ;;  %2253 = vmatprep.mubr.bf16.mxu1 %v3085_v30  ;;  %v4801_v29 = vld [vmem:[#allocation51_spill] sm:$0xff]  ;;  %v2313_v30 = vlaneseq }
 0x219   : > { %1948 = vmatpush1.bf16.msra.mxu0 %v4756_v32  ;;  %2224 = vmatpush1.bf16.msra.mxu1 %v4756_v32  ;;  %v2314_v31 = vshrl.u32 %v2313_v30, 7 }
 0x21a   : > { %1949 = vmatprep.subr.bf16.mxu0 %v4757_v33  ;;  %2225 = vmatprep.subr.bf16.mxu1 %v4757_v33  ;;  %v2311_v33 = vld [vmem:[%s4601_s2] sm:$0x3] }
 0x21b   : > { %v2315_v32 = vsub.s32 0, %v2314_v31 }
 0x21d   : > { %1950 = vmatpush1.bf16.msra.mxu0 %v4758_v34  ;;  %2226 = vmatpush1.bf16.msra.mxu1 %v4758_v34  ;;  %v2319_v34 = vsub.s32 1, %v2314_v31 }
 0x21e   : > { %1951 = vmatprep.subr.bf16.mxu0 %v4759_v35  ;;  %2227 = vmatprep.subr.bf16.mxu1 %v4759_v35 }
 0x221   : > { %1952 = vmatpush1.bf16.msra.mxu0 %v4760_v36  ;;  %2228 = vmatpush1.bf16.msra.mxu1 %v4760_v36 }
 0x222   : > { %1953 = vmatprep.subr.bf16.mxu0 %v4761_v37  ;;  %2229 = vmatprep.subr.bf16.mxu1 %v4761_v37 }
 0x225   : > { %1954 = vmatpush1.bf16.msra.mxu0 %v4762_v38  ;;  %2230 = vmatpush1.bf16.msra.mxu1 %v4762_v38  ;;  %v2316_v38 = vrot.slane %v2311_v33, %v2315_v32 }
 0x226   : > { %1955 = vmatprep.subr.bf16.mxu0 %v4763_v39  ;;  %2231 = vmatprep.subr.bf16.mxu1 %v4763_v39 }
 0x227   : > { %v4461_v40 = vpop.f32.mrb[0].mxu0  ;;  %v4463_v41 = vpop.f32.mrb[0].mxu1 }
 0x228   : > { %v1755_v42 = vmax.f32 %v4461_v40, %v4463_v41  ;;  %v4467_v43 = vpop.f32.mrb[1].mxu0  ;;  %v4469_v44 = vpop.f32.mrb[1].mxu1 }
 0x229   : > { %v1756_v45 = vmax.f32 %v4467_v43, %v4469_v44  ;;  %v4473_v46 = vpop.f32.mrb[2].mxu0  ;;  %v4475_v49 = vpop.f32.mrb[2].mxu1  ;;  %1956 = vmatpush1.bf16.msra.mxu0 %v4764_v50  ;;  %2232 = vmatpush1.bf16.msra.mxu1 %v4764_v50 }
 0x22a   : > { %v1757_v53 = vmax.f32 %v4473_v46, %v4475_v49  ;;  %v4481_v54 = vpop.f32.mrb[3].mxu0  ;;  %v4483_v55 = vpop.f32.mrb[3].mxu1  ;;  %1957 = vmatprep.subr.bf16.mxu0 %v4765_v56  ;;  %2233 = vmatprep.subr.bf16.mxu1 %v4765_v56 }
 0x22b   : > { %v1758_v57 = vmax.f32 %v4481_v54, %v4483_v55 }
 0x22d   : > { %1958 = vmatpush1.bf16.msra.mxu0 %v4766_v58  ;;  %2234 = vmatpush1.bf16.msra.mxu1 %v4766_v58  ;;  %v2320_v58 = vrot.slane %v2311_v33, %v2319_v34 }
 0x22e   : > { %1959 = vmatprep.subr.bf16.mxu0 %v4767_v59  ;;  %2235 = vmatprep.subr.bf16.mxu1 %v4767_v59 }
 0x231   : > { %1960 = vmatpush1.bf16.msra.mxu0 %v4768_v60  ;;  %2236 = vmatpush1.bf16.msra.mxu1 %v4768_v60 }
 0x232   : > { %1961 = vmatprep.subr.bf16.mxu0 %v4769_v61  ;;  %2237 = vmatprep.subr.bf16.mxu1 %v4769_v61 }
 0x235   : > { %1962 = vmatpush1.bf16.msra.mxu0 %v4770_v62  ;;  %2238 = vmatpush1.bf16.msra.mxu1 %v4770_v62 }
 0x236   : > { %1963 = vmatprep.subr.bf16.mxu0 %v4771_v63  ;;  %2239 = vmatprep.subr.bf16.mxu1 %v4771_v63 }
 0x239   : > { %1964 = vmatpush1.bf16.msra.mxu0 %v4772_v0  ;;  %2240 = vmatpush1.bf16.msra.mxu1 %v4772_v0 }
 0x23a   : > { %1965 = vmatprep.subr.bf16.mxu0 %v4773_v1  ;;  %2241 = vmatprep.subr.bf16.mxu1 %v4773_v1 }
 0x23d   : > { %1966 = vmatpush1.bf16.msra.mxu0 %v4774_v2  ;;  %2242 = vmatpush1.bf16.msra.mxu1 %v4774_v2 }
 0x23e   : > { %1967 = vmatprep.subr.bf16.mxu0 %v4775_v3  ;;  %2243 = vmatprep.subr.bf16.mxu1 %v4775_v3 }
 0x241   : > { %1968 = vmatpush1.bf16.msra.mxu0 %v4776_v4  ;;  %2244 = vmatpush1.bf16.msra.mxu1 %v4776_v4 }
 0x242   : > { %1969 = vmatprep.subr.bf16.mxu0 %v4777_v5  ;;  %2245 = vmatprep.subr.bf16.mxu1 %v4777_v5 }
 0x245   : > { %1970 = vmatpush1.bf16.msra.mxu0 %v4778_v6  ;;  %2246 = vmatpush1.bf16.msra.mxu1 %v4778_v6 }
 0x246   : > { %1971 = vmatprep.subr.bf16.mxu0 %v4779_v7  ;;  %2247 = vmatprep.subr.bf16.mxu1 %v4779_v7 }
 0x249   : > { %1972 = vmatpush1.bf16.msra.mxu0 %v4780_v8  ;;  %2248 = vmatpush1.bf16.msra.mxu1 %v4780_v8 }
 0x24a   : > { %1973 = vmatprep.subr.bf16.mxu0 %v4781_v9  ;;  %2249 = vmatprep.subr.bf16.mxu1 %v4781_v9 }
 0x24d   : > { %1974 = vmatpush1.bf16.msra.mxu0 %v4782_v10  ;;  %2250 = vmatpush1.bf16.msra.mxu1 %v4782_v10 }
 0x24e   : > { %1975 = vmatprep.subr.bf16.mxu0 %v4783_v11  ;;  %2251 = vmatprep.subr.bf16.mxu1 %v4783_v11 }
 0x251   : > { %1976 = vmatpush1.bf16.msra.mxu0 %v4784_v14  ;;  %2252 = vmatpush1.bf16.msra.mxu1 %v4784_v14 }
 0x252   : > { %1988 = vmatprep.subr.bf16.mxu0 %v4785_v15  ;;  %2264 = vmatprep.subr.bf16.mxu1 %v4785_v15 }
 0x254   : > { %1978 = vmatmul.mubr.bf16.vlgmr.msra.gmra.mrb[4].mxu0 %v3080_v12  ;;  %2254 = vmatmul.mubr.bf16.vlgmr.msra.gmra.mrb[4].mxu1 %v3083_v13 }
 0x255   : > { %1989 = vmatpush1.bf16.msra.mxu0 %v4786_v48  ;;  %2265 = vmatpush1.bf16.msra.mxu1 %v4786_v48 }
 0x256   : > { %1990 = vmatprep.subr.bf16.mxu0 %v4787_v52  ;;  %2266 = vmatprep.subr.bf16.mxu1 %v4787_v52 }
 0x257   : > { %2020 = vmatprep.mubr.bf16.mxu0 %v4788_v18  ;;  %2296 = vmatprep.mubr.bf16.mxu1 %v4788_v18 }
 0x259   : > { %1991 = vmatpush1.bf16.msra.mxu0 %v4789_v17  ;;  %2267 = vmatpush1.bf16.msra.mxu1 %v4789_v17 }
 0x25a   : > { %1992 = vmatprep.subr.bf16.mxu0 %v4790_v47  ;;  %2268 = vmatprep.subr.bf16.mxu1 %v4790_v47 }
 0x25d   : > { %1993 = vmatpush1.bf16.msra.mxu0 %v4791_v51  ;;  %2269 = vmatpush1.bf16.msra.mxu1 %v4791_v51 }
 0x25e   : > { %1994 = vmatprep.subr.bf16.mxu0 %v4792_v19  ;;  %2270 = vmatprep.subr.bf16.mxu1 %v4792_v19 }
 0x261   : > { %1995 = vmatpush1.bf16.msra.mxu0 %v4793_v16  ;;  %2271 = vmatpush1.bf16.msra.mxu1 %v4793_v16 }
 0x262   : > { %1996 = vmatprep.subr.bf16.mxu0 %v4794_v20  ;;  %2272 = vmatprep.subr.bf16.mxu1 %v4794_v20 }
 0x265   : > { %1997 = vmatpush1.bf16.msra.mxu0 %v4795_v21  ;;  %2273 = vmatpush1.bf16.msra.mxu1 %v4795_v21 }
 0x266   : > { %1998 = vmatprep.subr.bf16.mxu0 %v4796_v22  ;;  %2274 = vmatprep.subr.bf16.mxu1 %v4796_v22 }
 0x269   : > { %1999 = vmatpush1.bf16.msra.mxu0 %v4797_v23  ;;  %2275 = vmatpush1.bf16.msra.mxu1 %v4797_v23 }
 0x26a   : > { %2000 = vmatprep.subr.bf16.mxu0 %v4798_v24  ;;  %2276 = vmatprep.subr.bf16.mxu1 %v4798_v24 }
 0x26d   : > { %2001 = vmatpush1.bf16.msra.mxu0 %v4799_v25  ;;  %2277 = vmatpush1.bf16.msra.mxu1 %v4799_v25 }
 0x26e   : > { %2002 = vmatprep.subr.bf16.mxu0 %v4800_v26  ;;  %2278 = vmatprep.subr.bf16.mxu1 %v4800_v26 }
 0x271   : > { %2003 = vmatpush1.bf16.msra.mxu0 %v4801_v29  ;;  %2279 = vmatpush1.bf16.msra.mxu1 %v4801_v29 }
 0x274   : > { %2021 = vmatmul.mubr.bf16.vlgmr.msra.gmra.mrb[4].mxu0 %v3086_v27  ;;  %2297 = vmatmul.mubr.bf16.vlgmr.msra.gmra.mrb[4].mxu1 %v3087_v28 }
 0x347   : > { %v2022_v35 = vpop.f32.mrb[4].mxu0  ;;  %v2298_v36 = vpop.f32.mrb[4].mxu1 }
 0x348   : > { %v2031_v37 = vmax.f32 %v1755_v42, %v2022_v35  ;;  %v2024_v39 = vpop.f32.mrb[5].mxu0  ;;  %v2300_v50 = vpop.f32.mrb[5].mxu1 }
 0x349   : > { %v2032_v56 = vmax.f32 %v1756_v45, %v2024_v39  ;;  %v2026_v59 = vpop.f32.mrb[6].mxu0  ;;  %v2302_v60 = vpop.f32.mrb[6].mxu1 }
 0x34a   : > { %v2307_v61 = vmax.f32 %v2031_v37, %v2298_v36  ;;  %v2033_v62 = vmax.f32 %v1757_v53, %v2026_v59  ;;  %v2028_v63 = vpop.f32.mrb[7].mxu0  ;;  %v2304_v0 = vpop.f32.mrb[7].mxu1 }
 0x34b   : > { %v2308_v40 = vmax.f32 %v2032_v56, %v2300_v50  ;;  %v2034_v41 = vmax.f32 %v1758_v57, %v2028_v63 }
 0x34c   : > { %v2323_v42 = vadd.f32 %v2316_v38, %v2307_v61  ;;  %v2309_v1 = vmax.f32 %v2033_v62, %v2302_v60 }
 0x34d   : > { %v2324_v43 = vadd.f32 %v2320_v58, %v2308_v40  ;;  %v2310_v44 = vmax.f32 %v2034_v41, %v2304_v0 }
 0x34e   : > { %v2327_v45 = vmax.f32 %v2323_v42, 0.0  ;;  %v2325_v2 = vadd.f32 %v2316_v38, %v2309_v1 }
 0x34f   : > { %v2328_v3 = vmax.f32 %v2324_v43, 0.0  ;;  %v2326_v4 = vadd.f32 %v2320_v58, %v2310_v44 }
 0x350   : > { %v2329_v46 = vmax.f32 %v2325_v2, 0.0 }
 0x351   : > { %v2710_v49 = vpack.c.bf16 %v2328_v3, %v2327_v45  ;;  %v2330_v53 = vmax.f32 %v2326_v4, 0.0 }
 0x353   : > { %2343 = vst [vmem:[%s344_s11] sm:$0xff] %v2710_v49  ;;  %v2711_v5 = vpack.c.bf16 %v2330_v53, %v2329_v46 }
 0x355   : > { %2344 = vst [vmem:[%s344_s11 + $0x8] sm:$0xff] %v2711_v5 }
 0x356 PF: > { %s13_s16 = sadd.s32 1, %s3164_s16   ;;  %s4802_s12 = smov %s3152_s13 }
 0x357   : > { %p10_p10 = scmp.ge.s32.totalorder %s13_s16, 4   ;;  %s4803_s13 = smov %s3222_s20 }
 0x358   : > { %s4804_s14 = smov %s3160_s15  ;;  %s4805_s15 = smov %s4807_s17 }
 0x359   :  { %12 = sbr.rel (!%p10_p10) target bundleno = 3 (0x3), region = 108 }

// kernel: cnn_forward.9
= control target key start
LH: loop header
LB: loop body
LE: loop exit
PB: predicated region body
PF: predicated region fallthrough
CT: control target
= control target key end

     0   :  { %vm40_vm0 = vcmask 1043456   ;;  %vm279_vm1 = vcmask 1041409   ;;  %s2489_s0 = inlined_call_operand.vmem [shape: bf16[2,4,512], index: 0, kind: input, shape index: {}]   ;;  %s2490_s1 = inlined_call_operand.vmem [shape: bf16[512,512], index: 1, kind: input, shape index: {}]   ;;  %s2491_s2 = inlined_call_operand.vmem [shape: f32[1,512], index: 2, kind: input, shape index: {}]   ;;  %s2492_s3 = inlined_call_operand.vmem [shape: bf16[512,128], index: 3, kind: input, shape index: {}]   ;;  %s2493_s4 = inlined_call_operand.vmem [shape: f32[1,128], index: 4, kind: input, shape index: {}]   ;;  %s2494_s5 = inlined_call_operand.hbm [shape: f32[2,128], index: 5, kind: output, shape index: {}]  }
   0x1   :  { %v1680_v0 = vld [vmem:[%s2490_s1 + $0x4] ss:$16 sps:$4 sm:$0xff]   ;;  %v1682_v1 = vld [vmem:[%s2490_s1 + $0xc] ss:$16 sps:$4 sm:$0xff]   ;;  %v1684_v2 = vld [vmem:[%s2490_s1] ss:$16 sps:$4 sm:$0xff]  }
   0x2   :  { %932 = vmatprep.subr.bf16.mxu0 %v1680_v0  ;;  %v1685_v3 = vld [vmem:[%s2490_s1 + $0x8] ss:$16 sps:$4 sm:$0xff]   ;;  %1014 = vmatprep.subr.bf16.mxu1 %v1682_v1  ;;  %v1686_v4 = vld [vmem:[%s2490_s1 + $0x24] ss:$16 sps:$4 sm:$0xff]   ;;  %v1688_v5 = vld [vmem:[%s2490_s1 + $0x2c] ss:$16 sps:$4 sm:$0xff]  }
   0x3   :  { %933 = vmatpush1.bf16.msra.mxu0 %v1684_v2  ;;  %1015 = vmatpush1.bf16.msra.mxu1 %v1685_v3  ;;  %v1690_v6 = vld [vmem:[%s2490_s1 + $0x20] ss:$16 sps:$4 sm:$0xff]   ;;  %v1691_v7 = vld [vmem:[%s2490_s1 + $0x28] ss:$16 sps:$4 sm:$0xff]   ;;  %v1692_v8 = vld [vmem:[%s2490_s1 + $0x44] ss:$16 sps:$4 sm:$0xff]  }
   0x4   :  { %934 = vmatprep.subr.bf16.mxu0 %v1686_v4  ;;  %1016 = vmatprep.subr.bf16.mxu1 %v1688_v5  ;;  %v1694_v9 = vld [vmem:[%s2490_s1 + $0x4c] ss:$16 sps:$4 sm:$0xff]   ;;  %v1696_v10 = vld [vmem:[%s2490_s1 + $0x40] ss:$16 sps:$4 sm:$0xff]   ;;  %v1697_v11 = vld [vmem:[%s2490_s1 + $0x48] ss:$16 sps:$4 sm:$0xff]  }
   0x5   :  { %v1698_v12 = vld [vmem:[%s2490_s1 + $0x64] ss:$16 sps:$4 sm:$0xff]   ;;  %v1700_v13 = vld [vmem:[%s2490_s1 + $0x6c] ss:$16 sps:$4 sm:$0xff]   ;;  %v1702_v14 = vld [vmem:[%s2490_s1 + $0x60] ss:$16 sps:$4 sm:$0xff]  }
   0x6   :  { %v1703_v15 = vld [vmem:[%s2490_s1 + $0x68] ss:$16 sps:$4 sm:$0xff]   ;;  %v1704_v16 = vld [vmem:[%s2490_s1 + $0x84] ss:$16 sps:$4 sm:$0xff]   ;;  %v1706_v17 = vld [vmem:[%s2490_s1 + $0x8c] ss:$16 sps:$4 sm:$0xff]  }
   0x7   :  { %935 = vmatpush1.bf16.msra.mxu0 %v1690_v6  ;;  %1017 = vmatpush1.bf16.msra.mxu1 %v1691_v7  ;;  %v1708_v18 = vld [vmem:[%s2490_s1 + $0x80] ss:$16 sps:$4 sm:$0xff]   ;;  %v1709_v19 = vld [vmem:[%s2490_s1 + $0x88] ss:$16 sps:$4 sm:$0xff]   ;;  %v1710_v20 = vld [vmem:[%s2490_s1 + $0xa4] ss:$16 sps:$4 sm:$0xff]  }
   0x8   :  { %936 = vmatprep.subr.bf16.mxu0 %v1692_v8  ;;  %1018 = vmatprep.subr.bf16.mxu1 %v1694_v9  ;;  %v1712_v21 = vld [vmem:[%s2490_s1 + $0xac] ss:$16 sps:$4 sm:$0xff]   ;;  %v1714_v22 = vld [vmem:[%s2490_s1 + $0xa0] ss:$16 sps:$4 sm:$0xff]   ;;  %v1715_v23 = vld [vmem:[%s2490_s1 + $0xa8] ss:$16 sps:$4 sm:$0xff]  }
   0x9   :  { %v1716_v24 = vld [vmem:[%s2490_s1 + $0xc4] ss:$16 sps:$4 sm:$0xff]   ;;  %v1718_v25 = vld [vmem:[%s2490_s1 + $0xcc] ss:$16 sps:$4 sm:$0xff]   ;;  %v1720_v26 = vld [vmem:[%s2490_s1 + $0xc0] ss:$16 sps:$4 sm:$0xff]  }
   0xa   :  { %v1721_v27 = vld [vmem:[%s2490_s1 + $0xc8] ss:$16 sps:$4 sm:$0xff]   ;;  %v1722_v28 = vld [vmem:[%s2490_s1 + $0xe4] ss:$16 sps:$4 sm:$0xff]   ;;  %v1724_v29 = vld [vmem:[%s2490_s1 + $0xec] ss:$16 sps:$4 sm:$0xff]  }
   0xb   :  { %937 = vmatpush1.bf16.msra.mxu0 %v1696_v10  ;;  %1019 = vmatpush1.bf16.msra.mxu1 %v1697_v11  ;;  %v1726_v30 = vld [vmem:[%s2490_s1 + $0xe0] ss:$16 sps:$4 sm:$0xff]   ;;  %v1727_v31 = vld [vmem:[%s2490_s1 + $0xe8] ss:$16 sps:$4 sm:$0xff]   ;;  %v1728_v32 = vld [vmem:[%s2490_s1 + $0x104] ss:$16 sps:$4 sm:$0xff]  }
   0xc   :  { %938 = vmatprep.subr.bf16.mxu0 %v1698_v12  ;;  %1020 = vmatprep.subr.bf16.mxu1 %v1700_v13  ;;  %v1730_v33 = vld [vmem:[%s2490_s1 + $0x10c] ss:$16 sps:$4 sm:$0xff]   ;;  %v1732_v34 = vld [vmem:[%s2490_s1 + $0x100] ss:$16 sps:$4 sm:$0xff]   ;;  %v1733_v35 = vld [vmem:[%s2490_s1 + $0x108] ss:$16 sps:$4 sm:$0xff]  }
   0xd   :  { %v1734_v36 = vld [vmem:[%s2490_s1 + $0x124] ss:$16 sps:$4 sm:$0xff]   ;;  %v1736_v37 = vld [vmem:[%s2490_s1 + $0x12c] ss:$16 sps:$4 sm:$0xff]   ;;  %v1738_v38 = vld [vmem:[%s2490_s1 + $0x120] ss:$16 sps:$4 sm:$0xff]  }
   0xe   :  { %v1739_v39 = vld [vmem:[%s2490_s1 + $0x128] ss:$16 sps:$4 sm:$0xff]   ;;  %v1740_v40 = vld [vmem:[%s2490_s1 + $0x144] ss:$16 sps:$4 sm:$0xff]   ;;  %v1742_v41 = vld [vmem:[%s2490_s1 + $0x14c] ss:$16 sps:$4 sm:$0xff]  }
   0xf   :  { %939 = vmatpush1.bf16.msra.mxu0 %v1702_v14  ;;  %1021 = vmatpush1.bf16.msra.mxu1 %v1703_v15  ;;  %v1744_v42 = vld [vmem:[%s2490_s1 + $0x140] ss:$16 sps:$4 sm:$0xff]   ;;  %v1745_v43 = vld [vmem:[%s2490_s1 + $0x148] ss:$16 sps:$4 sm:$0xff]   ;;  %v1746_v44 = vld [vmem:[%s2490_s1 + $0x164] ss:$16 sps:$4 sm:$0xff]  }
  0x10   :  { %940 = vmatprep.subr.bf16.mxu0 %v1704_v16  ;;  %1022 = vmatprep.subr.bf16.mxu1 %v1706_v17  ;;  %v1748_v45 = vld [vmem:[%s2490_s1 + $0x16c] ss:$16 sps:$4 sm:$0xff]   ;;  %v22_v46 = vld [vmem:[%s2489_s0] sm:$0xff]  ;;  %v1751_v51 = vld [vmem:[%s2490_s1 + $0x168] ss:$16 sps:$4 sm:$0xff]  }
  0x11   :  { %v23_v47 = vld [vmem:[%s2489_s0 + $0x8] sm:$0xff]  ;;  %v24_v48 = vunpack.c.l.bf16 %v22_v46  ;;  %v2103_v49 = vunpack.c.h.bf16 %v22_v46  ;;  %v1750_v50 = vld [vmem:[%s2490_s1 + $0x160] ss:$16 sps:$4 sm:$0xff]   ;;  %v1752_v53 = vld [vmem:[%s2490_s1 + $0x184] ss:$16 sps:$4 sm:$0xff]  }
  0x12   :  { %v26_v52 = vunpack.c.l.bf16 %v23_v47  ;;  %v1754_v54 = vld [vmem:[%s2490_s1 + $0x18c] ss:$16 sps:$4 sm:$0xff]   ;;  %v2120_v58 = vunpack.c.h.bf16 %v23_v47  ;;  %v1756_v62 = vld [vmem:[%s2490_s1 + $0x180] ss:$16 sps:$4 sm:$0xff]   ;;  %v1757_v1 = vld [vmem:[%s2490_s1 + $0x188] ss:$16 sps:$4 sm:$0xff]  }
  0x13   :  { %941 = vmatpush1.bf16.msra.mxu0 %v1708_v18  ;;  %1023 = vmatpush1.bf16.msra.mxu1 %v1709_v19  ;;  %v32_v55 = vcombine.high %v24_v48, %v24_v48  ;;  %v41_v56 = vsel %vm40_vm0, %v24_v48, 0.0  ;;  %v33_v57 = vcombine.high %v2103_v49, %v2103_v49  ;;  %v1758_v2 = vld [vmem:[%s2490_s1 + $0x1a4] ss:$16 sps:$4 sm:$0xff]   ;;  %v1760_v6 = vld [vmem:[%s2490_s1 + $0x1ac] ss:$16 sps:$4 sm:$0xff]  }
  0x14   :  { %942 = vmatprep.subr.bf16.mxu0 %v1710_v20  ;;  %1024 = vmatprep.subr.bf16.mxu1 %v1712_v21  ;;  %v34_v59 = vcombine.high %v26_v52, %v26_v52  ;;  %v42_v60 = vrot.slane %v41_v56, 4  ;;  %v69_v61 = vsel %vm40_vm0, %v26_v52, 0.0  ;;  %v35_v12 = vcombine.high %v2120_v58, %v2120_v58  ;;  %v1762_v14 = vld [vmem:[%s2490_s1 + $0x1a0] ss:$16 sps:$4 sm:$0xff]   ;;  %v1763_v17 = vld [vmem:[%s2490_s1 + $0x1a8] ss:$16 sps:$4 sm:$0xff]  }
  0x15   :  { %v48_v63 = vsel %vm40_vm0, %v32_v55, 0.0  ;;  %v70_v0 = vrot.slane %v69_v61, 4  ;;  %v62_v9 = vsel %vm40_vm0, %v33_v57, 0.0  ;;  %v1764_v18 = vld [vmem:[%s2490_s1 + $0x1c4] ss:$16 sps:$4 sm:$0xff]  }
  0x16   :  { %v49_v3 = vrot.slane %v48_v63, 4  ;;  %v76_v4 = vsel %vm40_vm0, %v34_v59, 0.0  ;;  %v43_v5 = vadd.f32 %v42_v60, %v41_v56  ;;  %v63_v13 = vrot.slane %v62_v9, 4  ;;  %v1775_v48 = vld [vmem:[%s2490_s1 + $0x1e8] ss:$16 sps:$4 sm:$0xff]  }
  0x17   :  { %943 = vmatpush1.bf16.msra.mxu0 %v1714_v22  ;;  %1025 = vmatpush1.bf16.msra.mxu1 %v1715_v23  ;;  %v77_v7 = vrot.slane %v76_v4, 4  ;;  %v71_v8 = vadd.f32 %v70_v0, %v69_v61  ;;  %v1766_v22 = vld [vmem:[%s2490_s1 + $0x1cc] ss:$16 sps:$4 sm:$0xff]  }
  0x18   :  { %944 = vmatprep.subr.bf16.mxu0 %v1716_v24  ;;  %1026 = vmatprep.subr.bf16.mxu1 %v1718_v25  ;;  %v50_v10 = vadd.f32 %v49_v3, %v48_v63  ;;  %v44_v11 = vrot.slane %v43_v5, 2  ;;  %v64_v21 = vadd.f32 %v63_v13, %v62_v9  ;;  %v1781_v55 = vld [vmem:[%s2490_s1 + $0x20c] ss:$16 sps:$4 sm:$0xff]  }
  0x19   :  { %v78_v15 = vadd.f32 %v77_v7, %v76_v4  ;;  %v72_v16 = vrot.slane %v71_v8, 2  ;;  %v83_v4 = vsel %vm40_vm0, %v2120_v58, 0.0  ;;  %v1779_v58 = vld [vmem:[%s2490_s1 + $0x208] ss:$16 sps:$4 sm:$0xff]  }
  0x1a   :  { %v51_v19 = vrot.slane %v50_v10, 2  ;;  %v45_v20 = vadd.f32 %v44_v11, %v43_v5  ;;  %v1776_v11 = vld [vmem:[%s2490_s1 + $0x200] ss:$16 sps:$4 sm:$0xff]  }
  0x1b   :  { %945 = vmatpush1.bf16.msra.mxu0 %v1720_v26  ;;  %1027 = vmatpush1.bf16.msra.mxu1 %v1721_v27  ;;  %v79_v23 = vrot.slane %v78_v15, 2  ;;  %v73_v24 = vadd.f32 %v72_v16, %v71_v8  ;;  %v65_v27 = vrot.slane %v64_v21, 2  ;;  %v1784_v16 = vld [vmem:[%s2490_s1 + $0x224] ss:$16 sps:$4 sm:$0xff]  }
  0x1c   :  { %946 = vmatprep.subr.bf16.mxu0 %v1722_v28  ;;  %1028 = vmatprep.subr.bf16.mxu1 %v1724_v29  ;;  %v52_v25 = vadd.f32 %v51_v19, %v50_v10  ;;  %v46_v26 = vrot.slane %v45_v20, 1  ;;  %v90_v28 = vsel %vm40_vm0, %v35_v12, 0.0  ;;  %v1768_v29 = vld [vmem:[%s2490_s1 + $0x1c0] ss:$16 sps:$4 sm:$0xff]   ;;  %v84_v10 = vrot.slane %v83_v4, 4 }
  0x1f   :  { %947 = vmatpush1.bf16.msra.mxu0 %v1726_v30  ;;  %1029 = vmatpush1.bf16.msra.mxu1 %v1727_v31  ;;  %v80_v30 = vadd.f32 %v79_v23, %v78_v15  ;;  %v74_v31 = vrot.slane %v73_v24, 1 }
  0x20   :  { %948 = vmatprep.subr.bf16.mxu0 %v1728_v32  ;;  %1030 = vmatprep.subr.bf16.mxu1 %v1730_v33  ;;  %v1769_v32 = vld [vmem:[%s2490_s1 + $0x1c8] ss:$16 sps:$4 sm:$0xff]   ;;  %v1770_v33 = vld [vmem:[%s2490_s1 + $0x1e4] ss:$16 sps:$4 sm:$0xff]  }
  0x23   :  { %949 = vmatpush1.bf16.msra.mxu0 %v1732_v34  ;;  %1031 = vmatpush1.bf16.msra.mxu1 %v1733_v35  ;;  %v53_v34 = vrot.slane %v52_v25, 1  ;;  %v47_v35 = vadd.f32 %v46_v26, %v45_v20  ;;  %v1785_v26 = vld [vmem:[%s2490_s1 + $0x228] ss:$16 sps:$4 sm:$0xff]  }
  0x24   :  { %950 = vmatprep.subr.bf16.mxu0 %v1734_v36  ;;  %1032 = vmatprep.subr.bf16.mxu1 %v1736_v37  ;;  %v66_v36 = vadd.f32 %v65_v27, %v64_v21  ;;  %v1772_v37 = vld [vmem:[%s2490_s1 + $0x1ec] ss:$16 sps:$4 sm:$0xff]   ;;  %v1790_v27 = vld [vmem:[%s2490_s1 + $0x244] ss:$16 sps:$4 sm:$0xff]  }
  0x27   :  { %951 = vmatpush1.bf16.msra.mxu0 %v1738_v38  ;;  %1033 = vmatpush1.bf16.msra.mxu1 %v1739_v39  ;;  %v81_v38 = vrot.slane %v80_v30, 1  ;;  %v75_v39 = vadd.f32 %v74_v31, %v73_v24 }
  0x28   :  { %952 = vmatprep.subr.bf16.mxu0 %v1740_v40  ;;  %1034 = vmatprep.subr.bf16.mxu1 %v1742_v41  ;;  %v91_v40 = vrot.slane %v90_v28, 4  ;;  %v54_v41 = vadd.f32 %v53_v34, %v52_v25 }
  0x29   :  { %v101_v46 = vmul.f32 0.25, %v75_v39 }
  0x2a   :  { %v92_v47 = vadd.f32 %v91_v40, %v90_v28  ;;  %v1799_v40 = vld [vmem:[%s2490_s1 + $0x26c] ss:$16 sps:$4 sm:$0xff]  }
  0x2b   :  { %953 = vmatpush1.bf16.msra.mxu0 %v1744_v42  ;;  %1035 = vmatpush1.bf16.msra.mxu1 %v1745_v43  ;;  %v97_v42 = vmul.f32 0.25, %v47_v35  ;;  %v67_v43 = vrot.slane %v66_v36, 1  ;;  %v109_v56 = vpack.c.bf16 %v101_v46, %v101_v46 }
  0x2c   :  { %954 = vmatprep.subr.bf16.mxu0 %v1746_v44  ;;  %1036 = vmatprep.subr.bf16.mxu1 %v1748_v45  ;;  %v1774_v44 = vld [vmem:[%s2490_s1 + $0x1e0] ss:$16 sps:$4 sm:$0xff]   ;;  %v82_v45 = vadd.f32 %v81_v38, %v80_v30  ;;  %v93_v57 = vrot.slane %v92_v47, 2 }
  0x2d   :  { %v105_v52 = vpack.c.bf16 %v97_v42, %v97_v42  ;;  %v275_v0 = vunpack.c.l.b16 %v109_v56  ;;  %v1806_v56 = vld [vmem:[%s2490_s1 + $0x2a0] ss:$16 sps:$4 sm:$0xff]  }
  0x2f   :  { %955 = vmatpush1.bf16.msra.mxu0 %v1750_v50  ;;  %1037 = vmatpush1.bf16.msra.mxu1 %v1751_v51  ;;  %v98_v50 = vmul.f32 0.25, %v54_v41  ;;  %v1778_v51 = vld [vmem:[%s2490_s1 + $0x204] ss:$16 sps:$4 sm:$0xff]   ;;  %v271_v60 = vunpack.c.l.b16 %v105_v52  ;;  %v1803_v52 = vld [vmem:[%s2490_s1 + $0x288] ss:$16 sps:$4 sm:$0xff]  }
  0x30   :  { %956 = vmatprep.subr.bf16.mxu0 %v1752_v53  ;;  %1038 = vmatprep.subr.bf16.mxu1 %v1754_v54  ;;  %v68_v53 = vadd.f32 %v67_v43, %v66_v36  ;;  %v102_v54 = vmul.f32 0.25, %v82_v45  ;;  %v1791_v36 = vld [vmem:[%s2490_s1 + $0x248] ss:$16 sps:$4 sm:$0xff]   ;;  %v1794_v43 = vld [vmem:[%s2490_s1 + $0x260] ss:$16 sps:$4 sm:$0xff]  }
  0x31   :  { %v106_v59 = vpack.c.bf16 %v98_v50, %v98_v50  ;;  %v1802_v45 = vld [vmem:[%s2490_s1 + $0x284] ss:$16 sps:$4 sm:$0xff]  }
  0x32   :  { %v100_v61 = vmul.f32 0.25, %v68_v53  ;;  %v110_v63 = vpack.c.bf16 %v102_v54, %v102_v54  ;;  %v1808_v53 = vld [vmem:[%s2490_s1 + $0x2a4] ss:$16 sps:$4 sm:$0xff]  }
  0x33   :  { %957 = vmatpush1.bf16.msra.mxu0 %v1756_v62  ;;  %1039 = vmatpush1.bf16.msra.mxu1 %v1757_v1  ;;  %v55_v62 = vsel %vm40_vm0, %v2103_v49, 0.0  ;;  %v94_v1 = vadd.f32 %v93_v57, %v92_v47  ;;  %v272_v3 = vunpack.c.l.b16 %v106_v59  ;;  %v1809_v57 = vld [vmem:[%s2490_s1 + $0x2a8] ss:$16 sps:$4 sm:$0xff]   ;;  %v1814_v59 = vld [vmem:[%s2490_s1 + $0x2c4] ss:$16 sps:$4 sm:$0xff]  }
  0x34   :  { %958 = vmatprep.subr.bf16.mxu0 %v1758_v2  ;;  %1040 = vmatprep.subr.bf16.mxu1 %v1760_v6  ;;  %v56_v2 = vrot.slane %v55_v62, 4  ;;  %v276_v5 = vunpack.c.l.b16 %v110_v63  ;;  %v280_v6 = vsel %vm279_vm1, %v275_v0, %v271_v60  ;;  %v108_v9 = vpack.c.bf16 %v100_v61, %v100_v61  ;;  %v1817_v60 = vld [vmem:[%s2490_s1 + $0x2cc] ss:$16 sps:$4 sm:$0xff]   ;;  %v1812_v61 = vld [vmem:[%s2490_s1 + $0x2c0] ss:$16 sps:$4 sm:$0xff]  }
  0x35   :  { %v95_v7 = vrot.slane %v94_v1, 1  ;;  %v284_v12 = vpack.c.b16 %v280_v6, %v280_v6  ;;  %v1820_v63 = vld [vmem:[%s2490_s1 + $0x2e4] ss:$16 sps:$4 sm:$0xff]   ;;  %v1823_v0 = vld [vmem:[%s2490_s1 + $0x2ec] ss:$16 sps:$4 sm:$0xff]  }
  0x36   :  { %v57_v8 = vadd.f32 %v56_v2, %v55_v62  ;;  %v281_v49 = vsel %vm279_vm1, %v276_v5, %v272_v3  ;;  %v274_v24 = vunpack.c.l.b16 %v108_v9  ;;  %v1815_v62 = vld [vmem:[%s2490_s1 + $0x2c8] ss:$16 sps:$4 sm:$0xff]   ;;  %v1826_v3 = vld [vmem:[%s2490_s1 + $0x304] ss:$16 sps:$4 sm:$0xff]   ;;  %v1824_v5 = vld [vmem:[%s2490_s1 + $0x300] ss:$16 sps:$4 sm:$0xff]  }
  0x37   :  { %959 = vmatpush1.bf16.msra.mxu0 %v1762_v14  ;;  %1041 = vmatpush1.bf16.msra.mxu1 %v1763_v17  ;;  %v96_v13 = vadd.f32 %v95_v7, %v94_v1  ;;  %v285_v15 = vpack.c.b16 %v281_v49, %v281_v49  ;;  %v85_v17 = vadd.f32 %v84_v10, %v83_v4  ;;  %v1818_v1 = vld [vmem:[%s2490_s1 + $0x2e0] ss:$16 sps:$4 sm:$0xff]   ;;  %v1821_v2 = vld [vmem:[%s2490_s1 + $0x2e8] ss:$16 sps:$4 sm:$0xff]   ;;  %v1829_v4 = vld [vmem:[%s2490_s1 + $0x30c] ss:$16 sps:$4 sm:$0xff]  }
  0x38   :  { %960 = vmatprep.subr.bf16.mxu0 %v1764_v18  ;;  %1042 = vmatprep.subr.bf16.mxu1 %v1766_v22  ;;  %v58_v14 = vrot.slane %v57_v8, 2  ;;  %v1787_v18 = vld [vmem:[%s2490_s1 + $0x22c] ss:$16 sps:$4 sm:$0xff]   ;;  %v1782_v22 = vld [vmem:[%s2490_s1 + $0x220] ss:$16 sps:$4 sm:$0xff]  }
  0x39   :  { %v104_v19 = vmul.f32 0.25, %v96_v13  ;;  %964 = vmatprep.mubr.bf16.mxu0 %v285_v15  ;;  %1046 = vmatprep.mubr.bf16.mxu1 %v285_v15  ;;  %v86_v21 = vrot.slane %v85_v17, 2  ;;  %v1827_v6 = vld [vmem:[%s2490_s1 + $0x308] ss:$16 sps:$4 sm:$0xff]   ;;  %v1832_v7 = vld [vmem:[%s2490_s1 + $0x324] ss:$16 sps:$4 sm:$0xff]  }
  0x3a   :  { %v59_v20 = vadd.f32 %v58_v14, %v57_v8  ;;  %v1835_v8 = vld [vmem:[%s2490_s1 + $0x32c] ss:$16 sps:$4 sm:$0xff]   ;;  %v1830_v9 = vld [vmem:[%s2490_s1 + $0x320] ss:$16 sps:$4 sm:$0xff]   ;;  %v1833_v10 = vld [vmem:[%s2490_s1 + $0x328] ss:$16 sps:$4 sm:$0xff]  }
  0x3b   :  { %961 = vmatpush1.bf16.msra.mxu0 %v1768_v29  ;;  %1043 = vmatpush1.bf16.msra.mxu1 %v1769_v32  ;;  %v112_v23 = vpack.c.bf16 %v104_v19, %v104_v19  ;;  %v87_v28 = vadd.f32 %v86_v21, %v85_v17  ;;  %v1793_v29 = vld [vmem:[%s2490_s1 + $0x24c] ss:$16 sps:$4 sm:$0xff]   ;;  %v1838_v49 = vld [vmem:[%s2490_s1 + $0x344] ss:$16 sps:$4 sm:$0xff]   ;;  %v1839_v13 = vld [vmem:[%s2490_s1 + $0x348] ss:$16 sps:$4 sm:$0xff]  }
  0x3c   :  { %962 = vmatprep.subr.bf16.mxu0 %v1770_v33  ;;  %1044 = vmatprep.subr.bf16.mxu1 %v1772_v37  ;;  %v60_v25 = vrot.slane %v59_v20, 1  ;;  %v1788_v33 = vld [vmem:[%s2490_s1 + $0x240] ss:$16 sps:$4 sm:$0xff]   ;;  %v1796_v37 = vld [vmem:[%s2490_s1 + $0x264] ss:$16 sps:$4 sm:$0xff]  }
  0x3d   :  { %v278_v30 = vunpack.c.l.b16 %v112_v23  ;;  %v88_v32 = vrot.slane %v87_v28, 1  ;;  %v1844_v14 = vld [vmem:[%s2490_s1 + $0x364] ss:$16 sps:$4 sm:$0xff]   ;;  %v1847_v15 = vld [vmem:[%s2490_s1 + $0x36c] ss:$16 sps:$4 sm:$0xff]  }
  0x3e   :  { %v61_v31 = vadd.f32 %v60_v25, %v59_v20  ;;  %v1850_v17 = vld [vmem:[%s2490_s1 + $0x384] ss:$16 sps:$4 sm:$0xff]   ;;  %v1848_v19 = vld [vmem:[%s2490_s1 + $0x380] ss:$16 sps:$4 sm:$0xff]   ;;  %v1851_v20 = vld [vmem:[%s2490_s1 + $0x388] ss:$16 sps:$4 sm:$0xff]  }
  0x3f   :  { %963 = vmatpush1.bf16.msra.mxu0 %v1774_v44  ;;  %1045 = vmatpush1.bf16.msra.mxu1 %v1775_v48  ;;  %v283_v34 = vsel %vm279_vm1, %v278_v30, %v274_v24  ;;  %v89_v39 = vadd.f32 %v88_v32, %v87_v28  ;;  %v1797_v44 = vld [vmem:[%s2490_s1 + $0x268] ss:$16 sps:$4 sm:$0xff]   ;;  %v1805_v48 = vld [vmem:[%s2490_s1 + $0x28c] ss:$16 sps:$4 sm:$0xff]  }
  0x40   :  { %973 = vmatprep.subr.bf16.mxu0 %v1778_v51  ;;  %1055 = vmatprep.subr.bf16.mxu1 %v1781_v55  ;;  %v99_v35 = vmul.f32 0.25, %v61_v31  ;;  %v287_v38 = vpack.c.b16 %v283_v34, %v283_v34  ;;  %v1800_v51 = vld [vmem:[%s2490_s1 + $0x280] ss:$16 sps:$4 sm:$0xff]   ;;  %v1811_v55 = vld [vmem:[%s2490_s1 + $0x2ac] ss:$16 sps:$4 sm:$0xff]  }
  0x41   :  { %v103_v42 = vmul.f32 0.25, %v89_v39 }
  0x42   :  { %965 = vmatmul.mubr.bf16.vlgmr.msra.gmra.mrb[0].mxu0 %v284_v12  ;;  %1047 = vmatmul.mubr.bf16.vlgmr.msra.gmra.mrb[0].mxu1 %v284_v12  ;;  %v107_v41 = vpack.c.bf16 %v99_v35, %v99_v35  ;;  %v1836_v12 = vld [vmem:[%s2490_s1 + $0x340] ss:$16 sps:$4 sm:$0xff]  }
  0x43   :  { %974 = vmatpush1.bf16.msra.mxu0 %v1776_v11  ;;  %1056 = vmatpush1.bf16.msra.mxu1 %v1779_v58  ;;  %v111_v46 = vpack.c.bf16 %v103_v42, %v103_v42  ;;  %v1841_v11 = vld [vmem:[%s2490_s1 + $0x34c] ss:$16 sps:$4 sm:$0xff]   ;;  %v1842_v58 = vld [vmem:[%s2490_s1 + $0x360] ss:$16 sps:$4 sm:$0xff]  }
  0x44   :  { %975 = vmatprep.subr.bf16.mxu0 %v1784_v16  ;;  %1057 = vmatprep.subr.bf16.mxu1 %v1787_v18  ;;  %v273_v47 = vunpack.c.l.b16 %v107_v41  ;;  %v1845_v16 = vld [vmem:[%s2490_s1 + $0x368] ss:$16 sps:$4 sm:$0xff]   ;;  %v1853_v18 = vld [vmem:[%s2490_s1 + $0x38c] ss:$16 sps:$4 sm:$0xff]  }
  0x45   :  { %1005 = vmatprep.mubr.bf16.mxu0 %v287_v38  ;;  %1087 = vmatprep.mubr.bf16.mxu1 %v287_v38  ;;  %v277_v50 = vunpack.c.l.b16 %v111_v46 }
  0x47   :  { %976 = vmatpush1.bf16.msra.mxu0 %v1782_v22  ;;  %1058 = vmatpush1.bf16.msra.mxu1 %v1785_v26  ;;  %v2242_v54 = vsel %vm279_vm1, %v277_v50, %v273_v47 }
  0x48   :  { %977 = vmatprep.subr.bf16.mxu0 %v1790_v27  ;;  %1059 = vmatprep.subr.bf16.mxu1 %v1793_v29 }
  0x4b   :  { %978 = vmatpush1.bf16.msra.mxu0 %v1788_v33  ;;  %1060 = vmatpush1.bf16.msra.mxu1 %v1791_v36 }
  0x4c   :  { %979 = vmatprep.subr.bf16.mxu0 %v1796_v37  ;;  %1061 = vmatprep.subr.bf16.mxu1 %v1799_v40 }
  0x4f   :  { %980 = vmatpush1.bf16.msra.mxu0 %v1794_v43  ;;  %1062 = vmatpush1.bf16.msra.mxu1 %v1797_v44 }
  0x50   :  { %981 = vmatprep.subr.bf16.mxu0 %v1802_v45  ;;  %1063 = vmatprep.subr.bf16.mxu1 %v1805_v48 }
  0x53   :  { %982 = vmatpush1.bf16.msra.mxu0 %v1800_v51  ;;  %1064 = vmatpush1.bf16.msra.mxu1 %v1803_v52 }
  0x54   :  { %983 = vmatprep.subr.bf16.mxu0 %v1808_v53  ;;  %1065 = vmatprep.subr.bf16.mxu1 %v1811_v55 }
  0x57   :  { %984 = vmatpush1.bf16.msra.mxu0 %v1806_v56  ;;  %1066 = vmatpush1.bf16.msra.mxu1 %v1809_v57 }
  0x58   :  { %985 = vmatprep.subr.bf16.mxu0 %v1814_v59  ;;  %1067 = vmatprep.subr.bf16.mxu1 %v1817_v60 }
  0x5b   :  { %986 = vmatpush1.bf16.msra.mxu0 %v1812_v61  ;;  %1068 = vmatpush1.bf16.msra.mxu1 %v1815_v62 }
  0x5c   :  { %987 = vmatprep.subr.bf16.mxu0 %v1820_v63  ;;  %1069 = vmatprep.subr.bf16.mxu1 %v1823_v0 }
  0x5f   :  { %988 = vmatpush1.bf16.msra.mxu0 %v1818_v1  ;;  %1070 = vmatpush1.bf16.msra.mxu1 %v1821_v2 }
  0x60   :  { %989 = vmatprep.subr.bf16.mxu0 %v1826_v3  ;;  %1071 = vmatprep.subr.bf16.mxu1 %v1829_v4 }
  0x63   :  { %990 = vmatpush1.bf16.msra.mxu0 %v1824_v5  ;;  %1072 = vmatpush1.bf16.msra.mxu1 %v1827_v6 }
  0x64   :  { %991 = vmatprep.subr.bf16.mxu0 %v1832_v7  ;;  %1073 = vmatprep.subr.bf16.mxu1 %v1835_v8 }
  0x67   :  { %992 = vmatpush1.bf16.msra.mxu0 %v1830_v9  ;;  %1074 = vmatpush1.bf16.msra.mxu1 %v1833_v10 }
  0x68   :  { %993 = vmatprep.subr.bf16.mxu0 %v1838_v49  ;;  %1075 = vmatprep.subr.bf16.mxu1 %v1841_v11 }
  0x6b   :  { %994 = vmatpush1.bf16.msra.mxu0 %v1836_v12  ;;  %1076 = vmatpush1.bf16.msra.mxu1 %v1839_v13 }
  0x6c   :  { %995 = vmatprep.subr.bf16.mxu0 %v1844_v14  ;;  %1077 = vmatprep.subr.bf16.mxu1 %v1847_v15 }
  0x6f   :  { %996 = vmatpush1.bf16.msra.mxu0 %v1842_v58  ;;  %1078 = vmatpush1.bf16.msra.mxu1 %v1845_v16 }
  0x70   :  { %10 = vsyncpa [#allocation3], 0  ;;  %997 = vmatprep.subr.bf16.mxu0 %v1850_v17  ;;  %1079 = vmatprep.subr.bf16.mxu1 %v1853_v18  ;;  %v1856_v21 = vld [vmem:[%s2490_s1 + $0x3a4] ss:$16 sps:$4 sm:$0xff]   ;;  %v1859_v22 = vld [vmem:[%s2490_s1 + $0x3ac] ss:$16 sps:$4 sm:$0xff]   ;;  %v286_v35 = vpack.c.b16 %v2242_v54, %v2242_v54  ;;  %v243_v4 = vlaneseq }
  0x71   :  { %v1854_v23 = vld [vmem:[%s2490_s1 + $0x3a0] ss:$16 sps:$4 sm:$0xff]   ;;  %v1857_v24 = vld [vmem:[%s2490_s1 + $0x3a8] ss:$16 sps:$4 sm:$0xff]   ;;  %v1862_v25 = vld [vmem:[%s2490_s1 + $0x3c4] ss:$16 sps:$4 sm:$0xff]  }
  0x72   :  { %v1865_v26 = vld [vmem:[%s2490_s1 + $0x3cc] ss:$16 sps:$4 sm:$0xff]   ;;  %v1860_v27 = vld [vmem:[%s2490_s1 + $0x3c0] ss:$16 sps:$4 sm:$0xff]   ;;  %v1863_v28 = vld [vmem:[%s2490_s1 + $0x3c8] ss:$16 sps:$4 sm:$0xff]  }
  0x73   :  { %998 = vmatpush1.bf16.msra.mxu0 %v1848_v19  ;;  %1080 = vmatpush1.bf16.msra.mxu1 %v1851_v20  ;;  %v1868_v29 = vld [vmem:[%s2490_s1 + $0x3e4] ss:$16 sps:$4 sm:$0xff]   ;;  %v1871_v30 = vld [vmem:[%s2490_s1 + $0x3ec] ss:$16 sps:$4 sm:$0xff]   ;;  %v1866_v31 = vld [vmem:[%s2490_s1 + $0x3e0] ss:$16 sps:$4 sm:$0xff]  }
  0x74   :  { %999 = vmatprep.subr.bf16.mxu0 %v1856_v21  ;;  %1081 = vmatprep.subr.bf16.mxu1 %v1859_v22  ;;  %v1869_v32 = vld [vmem:[%s2490_s1 + $0x3e8] ss:$16 sps:$4 sm:$0xff]   ;;  %v1872_v33 = vld [vmem:[%s2492_s3 + $0x40] sm:$0xff]   ;;  %v1880_v42 = vld [vmem:[%s2492_s3 + $0x50] sm:$0xff]   ;;  %v244_v5 = vshrl.u32 %v243_v4, 7  ;;  %s1928_s7 = smov [#allocation2]  }
  0x75   :  { %v1873_v34 = vld [vmem:[%s2492_s3 + $0xc0] sm:$0xff]   ;;  %v1876_v38 = vld [vmem:[%s2492_s3 + $0x48] sm:$0xff]   ;;  %v1881_v43 = vld [vmem:[%s2492_s3 + $0xd0] sm:$0xff]   ;;  %s1454_s8 = sshll.u32 %s1928_s7, 4  ;;  %s1455_s8 = int_to_ptr.vmem [resolvable:$true] %s1454_s8 }
  0x76   :  { %v1874_v36 = vld [vmem:[%s2492_s3] sm:$0xff]   ;;  %v1877_v39 = vld [vmem:[%s2492_s3 + $0xc8] sm:$0xff]   ;;  %v1882_v44 = vld [vmem:[%s2492_s3 + $0x10] sm:$0xff]   ;;  %v245_v6 = vsub.s32 0, %v244_v5  ;;  %v253_v7 = vsub.s32 2, %v244_v5  ;;  %v249_v9 = vsub.s32 1, %v244_v5  ;;  %p1909_p1 = scmp.lt.s32.totalorder %s1455_s8, %s1455_s8 }
  0x77   :  { %1000 = vmatpush1.bf16.msra.mxu0 %v1854_v23  ;;  %1082 = vmatpush1.bf16.msra.mxu1 %v1857_v24  ;;  %v1875_v37 = vld [vmem:[%s2492_s3 + $0x80] sm:$0xff]   ;;  %v1878_v40 = vld [vmem:[%s2492_s3 + $0x8] sm:$0xff]   ;;  %v1883_v45 = vld [vmem:[%s2492_s3 + $0x90] sm:$0xff]   ;;  %v257_v10 = vsub.s32 3, %v244_v5  ;;  %s1904_s9 = scalar_lea.vmem %s1455_s8, 32 }
  0x78   :  { %1001 = vmatprep.subr.bf16.mxu0 %v1862_v25  ;;  %1083 = vmatprep.subr.bf16.mxu1 %v1865_v26  ;;  %v1879_v41 = vld [vmem:[%s2492_s3 + $0x88] sm:$0xff]   ;;  %v1884_v46 = vld [vmem:[%s2492_s3 + $0x58] sm:$0xff]   ;;  %v1888_v51 = vld [vmem:[%s2492_s3 + $0x60] sm:$0xff]   ;;  %p1905_p0 = scmp.ne.s32.totalorder %s1455_s8, %s1904_s9  ;;  %p1910_p2 = scmp.lt.s32.totalorder %s1904_s9, %s1904_s9 }
  0x79   :  { %v1885_v47 = vld [vmem:[%s2492_s3 + $0xd8] sm:$0xff]   ;;  %v1889_v52 = vld [vmem:[%s2492_s3 + $0xe0] sm:$0xff]   ;;  %v1892_v55 = vld [vmem:[%s2492_s3 + $0x68] sm:$0xff]  }
  0x7a   :  { %v1886_v48 = vld [vmem:[%s2492_s3 + $0x18] sm:$0xff]   ;;  %v1890_v53 = vld [vmem:[%s2492_s3 + $0x20] sm:$0xff]   ;;  %v1893_v56 = vld [vmem:[%s2492_s3 + $0xe8] sm:$0xff]   ;;  %p1911_p3 = por %p1910_p2, %p1909_p1 }
  0x7b   :  { %1002 = vmatpush1.bf16.msra.mxu0 %v1860_v27  ;;  %1084 = vmatpush1.bf16.msra.mxu1 %v1863_v28  ;;  %v1887_v50 = vld [vmem:[%s2492_s3 + $0x98] sm:$0xff]   ;;  %v1891_v54 = vld [vmem:[%s2492_s3 + $0xa0] sm:$0xff]   ;;  %v1894_v57 = vld [vmem:[%s2492_s3 + $0x28] sm:$0xff]  }
  0x7c   :  { %1003 = vmatprep.subr.bf16.mxu0 %v1868_v29  ;;  %1085 = vmatprep.subr.bf16.mxu1 %v1871_v30  ;;  %v1895_v59 = vld [vmem:[%s2492_s3 + $0xa8] sm:$0xff]   ;;  %v1896_v60 = vld [vmem:[%s2492_s3 + $0x70] sm:$0xff]   ;;  %v1900_v0 = vld [vmem:[%s2492_s3 + $0x78] sm:$0xff]   ;;  %p1912_p4 = pnand %p1911_p3, %p1905_p0 }
  0x7d   :  { %v1897_v61 = vld [vmem:[%s2492_s3 + $0xf0] sm:$0xff]   ;;  %v1901_v1 = vld [vmem:[%s2492_s3 + $0xf8] sm:$0xff]   ;;  %v241_v8 = vld [vmem:[%s2491_s2] sm:$0xf] }
  0x7e   :  { %v1898_v62 = vld [vmem:[%s2492_s3 + $0x30] sm:$0xff]   ;;  %v1902_v2 = vld [vmem:[%s2492_s3 + $0x38] sm:$0xff]   ;;  %v246_v49 = vrot.slane %v241_v8, %v245_v6  ;;  %v254_v11 = vrot.slane %v241_v8, %v253_v7  ;;  %v250_v12 = vrot.slane %v241_v8, %v249_v9  ;;  %v258_v13 = vrot.slane %v241_v8, %v257_v10 }
  0x7f   :  { %1004 = vmatpush1.bf16.msra.mxu0 %v1866_v31  ;;  %1086 = vmatpush1.bf16.msra.mxu1 %v1869_v32  ;;  %v1899_v63 = vld [vmem:[%s2492_s3 + $0xb0] sm:$0xff]   ;;  %v1903_v3 = vld [vmem:[%s2492_s3 + $0xb8] sm:$0xff]  }
  0x80   :  { %1623 = vmatprep.subr.bf16.mxu0 %v1872_v33  ;;  %1645 = vmatprep.subr.bf16.mxu1 %v1873_v34 }
  0x82   :  { %1006 = vmatmul.mubr.bf16.vlgmr.msra.gmra.mrb[0].mxu0 %v286_v35  ;;  %1088 = vmatmul.mubr.bf16.vlgmr.msra.gmra.mrb[0].mxu1 %v286_v35  ;;  %v1590_v35 = vld [vmem:[%s2493_s4] ss:$0 sm:$0xff] }
  0x83   :  { %1624 = vmatpush3.bf16.msra.mxu0 %v1874_v36  ;;  %1646 = vmatpush3.bf16.msra.mxu1 %v1875_v37 }
  0x84   :  { %1625 = vmatprep.subr.bf16.mxu0 %v1876_v38  ;;  %1647 = vmatprep.subr.bf16.mxu1 %v1877_v39 }
  0x87   :  { %1626 = vmatpush3.bf16.msra.mxu0 %v1878_v40  ;;  %1648 = vmatpush3.bf16.msra.mxu1 %v1879_v41 }
  0x88   :  { %1627 = vmatprep.subr.bf16.mxu0 %v1880_v42  ;;  %1649 = vmatprep.subr.bf16.mxu1 %v1881_v43 }
  0x8b   :  { %1628 = vmatpush3.bf16.msra.mxu0 %v1882_v44  ;;  %1650 = vmatpush3.bf16.msra.mxu1 %v1883_v45 }
  0x8c   :  { %1629 = vmatprep.subr.bf16.mxu0 %v1884_v46  ;;  %1651 = vmatprep.subr.bf16.mxu1 %v1885_v47 }
  0x8f   :  { %1630 = vmatpush3.bf16.msra.mxu0 %v1886_v48  ;;  %1652 = vmatpush3.bf16.msra.mxu1 %v1887_v50 }
  0x90   :  { %1631 = vmatprep.subr.bf16.mxu0 %v1888_v51  ;;  %1653 = vmatprep.subr.bf16.mxu1 %v1889_v52 }
  0x93   :  { %1632 = vmatpush3.bf16.msra.mxu0 %v1890_v53  ;;  %1654 = vmatpush3.bf16.msra.mxu1 %v1891_v54 }
  0x94   :  { %1633 = vmatprep.subr.bf16.mxu0 %v1892_v55  ;;  %1655 = vmatprep.subr.bf16.mxu1 %v1893_v56 }
  0x97   :  { %1634 = vmatpush3.bf16.msra.mxu0 %v1894_v57  ;;  %1656 = vmatpush3.bf16.msra.mxu1 %v1895_v59 }
  0x98   :  { %1635 = vmatprep.subr.bf16.mxu0 %v1896_v60  ;;  %1657 = vmatprep.subr.bf16.mxu1 %v1897_v61 }
  0x9b   :  { %1636 = vmatpush3.bf16.msra.mxu0 %v1898_v62  ;;  %1658 = vmatpush3.bf16.msra.mxu1 %v1899_v63 }
  0x9c   :  { %1637 = vmatprep.subr.bf16.mxu0 %v1900_v0  ;;  %1659 = vmatprep.subr.bf16.mxu1 %v1901_v1 }
  0x9f   :  { %1638 = vmatpush3.bf16.msra.mxu0 %v1902_v2  ;;  %1660 = vmatpush3.bf16.msra.mxu1 %v1903_v3 }
 0x155   :  { %v1007_v14 = vpop.f32.mrb[0].mxu0  ;;  %v1089_v15 = vpop.f32.mrb[0].mxu1 }
 0x156   :  { %v1667_v58 = vadd.f32 %v1007_v14, %v246_v49  ;;  %v1669_v16 = vadd.f32 %v1089_v15, %v254_v11  ;;  %v1009_v17 = vpop.f32.mrb[1].mxu0  ;;  %v1091_v18 = vpop.f32.mrb[1].mxu1 }
 0x157   :  { %v1668_v19 = vadd.f32 %v1009_v17, %v250_v12  ;;  %v1670_v20 = vadd.f32 %v1091_v18, %v258_v13  ;;  %v1011_v21 = vpop.f32.mrb[2].mxu0  ;;  %v1093_v22 = vpop.f32.mrb[2].mxu1 }
 0x158   :  { %v1096_v23 = vmax.f32 %v1667_v58, 0.0  ;;  %v1098_v24 = vmax.f32 %v1669_v16, 0.0  ;;  %v1012_v25 = vpop.f32.mrb[3].mxu0  ;;  %v1094_v26 = vpop.f32.mrb[3].mxu1 }
 0x159   :  { %v1097_v27 = vmax.f32 %v1668_v19, 0.0  ;;  %v1099_v28 = vmax.f32 %v1670_v20, 0.0 }
 0x15a   :  { %v1100_v31 = vpack.c.bf16 %v1096_v23, %v1096_v23  ;;  %v1102_v32 = vpack.c.bf16 %v1098_v24, %v1098_v24 }
 0x15b   :  { %v1101_v29 = vpack.c.bf16 %v1097_v27, %v1097_v27  ;;  %v1103_v30 = vpack.c.bf16 %v1099_v28, %v1099_v28 }
 0x15d   :  { %1399 = vmatprep.mubr.bf16.mxu0 %v1101_v29  ;;  %1439 = vmatprep.mubr.bf16.mxu1 %v1103_v30 }
 0x15e   :  { %1400 = vmatmul.mubr.bf16.vlgmr.msra.gmra.mrb[4].mxu0 %v1100_v31  ;;  %1440 = vmatmul.mubr.bf16.vlgmr.msra.gmra.mrb[4].mxu1 %v1102_v32 }
 0x231   :  { %v1639_v33 = vpop.f32.mrb[4].mxu0  ;;  %v1661_v34 = vpop.f32.mrb[4].mxu1 }
 0x232   :  { %v1640_v36 = vpop.f32.mrb[5].mxu0  ;;  %v1662_v37 = vpop.f32.mrb[5].mxu1 }
 0x233   :  { %v1641_v38 = vadd.f32 %v1640_v36, %v1639_v33  ;;  %v1663_v39 = vadd.f32 %v1662_v37, %v1661_v34  ;;  %v1642_v40 = vpop.f32.mrb[6].mxu0  ;;  %v1664_v41 = vpop.f32.mrb[6].mxu1 }
 0x234   :  { %v1643_v42 = vpop.f32.mrb[7].mxu0  ;;  %v1665_v43 = vpop.f32.mrb[7].mxu1 }
 0x235   :  { %v1402_v44 = vadd.f32 %v1641_v38, %v1590_v35 }
 0x237   :  { %v1442_v45 = vadd.f32 %v1663_v39, %v1402_v44 }
 0x239   :  { %1447 = vst [vmem:[#allocation2] sm:$0x3] %v1442_v45 }
 0x23a   :  { %1915 = shalt.err (!%p1912_p4)
}
 0x23b   :  { %s1916_s11 = scalar_lea.hbm %s2494_s5, 32 }
 0x23c   :  { %p1917_p5 = scmp.ne.s32.totalorder %s2494_s5, %s1916_s11  ;;  %p1920_p6 = scmp.lt.u32.totalorder %s1916_s11, %s2494_s5 }
 0x23e   :  { %p1922_p7 = pnand %p1920_p6, %p1917_p5 }
 0x240   :  { %1925 = shalt.err (!%p1922_p7)
}
 0x241   :  { %1457 = dma.vmem_to_hbm [thread:$0]  %s1455_s8, 32, %s2494_s5, [#allocation3]  }
 0x242   :  { %1926 = dma.done.wait [#allocation3], 32  }
 0x243   :  { %1927 = vsyncadd [#allocation3], 4294967264 }
 0x244   :  { %1461 = vsyncpa [#allocation3], 1 }

// kernel: cnn_forward.8
= control target key start
LH: loop header
LB: loop body
LE: loop exit
PB: predicated region body
PF: predicated region fallthrough
CT: control target
= control target key end

     0   :  { %s6479_s12 = smov 0   ;;  %s6481_s13 = smov 0   ;;  %s8047_s0 = inlined_call_operand.vmem [shape: bf16[4,8,2304], index: 0, kind: input, shape index: {}]   ;;  %s8048_s1 = inlined_call_operand.vmem [shape: bf16[2304,512], index: 1, kind: input, shape index: {}]   ;;  %s8049_s2 = inlined_call_operand.vmem [shape: f32[1,512], index: 2, kind: input, shape index: {}]   ;;  %s8050_s3 = inlined_call_operand.vmem [shape: bf16[8,512], index: 3, kind: output, shape index: {}]  }
   0x1   :  { %s6483_s14 = smov 0   ;;  %s6485_s15 = smov 0  }
   0x2   :  { %s6487_s16 = smov 0  }
   0x3 LB: > { %s22_s17 = sadd.s32 1, %s6453_s15  ;;  %p65_p1 = scmp.ne.s32.totalorder %s6445_s13, %s6441_s12  ;;  %s6457_s16 = sphi %s6487_s16, %s13_s16   ;;  %s6453_s15 = sphi %s6485_s15, %s8054_s15   ;;  %s6449_s14 = sphi %s6483_s14, %s8053_s14   ;;  %s6445_s13 = sphi %s6481_s13, %s8052_s13   ;;  %s6441_s12 = sphi %s6479_s12, %s8051_s12  }
   0x4   : > { %p23_p0 = scmp.ge.s32.totalorder %s22_s17, 2  ;;  %p66_p2 = scmp.eq.s32.totalorder %s6457_s16, 0 }
   0x5   : > { %s58_s19 = sadd.s32 1, %s6445_s13  ;;  %p5058_p5 = scmp.ge.s32.totalorder %s6457_s16, 2 }
   0x6   : > { %s8056_s17 = smov (%p23_p0, %s22_s17), 0  ;;  %p67_p3 = por %p66_p2, %p65_p1 }
   0x7   : > { %s55_s18 = ssub.s32 %s6453_s15, %s8056_s17  ;;  %153 = sbr.rel (%p5058_p5) target bundleno = 162 (0xa2), region = 20 }
   0x8   : > { %p56_p4 = scmp.eq.s32.totalorder %s55_s18, 0 }
   0xa   : > { %s6514_s20 = scalar_select %p56_p4, %s6445_s13, %s58_s19  }
   0xe   : > { %156 = sbr.rel (!%p67_p3) target bundleno = 162 (0xa2), region = 24  ;;  %s158_s21 = sand.u32 (%p67_p3), 1, %s6445_s13  }
   0xf   : > { %s5455_s22 = sshll.u32 (%p67_p3), %s6453_s15, 3  ;;  %s5585_s23 = smul.u32 (%p67_p3), 2304, %s158_s21 }
  0x10   : > { %s6522_s26 = scalar_lea.vmem (%p67_p3), %s8048_s1, %s5455_s22 }
  0x11   : > { %v765_v0 = vld [vmem:[%s6522_s26] sm:$0xff] (%p67_p3)  ;;  %v767_v1 = vld [vmem:[%s6522_s26 + $0x10] sm:$0xff] (%p67_p3)  ;;  %s6530_s27 = scalar_lea.vmem (%p67_p3), [#allocation2], %s5585_s23 }
  0x12   : > { %v769_v2 = vld [vmem:[%s6522_s26 + $0x20] sm:$0xff] (%p67_p3)  ;;  %v771_v3 = vld [vmem:[%s6522_s26 + $0x30] sm:$0xff] (%p67_p3)  ;;  %766 = vst [vmem:[%s6530_s27] sm:$0xff] (%p67_p3), %v765_v0  ;;  %768 = vst [vmem:[%s6530_s27 + $0x8] sm:$0xff] (%p67_p3), %v767_v1 }
  0x13   : > { %v773_v4 = vld [vmem:[%s6522_s26 + $0x40] sm:$0xff] (%p67_p3)  ;;  %v775_v5 = vld [vmem:[%s6522_s26 + $0x50] sm:$0xff] (%p67_p3)  ;;  %770 = vst [vmem:[%s6530_s27 + $0x10] sm:$0xff] (%p67_p3), %v769_v2  ;;  %772 = vst [vmem:[%s6530_s27 + $0x18] sm:$0xff] (%p67_p3), %v771_v3 }
  0x14   : > { %774 = vst [vmem:[%s6530_s27 + $0x20] sm:$0xff] (%p67_p3), %v773_v4  ;;  %776 = vst [vmem:[%s6530_s27 + $0x28] sm:$0xff] (%p67_p3), %v775_v5  ;;  %v777_v6 = vld [vmem:[%s6522_s26 + $0x60] sm:$0xff] (%p67_p3)  ;;  %v779_v7 = vld [vmem:[%s6522_s26 + $0x70] sm:$0xff] (%p67_p3) }
  0x15   : > { %v781_v8 = vld [vmem:[%s6522_s26 + $0x80] sm:$0xff]  ;;  %778 = vst [vmem:[%s6530_s27 + $0x30] sm:$0xff] %v777_v6  ;;  %780 = vst [vmem:[%s6530_s27 + $0x38] sm:$0xff] %v779_v7  ;;  %v783_v9 = vld [vmem:[%s6522_s26 + $0x90] sm:$0xff] }
  0x16   : > { %782 = vst [vmem:[%s6530_s27 + $0x40] sm:$0xff] %v781_v8  ;;  %v785_v10 = vld [vmem:[%s6522_s26 + $0xa0] sm:$0xff]  ;;  %v787_v11 = vld [vmem:[%s6522_s26 + $0xb0] sm:$0xff]  ;;  %784 = vst [vmem:[%s6530_s27 + $0x48] sm:$0xff] %v783_v9 }
  0x17   : > { %786 = vst [vmem:[%s6530_s27 + $0x50] sm:$0xff] %v785_v10  ;;  %788 = vst [vmem:[%s6530_s27 + $0x58] sm:$0xff] %v787_v11  ;;  %v789_v12 = vld [vmem:[%s6522_s26 + $0xc0] sm:$0xff]  ;;  %v791_v13 = vld [vmem:[%s6522_s26 + $0xd0] sm:$0xff] }
  0x18   : > { %v793_v14 = vld [vmem:[%s6522_s26 + $0xe0] sm:$0xff]  ;;  %790 = vst [vmem:[%s6530_s27 + $0x60] sm:$0xff] %v789_v12  ;;  %792 = vst [vmem:[%s6530_s27 + $0x68] sm:$0xff] %v791_v13  ;;  %v795_v15 = vld [vmem:[%s6522_s26 + $0xf0] sm:$0xff] }
  0x19   : > { %794 = vst [vmem:[%s6530_s27 + $0x70] sm:$0xff] %v793_v14  ;;  %v797_v16 = vld [vmem:[%s6522_s26 + $0x100] sm:$0xff]  ;;  %v799_v17 = vld [vmem:[%s6522_s26 + $0x110] sm:$0xff]  ;;  %796 = vst [vmem:[%s6530_s27 + $0x78] sm:$0xff] %v795_v15 }
  0x1a   : > { %798 = vst [vmem:[%s6530_s27 + $0x80] sm:$0xff] %v797_v16  ;;  %800 = vst [vmem:[%s6530_s27 + $0x88] sm:$0xff] %v799_v17  ;;  %v801_v18 = vld [vmem:[%s6522_s26 + $0x120] sm:$0xff]  ;;  %v803_v19 = vld [vmem:[%s6522_s26 + $0x130] sm:$0xff] }
  0x1b   : > { %v805_v20 = vld [vmem:[%s6522_s26 + $0x140] sm:$0xff]  ;;  %802 = vst [vmem:[%s6530_s27 + $0x90] sm:$0xff] %v801_v18  ;;  %804 = vst [vmem:[%s6530_s27 + $0x98] sm:$0xff] %v803_v19  ;;  %v807_v21 = vld [vmem:[%s6522_s26 + $0x150] sm:$0xff] }
  0x1c   : > { %806 = vst [vmem:[%s6530_s27 + $0xa0] sm:$0xff] %v805_v20  ;;  %v809_v22 = vld [vmem:[%s6522_s26 + $0x160] sm:$0xff]  ;;  %v811_v23 = vld [vmem:[%s6522_s26 + $0x170] sm:$0xff]  ;;  %808 = vst [vmem:[%s6530_s27 + $0xa8] sm:$0xff] %v807_v21 }
  0x1d   : > { %810 = vst [vmem:[%s6530_s27 + $0xb0] sm:$0xff] %v809_v22  ;;  %812 = vst [vmem:[%s6530_s27 + $0xb8] sm:$0xff] %v811_v23  ;;  %v813_v24 = vld [vmem:[%s6522_s26 + $0x180] sm:$0xff]  ;;  %v815_v25 = vld [vmem:[%s6522_s26 + $0x190] sm:$0xff] }
  0x1e   : > { %v817_v26 = vld [vmem:[%s6522_s26 + $0x1a0] sm:$0xff]  ;;  %814 = vst [vmem:[%s6530_s27 + $0xc0] sm:$0xff] %v813_v24  ;;  %816 = vst [vmem:[%s6530_s27 + $0xc8] sm:$0xff] %v815_v25  ;;  %v819_v27 = vld [vmem:[%s6522_s26 + $0x1b0] sm:$0xff] }
  0x1f   : > { %818 = vst [vmem:[%s6530_s27 + $0xd0] sm:$0xff] %v817_v26  ;;  %v821_v28 = vld [vmem:[%s6522_s26 + $0x1c0] sm:$0xff]  ;;  %v823_v29 = vld [vmem:[%s6522_s26 + $0x1d0] sm:$0xff]  ;;  %820 = vst [vmem:[%s6530_s27 + $0xd8] sm:$0xff] %v819_v27 }
  0x20   : > { %822 = vst [vmem:[%s6530_s27 + $0xe0] sm:$0xff] %v821_v28  ;;  %824 = vst [vmem:[%s6530_s27 + $0xe8] sm:$0xff] %v823_v29  ;;  %v825_v30 = vld [vmem:[%s6522_s26 + $0x1e0] sm:$0xff]  ;;  %v827_v31 = vld [vmem:[%s6522_s26 + $0x1f0] sm:$0xff] }
  0x21   : > { %v829_v32 = vld [vmem:[%s6522_s26 + $0x200] sm:$0xff]  ;;  %826 = vst [vmem:[%s6530_s27 + $0xf0] sm:$0xff] %v825_v30  ;;  %828 = vst [vmem:[%s6530_s27 + $0xf8] sm:$0xff] %v827_v31  ;;  %v831_v33 = vld [vmem:[%s6522_s26 + $0x210] sm:$0xff] }
  0x22   : > { %830 = vst [vmem:[%s6530_s27 + $0x100] sm:$0xff] %v829_v32  ;;  %v833_v34 = vld [vmem:[%s6522_s26 + $0x220] sm:$0xff]  ;;  %v835_v35 = vld [vmem:[%s6522_s26 + $0x230] sm:$0xff]  ;;  %832 = vst [vmem:[%s6530_s27 + $0x108] sm:$0xff] %v831_v33 }
  0x23   : > { %834 = vst [vmem:[%s6530_s27 + $0x110] sm:$0xff] %v833_v34  ;;  %836 = vst [vmem:[%s6530_s27 + $0x118] sm:$0xff] %v835_v35  ;;  %v837_v36 = vld [vmem:[%s6522_s26 + $0x240] sm:$0xff]  ;;  %v839_v37 = vld [vmem:[%s6522_s26 + $0x250] sm:$0xff] }
  0x24   : > { %v841_v38 = vld [vmem:[%s6522_s26 + $0x260] sm:$0xff]  ;;  %838 = vst [vmem:[%s6530_s27 + $0x120] sm:$0xff] %v837_v36  ;;  %840 = vst [vmem:[%s6530_s27 + $0x128] sm:$0xff] %v839_v37  ;;  %v843_v39 = vld [vmem:[%s6522_s26 + $0x270] sm:$0xff] }
  0x25   : > { %842 = vst [vmem:[%s6530_s27 + $0x130] sm:$0xff] %v841_v38  ;;  %v845_v40 = vld [vmem:[%s6522_s26 + $0x280] sm:$0xff]  ;;  %v847_v41 = vld [vmem:[%s6522_s26 + $0x290] sm:$0xff]  ;;  %844 = vst [vmem:[%s6530_s27 + $0x138] sm:$0xff] %v843_v39 }
  0x26   : > { %846 = vst [vmem:[%s6530_s27 + $0x140] sm:$0xff] %v845_v40  ;;  %848 = vst [vmem:[%s6530_s27 + $0x148] sm:$0xff] %v847_v41  ;;  %v849_v42 = vld [vmem:[%s6522_s26 + $0x2a0] sm:$0xff]  ;;  %v851_v43 = vld [vmem:[%s6522_s26 + $0x2b0] sm:$0xff] }
  0x27   : > { %v853_v44 = vld [vmem:[%s6522_s26 + $0x2c0] sm:$0xff]  ;;  %850 = vst [vmem:[%s6530_s27 + $0x150] sm:$0xff] %v849_v42  ;;  %852 = vst [vmem:[%s6530_s27 + $0x158] sm:$0xff] %v851_v43  ;;  %v855_v45 = vld [vmem:[%s6522_s26 + $0x2d0] sm:$0xff] }
  0x28   : > { %854 = vst [vmem:[%s6530_s27 + $0x160] sm:$0xff] %v853_v44  ;;  %v857_v46 = vld [vmem:[%s6522_s26 + $0x2e0] sm:$0xff]  ;;  %v859_v47 = vld [vmem:[%s6522_s26 + $0x2f0] sm:$0xff]  ;;  %856 = vst [vmem:[%s6530_s27 + $0x168] sm:$0xff] %v855_v45 }
  0x29   : > { %858 = vst [vmem:[%s6530_s27 + $0x170] sm:$0xff] %v857_v46  ;;  %860 = vst [vmem:[%s6530_s27 + $0x178] sm:$0xff] %v859_v47  ;;  %v861_v48 = vld [vmem:[%s6522_s26 + $0x300] sm:$0xff]  ;;  %v863_v49 = vld [vmem:[%s6522_s26 + $0x310] sm:$0xff] }
  0x2a   : > { %v865_v50 = vld [vmem:[%s6522_s26 + $0x320] sm:$0xff]  ;;  %862 = vst [vmem:[%s6530_s27 + $0x180] sm:$0xff] %v861_v48  ;;  %864 = vst [vmem:[%s6530_s27 + $0x188] sm:$0xff] %v863_v49  ;;  %v867_v51 = vld [vmem:[%s6522_s26 + $0x330] sm:$0xff] }
  0x2b   : > { %866 = vst [vmem:[%s6530_s27 + $0x190] sm:$0xff] %v865_v50  ;;  %v869_v52 = vld [vmem:[%s6522_s26 + $0x340] sm:$0xff]  ;;  %v871_v53 = vld [vmem:[%s6522_s26 + $0x350] sm:$0xff]  ;;  %868 = vst [vmem:[%s6530_s27 + $0x198] sm:$0xff] %v867_v51 }
  0x2c   : > { %870 = vst [vmem:[%s6530_s27 + $0x1a0] sm:$0xff] %v869_v52  ;;  %872 = vst [vmem:[%s6530_s27 + $0x1a8] sm:$0xff] %v871_v53  ;;  %v873_v54 = vld [vmem:[%s6522_s26 + $0x360] sm:$0xff]  ;;  %v875_v55 = vld [vmem:[%s6522_s26 + $0x370] sm:$0xff] }
  0x2d   : > { %v877_v56 = vld [vmem:[%s6522_s26 + $0x380] sm:$0xff]  ;;  %874 = vst [vmem:[%s6530_s27 + $0x1b0] sm:$0xff] %v873_v54  ;;  %876 = vst [vmem:[%s6530_s27 + $0x1b8] sm:$0xff] %v875_v55  ;;  %v879_v57 = vld [vmem:[%s6522_s26 + $0x390] sm:$0xff] }
  0x2e   : > { %878 = vst [vmem:[%s6530_s27 + $0x1c0] sm:$0xff] %v877_v56  ;;  %v881_v58 = vld [vmem:[%s6522_s26 + $0x3a0] sm:$0xff]  ;;  %v883_v59 = vld [vmem:[%s6522_s26 + $0x3b0] sm:$0xff]  ;;  %880 = vst [vmem:[%s6530_s27 + $0x1c8] sm:$0xff] %v879_v57 }
  0x2f   : > { %882 = vst [vmem:[%s6530_s27 + $0x1d0] sm:$0xff] %v881_v58  ;;  %884 = vst [vmem:[%s6530_s27 + $0x1d8] sm:$0xff] %v883_v59  ;;  %v885_v60 = vld [vmem:[%s6522_s26 + $0x3c0] sm:$0xff]  ;;  %v887_v61 = vld [vmem:[%s6522_s26 + $0x3d0] sm:$0xff] }
  0x30   : > { %v889_v62 = vld [vmem:[%s6522_s26 + $0x3e0] sm:$0xff]  ;;  %886 = vst [vmem:[%s6530_s27 + $0x1e0] sm:$0xff] %v885_v60  ;;  %888 = vst [vmem:[%s6530_s27 + $0x1e8] sm:$0xff] %v887_v61  ;;  %v891_v63 = vld [vmem:[%s6522_s26 + $0x3f0] sm:$0xff] }
  0x31   : > { %890 = vst [vmem:[%s6530_s27 + $0x1f0] sm:$0xff] %v889_v62  ;;  %v893_v0 = vld [vmem:[%s6522_s26 + $0x400] sm:$0xff]  ;;  %v895_v1 = vld [vmem:[%s6522_s26 + $0x410] sm:$0xff]  ;;  %892 = vst [vmem:[%s6530_s27 + $0x1f8] sm:$0xff] %v891_v63 }
  0x32   : > { %894 = vst [vmem:[%s6530_s27 + $0x200] sm:$0xff] %v893_v0  ;;  %896 = vst [vmem:[%s6530_s27 + $0x208] sm:$0xff] %v895_v1  ;;  %v897_v2 = vld [vmem:[%s6522_s26 + $0x420] sm:$0xff]  ;;  %v899_v3 = vld [vmem:[%s6522_s26 + $0x430] sm:$0xff] }
  0x33   : > { %v901_v4 = vld [vmem:[%s6522_s26 + $0x440] sm:$0xff]  ;;  %898 = vst [vmem:[%s6530_s27 + $0x210] sm:$0xff] %v897_v2  ;;  %900 = vst [vmem:[%s6530_s27 + $0x218] sm:$0xff] %v899_v3  ;;  %v903_v5 = vld [vmem:[%s6522_s26 + $0x450] sm:$0xff] }
  0x34   : > { %902 = vst [vmem:[%s6530_s27 + $0x220] sm:$0xff] %v901_v4  ;;  %v905_v6 = vld [vmem:[%s6522_s26 + $0x460] sm:$0xff]  ;;  %v907_v7 = vld [vmem:[%s6522_s26 + $0x470] sm:$0xff]  ;;  %904 = vst [vmem:[%s6530_s27 + $0x228] sm:$0xff] %v903_v5 }
  0x35   : > { %906 = vst [vmem:[%s6530_s27 + $0x230] sm:$0xff] %v905_v6  ;;  %908 = vst [vmem:[%s6530_s27 + $0x238] sm:$0xff] %v907_v7  ;;  %v909_v8 = vld [vmem:[%s6522_s26 + $0x480] sm:$0xff]  ;;  %v911_v9 = vld [vmem:[%s6522_s26 + $0x490] sm:$0xff] }
  0x36   : > { %v913_v10 = vld [vmem:[%s6522_s26 + $0x4a0] sm:$0xff]  ;;  %910 = vst [vmem:[%s6530_s27 + $0x240] sm:$0xff] %v909_v8  ;;  %912 = vst [vmem:[%s6530_s27 + $0x248] sm:$0xff] %v911_v9  ;;  %v915_v11 = vld [vmem:[%s6522_s26 + $0x4b0] sm:$0xff] }
  0x37   : > { %914 = vst [vmem:[%s6530_s27 + $0x250] sm:$0xff] %v913_v10  ;;  %v917_v12 = vld [vmem:[%s6522_s26 + $0x4c0] sm:$0xff]  ;;  %v919_v13 = vld [vmem:[%s6522_s26 + $0x4d0] sm:$0xff]  ;;  %916 = vst [vmem:[%s6530_s27 + $0x258] sm:$0xff] %v915_v11 }
  0x38   : > { %918 = vst [vmem:[%s6530_s27 + $0x260] sm:$0xff] %v917_v12  ;;  %920 = vst [vmem:[%s6530_s27 + $0x268] sm:$0xff] %v919_v13  ;;  %v921_v14 = vld [vmem:[%s6522_s26 + $0x4e0] sm:$0xff]  ;;  %v923_v15 = vld [vmem:[%s6522_s26 + $0x4f0] sm:$0xff] }
  0x39   : > { %v925_v16 = vld [vmem:[%s6522_s26 + $0x500] sm:$0xff]  ;;  %922 = vst [vmem:[%s6530_s27 + $0x270] sm:$0xff] %v921_v14  ;;  %924 = vst [vmem:[%s6530_s27 + $0x278] sm:$0xff] %v923_v15  ;;  %v927_v17 = vld [vmem:[%s6522_s26 + $0x510] sm:$0xff] }
  0x3a   : > { %926 = vst [vmem:[%s6530_s27 + $0x280] sm:$0xff] %v925_v16  ;;  %v929_v18 = vld [vmem:[%s6522_s26 + $0x520] sm:$0xff]  ;;  %v931_v19 = vld [vmem:[%s6522_s26 + $0x530] sm:$0xff]  ;;  %928 = vst [vmem:[%s6530_s27 + $0x288] sm:$0xff] %v927_v17 }
  0x3b   : > { %930 = vst [vmem:[%s6530_s27 + $0x290] sm:$0xff] %v929_v18  ;;  %932 = vst [vmem:[%s6530_s27 + $0x298] sm:$0xff] %v931_v19  ;;  %v933_v20 = vld [vmem:[%s6522_s26 + $0x540] sm:$0xff]  ;;  %v935_v21 = vld [vmem:[%s6522_s26 + $0x550] sm:$0xff] }
  0x3c   : > { %v937_v22 = vld [vmem:[%s6522_s26 + $0x560] sm:$0xff]  ;;  %934 = vst [vmem:[%s6530_s27 + $0x2a0] sm:$0xff] %v933_v20  ;;  %936 = vst [vmem:[%s6530_s27 + $0x2a8] sm:$0xff] %v935_v21  ;;  %v939_v23 = vld [vmem:[%s6522_s26 + $0x570] sm:$0xff] }
  0x3d   : > { %938 = vst [vmem:[%s6530_s27 + $0x2b0] sm:$0xff] %v937_v22  ;;  %v941_v24 = vld [vmem:[%s6522_s26 + $0x580] sm:$0xff]  ;;  %v943_v25 = vld [vmem:[%s6522_s26 + $0x590] sm:$0xff]  ;;  %940 = vst [vmem:[%s6530_s27 + $0x2b8] sm:$0xff] %v939_v23 }
  0x3e   : > { %942 = vst [vmem:[%s6530_s27 + $0x2c0] sm:$0xff] %v941_v24  ;;  %944 = vst [vmem:[%s6530_s27 + $0x2c8] sm:$0xff] %v943_v25  ;;  %v945_v26 = vld [vmem:[%s6522_s26 + $0x5a0] sm:$0xff]  ;;  %v947_v27 = vld [vmem:[%s6522_s26 + $0x5b0] sm:$0xff] }
  0x3f   : > { %v949_v28 = vld [vmem:[%s6522_s26 + $0x5c0] sm:$0xff]  ;;  %946 = vst [vmem:[%s6530_s27 + $0x2d0] sm:$0xff] %v945_v26  ;;  %948 = vst [vmem:[%s6530_s27 + $0x2d8] sm:$0xff] %v947_v27  ;;  %v951_v29 = vld [vmem:[%s6522_s26 + $0x5d0] sm:$0xff] }
  0x40   : > { %950 = vst [vmem:[%s6530_s27 + $0x2e0] sm:$0xff] %v949_v28  ;;  %v953_v30 = vld [vmem:[%s6522_s26 + $0x5e0] sm:$0xff]  ;;  %v955_v31 = vld [vmem:[%s6522_s26 + $0x5f0] sm:$0xff]  ;;  %952 = vst [vmem:[%s6530_s27 + $0x2e8] sm:$0xff] %v951_v29 }
  0x41   : > { %954 = vst [vmem:[%s6530_s27 + $0x2f0] sm:$0xff] %v953_v30  ;;  %956 = vst [vmem:[%s6530_s27 + $0x2f8] sm:$0xff] %v955_v31  ;;  %v957_v32 = vld [vmem:[%s6522_s26 + $0x600] sm:$0xff]  ;;  %v959_v33 = vld [vmem:[%s6522_s26 + $0x610] sm:$0xff] }
  0x42   : > { %v961_v34 = vld [vmem:[%s6522_s26 + $0x620] sm:$0xff]  ;;  %958 = vst [vmem:[%s6530_s27 + $0x300] sm:$0xff] %v957_v32  ;;  %960 = vst [vmem:[%s6530_s27 + $0x308] sm:$0xff] %v959_v33  ;;  %v963_v35 = vld [vmem:[%s6522_s26 + $0x630] sm:$0xff] }
  0x43   : > { %962 = vst [vmem:[%s6530_s27 + $0x310] sm:$0xff] %v961_v34  ;;  %v965_v36 = vld [vmem:[%s6522_s26 + $0x640] sm:$0xff]  ;;  %v967_v37 = vld [vmem:[%s6522_s26 + $0x650] sm:$0xff]  ;;  %964 = vst [vmem:[%s6530_s27 + $0x318] sm:$0xff] %v963_v35 }
  0x44   : > { %966 = vst [vmem:[%s6530_s27 + $0x320] sm:$0xff] %v965_v36  ;;  %968 = vst [vmem:[%s6530_s27 + $0x328] sm:$0xff] %v967_v37  ;;  %v969_v38 = vld [vmem:[%s6522_s26 + $0x660] sm:$0xff]  ;;  %v971_v39 = vld [vmem:[%s6522_s26 + $0x670] sm:$0xff] }
  0x45   : > { %v973_v40 = vld [vmem:[%s6522_s26 + $0x680] sm:$0xff]  ;;  %970 = vst [vmem:[%s6530_s27 + $0x330] sm:$0xff] %v969_v38  ;;  %972 = vst [vmem:[%s6530_s27 + $0x338] sm:$0xff] %v971_v39  ;;  %v975_v41 = vld [vmem:[%s6522_s26 + $0x690] sm:$0xff] }
  0x46   : > { %974 = vst [vmem:[%s6530_s27 + $0x340] sm:$0xff] %v973_v40  ;;  %v977_v42 = vld [vmem:[%s6522_s26 + $0x6a0] sm:$0xff]  ;;  %v979_v43 = vld [vmem:[%s6522_s26 + $0x6b0] sm:$0xff]  ;;  %976 = vst [vmem:[%s6530_s27 + $0x348] sm:$0xff] %v975_v41 }
  0x47   : > { %978 = vst [vmem:[%s6530_s27 + $0x350] sm:$0xff] %v977_v42  ;;  %980 = vst [vmem:[%s6530_s27 + $0x358] sm:$0xff] %v979_v43  ;;  %v981_v44 = vld [vmem:[%s6522_s26 + $0x6c0] sm:$0xff]  ;;  %v983_v45 = vld [vmem:[%s6522_s26 + $0x6d0] sm:$0xff] }
  0x48   : > { %v985_v46 = vld [vmem:[%s6522_s26 + $0x6e0] sm:$0xff]  ;;  %982 = vst [vmem:[%s6530_s27 + $0x360] sm:$0xff] %v981_v44  ;;  %984 = vst [vmem:[%s6530_s27 + $0x368] sm:$0xff] %v983_v45  ;;  %v987_v47 = vld [vmem:[%s6522_s26 + $0x6f0] sm:$0xff] }
  0x49   : > { %986 = vst [vmem:[%s6530_s27 + $0x370] sm:$0xff] %v985_v46  ;;  %v989_v48 = vld [vmem:[%s6522_s26 + $0x700] sm:$0xff]  ;;  %v991_v49 = vld [vmem:[%s6522_s26 + $0x710] sm:$0xff]  ;;  %988 = vst [vmem:[%s6530_s27 + $0x378] sm:$0xff] %v987_v47 }
  0x4a   : > { %990 = vst [vmem:[%s6530_s27 + $0x380] sm:$0xff] %v989_v48  ;;  %992 = vst [vmem:[%s6530_s27 + $0x388] sm:$0xff] %v991_v49  ;;  %v993_v50 = vld [vmem:[%s6522_s26 + $0x720] sm:$0xff]  ;;  %v995_v51 = vld [vmem:[%s6522_s26 + $0x730] sm:$0xff] }
  0x4b   : > { %v997_v52 = vld [vmem:[%s6522_s26 + $0x740] sm:$0xff]  ;;  %994 = vst [vmem:[%s6530_s27 + $0x390] sm:$0xff] %v993_v50  ;;  %996 = vst [vmem:[%s6530_s27 + $0x398] sm:$0xff] %v995_v51  ;;  %v999_v53 = vld [vmem:[%s6522_s26 + $0x750] sm:$0xff] }
  0x4c   : > { %998 = vst [vmem:[%s6530_s27 + $0x3a0] sm:$0xff] %v997_v52  ;;  %v1001_v54 = vld [vmem:[%s6522_s26 + $0x760] sm:$0xff]  ;;  %v1003_v55 = vld [vmem:[%s6522_s26 + $0x770] sm:$0xff]  ;;  %1000 = vst [vmem:[%s6530_s27 + $0x3a8] sm:$0xff] %v999_v53 }
  0x4d   : > { %1002 = vst [vmem:[%s6530_s27 + $0x3b0] sm:$0xff] %v1001_v54  ;;  %1004 = vst [vmem:[%s6530_s27 + $0x3b8] sm:$0xff] %v1003_v55  ;;  %v1005_v56 = vld [vmem:[%s6522_s26 + $0x780] sm:$0xff]  ;;  %v1007_v57 = vld [vmem:[%s6522_s26 + $0x790] sm:$0xff] }
  0x4e   : > { %v1009_v58 = vld [vmem:[%s6522_s26 + $0x7a0] sm:$0xff]  ;;  %1006 = vst [vmem:[%s6530_s27 + $0x3c0] sm:$0xff] %v1005_v56  ;;  %1008 = vst [vmem:[%s6530_s27 + $0x3c8] sm:$0xff] %v1007_v57  ;;  %v1011_v59 = vld [vmem:[%s6522_s26 + $0x7b0] sm:$0xff] }
  0x4f   : > { %1010 = vst [vmem:[%s6530_s27 + $0x3d0] sm:$0xff] %v1009_v58  ;;  %v1013_v60 = vld [vmem:[%s6522_s26 + $0x7c0] sm:$0xff]  ;;  %v1015_v61 = vld [vmem:[%s6522_s26 + $0x7d0] sm:$0xff]  ;;  %1012 = vst [vmem:[%s6530_s27 + $0x3d8] sm:$0xff] %v1011_v59 }
  0x50   : > { %1014 = vst [vmem:[%s6530_s27 + $0x3e0] sm:$0xff] %v1013_v60  ;;  %1016 = vst [vmem:[%s6530_s27 + $0x3e8] sm:$0xff] %v1015_v61  ;;  %v1017_v62 = vld [vmem:[%s6522_s26 + $0x7e0] sm:$0xff]  ;;  %v1019_v63 = vld [vmem:[%s6522_s26 + $0x7f0] sm:$0xff] }
  0x51   : > { %v1021_v0 = vld [vmem:[%s6522_s26 + $0x800] sm:$0xff]  ;;  %1018 = vst [vmem:[%s6530_s27 + $0x3f0] sm:$0xff] %v1017_v62  ;;  %1020 = vst [vmem:[%s6530_s27 + $0x3f8] sm:$0xff] %v1019_v63  ;;  %v1023_v1 = vld [vmem:[%s6522_s26 + $0x810] sm:$0xff] }
  0x52   : > { %1022 = vst [vmem:[%s6530_s27 + $0x400] sm:$0xff] %v1021_v0  ;;  %v1025_v2 = vld [vmem:[%s6522_s26 + $0x820] sm:$0xff]  ;;  %v1027_v3 = vld [vmem:[%s6522_s26 + $0x830] sm:$0xff]  ;;  %1024 = vst [vmem:[%s6530_s27 + $0x408] sm:$0xff] %v1023_v1 }
  0x53   : > { %1026 = vst [vmem:[%s6530_s27 + $0x410] sm:$0xff] %v1025_v2  ;;  %1028 = vst [vmem:[%s6530_s27 + $0x418] sm:$0xff] %v1027_v3  ;;  %v1029_v4 = vld [vmem:[%s6522_s26 + $0x840] sm:$0xff]  ;;  %v1031_v5 = vld [vmem:[%s6522_s26 + $0x850] sm:$0xff] }
  0x54   : > { %v1033_v6 = vld [vmem:[%s6522_s26 + $0x860] sm:$0xff]  ;;  %1030 = vst [vmem:[%s6530_s27 + $0x420] sm:$0xff] %v1029_v4  ;;  %1032 = vst [vmem:[%s6530_s27 + $0x428] sm:$0xff] %v1031_v5  ;;  %v1035_v7 = vld [vmem:[%s6522_s26 + $0x870] sm:$0xff] }
  0x55   : > { %1034 = vst [vmem:[%s6530_s27 + $0x430] sm:$0xff] %v1033_v6  ;;  %v1037_v8 = vld [vmem:[%s6522_s26 + $0x880] sm:$0xff]  ;;  %v1039_v9 = vld [vmem:[%s6522_s26 + $0x890] sm:$0xff]  ;;  %1036 = vst [vmem:[%s6530_s27 + $0x438] sm:$0xff] %v1035_v7 }
  0x56   : > { %1038 = vst [vmem:[%s6530_s27 + $0x440] sm:$0xff] %v1037_v8  ;;  %1040 = vst [vmem:[%s6530_s27 + $0x448] sm:$0xff] %v1039_v9  ;;  %v1041_v10 = vld [vmem:[%s6522_s26 + $0x8a0] sm:$0xff]  ;;  %v1043_v11 = vld [vmem:[%s6522_s26 + $0x8b0] sm:$0xff] }
  0x57   : > { %v1045_v12 = vld [vmem:[%s6522_s26 + $0x8c0] sm:$0xff]  ;;  %1042 = vst [vmem:[%s6530_s27 + $0x450] sm:$0xff] %v1041_v10  ;;  %1044 = vst [vmem:[%s6530_s27 + $0x458] sm:$0xff] %v1043_v11  ;;  %v1047_v13 = vld [vmem:[%s6522_s26 + $0x8d0] sm:$0xff] }
  0x58   : > { %1046 = vst [vmem:[%s6530_s27 + $0x460] sm:$0xff] %v1045_v12  ;;  %v1049_v14 = vld [vmem:[%s6522_s26 + $0x8e0] sm:$0xff]  ;;  %v1051_v15 = vld [vmem:[%s6522_s26 + $0x8f0] sm:$0xff]  ;;  %1048 = vst [vmem:[%s6530_s27 + $0x468] sm:$0xff] %v1047_v13 }
  0x59   : > { %1050 = vst [vmem:[%s6530_s27 + $0x470] sm:$0xff] %v1049_v14  ;;  %1052 = vst [vmem:[%s6530_s27 + $0x478] sm:$0xff] %v1051_v15  ;;  %v1053_v16 = vld [vmem:[%s6522_s26 + $0x900] sm:$0xff]  ;;  %v1055_v17 = vld [vmem:[%s6522_s26 + $0x910] sm:$0xff] }
  0x5a   : > { %v1057_v18 = vld [vmem:[%s6522_s26 + $0x920] sm:$0xff]  ;;  %1054 = vst [vmem:[%s6530_s27 + $0x480] sm:$0xff] %v1053_v16  ;;  %1056 = vst [vmem:[%s6530_s27 + $0x488] sm:$0xff] %v1055_v17  ;;  %v1059_v19 = vld [vmem:[%s6522_s26 + $0x930] sm:$0xff] }
  0x5b   : > { %1058 = vst [vmem:[%s6530_s27 + $0x490] sm:$0xff] %v1057_v18  ;;  %v1061_v20 = vld [vmem:[%s6522_s26 + $0x940] sm:$0xff]  ;;  %v1063_v21 = vld [vmem:[%s6522_s26 + $0x950] sm:$0xff]  ;;  %1060 = vst [vmem:[%s6530_s27 + $0x498] sm:$0xff] %v1059_v19 }
  0x5c   : > { %1062 = vst [vmem:[%s6530_s27 + $0x4a0] sm:$0xff] %v1061_v20  ;;  %1064 = vst [vmem:[%s6530_s27 + $0x4a8] sm:$0xff] %v1063_v21  ;;  %v1065_v22 = vld [vmem:[%s6522_s26 + $0x960] sm:$0xff]  ;;  %v1067_v23 = vld [vmem:[%s6522_s26 + $0x970] sm:$0xff] }
  0x5d   : > { %v1069_v24 = vld [vmem:[%s6522_s26 + $0x980] sm:$0xff]  ;;  %1066 = vst [vmem:[%s6530_s27 + $0x4b0] sm:$0xff] %v1065_v22  ;;  %1068 = vst [vmem:[%s6530_s27 + $0x4b8] sm:$0xff] %v1067_v23  ;;  %v1071_v25 = vld [vmem:[%s6522_s26 + $0x990] sm:$0xff] }
  0x5e   : > { %1070 = vst [vmem:[%s6530_s27 + $0x4c0] sm:$0xff] %v1069_v24  ;;  %v1073_v26 = vld [vmem:[%s6522_s26 + $0x9a0] sm:$0xff]  ;;  %v1075_v27 = vld [vmem:[%s6522_s26 + $0x9b0] sm:$0xff]  ;;  %1072 = vst [vmem:[%s6530_s27 + $0x4c8] sm:$0xff] %v1071_v25 }
  0x5f   : > { %1074 = vst [vmem:[%s6530_s27 + $0x4d0] sm:$0xff] %v1073_v26  ;;  %1076 = vst [vmem:[%s6530_s27 + $0x4d8] sm:$0xff] %v1075_v27  ;;  %v1077_v28 = vld [vmem:[%s6522_s26 + $0x9c0] sm:$0xff]  ;;  %v1079_v29 = vld [vmem:[%s6522_s26 + $0x9d0] sm:$0xff] }
  0x60   : > { %v1081_v30 = vld [vmem:[%s6522_s26 + $0x9e0] sm:$0xff]  ;;  %1078 = vst [vmem:[%s6530_s27 + $0x4e0] sm:$0xff] %v1077_v28  ;;  %1080 = vst [vmem:[%s6530_s27 + $0x4e8] sm:$0xff] %v1079_v29  ;;  %v1083_v31 = vld [vmem:[%s6522_s26 + $0x9f0] sm:$0xff] }
  0x61   : > { %1082 = vst [vmem:[%s6530_s27 + $0x4f0] sm:$0xff] %v1081_v30  ;;  %v1085_v32 = vld [vmem:[%s6522_s26 + $0xa00] sm:$0xff]  ;;  %v1087_v33 = vld [vmem:[%s6522_s26 + $0xa10] sm:$0xff]  ;;  %1084 = vst [vmem:[%s6530_s27 + $0x4f8] sm:$0xff] %v1083_v31 }
  0x62   : > { %1086 = vst [vmem:[%s6530_s27 + $0x500] sm:$0xff] %v1085_v32  ;;  %1088 = vst [vmem:[%s6530_s27 + $0x508] sm:$0xff] %v1087_v33  ;;  %v1089_v34 = vld [vmem:[%s6522_s26 + $0xa20] sm:$0xff]  ;;  %v1091_v35 = vld [vmem:[%s6522_s26 + $0xa30] sm:$0xff] }
  0x63   : > { %v1093_v36 = vld [vmem:[%s6522_s26 + $0xa40] sm:$0xff]  ;;  %1090 = vst [vmem:[%s6530_s27 + $0x510] sm:$0xff] %v1089_v34  ;;  %1092 = vst [vmem:[%s6530_s27 + $0x518] sm:$0xff] %v1091_v35  ;;  %v1095_v37 = vld [vmem:[%s6522_s26 + $0xa50] sm:$0xff] }
  0x64   : > { %1094 = vst [vmem:[%s6530_s27 + $0x520] sm:$0xff] %v1093_v36  ;;  %v1097_v38 = vld [vmem:[%s6522_s26 + $0xa60] sm:$0xff]  ;;  %v1099_v39 = vld [vmem:[%s6522_s26 + $0xa70] sm:$0xff]  ;;  %1096 = vst [vmem:[%s6530_s27 + $0x528] sm:$0xff] %v1095_v37 }
  0x65   : > { %1098 = vst [vmem:[%s6530_s27 + $0x530] sm:$0xff] %v1097_v38  ;;  %1100 = vst [vmem:[%s6530_s27 + $0x538] sm:$0xff] %v1099_v39  ;;  %v1101_v40 = vld [vmem:[%s6522_s26 + $0xa80] sm:$0xff]  ;;  %v1103_v41 = vld [vmem:[%s6522_s26 + $0xa90] sm:$0xff] }
  0x66   : > { %v1105_v42 = vld [vmem:[%s6522_s26 + $0xaa0] sm:$0xff]  ;;  %1102 = vst [vmem:[%s6530_s27 + $0x540] sm:$0xff] %v1101_v40  ;;  %1104 = vst [vmem:[%s6530_s27 + $0x548] sm:$0xff] %v1103_v41  ;;  %v1107_v43 = vld [vmem:[%s6522_s26 + $0xab0] sm:$0xff] }
  0x67   : > { %1106 = vst [vmem:[%s6530_s27 + $0x550] sm:$0xff] %v1105_v42  ;;  %v1109_v44 = vld [vmem:[%s6522_s26 + $0xac0] sm:$0xff]  ;;  %v1111_v45 = vld [vmem:[%s6522_s26 + $0xad0] sm:$0xff]  ;;  %1108 = vst [vmem:[%s6530_s27 + $0x558] sm:$0xff] %v1107_v43 }
  0x68   : > { %1110 = vst [vmem:[%s6530_s27 + $0x560] sm:$0xff] %v1109_v44  ;;  %1112 = vst [vmem:[%s6530_s27 + $0x568] sm:$0xff] %v1111_v45  ;;  %v1113_v46 = vld [vmem:[%s6522_s26 + $0xae0] sm:$0xff]  ;;  %v1115_v47 = vld [vmem:[%s6522_s26 + $0xaf0] sm:$0xff] }
  0x69   : > { %v1117_v48 = vld [vmem:[%s6522_s26 + $0xb00] sm:$0xff]  ;;  %1114 = vst [vmem:[%s6530_s27 + $0x570] sm:$0xff] %v1113_v46  ;;  %1116 = vst [vmem:[%s6530_s27 + $0x578] sm:$0xff] %v1115_v47  ;;  %v1119_v49 = vld [vmem:[%s6522_s26 + $0xb10] sm:$0xff] }
  0x6a   : > { %1118 = vst [vmem:[%s6530_s27 + $0x580] sm:$0xff] %v1117_v48  ;;  %v1121_v50 = vld [vmem:[%s6522_s26 + $0xb20] sm:$0xff]  ;;  %v1123_v51 = vld [vmem:[%s6522_s26 + $0xb30] sm:$0xff]  ;;  %1120 = vst [vmem:[%s6530_s27 + $0x588] sm:$0xff] %v1119_v49 }
  0x6b   : > { %1122 = vst [vmem:[%s6530_s27 + $0x590] sm:$0xff] %v1121_v50  ;;  %1124 = vst [vmem:[%s6530_s27 + $0x598] sm:$0xff] %v1123_v51  ;;  %v1125_v52 = vld [vmem:[%s6522_s26 + $0xb40] sm:$0xff]  ;;  %v1127_v53 = vld [vmem:[%s6522_s26 + $0xb50] sm:$0xff] }
  0x6c   : > { %v1129_v54 = vld [vmem:[%s6522_s26 + $0xb60] sm:$0xff]  ;;  %1126 = vst [vmem:[%s6530_s27 + $0x5a0] sm:$0xff] %v1125_v52  ;;  %1128 = vst [vmem:[%s6530_s27 + $0x5a8] sm:$0xff] %v1127_v53  ;;  %v1131_v55 = vld [vmem:[%s6522_s26 + $0xb70] sm:$0xff] }
  0x6d   : > { %1130 = vst [vmem:[%s6530_s27 + $0x5b0] sm:$0xff] %v1129_v54  ;;  %v1133_v56 = vld [vmem:[%s6522_s26 + $0xb80] sm:$0xff]  ;;  %v1135_v57 = vld [vmem:[%s6522_s26 + $0xb90] sm:$0xff]  ;;  %1132 = vst [vmem:[%s6530_s27 + $0x5b8] sm:$0xff] %v1131_v55 }
  0x6e   : > { %1134 = vst [vmem:[%s6530_s27 + $0x5c0] sm:$0xff] %v1133_v56  ;;  %1136 = vst [vmem:[%s6530_s27 + $0x5c8] sm:$0xff] %v1135_v57  ;;  %v1137_v58 = vld [vmem:[%s6522_s26 + $0xba0] sm:$0xff]  ;;  %v1139_v59 = vld [vmem:[%s6522_s26 + $0xbb0] sm:$0xff] }
  0x6f   : > { %v1141_v60 = vld [vmem:[%s6522_s26 + $0xbc0] sm:$0xff]  ;;  %1138 = vst [vmem:[%s6530_s27 + $0x5d0] sm:$0xff] %v1137_v58  ;;  %1140 = vst [vmem:[%s6530_s27 + $0x5d8] sm:$0xff] %v1139_v59  ;;  %v1143_v61 = vld [vmem:[%s6522_s26 + $0xbd0] sm:$0xff] }
  0x70   : > { %1142 = vst [vmem:[%s6530_s27 + $0x5e0] sm:$0xff] %v1141_v60  ;;  %v1145_v62 = vld [vmem:[%s6522_s26 + $0xbe0] sm:$0xff]  ;;  %v1147_v63 = vld [vmem:[%s6522_s26 + $0xbf0] sm:$0xff]  ;;  %1144 = vst [vmem:[%s6530_s27 + $0x5e8] sm:$0xff] %v1143_v61 }
  0x71   : > { %1146 = vst [vmem:[%s6530_s27 + $0x5f0] sm:$0xff] %v1145_v62  ;;  %1148 = vst [vmem:[%s6530_s27 + $0x5f8] sm:$0xff] %v1147_v63  ;;  %v1149_v0 = vld [vmem:[%s6522_s26 + $0xc00] sm:$0xff]  ;;  %v1151_v1 = vld [vmem:[%s6522_s26 + $0xc10] sm:$0xff] }
  0x72   : > { %v1153_v2 = vld [vmem:[%s6522_s26 + $0xc20] sm:$0xff]  ;;  %1150 = vst [vmem:[%s6530_s27 + $0x600] sm:$0xff] %v1149_v0  ;;  %1152 = vst [vmem:[%s6530_s27 + $0x608] sm:$0xff] %v1151_v1  ;;  %v1155_v3 = vld [vmem:[%s6522_s26 + $0xc30] sm:$0xff] }
  0x73   : > { %1154 = vst [vmem:[%s6530_s27 + $0x610] sm:$0xff] %v1153_v2  ;;  %v1157_v4 = vld [vmem:[%s6522_s26 + $0xc40] sm:$0xff]  ;;  %v1159_v5 = vld [vmem:[%s6522_s26 + $0xc50] sm:$0xff]  ;;  %1156 = vst [vmem:[%s6530_s27 + $0x618] sm:$0xff] %v1155_v3 }
  0x74   : > { %1158 = vst [vmem:[%s6530_s27 + $0x620] sm:$0xff] %v1157_v4  ;;  %1160 = vst [vmem:[%s6530_s27 + $0x628] sm:$0xff] %v1159_v5  ;;  %v1161_v6 = vld [vmem:[%s6522_s26 + $0xc60] sm:$0xff]  ;;  %v1163_v7 = vld [vmem:[%s6522_s26 + $0xc70] sm:$0xff] }
  0x75   : > { %v1165_v8 = vld [vmem:[%s6522_s26 + $0xc80] sm:$0xff]  ;;  %1162 = vst [vmem:[%s6530_s27 + $0x630] sm:$0xff] %v1161_v6  ;;  %1164 = vst [vmem:[%s6530_s27 + $0x638] sm:$0xff] %v1163_v7  ;;  %v1167_v9 = vld [vmem:[%s6522_s26 + $0xc90] sm:$0xff] }
  0x76   : > { %1166 = vst [vmem:[%s6530_s27 + $0x640] sm:$0xff] %v1165_v8  ;;  %v1169_v10 = vld [vmem:[%s6522_s26 + $0xca0] sm:$0xff]  ;;  %v1171_v11 = vld [vmem:[%s6522_s26 + $0xcb0] sm:$0xff]  ;;  %1168 = vst [vmem:[%s6530_s27 + $0x648] sm:$0xff] %v1167_v9 }
  0x77   : > { %1170 = vst [vmem:[%s6530_s27 + $0x650] sm:$0xff] %v1169_v10  ;;  %1172 = vst [vmem:[%s6530_s27 + $0x658] sm:$0xff] %v1171_v11  ;;  %v1173_v12 = vld [vmem:[%s6522_s26 + $0xcc0] sm:$0xff]  ;;  %v1175_v13 = vld [vmem:[%s6522_s26 + $0xcd0] sm:$0xff] }
  0x78   : > { %v1177_v14 = vld [vmem:[%s6522_s26 + $0xce0] sm:$0xff]  ;;  %1174 = vst [vmem:[%s6530_s27 + $0x660] sm:$0xff] %v1173_v12  ;;  %1176 = vst [vmem:[%s6530_s27 + $0x668] sm:$0xff] %v1175_v13  ;;  %v1179_v15 = vld [vmem:[%s6522_s26 + $0xcf0] sm:$0xff] }
  0x79   : > { %1178 = vst [vmem:[%s6530_s27 + $0x670] sm:$0xff] %v1177_v14  ;;  %v1181_v16 = vld [vmem:[%s6522_s26 + $0xd00] sm:$0xff]  ;;  %v1183_v17 = vld [vmem:[%s6522_s26 + $0xd10] sm:$0xff]  ;;  %1180 = vst [vmem:[%s6530_s27 + $0x678] sm:$0xff] %v1179_v15 }
  0x7a   : > { %1182 = vst [vmem:[%s6530_s27 + $0x680] sm:$0xff] %v1181_v16  ;;  %1184 = vst [vmem:[%s6530_s27 + $0x688] sm:$0xff] %v1183_v17  ;;  %v1185_v18 = vld [vmem:[%s6522_s26 + $0xd20] sm:$0xff]  ;;  %v1187_v19 = vld [vmem:[%s6522_s26 + $0xd30] sm:$0xff] }
  0x7b   : > { %v1189_v20 = vld [vmem:[%s6522_s26 + $0xd40] sm:$0xff]  ;;  %1186 = vst [vmem:[%s6530_s27 + $0x690] sm:$0xff] %v1185_v18  ;;  %1188 = vst [vmem:[%s6530_s27 + $0x698] sm:$0xff] %v1187_v19  ;;  %v1191_v21 = vld [vmem:[%s6522_s26 + $0xd50] sm:$0xff] }
  0x7c   : > { %1190 = vst [vmem:[%s6530_s27 + $0x6a0] sm:$0xff] %v1189_v20  ;;  %v1193_v22 = vld [vmem:[%s6522_s26 + $0xd60] sm:$0xff]  ;;  %v1195_v23 = vld [vmem:[%s6522_s26 + $0xd70] sm:$0xff]  ;;  %1192 = vst [vmem:[%s6530_s27 + $0x6a8] sm:$0xff] %v1191_v21 }
  0x7d   : > { %1194 = vst [vmem:[%s6530_s27 + $0x6b0] sm:$0xff] %v1193_v22  ;;  %1196 = vst [vmem:[%s6530_s27 + $0x6b8] sm:$0xff] %v1195_v23  ;;  %v1197_v24 = vld [vmem:[%s6522_s26 + $0xd80] sm:$0xff]  ;;  %v1199_v25 = vld [vmem:[%s6522_s26 + $0xd90] sm:$0xff] }
  0x7e   : > { %v1201_v26 = vld [vmem:[%s6522_s26 + $0xda0] sm:$0xff]  ;;  %1198 = vst [vmem:[%s6530_s27 + $0x6c0] sm:$0xff] %v1197_v24  ;;  %1200 = vst [vmem:[%s6530_s27 + $0x6c8] sm:$0xff] %v1199_v25  ;;  %v1203_v27 = vld [vmem:[%s6522_s26 + $0xdb0] sm:$0xff] }
  0x7f   : > { %1202 = vst [vmem:[%s6530_s27 + $0x6d0] sm:$0xff] %v1201_v26  ;;  %v1205_v28 = vld [vmem:[%s6522_s26 + $0xdc0] sm:$0xff]  ;;  %v1207_v29 = vld [vmem:[%s6522_s26 + $0xdd0] sm:$0xff]  ;;  %1204 = vst [vmem:[%s6530_s27 + $0x6d8] sm:$0xff] %v1203_v27 }
  0x80   : > { %1206 = vst [vmem:[%s6530_s27 + $0x6e0] sm:$0xff] %v1205_v28  ;;  %1208 = vst [vmem:[%s6530_s27 + $0x6e8] sm:$0xff] %v1207_v29  ;;  %v1209_v30 = vld [vmem:[%s6522_s26 + $0xde0] sm:$0xff]  ;;  %v1211_v31 = vld [vmem:[%s6522_s26 + $0xdf0] sm:$0xff] }
  0x81   : > { %v1213_v32 = vld [vmem:[%s6522_s26 + $0xe00] sm:$0xff]  ;;  %1210 = vst [vmem:[%s6530_s27 + $0x6f0] sm:$0xff] %v1209_v30  ;;  %1212 = vst [vmem:[%s6530_s27 + $0x6f8] sm:$0xff] %v1211_v31  ;;  %v1215_v33 = vld [vmem:[%s6522_s26 + $0xe10] sm:$0xff] }
  0x82   : > { %1214 = vst [vmem:[%s6530_s27 + $0x700] sm:$0xff] %v1213_v32  ;;  %v1217_v34 = vld [vmem:[%s6522_s26 + $0xe20] sm:$0xff]  ;;  %v1219_v35 = vld [vmem:[%s6522_s26 + $0xe30] sm:$0xff]  ;;  %1216 = vst [vmem:[%s6530_s27 + $0x708] sm:$0xff] %v1215_v33 }
  0x83   : > { %1218 = vst [vmem:[%s6530_s27 + $0x710] sm:$0xff] %v1217_v34  ;;  %1220 = vst [vmem:[%s6530_s27 + $0x718] sm:$0xff] %v1219_v35  ;;  %v1221_v36 = vld [vmem:[%s6522_s26 + $0xe40] sm:$0xff]  ;;  %v1223_v37 = vld [vmem:[%s6522_s26 + $0xe50] sm:$0xff] }
  0x84   : > { %v1225_v38 = vld [vmem:[%s6522_s26 + $0xe60] sm:$0xff]  ;;  %1222 = vst [vmem:[%s6530_s27 + $0x720] sm:$0xff] %v1221_v36  ;;  %1224 = vst [vmem:[%s6530_s27 + $0x728] sm:$0xff] %v1223_v37  ;;  %v1227_v39 = vld [vmem:[%s6522_s26 + $0xe70] sm:$0xff] }
  0x85   : > { %1226 = vst [vmem:[%s6530_s27 + $0x730] sm:$0xff] %v1225_v38  ;;  %v1229_v40 = vld [vmem:[%s6522_s26 + $0xe80] sm:$0xff]  ;;  %v1231_v41 = vld [vmem:[%s6522_s26 + $0xe90] sm:$0xff]  ;;  %1228 = vst [vmem:[%s6530_s27 + $0x738] sm:$0xff] %v1227_v39 }
  0x86   : > { %1230 = vst [vmem:[%s6530_s27 + $0x740] sm:$0xff] %v1229_v40  ;;  %1232 = vst [vmem:[%s6530_s27 + $0x748] sm:$0xff] %v1231_v41  ;;  %v1233_v42 = vld [vmem:[%s6522_s26 + $0xea0] sm:$0xff]  ;;  %v1235_v43 = vld [vmem:[%s6522_s26 + $0xeb0] sm:$0xff] }
  0x87   : > { %v1237_v44 = vld [vmem:[%s6522_s26 + $0xec0] sm:$0xff]  ;;  %1234 = vst [vmem:[%s6530_s27 + $0x750] sm:$0xff] %v1233_v42  ;;  %1236 = vst [vmem:[%s6530_s27 + $0x758] sm:$0xff] %v1235_v43  ;;  %v1239_v45 = vld [vmem:[%s6522_s26 + $0xed0] sm:$0xff] }
  0x88   : > { %1238 = vst [vmem:[%s6530_s27 + $0x760] sm:$0xff] %v1237_v44  ;;  %v1241_v46 = vld [vmem:[%s6522_s26 + $0xee0] sm:$0xff]  ;;  %v1243_v47 = vld [vmem:[%s6522_s26 + $0xef0] sm:$0xff]  ;;  %1240 = vst [vmem:[%s6530_s27 + $0x768] sm:$0xff] %v1239_v45 }
  0x89   : > { %1242 = vst [vmem:[%s6530_s27 + $0x770] sm:$0xff] %v1241_v46  ;;  %1244 = vst [vmem:[%s6530_s27 + $0x778] sm:$0xff] %v1243_v47  ;;  %v1245_v48 = vld [vmem:[%s6522_s26 + $0xf00] sm:$0xff]  ;;  %v1247_v49 = vld [vmem:[%s6522_s26 + $0xf10] sm:$0xff] }
  0x8a   : > { %v1249_v50 = vld [vmem:[%s6522_s26 + $0xf20] sm:$0xff]  ;;  %1246 = vst [vmem:[%s6530_s27 + $0x780] sm:$0xff] %v1245_v48  ;;  %1248 = vst [vmem:[%s6530_s27 + $0x788] sm:$0xff] %v1247_v49  ;;  %v1251_v51 = vld [vmem:[%s6522_s26 + $0xf30] sm:$0xff] }
  0x8b   : > { %1250 = vst [vmem:[%s6530_s27 + $0x790] sm:$0xff] %v1249_v50  ;;  %v1253_v52 = vld [vmem:[%s6522_s26 + $0xf40] sm:$0xff]  ;;  %v1255_v53 = vld [vmem:[%s6522_s26 + $0xf50] sm:$0xff]  ;;  %1252 = vst [vmem:[%s6530_s27 + $0x798] sm:$0xff] %v1251_v51 }
  0x8c   : > { %1254 = vst [vmem:[%s6530_s27 + $0x7a0] sm:$0xff] %v1253_v52  ;;  %1256 = vst [vmem:[%s6530_s27 + $0x7a8] sm:$0xff] %v1255_v53  ;;  %v1257_v54 = vld [vmem:[%s6522_s26 + $0xf60] sm:$0xff]  ;;  %v1259_v55 = vld [vmem:[%s6522_s26 + $0xf70] sm:$0xff] }
  0x8d   : > { %v1261_v56 = vld [vmem:[%s6522_s26 + $0xf80] sm:$0xff]  ;;  %1258 = vst [vmem:[%s6530_s27 + $0x7b0] sm:$0xff] %v1257_v54  ;;  %1260 = vst [vmem:[%s6530_s27 + $0x7b8] sm:$0xff] %v1259_v55  ;;  %v1263_v57 = vld [vmem:[%s6522_s26 + $0xf90] sm:$0xff] }
  0x8e   : > { %1262 = vst [vmem:[%s6530_s27 + $0x7c0] sm:$0xff] %v1261_v56  ;;  %v1265_v58 = vld [vmem:[%s6522_s26 + $0xfa0] sm:$0xff]  ;;  %v1267_v59 = vld [vmem:[%s6522_s26 + $0xfb0] sm:$0xff]  ;;  %1264 = vst [vmem:[%s6530_s27 + $0x7c8] sm:$0xff] %v1263_v57 }
  0x8f   : > { %1266 = vst [vmem:[%s6530_s27 + $0x7d0] sm:$0xff] %v1265_v58  ;;  %1268 = vst [vmem:[%s6530_s27 + $0x7d8] sm:$0xff] %v1267_v59  ;;  %v1269_v60 = vld [vmem:[%s6522_s26 + $0xfc0] sm:$0xff]  ;;  %v1271_v61 = vld [vmem:[%s6522_s26 + $0xfd0] sm:$0xff] }
  0x90   : > { %v1273_v62 = vld [vmem:[%s6522_s26 + $0xfe0] sm:$0xff]  ;;  %1270 = vst [vmem:[%s6530_s27 + $0x7e0] sm:$0xff] %v1269_v60  ;;  %1272 = vst [vmem:[%s6530_s27 + $0x7e8] sm:$0xff] %v1271_v61  ;;  %v1275_v63 = vld [vmem:[%s6522_s26 + $0xff0] sm:$0xff] }
  0x91   : > { %1274 = vst [vmem:[%s6530_s27 + $0x7f0] sm:$0xff] %v1273_v62  ;;  %v1277_v0 = vld [vmem:[%s6522_s26 + $0x1000] sm:$0xff]  ;;  %v1279_v1 = vld [vmem:[%s6522_s26 + $0x1010] sm:$0xff]  ;;  %1276 = vst [vmem:[%s6530_s27 + $0x7f8] sm:$0xff] %v1275_v63 }
  0x92   : > { %1278 = vst [vmem:[%s6530_s27 + $0x800] sm:$0xff] %v1277_v0  ;;  %1280 = vst [vmem:[%s6530_s27 + $0x808] sm:$0xff] %v1279_v1  ;;  %v1281_v2 = vld [vmem:[%s6522_s26 + $0x1020] sm:$0xff]  ;;  %v1283_v3 = vld [vmem:[%s6522_s26 + $0x1030] sm:$0xff] }
  0x93   : > { %v1285_v4 = vld [vmem:[%s6522_s26 + $0x1040] sm:$0xff]  ;;  %1282 = vst [vmem:[%s6530_s27 + $0x810] sm:$0xff] %v1281_v2  ;;  %1284 = vst [vmem:[%s6530_s27 + $0x818] sm:$0xff] %v1283_v3  ;;  %v1287_v5 = vld [vmem:[%s6522_s26 + $0x1050] sm:$0xff] }
  0x94   : > { %1286 = vst [vmem:[%s6530_s27 + $0x820] sm:$0xff] %v1285_v4  ;;  %v1289_v6 = vld [vmem:[%s6522_s26 + $0x1060] sm:$0xff]  ;;  %v1291_v7 = vld [vmem:[%s6522_s26 + $0x1070] sm:$0xff]  ;;  %1288 = vst [vmem:[%s6530_s27 + $0x828] sm:$0xff] %v1287_v5 }
  0x95   : > { %1290 = vst [vmem:[%s6530_s27 + $0x830] sm:$0xff] %v1289_v6  ;;  %1292 = vst [vmem:[%s6530_s27 + $0x838] sm:$0xff] %v1291_v7  ;;  %v1293_v8 = vld [vmem:[%s6522_s26 + $0x1080] sm:$0xff]  ;;  %v1295_v9 = vld [vmem:[%s6522_s26 + $0x1090] sm:$0xff] }
  0x96   : > { %v1297_v10 = vld [vmem:[%s6522_s26 + $0x10a0] sm:$0xff]  ;;  %1294 = vst [vmem:[%s6530_s27 + $0x840] sm:$0xff] %v1293_v8  ;;  %1296 = vst [vmem:[%s6530_s27 + $0x848] sm:$0xff] %v1295_v9  ;;  %v1299_v11 = vld [vmem:[%s6522_s26 + $0x10b0] sm:$0xff] }
  0x97   : > { %1298 = vst [vmem:[%s6530_s27 + $0x850] sm:$0xff] %v1297_v10  ;;  %v1301_v12 = vld [vmem:[%s6522_s26 + $0x10c0] sm:$0xff]  ;;  %v1303_v13 = vld [vmem:[%s6522_s26 + $0x10d0] sm:$0xff]  ;;  %1300 = vst [vmem:[%s6530_s27 + $0x858] sm:$0xff] %v1299_v11 }
  0x98   : > { %1302 = vst [vmem:[%s6530_s27 + $0x860] sm:$0xff] %v1301_v12  ;;  %1304 = vst [vmem:[%s6530_s27 + $0x868] sm:$0xff] %v1303_v13  ;;  %v1305_v14 = vld [vmem:[%s6522_s26 + $0x10e0] sm:$0xff]  ;;  %v1307_v15 = vld [vmem:[%s6522_s26 + $0x10f0] sm:$0xff] }
  0x99   : > { %v1309_v16 = vld [vmem:[%s6522_s26 + $0x1100] sm:$0xff]  ;;  %1306 = vst [vmem:[%s6530_s27 + $0x870] sm:$0xff] %v1305_v14  ;;  %1308 = vst [vmem:[%s6530_s27 + $0x878] sm:$0xff] %v1307_v15  ;;  %v1311_v17 = vld [vmem:[%s6522_s26 + $0x1110] sm:$0xff] }
  0x9a   : > { %1310 = vst [vmem:[%s6530_s27 + $0x880] sm:$0xff] %v1309_v16  ;;  %v1313_v18 = vld [vmem:[%s6522_s26 + $0x1120] sm:$0xff]  ;;  %v1315_v19 = vld [vmem:[%s6522_s26 + $0x1130] sm:$0xff]  ;;  %1312 = vst [vmem:[%s6530_s27 + $0x888] sm:$0xff] %v1311_v17 }
  0x9b   : > { %1314 = vst [vmem:[%s6530_s27 + $0x890] sm:$0xff] %v1313_v18  ;;  %1316 = vst [vmem:[%s6530_s27 + $0x898] sm:$0xff] %v1315_v19  ;;  %v1317_v20 = vld [vmem:[%s6522_s26 + $0x1140] sm:$0xff]  ;;  %v1319_v21 = vld [vmem:[%s6522_s26 + $0x1150] sm:$0xff] }
  0x9c   : > { %v1321_v22 = vld [vmem:[%s6522_s26 + $0x1160] sm:$0xff]  ;;  %1318 = vst [vmem:[%s6530_s27 + $0x8a0] sm:$0xff] %v1317_v20  ;;  %1320 = vst [vmem:[%s6530_s27 + $0x8a8] sm:$0xff] %v1319_v21  ;;  %v1323_v23 = vld [vmem:[%s6522_s26 + $0x1170] sm:$0xff] }
  0x9d   : > { %1322 = vst [vmem:[%s6530_s27 + $0x8b0] sm:$0xff] %v1321_v22  ;;  %v1325_v24 = vld [vmem:[%s6522_s26 + $0x1180] sm:$0xff]  ;;  %v1327_v25 = vld [vmem:[%s6522_s26 + $0x1190] sm:$0xff]  ;;  %1324 = vst [vmem:[%s6530_s27 + $0x8b8] sm:$0xff] %v1323_v23 }
  0x9e   : > { %1326 = vst [vmem:[%s6530_s27 + $0x8c0] sm:$0xff] %v1325_v24  ;;  %1328 = vst [vmem:[%s6530_s27 + $0x8c8] sm:$0xff] %v1327_v25  ;;  %v1329_v26 = vld [vmem:[%s6522_s26 + $0x11a0] sm:$0xff]  ;;  %v1331_v27 = vld [vmem:[%s6522_s26 + $0x11b0] sm:$0xff] }
  0x9f   : > { %v1333_v28 = vld [vmem:[%s6522_s26 + $0x11c0] sm:$0xff]  ;;  %1330 = vst [vmem:[%s6530_s27 + $0x8d0] sm:$0xff] %v1329_v26  ;;  %1332 = vst [vmem:[%s6530_s27 + $0x8d8] sm:$0xff] %v1331_v27  ;;  %v1335_v29 = vld [vmem:[%s6522_s26 + $0x11d0] sm:$0xff] }
  0xa0   : > { %1334 = vst [vmem:[%s6530_s27 + $0x8e0] sm:$0xff] %v1333_v28  ;;  %v1337_v30 = vld [vmem:[%s6522_s26 + $0x11e0] sm:$0xff]  ;;  %v1339_v31 = vld [vmem:[%s6522_s26 + $0x11f0] sm:$0xff]  ;;  %1336 = vst [vmem:[%s6530_s27 + $0x8e8] sm:$0xff] %v1335_v29 }
  0xa1   : > { %1338 = vst [vmem:[%s6530_s27 + $0x8f0] sm:$0xff] %v1337_v30  ;;  %1340 = vst [vmem:[%s6530_s27 + $0x8f8] sm:$0xff] %v1339_v31 }
  0xa2 PF: > { %p5061_p6 = scmp.ge.s32.totalorder %s6457_s16, 1  ;;  %p1353_p7 = scmp.lt.s32.totalorder %s6457_s16, 3 }
  0xa4   : > { %p1354_p8 = pnand %p5061_p6, %p1353_p7 }
  0xa5   : > { %s1360_s28 = sand.u32 (!%p1354_p8), 1, %s6441_s12   ;;  %v7108_v32 = vld [vmem:[%s8047_s0] sm:$0xff] (!%p1354_p8)  ;;  %v7113_v33 = vld [vmem:[%s8047_s0 + $0x48] sm:$0xff] (!%p1354_p8)  ;;  %v7166_v8 = vld [vmem:[%s8047_s0 + $0x50] sm:$0xff] (!%p1354_p8)  ;;  %s5062_s22 = sshll.u32 (!%p1354_p8), %s6449_s14, 1 }
  0xa6   : > { %1357 = sbr.rel (%p1354_p8) target bundleno = 1547 (0x60b), region = 66  ;;  %v5066_v34 = vcombine.high (!%p1354_p8), %v7108_v32, %v7108_v32  ;;  %v5381_v35 = vcombine.high (!%p1354_p8), %v7113_v33, %v7113_v33  ;;  %v5065_v5 = vcombine.low (!%p1354_p8), %v7108_v32, %v7108_v32  ;;  %v5380_v6 = vcombine.low (!%p1354_p8), %v7113_v33, %v7113_v33  ;;  %v7161_v7 = vld [vmem:[%s8047_s0 + $0x8] sm:$0xff] (!%p1354_p8)  ;;  %p1403_p9 = scmp.lt.s32.totalorder (!%p1354_p8), %s5062_s22, 3 }
  0xa7   : > { %s5586_s6 = smul.u32 (!%p1354_p8), 2304, %s1360_s28  ;;  %v5068_v11 = vcombine.high (!%p1354_p8), %v7161_v7, %v7161_v7  ;;  %v5383_v12 = vcombine.high (!%p1354_p8), %v7166_v8, %v7166_v8 }
  0xa8   : > { %3249 = vmatprep.mubr.bf16.mxu0 (!%p1354_p8), %v5066_v34  ;;  %3691 = vmatprep.mubr.bf16.mxu1 (!%p1354_p8), %v5381_v35 }
  0xa9   : > { %s7119_s7 = scalar_lea.vmem (!%p1354_p8), [#allocation2], %s5586_s6 }
  0xaa   : > { %v5627_v36 = vld [vmem:[%s7119_s7 + $0x4] ss:$8 sps:$4 sm:$0xff] (!%p1354_p8)   ;;  %v5629_v37 = vld [vmem:[%s7119_s7] ss:$8 sps:$4 sm:$0xff] (!%p1354_p8)   ;;  %v5630_v38 = vld [vmem:[%s7119_s7 + $0x14] ss:$8 sps:$4 sm:$0xff] (!%p1354_p8)  }
  0xab   : > { %3217 = vmatprep.subr.bf16.mxu0 (!%p1354_p8), %v5627_v36  ;;  %3659 = vmatprep.subr.bf16.mxu1 (!%p1354_p8), %v5627_v36  ;;  %v5632_v39 = vld [vmem:[%s7119_s7 + $0x10] ss:$8 sps:$4 sm:$0xff] (!%p1354_p8)   ;;  %v5633_v40 = vld [vmem:[%s7119_s7 + $0x24] ss:$8 sps:$4 sm:$0xff] (!%p1354_p8)   ;;  %v5635_v41 = vld [vmem:[%s7119_s7 + $0x20] ss:$8 sps:$4 sm:$0xff] (!%p1354_p8)  }
  0xac   : > { %3218 = vmatpush1.bf16.msra.mxu0 (!%p1354_p8), %v5629_v37  ;;  %3660 = vmatpush1.bf16.msra.mxu1 (!%p1354_p8), %v5629_v37  ;;  %v5636_v42 = vld [vmem:[%s7119_s7 + $0x34] ss:$8 sps:$4 sm:$0xff] (!%p1354_p8)   ;;  %v5638_v43 = vld [vmem:[%s7119_s7 + $0x30] ss:$8 sps:$4 sm:$0xff] (!%p1354_p8)   ;;  %v5639_v44 = vld [vmem:[%s7119_s7 + $0x44] ss:$8 sps:$4 sm:$0xff] (!%p1354_p8)  }
  0xad   : > { %3219 = vmatprep.subr.bf16.mxu0 %v5630_v38  ;;  %3661 = vmatprep.subr.bf16.mxu1 %v5630_v38  ;;  %v5641_v45 = vld [vmem:[%s7119_s7 + $0x40] ss:$8 sps:$4 sm:$0xff]   ;;  %v5642_v46 = vld [vmem:[%s7119_s7 + $0x54] ss:$8 sps:$4 sm:$0xff]   ;;  %v5644_v47 = vld [vmem:[%s7119_s7 + $0x50] ss:$8 sps:$4 sm:$0xff]  }
  0xae   : > { %v5645_v48 = vld [vmem:[%s7119_s7 + $0x64] ss:$8 sps:$4 sm:$0xff]   ;;  %v5647_v49 = vld [vmem:[%s7119_s7 + $0x60] ss:$8 sps:$4 sm:$0xff]   ;;  %v5648_v50 = vld [vmem:[%s7119_s7 + $0x74] ss:$8 sps:$4 sm:$0xff]  }
  0xaf   : > { %v5650_v51 = vld [vmem:[%s7119_s7 + $0x70] ss:$8 sps:$4 sm:$0xff]   ;;  %v5651_v52 = vld [vmem:[%s7119_s7 + $0x84] ss:$8 sps:$4 sm:$0xff]   ;;  %v5653_v53 = vld [vmem:[%s7119_s7 + $0x80] ss:$8 sps:$4 sm:$0xff]  }
  0xb0   : > { %3220 = vmatpush1.bf16.msra.mxu0 %v5632_v39  ;;  %3662 = vmatpush1.bf16.msra.mxu1 %v5632_v39  ;;  %v5654_v54 = vld [vmem:[%s7119_s7 + $0x94] ss:$8 sps:$4 sm:$0xff]   ;;  %v5656_v55 = vld [vmem:[%s7119_s7 + $0x90] ss:$8 sps:$4 sm:$0xff]   ;;  %v5657_v56 = vld [vmem:[%s7119_s7 + $0xa4] ss:$8 sps:$4 sm:$0xff]  }
  0xb1   : > { %3221 = vmatprep.subr.bf16.mxu0 %v5633_v40  ;;  %3663 = vmatprep.subr.bf16.mxu1 %v5633_v40  ;;  %v5659_v57 = vld [vmem:[%s7119_s7 + $0xa0] ss:$8 sps:$4 sm:$0xff]   ;;  %v5660_v58 = vld [vmem:[%s7119_s7 + $0xb4] ss:$8 sps:$4 sm:$0xff]   ;;  %v5662_v59 = vld [vmem:[%s7119_s7 + $0xb0] ss:$8 sps:$4 sm:$0xff]  }
  0xb2   : > { %v5663_v60 = vld [vmem:[%s7119_s7 + $0xc4] ss:$8 sps:$4 sm:$0xff]   ;;  %v5665_v61 = vld [vmem:[%s7119_s7 + $0xc0] ss:$8 sps:$4 sm:$0xff]   ;;  %v5666_v62 = vld [vmem:[%s7119_s7 + $0xd4] ss:$8 sps:$4 sm:$0xff]  }
  0xb3   : > { %v5668_v63 = vld [vmem:[%s7119_s7 + $0xd0] ss:$8 sps:$4 sm:$0xff]   ;;  %v5669_v0 = vld [vmem:[%s7119_s7 + $0xe4] ss:$8 sps:$4 sm:$0xff]   ;;  %v5671_v1 = vld [vmem:[%s7119_s7 + $0xe0] ss:$8 sps:$4 sm:$0xff]  }
  0xb4   : > { %3222 = vmatpush1.bf16.msra.mxu0 %v5635_v41  ;;  %3664 = vmatpush1.bf16.msra.mxu1 %v5635_v41  ;;  %v5672_v2 = vld [vmem:[%s7119_s7 + $0xf4] ss:$8 sps:$4 sm:$0xff]   ;;  %v5674_v3 = vld [vmem:[%s7119_s7 + $0xf0] ss:$8 sps:$4 sm:$0xff]   ;;  %v5677_v4 = vld [vmem:[%s7119_s7 + $0x104] ss:$8 sps:$4 sm:$0xff]  }
  0xb5   : > { %3223 = vmatprep.subr.bf16.mxu0 %v5636_v42  ;;  %3665 = vmatprep.subr.bf16.mxu1 %v5636_v42  ;;  %v5681_v9 = vld [vmem:[%s7119_s7 + $0x100] ss:$8 sps:$4 sm:$0xff]   ;;  %v5682_v10 = vld [vmem:[%s7119_s7 + $0x114] ss:$8 sps:$4 sm:$0xff]   ;;  %v5684_v13 = vld [vmem:[%s7119_s7 + $0x110] ss:$8 sps:$4 sm:$0xff]  }
  0xb6   : > { %v5685_v14 = vld [vmem:[%s7119_s7 + $0x124] ss:$8 sps:$4 sm:$0xff]   ;;  %v5687_v15 = vld [vmem:[%s7119_s7 + $0x120] ss:$8 sps:$4 sm:$0xff]   ;;  %v5688_v16 = vld [vmem:[%s7119_s7 + $0x134] ss:$8 sps:$4 sm:$0xff]  }
  0xb7   : > { %v5690_v17 = vld [vmem:[%s7119_s7 + $0x130] ss:$8 sps:$4 sm:$0xff]   ;;  %v5691_v18 = vld [vmem:[%s7119_s7 + $0x144] ss:$8 sps:$4 sm:$0xff]   ;;  %v5693_v19 = vld [vmem:[%s7119_s7 + $0x140] ss:$8 sps:$4 sm:$0xff]  }
  0xb8   : > { %3224 = vmatpush1.bf16.msra.mxu0 %v5638_v43  ;;  %3666 = vmatpush1.bf16.msra.mxu1 %v5638_v43  ;;  %v5694_v20 = vld [vmem:[%s7119_s7 + $0x154] ss:$8 sps:$4 sm:$0xff]   ;;  %v5696_v21 = vld [vmem:[%s7119_s7 + $0x150] ss:$8 sps:$4 sm:$0xff]   ;;  %v5697_v22 = vld [vmem:[%s7119_s7 + $0x164] ss:$8 sps:$4 sm:$0xff]  }
  0xb9   : > { %3225 = vmatprep.subr.bf16.mxu0 %v5639_v44  ;;  %3667 = vmatprep.subr.bf16.mxu1 %v5639_v44  ;;  %v5699_v23 = vld [vmem:[%s7119_s7 + $0x160] ss:$8 sps:$4 sm:$0xff]   ;;  %v5700_v24 = vld [vmem:[%s7119_s7 + $0x174] ss:$8 sps:$4 sm:$0xff]   ;;  %v5702_v25 = vld [vmem:[%s7119_s7 + $0x170] ss:$8 sps:$4 sm:$0xff]  }
  0xba   : > { %v5703_v26 = vld [vmem:[%s7119_s7 + $0x184] ss:$8 sps:$4 sm:$0xff]   ;;  %v5705_v27 = vld [vmem:[%s7119_s7 + $0x180] ss:$8 sps:$4 sm:$0xff]   ;;  %v5706_v28 = vld [vmem:[%s7119_s7 + $0x194] ss:$8 sps:$4 sm:$0xff]  }
  0xbb   : > { %v5708_v29 = vld [vmem:[%s7119_s7 + $0x190] ss:$8 sps:$4 sm:$0xff]   ;;  %v5709_v30 = vld [vmem:[%s7119_s7 + $0x1a4] ss:$8 sps:$4 sm:$0xff]   ;;  %v5711_v31 = vld [vmem:[%s7119_s7 + $0x1a0] ss:$8 sps:$4 sm:$0xff]  }
  0xbc   : > { %3226 = vmatpush1.bf16.msra.mxu0 %v5641_v45  ;;  %3668 = vmatpush1.bf16.msra.mxu1 %v5641_v45  ;;  %v5712_v32 = vld [vmem:[%s7119_s7 + $0x1b4] ss:$8 sps:$4 sm:$0xff]   ;;  %v5714_v33 = vld [vmem:[%s7119_s7 + $0x1b0] ss:$8 sps:$4 sm:$0xff]   ;;  %v5715_v34 = vld [vmem:[%s7119_s7 + $0x1c4] ss:$8 sps:$4 sm:$0xff]   ;;  %v5067_v45 = vcombine.low %v7161_v7, %v7161_v7 }
  0xbd   : > { %3227 = vmatprep.subr.bf16.mxu0 %v5642_v46  ;;  %3669 = vmatprep.subr.bf16.mxu1 %v5642_v46  ;;  %v5717_v35 = vld [vmem:[%s7119_s7 + $0x1c0] ss:$8 sps:$4 sm:$0xff]   ;;  %v5718_v36 = vld [vmem:[%s7119_s7 + $0x1d4] ss:$8 sps:$4 sm:$0xff]   ;;  %v5720_v37 = vld [vmem:[%s7119_s7 + $0x1d0] ss:$8 sps:$4 sm:$0xff]   ;;  %v5382_v46 = vcombine.low %v7166_v8, %v7166_v8 }
  0xbe   : > { %v5721_v38 = vld [vmem:[%s7119_s7 + $0x1e4] ss:$8 sps:$4 sm:$0xff]   ;;  %v5723_v39 = vld [vmem:[%s7119_s7 + $0x1e0] ss:$8 sps:$4 sm:$0xff]   ;;  %v5724_v40 = vld [vmem:[%s7119_s7 + $0x1f4] ss:$8 sps:$4 sm:$0xff]  }
  0xbf   : > { %v5726_v41 = vld [vmem:[%s7119_s7 + $0x1f0] ss:$8 sps:$4 sm:$0xff]   ;;  %v5729_v42 = vld [vmem:[%s7119_s7 + $0x204] ss:$8 sps:$4 sm:$0xff]   ;;  %s8058_s22 = smov (!%p1403_p9, %s5062_s22), 3 }
  0xc0   : > { %3228 = vmatpush1.bf16.msra.mxu0 %v5644_v47  ;;  %3670 = vmatpush1.bf16.msra.mxu1 %v5644_v47  ;;  %v7207_v43 = vld [vmem:[%s8047_s0 + $0x10] sm:$0xff]  ;;  %v7212_v44 = vld [vmem:[%s8047_s0 + $0x58] sm:$0xff]  ;;  %v5733_v47 = vld [vmem:[%s7119_s7 + $0x200] ss:$8 sps:$4 sm:$0xff]   ;;  %s1405_s25 = scalar_lea.vmem %s8049_s2, %s8058_s22  ;;  %s5064_s14 = sshll.u32 %s8058_s22, 2 }
  0xc1   : > { %3229 = vmatprep.subr.bf16.mxu0 %v5645_v48  ;;  %3671 = vmatprep.subr.bf16.mxu1 %v5645_v48  ;;  %v5734_v48 = vld [vmem:[%s7119_s7 + $0x214] ss:$8 sps:$4 sm:$0xff]   ;;  %v5766_v7 = vld [vmem:[%s7119_s7 + $0x2b0] ss:$8 sps:$4 sm:$0xff]   ;;  %v5767_v8 = vld [vmem:[%s7119_s7 + $0x2c4] ss:$8 sps:$4 sm:$0xff]   ;;  %s1415_s27 = scalar_lea.vmem %s8050_s3, %s5064_s14 }
  0xc4   : > { %3230 = vmatpush1.bf16.msra.mxu0 %v5647_v49  ;;  %3672 = vmatpush1.bf16.msra.mxu1 %v5647_v49  ;;  %v5070_v49 = vcombine.high %v7207_v43, %v7207_v43 }
  0xc5   : > { %3231 = vmatprep.subr.bf16.mxu0 %v5648_v50  ;;  %3673 = vmatprep.subr.bf16.mxu1 %v5648_v50  ;;  %v5385_v50 = vcombine.high %v7212_v44, %v7212_v44 }
  0xc8   : > { %3232 = vmatpush1.bf16.msra.mxu0 %v5650_v51  ;;  %3674 = vmatpush1.bf16.msra.mxu1 %v5650_v51  ;;  %v5736_v51 = vld [vmem:[%s7119_s7 + $0x210] ss:$8 sps:$4 sm:$0xff]  }
  0xc9   : > { %3233 = vmatprep.subr.bf16.mxu0 %v5651_v52  ;;  %3675 = vmatprep.subr.bf16.mxu1 %v5651_v52  ;;  %v5737_v52 = vld [vmem:[%s7119_s7 + $0x224] ss:$8 sps:$4 sm:$0xff]  }
  0xcc   : > { %3234 = vmatpush1.bf16.msra.mxu0 %v5653_v53  ;;  %3676 = vmatpush1.bf16.msra.mxu1 %v5653_v53  ;;  %v5739_v53 = vld [vmem:[%s7119_s7 + $0x220] ss:$8 sps:$4 sm:$0xff]  }
  0xcd   : > { %3235 = vmatprep.subr.bf16.mxu0 %v5654_v54  ;;  %3677 = vmatprep.subr.bf16.mxu1 %v5654_v54  ;;  %v5740_v54 = vld [vmem:[%s7119_s7 + $0x234] ss:$8 sps:$4 sm:$0xff]  }
  0xd0   : > { %3236 = vmatpush1.bf16.msra.mxu0 %v5656_v55  ;;  %3678 = vmatpush1.bf16.msra.mxu1 %v5656_v55  ;;  %v5742_v55 = vld [vmem:[%s7119_s7 + $0x230] ss:$8 sps:$4 sm:$0xff]  }
  0xd1   : > { %3237 = vmatprep.subr.bf16.mxu0 %v5657_v56  ;;  %3679 = vmatprep.subr.bf16.mxu1 %v5657_v56  ;;  %v5743_v56 = vld [vmem:[%s7119_s7 + $0x244] ss:$8 sps:$4 sm:$0xff]  }
  0xd4   : > { %3238 = vmatpush1.bf16.msra.mxu0 %v5659_v57  ;;  %3680 = vmatpush1.bf16.msra.mxu1 %v5659_v57  ;;  %v5745_v57 = vld [vmem:[%s7119_s7 + $0x240] ss:$8 sps:$4 sm:$0xff]  }
  0xd5   : > { %3239 = vmatprep.subr.bf16.mxu0 %v5660_v58  ;;  %3681 = vmatprep.subr.bf16.mxu1 %v5660_v58  ;;  %v5746_v58 = vld [vmem:[%s7119_s7 + $0x254] ss:$8 sps:$4 sm:$0xff]  }
  0xd8   : > { %3240 = vmatpush1.bf16.msra.mxu0 %v5662_v59  ;;  %3682 = vmatpush1.bf16.msra.mxu1 %v5662_v59  ;;  %v5748_v59 = vld [vmem:[%s7119_s7 + $0x250] ss:$8 sps:$4 sm:$0xff]  }
  0xd9   : > { %3241 = vmatprep.subr.bf16.mxu0 %v5663_v60  ;;  %3683 = vmatprep.subr.bf16.mxu1 %v5663_v60  ;;  %v5749_v60 = vld [vmem:[%s7119_s7 + $0x264] ss:$8 sps:$4 sm:$0xff]  }
  0xdc   : > { %3242 = vmatpush1.bf16.msra.mxu0 %v5665_v61  ;;  %3684 = vmatpush1.bf16.msra.mxu1 %v5665_v61  ;;  %v5751_v61 = vld [vmem:[%s7119_s7 + $0x260] ss:$8 sps:$4 sm:$0xff]  }
  0xdd   : > { %3243 = vmatprep.subr.bf16.mxu0 %v5666_v62  ;;  %3685 = vmatprep.subr.bf16.mxu1 %v5666_v62  ;;  %v5752_v62 = vld [vmem:[%s7119_s7 + $0x274] ss:$8 sps:$4 sm:$0xff]  }
  0xe0   : > { %3244 = vmatpush1.bf16.msra.mxu0 %v5668_v63  ;;  %3686 = vmatpush1.bf16.msra.mxu1 %v5668_v63  ;;  %v5754_v63 = vld [vmem:[%s7119_s7 + $0x270] ss:$8 sps:$4 sm:$0xff]  }
  0xe1   : > { %3245 = vmatprep.subr.bf16.mxu0 %v5669_v0  ;;  %3687 = vmatprep.subr.bf16.mxu1 %v5669_v0  ;;  %v5755_v0 = vld [vmem:[%s7119_s7 + $0x284] ss:$8 sps:$4 sm:$0xff]  }
  0xe4   : > { %3246 = vmatpush1.bf16.msra.mxu0 %v5671_v1  ;;  %3688 = vmatpush1.bf16.msra.mxu1 %v5671_v1  ;;  %v5757_v1 = vld [vmem:[%s7119_s7 + $0x280] ss:$8 sps:$4 sm:$0xff]  }
  0xe5   : > { %3247 = vmatprep.subr.bf16.mxu0 %v5672_v2  ;;  %3689 = vmatprep.subr.bf16.mxu1 %v5672_v2  ;;  %v5758_v2 = vld [vmem:[%s7119_s7 + $0x294] ss:$8 sps:$4 sm:$0xff]  }
  0xe8   : > { %3248 = vmatpush1.bf16.msra.mxu0 %v5674_v3  ;;  %3690 = vmatpush1.bf16.msra.mxu1 %v5674_v3  ;;  %v5760_v3 = vld [vmem:[%s7119_s7 + $0x290] ss:$8 sps:$4 sm:$0xff]  }
  0xe9   : > { %3258 = vmatprep.subr.bf16.mxu0 %v5677_v4  ;;  %3700 = vmatprep.subr.bf16.mxu1 %v5677_v4  ;;  %v5761_v4 = vld [vmem:[%s7119_s7 + $0x2a4] ss:$8 sps:$4 sm:$0xff]  }
  0xeb   : > { %3250 = vmatmul.mubr.bf16.vlgmr.msra.gmra.mrb[0].mxu0 %v5065_v5  ;;  %3692 = vmatmul.mubr.bf16.vlgmr.msra.gmra.mrb[0].mxu1 %v5380_v6  ;;  %v5763_v5 = vld [vmem:[%s7119_s7 + $0x2a0] ss:$8 sps:$4 sm:$0xff]   ;;  %v5764_v6 = vld [vmem:[%s7119_s7 + $0x2b4] ss:$8 sps:$4 sm:$0xff]  }
  0xec   : > { %3259 = vmatpush1.bf16.msra.mxu0 %v5681_v9  ;;  %3701 = vmatpush1.bf16.msra.mxu1 %v5681_v9  ;;  %v5769_v9 = vld [vmem:[%s7119_s7 + $0x2c0] ss:$8 sps:$4 sm:$0xff]  }
  0xed   : > { %3260 = vmatprep.subr.bf16.mxu0 %v5682_v10  ;;  %3702 = vmatprep.subr.bf16.mxu1 %v5682_v10  ;;  %v5770_v10 = vld [vmem:[%s7119_s7 + $0x2d4] ss:$8 sps:$4 sm:$0xff]  }
  0xee   : > { %3290 = vmatprep.mubr.bf16.mxu0 %v5068_v11  ;;  %3732 = vmatprep.mubr.bf16.mxu1 %v5383_v12  ;;  %v5772_v11 = vld [vmem:[%s7119_s7 + $0x2d0] ss:$8 sps:$4 sm:$0xff]   ;;  %v5773_v12 = vld [vmem:[%s7119_s7 + $0x2e4] ss:$8 sps:$4 sm:$0xff]  }
  0xf0   : > { %3261 = vmatpush1.bf16.msra.mxu0 %v5684_v13  ;;  %3703 = vmatpush1.bf16.msra.mxu1 %v5684_v13  ;;  %v5775_v13 = vld [vmem:[%s7119_s7 + $0x2e0] ss:$8 sps:$4 sm:$0xff]  }
  0xf1   : > { %3262 = vmatprep.subr.bf16.mxu0 %v5685_v14  ;;  %3704 = vmatprep.subr.bf16.mxu1 %v5685_v14  ;;  %v5776_v14 = vld [vmem:[%s7119_s7 + $0x2f4] ss:$8 sps:$4 sm:$0xff]  }
  0xf4   : > { %3263 = vmatpush1.bf16.msra.mxu0 %v5687_v15  ;;  %3705 = vmatpush1.bf16.msra.mxu1 %v5687_v15  ;;  %v5778_v15 = vld [vmem:[%s7119_s7 + $0x2f0] ss:$8 sps:$4 sm:$0xff]  }
  0xf5   : > { %3264 = vmatprep.subr.bf16.mxu0 %v5688_v16  ;;  %3706 = vmatprep.subr.bf16.mxu1 %v5688_v16  ;;  %v5781_v16 = vld [vmem:[%s7119_s7 + $0x304] ss:$8 sps:$4 sm:$0xff]  }
  0xf8   : > { %3265 = vmatpush1.bf16.msra.mxu0 %v5690_v17  ;;  %3707 = vmatpush1.bf16.msra.mxu1 %v5690_v17  ;;  %v5069_v17 = vcombine.low %v7207_v43, %v7207_v43  ;;  %v5815_v43 = vld [vmem:[%s7119_s7 + $0x3a0] ss:$8 sps:$4 sm:$0xff]  }
  0xf9   : > { %3266 = vmatprep.subr.bf16.mxu0 %v5691_v18  ;;  %3708 = vmatprep.subr.bf16.mxu1 %v5691_v18  ;;  %v5384_v18 = vcombine.low %v7212_v44, %v7212_v44  ;;  %v5816_v44 = vld [vmem:[%s7119_s7 + $0x3b4] ss:$8 sps:$4 sm:$0xff]  }
  0xfc   : > { %3267 = vmatpush1.bf16.msra.mxu0 %v5693_v19  ;;  %3709 = vmatpush1.bf16.msra.mxu1 %v5693_v19  ;;  %v7261_v19 = vld [vmem:[%s8047_s0 + $0x18] sm:$0xff] }
  0xfd   : > { %3268 = vmatprep.subr.bf16.mxu0 %v5694_v20  ;;  %3710 = vmatprep.subr.bf16.mxu1 %v5694_v20  ;;  %v7266_v20 = vld [vmem:[%s8047_s0 + $0x60] sm:$0xff] }
 0x100   : > { %3269 = vmatpush1.bf16.msra.mxu0 %v5696_v21  ;;  %3711 = vmatpush1.bf16.msra.mxu1 %v5696_v21  ;;  %v5785_v21 = vld [vmem:[%s7119_s7 + $0x300] ss:$8 sps:$4 sm:$0xff]  }
 0x101   : > { %3270 = vmatprep.subr.bf16.mxu0 %v5697_v22  ;;  %3712 = vmatprep.subr.bf16.mxu1 %v5697_v22  ;;  %v5786_v22 = vld [vmem:[%s7119_s7 + $0x314] ss:$8 sps:$4 sm:$0xff]  }
 0x104   : > { %3271 = vmatpush1.bf16.msra.mxu0 %v5699_v23  ;;  %3713 = vmatpush1.bf16.msra.mxu1 %v5699_v23  ;;  %v5072_v23 = vcombine.high %v7261_v19, %v7261_v19 }
 0x105   : > { %3272 = vmatprep.subr.bf16.mxu0 %v5700_v24  ;;  %3714 = vmatprep.subr.bf16.mxu1 %v5700_v24  ;;  %v5387_v24 = vcombine.high %v7266_v20, %v7266_v20 }
 0x108   : > { %3273 = vmatpush1.bf16.msra.mxu0 %v5702_v25  ;;  %3715 = vmatpush1.bf16.msra.mxu1 %v5702_v25  ;;  %v5788_v25 = vld [vmem:[%s7119_s7 + $0x310] ss:$8 sps:$4 sm:$0xff]  }
 0x109   : > { %3274 = vmatprep.subr.bf16.mxu0 %v5703_v26  ;;  %3716 = vmatprep.subr.bf16.mxu1 %v5703_v26  ;;  %v5789_v26 = vld [vmem:[%s7119_s7 + $0x324] ss:$8 sps:$4 sm:$0xff]  }
 0x10c   : > { %3275 = vmatpush1.bf16.msra.mxu0 %v5705_v27  ;;  %3717 = vmatpush1.bf16.msra.mxu1 %v5705_v27  ;;  %v5791_v27 = vld [vmem:[%s7119_s7 + $0x320] ss:$8 sps:$4 sm:$0xff]  }
 0x10d   : > { %3276 = vmatprep.subr.bf16.mxu0 %v5706_v28  ;;  %3718 = vmatprep.subr.bf16.mxu1 %v5706_v28  ;;  %v5792_v28 = vld [vmem:[%s7119_s7 + $0x334] ss:$8 sps:$4 sm:$0xff]  }
 0x110   : > { %3277 = vmatpush1.bf16.msra.mxu0 %v5708_v29  ;;  %3719 = vmatpush1.bf16.msra.mxu1 %v5708_v29  ;;  %v5794_v29 = vld [vmem:[%s7119_s7 + $0x330] ss:$8 sps:$4 sm:$0xff]  }
 0x111   : > { %3278 = vmatprep.subr.bf16.mxu0 %v5709_v30  ;;  %3720 = vmatprep.subr.bf16.mxu1 %v5709_v30  ;;  %v5795_v30 = vld [vmem:[%s7119_s7 + $0x344] ss:$8 sps:$4 sm:$0xff]  }
 0x114   : > { %3279 = vmatpush1.bf16.msra.mxu0 %v5711_v31  ;;  %3721 = vmatpush1.bf16.msra.mxu1 %v5711_v31  ;;  %v5797_v31 = vld [vmem:[%s7119_s7 + $0x340] ss:$8 sps:$4 sm:$0xff]  }
 0x115   : > { %3280 = vmatprep.subr.bf16.mxu0 %v5712_v32  ;;  %3722 = vmatprep.subr.bf16.mxu1 %v5712_v32  ;;  %v5798_v32 = vld [vmem:[%s7119_s7 + $0x354] ss:$8 sps:$4 sm:$0xff]  }
 0x118   : > { %3281 = vmatpush1.bf16.msra.mxu0 %v5714_v33  ;;  %3723 = vmatpush1.bf16.msra.mxu1 %v5714_v33  ;;  %v5800_v33 = vld [vmem:[%s7119_s7 + $0x350] ss:$8 sps:$4 sm:$0xff]  }
 0x119   : > { %3282 = vmatprep.subr.bf16.mxu0 %v5715_v34  ;;  %3724 = vmatprep.subr.bf16.mxu1 %v5715_v34  ;;  %v5801_v34 = vld [vmem:[%s7119_s7 + $0x364] ss:$8 sps:$4 sm:$0xff]  }
 0x11c   : > { %3283 = vmatpush1.bf16.msra.mxu0 %v5717_v35  ;;  %3725 = vmatpush1.bf16.msra.mxu1 %v5717_v35  ;;  %v5803_v35 = vld [vmem:[%s7119_s7 + $0x360] ss:$8 sps:$4 sm:$0xff]  }
 0x11d   : > { %3284 = vmatprep.subr.bf16.mxu0 %v5718_v36  ;;  %3726 = vmatprep.subr.bf16.mxu1 %v5718_v36  ;;  %v5804_v36 = vld [vmem:[%s7119_s7 + $0x374] ss:$8 sps:$4 sm:$0xff]  }
 0x120   : > { %3285 = vmatpush1.bf16.msra.mxu0 %v5720_v37  ;;  %3727 = vmatpush1.bf16.msra.mxu1 %v5720_v37  ;;  %v5806_v37 = vld [vmem:[%s7119_s7 + $0x370] ss:$8 sps:$4 sm:$0xff]  }
 0x121   : > { %3286 = vmatprep.subr.bf16.mxu0 %v5721_v38  ;;  %3728 = vmatprep.subr.bf16.mxu1 %v5721_v38  ;;  %v5807_v38 = vld [vmem:[%s7119_s7 + $0x384] ss:$8 sps:$4 sm:$0xff]  }
 0x124   : > { %3287 = vmatpush1.bf16.msra.mxu0 %v5723_v39  ;;  %3729 = vmatpush1.bf16.msra.mxu1 %v5723_v39  ;;  %v5809_v39 = vld [vmem:[%s7119_s7 + $0x380] ss:$8 sps:$4 sm:$0xff]  }
 0x125   : > { %3288 = vmatprep.subr.bf16.mxu0 %v5724_v40  ;;  %3730 = vmatprep.subr.bf16.mxu1 %v5724_v40  ;;  %v5810_v40 = vld [vmem:[%s7119_s7 + $0x394] ss:$8 sps:$4 sm:$0xff]  }
 0x128   : > { %3289 = vmatpush1.bf16.msra.mxu0 %v5726_v41  ;;  %3731 = vmatpush1.bf16.msra.mxu1 %v5726_v41  ;;  %v5812_v41 = vld [vmem:[%s7119_s7 + $0x390] ss:$8 sps:$4 sm:$0xff]  }
 0x129   : > { %3299 = vmatprep.subr.bf16.mxu0 %v5729_v42  ;;  %3741 = vmatprep.subr.bf16.mxu1 %v5729_v42  ;;  %v5813_v42 = vld [vmem:[%s7119_s7 + $0x3a4] ss:$8 sps:$4 sm:$0xff]  }
 0x12b   : > { %3291 = vmatmul.mubr.bf16.vlgmr.msra.gmra.mrb[0].mxu0 %v5067_v45  ;;  %3733 = vmatmul.mubr.bf16.vlgmr.msra.gmra.mrb[0].mxu1 %v5382_v46  ;;  %v5818_v45 = vld [vmem:[%s7119_s7 + $0x3b0] ss:$8 sps:$4 sm:$0xff]   ;;  %v5819_v46 = vld [vmem:[%s7119_s7 + $0x3c4] ss:$8 sps:$4 sm:$0xff]  }
 0x12c   : > { %3300 = vmatpush1.bf16.msra.mxu0 %v5733_v47  ;;  %3742 = vmatpush1.bf16.msra.mxu1 %v5733_v47  ;;  %v5821_v47 = vld [vmem:[%s7119_s7 + $0x3c0] ss:$8 sps:$4 sm:$0xff]  }
 0x12d   : > { %3301 = vmatprep.subr.bf16.mxu0 %v5734_v48  ;;  %3743 = vmatprep.subr.bf16.mxu1 %v5734_v48  ;;  %v5822_v48 = vld [vmem:[%s7119_s7 + $0x3d4] ss:$8 sps:$4 sm:$0xff]  }
 0x12e   : > { %3331 = vmatprep.mubr.bf16.mxu0 %v5070_v49  ;;  %3773 = vmatprep.mubr.bf16.mxu1 %v5385_v50  ;;  %v5824_v49 = vld [vmem:[%s7119_s7 + $0x3d0] ss:$8 sps:$4 sm:$0xff]   ;;  %v5825_v50 = vld [vmem:[%s7119_s7 + $0x3e4] ss:$8 sps:$4 sm:$0xff]  }
 0x130   : > { %3302 = vmatpush1.bf16.msra.mxu0 %v5736_v51  ;;  %3744 = vmatpush1.bf16.msra.mxu1 %v5736_v51  ;;  %v5827_v51 = vld [vmem:[%s7119_s7 + $0x3e0] ss:$8 sps:$4 sm:$0xff]  }
 0x131   : > { %3303 = vmatprep.subr.bf16.mxu0 %v5737_v52  ;;  %3745 = vmatprep.subr.bf16.mxu1 %v5737_v52  ;;  %v5828_v52 = vld [vmem:[%s7119_s7 + $0x3f4] ss:$8 sps:$4 sm:$0xff]  }
 0x134   : > { %3304 = vmatpush1.bf16.msra.mxu0 %v5739_v53  ;;  %3746 = vmatpush1.bf16.msra.mxu1 %v5739_v53  ;;  %v5830_v53 = vld [vmem:[%s7119_s7 + $0x3f0] ss:$8 sps:$4 sm:$0xff]  }
 0x135   : > { %3305 = vmatprep.subr.bf16.mxu0 %v5740_v54  ;;  %3747 = vmatprep.subr.bf16.mxu1 %v5740_v54  ;;  %v5833_v54 = vld [vmem:[%s7119_s7 + $0x404] ss:$8 sps:$4 sm:$0xff]  }
 0x138   : > { %3306 = vmatpush1.bf16.msra.mxu0 %v5742_v55  ;;  %3748 = vmatpush1.bf16.msra.mxu1 %v5742_v55  ;;  %v5071_v55 = vcombine.low %v7261_v19, %v7261_v19  ;;  %v5870_v19 = vld [vmem:[%s7119_s7 + $0x4b0] ss:$8 sps:$4 sm:$0xff]  }
 0x139   : > { %3307 = vmatprep.subr.bf16.mxu0 %v5743_v56  ;;  %3749 = vmatprep.subr.bf16.mxu1 %v5743_v56  ;;  %v5386_v56 = vcombine.low %v7266_v20, %v7266_v20  ;;  %v5871_v20 = vld [vmem:[%s7119_s7 + $0x4c4] ss:$8 sps:$4 sm:$0xff]  }
 0x13c   : > { %3308 = vmatpush1.bf16.msra.mxu0 %v5745_v57  ;;  %3750 = vmatpush1.bf16.msra.mxu1 %v5745_v57  ;;  %v7311_v57 = vld [vmem:[%s8047_s0 + $0x20] sm:$0xff] }
 0x13d   : > { %3309 = vmatprep.subr.bf16.mxu0 %v5746_v58  ;;  %3751 = vmatprep.subr.bf16.mxu1 %v5746_v58  ;;  %v7316_v58 = vld [vmem:[%s8047_s0 + $0x68] sm:$0xff] }
 0x140   : > { %3310 = vmatpush1.bf16.msra.mxu0 %v5748_v59  ;;  %3752 = vmatpush1.bf16.msra.mxu1 %v5748_v59  ;;  %v5837_v59 = vld [vmem:[%s7119_s7 + $0x400] ss:$8 sps:$4 sm:$0xff]  }
 0x141   : > { %3311 = vmatprep.subr.bf16.mxu0 %v5749_v60  ;;  %3753 = vmatprep.subr.bf16.mxu1 %v5749_v60  ;;  %v5838_v60 = vld [vmem:[%s7119_s7 + $0x414] ss:$8 sps:$4 sm:$0xff]  }
 0x144   : > { %3312 = vmatpush1.bf16.msra.mxu0 %v5751_v61  ;;  %3754 = vmatpush1.bf16.msra.mxu1 %v5751_v61  ;;  %v5074_v61 = vcombine.high %v7311_v57, %v7311_v57 }
 0x145   : > { %3313 = vmatprep.subr.bf16.mxu0 %v5752_v62  ;;  %3755 = vmatprep.subr.bf16.mxu1 %v5752_v62  ;;  %v5389_v62 = vcombine.high %v7316_v58, %v7316_v58 }
 0x148   : > { %3314 = vmatpush1.bf16.msra.mxu0 %v5754_v63  ;;  %3756 = vmatpush1.bf16.msra.mxu1 %v5754_v63  ;;  %v5840_v63 = vld [vmem:[%s7119_s7 + $0x410] ss:$8 sps:$4 sm:$0xff]  }
 0x149   : > { %3315 = vmatprep.subr.bf16.mxu0 %v5755_v0  ;;  %3757 = vmatprep.subr.bf16.mxu1 %v5755_v0  ;;  %v5841_v0 = vld [vmem:[%s7119_s7 + $0x424] ss:$8 sps:$4 sm:$0xff]  }
 0x14c   : > { %3316 = vmatpush1.bf16.msra.mxu0 %v5757_v1  ;;  %3758 = vmatpush1.bf16.msra.mxu1 %v5757_v1  ;;  %v5843_v1 = vld [vmem:[%s7119_s7 + $0x420] ss:$8 sps:$4 sm:$0xff]  }
 0x14d   : > { %3317 = vmatprep.subr.bf16.mxu0 %v5758_v2  ;;  %3759 = vmatprep.subr.bf16.mxu1 %v5758_v2  ;;  %v5844_v2 = vld [vmem:[%s7119_s7 + $0x434] ss:$8 sps:$4 sm:$0xff]  }
 0x150   : > { %3318 = vmatpush1.bf16.msra.mxu0 %v5760_v3  ;;  %3760 = vmatpush1.bf16.msra.mxu1 %v5760_v3  ;;  %v5846_v3 = vld [vmem:[%s7119_s7 + $0x430] ss:$8 sps:$4 sm:$0xff]  }
 0x151   : > { %3319 = vmatprep.subr.bf16.mxu0 %v5761_v4  ;;  %3761 = vmatprep.subr.bf16.mxu1 %v5761_v4  ;;  %v5847_v4 = vld [vmem:[%s7119_s7 + $0x444] ss:$8 sps:$4 sm:$0xff]  }
 0x154   : > { %3320 = vmatpush1.bf16.msra.mxu0 %v5763_v5  ;;  %3762 = vmatpush1.bf16.msra.mxu1 %v5763_v5  ;;  %v5849_v5 = vld [vmem:[%s7119_s7 + $0x440] ss:$8 sps:$4 sm:$0xff]  }
 0x155   : > { %3321 = vmatprep.subr.bf16.mxu0 %v5764_v6  ;;  %3763 = vmatprep.subr.bf16.mxu1 %v5764_v6  ;;  %v5850_v6 = vld [vmem:[%s7119_s7 + $0x454] ss:$8 sps:$4 sm:$0xff]  }
 0x158   : > { %3322 = vmatpush1.bf16.msra.mxu0 %v5766_v7  ;;  %3764 = vmatpush1.bf16.msra.mxu1 %v5766_v7  ;;  %v5852_v7 = vld [vmem:[%s7119_s7 + $0x450] ss:$8 sps:$4 sm:$0xff]  }
 0x159   : > { %3323 = vmatprep.subr.bf16.mxu0 %v5767_v8  ;;  %3765 = vmatprep.subr.bf16.mxu1 %v5767_v8  ;;  %v5853_v8 = vld [vmem:[%s7119_s7 + $0x464] ss:$8 sps:$4 sm:$0xff]  }
 0x15c   : > { %3324 = vmatpush1.bf16.msra.mxu0 %v5769_v9  ;;  %3766 = vmatpush1.bf16.msra.mxu1 %v5769_v9  ;;  %v5855_v9 = vld [vmem:[%s7119_s7 + $0x460] ss:$8 sps:$4 sm:$0xff]  }
 0x15d   : > { %3325 = vmatprep.subr.bf16.mxu0 %v5770_v10  ;;  %3767 = vmatprep.subr.bf16.mxu1 %v5770_v10  ;;  %v5856_v10 = vld [vmem:[%s7119_s7 + $0x474] ss:$8 sps:$4 sm:$0xff]  }
 0x160   : > { %3326 = vmatpush1.bf16.msra.mxu0 %v5772_v11  ;;  %3768 = vmatpush1.bf16.msra.mxu1 %v5772_v11  ;;  %v5858_v11 = vld [vmem:[%s7119_s7 + $0x470] ss:$8 sps:$4 sm:$0xff]  }
 0x161   : > { %3327 = vmatprep.subr.bf16.mxu0 %v5773_v12  ;;  %3769 = vmatprep.subr.bf16.mxu1 %v5773_v12  ;;  %v5859_v12 = vld [vmem:[%s7119_s7 + $0x484] ss:$8 sps:$4 sm:$0xff]  }
 0x164   : > { %3328 = vmatpush1.bf16.msra.mxu0 %v5775_v13  ;;  %3770 = vmatpush1.bf16.msra.mxu1 %v5775_v13  ;;  %v5861_v13 = vld [vmem:[%s7119_s7 + $0x480] ss:$8 sps:$4 sm:$0xff]  }
 0x165   : > { %3329 = vmatprep.subr.bf16.mxu0 %v5776_v14  ;;  %3771 = vmatprep.subr.bf16.mxu1 %v5776_v14  ;;  %v5862_v14 = vld [vmem:[%s7119_s7 + $0x494] ss:$8 sps:$4 sm:$0xff]  }
 0x168   : > { %3330 = vmatpush1.bf16.msra.mxu0 %v5778_v15  ;;  %3772 = vmatpush1.bf16.msra.mxu1 %v5778_v15  ;;  %v5864_v15 = vld [vmem:[%s7119_s7 + $0x490] ss:$8 sps:$4 sm:$0xff]  }
 0x169   : > { %3340 = vmatprep.subr.bf16.mxu0 %v5781_v16  ;;  %3782 = vmatprep.subr.bf16.mxu1 %v5781_v16  ;;  %v5865_v16 = vld [vmem:[%s7119_s7 + $0x4a4] ss:$8 sps:$4 sm:$0xff]  }
 0x16b   : > { %3332 = vmatmul.mubr.bf16.vlgmr.msra.gmra.mrb[0].mxu0 %v5069_v17  ;;  %3774 = vmatmul.mubr.bf16.vlgmr.msra.gmra.mrb[0].mxu1 %v5384_v18  ;;  %v5867_v17 = vld [vmem:[%s7119_s7 + $0x4a0] ss:$8 sps:$4 sm:$0xff]   ;;  %v5868_v18 = vld [vmem:[%s7119_s7 + $0x4b4] ss:$8 sps:$4 sm:$0xff]  }
 0x16c   : > { %3341 = vmatpush1.bf16.msra.mxu0 %v5785_v21  ;;  %3783 = vmatpush1.bf16.msra.mxu1 %v5785_v21  ;;  %v5873_v21 = vld [vmem:[%s7119_s7 + $0x4c0] ss:$8 sps:$4 sm:$0xff]  }
 0x16d   : > { %3342 = vmatprep.subr.bf16.mxu0 %v5786_v22  ;;  %3784 = vmatprep.subr.bf16.mxu1 %v5786_v22  ;;  %v5874_v22 = vld [vmem:[%s7119_s7 + $0x4d4] ss:$8 sps:$4 sm:$0xff]  }
 0x16e   : > { %3372 = vmatprep.mubr.bf16.mxu0 %v5072_v23  ;;  %3814 = vmatprep.mubr.bf16.mxu1 %v5387_v24  ;;  %v5876_v23 = vld [vmem:[%s7119_s7 + $0x4d0] ss:$8 sps:$4 sm:$0xff]   ;;  %v5877_v24 = vld [vmem:[%s7119_s7 + $0x4e4] ss:$8 sps:$4 sm:$0xff]  }
 0x170   : > { %3343 = vmatpush1.bf16.msra.mxu0 %v5788_v25  ;;  %3785 = vmatpush1.bf16.msra.mxu1 %v5788_v25  ;;  %v5879_v25 = vld [vmem:[%s7119_s7 + $0x4e0] ss:$8 sps:$4 sm:$0xff]  }
 0x171   : > { %3344 = vmatprep.subr.bf16.mxu0 %v5789_v26  ;;  %3786 = vmatprep.subr.bf16.mxu1 %v5789_v26  ;;  %v5880_v26 = vld [vmem:[%s7119_s7 + $0x4f4] ss:$8 sps:$4 sm:$0xff]  }
 0x174   : > { %3345 = vmatpush1.bf16.msra.mxu0 %v5791_v27  ;;  %3787 = vmatpush1.bf16.msra.mxu1 %v5791_v27  ;;  %v5882_v27 = vld [vmem:[%s7119_s7 + $0x4f0] ss:$8 sps:$4 sm:$0xff]  }
 0x175   : > { %3346 = vmatprep.subr.bf16.mxu0 %v5792_v28  ;;  %3788 = vmatprep.subr.bf16.mxu1 %v5792_v28  ;;  %v5885_v28 = vld [vmem:[%s7119_s7 + $0x504] ss:$8 sps:$4 sm:$0xff]  }
 0x178   : > { %3347 = vmatpush1.bf16.msra.mxu0 %v5794_v29  ;;  %3789 = vmatpush1.bf16.msra.mxu1 %v5794_v29  ;;  %v5073_v29 = vcombine.low %v7311_v57, %v7311_v57  ;;  %v5922_v57 = vld [vmem:[%s7119_s7 + $0x5b0] ss:$8 sps:$4 sm:$0xff]  }
 0x179   : > { %3348 = vmatprep.subr.bf16.mxu0 %v5795_v30  ;;  %3790 = vmatprep.subr.bf16.mxu1 %v5795_v30  ;;  %v5388_v30 = vcombine.low %v7316_v58, %v7316_v58  ;;  %v5923_v58 = vld [vmem:[%s7119_s7 + $0x5c4] ss:$8 sps:$4 sm:$0xff]  }
 0x17c   : > { %3349 = vmatpush1.bf16.msra.mxu0 %v5797_v31  ;;  %3791 = vmatpush1.bf16.msra.mxu1 %v5797_v31  ;;  %v7361_v31 = vld [vmem:[%s8047_s0 + $0x28] sm:$0xff] }
 0x17d   : > { %3350 = vmatprep.subr.bf16.mxu0 %v5798_v32  ;;  %3792 = vmatprep.subr.bf16.mxu1 %v5798_v32  ;;  %v7366_v32 = vld [vmem:[%s8047_s0 + $0x70] sm:$0xff] }
 0x180   : > { %3351 = vmatpush1.bf16.msra.mxu0 %v5800_v33  ;;  %3793 = vmatpush1.bf16.msra.mxu1 %v5800_v33  ;;  %v5889_v33 = vld [vmem:[%s7119_s7 + $0x500] ss:$8 sps:$4 sm:$0xff]  }
 0x181   : > { %3352 = vmatprep.subr.bf16.mxu0 %v5801_v34  ;;  %3794 = vmatprep.subr.bf16.mxu1 %v5801_v34  ;;  %v5890_v34 = vld [vmem:[%s7119_s7 + $0x514] ss:$8 sps:$4 sm:$0xff]  }
 0x184   : > { %3353 = vmatpush1.bf16.msra.mxu0 %v5803_v35  ;;  %3795 = vmatpush1.bf16.msra.mxu1 %v5803_v35  ;;  %v5076_v35 = vcombine.high %v7361_v31, %v7361_v31 }
 0x185   : > { %3354 = vmatprep.subr.bf16.mxu0 %v5804_v36  ;;  %3796 = vmatprep.subr.bf16.mxu1 %v5804_v36  ;;  %v5391_v36 = vcombine.high %v7366_v32, %v7366_v32 }
 0x188   : > { %3355 = vmatpush1.bf16.msra.mxu0 %v5806_v37  ;;  %3797 = vmatpush1.bf16.msra.mxu1 %v5806_v37  ;;  %v5892_v37 = vld [vmem:[%s7119_s7 + $0x510] ss:$8 sps:$4 sm:$0xff]  }
 0x189   : > { %3356 = vmatprep.subr.bf16.mxu0 %v5807_v38  ;;  %3798 = vmatprep.subr.bf16.mxu1 %v5807_v38  ;;  %v5893_v38 = vld [vmem:[%s7119_s7 + $0x524] ss:$8 sps:$4 sm:$0xff]  }
 0x18c   : > { %3357 = vmatpush1.bf16.msra.mxu0 %v5809_v39  ;;  %3799 = vmatpush1.bf16.msra.mxu1 %v5809_v39  ;;  %v5895_v39 = vld [vmem:[%s7119_s7 + $0x520] ss:$8 sps:$4 sm:$0xff]  }
 0x18d   : > { %3358 = vmatprep.subr.bf16.mxu0 %v5810_v40  ;;  %3800 = vmatprep.subr.bf16.mxu1 %v5810_v40  ;;  %v5896_v40 = vld [vmem:[%s7119_s7 + $0x534] ss:$8 sps:$4 sm:$0xff]  }
 0x190   : > { %3359 = vmatpush1.bf16.msra.mxu0 %v5812_v41  ;;  %3801 = vmatpush1.bf16.msra.mxu1 %v5812_v41  ;;  %v5898_v41 = vld [vmem:[%s7119_s7 + $0x530] ss:$8 sps:$4 sm:$0xff]  }
 0x191   : > { %3360 = vmatprep.subr.bf16.mxu0 %v5813_v42  ;;  %3802 = vmatprep.subr.bf16.mxu1 %v5813_v42  ;;  %v5899_v42 = vld [vmem:[%s7119_s7 + $0x544] ss:$8 sps:$4 sm:$0xff]  }
 0x194   : > { %3361 = vmatpush1.bf16.msra.mxu0 %v5815_v43  ;;  %3803 = vmatpush1.bf16.msra.mxu1 %v5815_v43  ;;  %v5901_v43 = vld [vmem:[%s7119_s7 + $0x540] ss:$8 sps:$4 sm:$0xff]  }
 0x195   : > { %3362 = vmatprep.subr.bf16.mxu0 %v5816_v44  ;;  %3804 = vmatprep.subr.bf16.mxu1 %v5816_v44  ;;  %v5902_v44 = vld [vmem:[%s7119_s7 + $0x554] ss:$8 sps:$4 sm:$0xff]  }
 0x198   : > { %3363 = vmatpush1.bf16.msra.mxu0 %v5818_v45  ;;  %3805 = vmatpush1.bf16.msra.mxu1 %v5818_v45  ;;  %v5904_v45 = vld [vmem:[%s7119_s7 + $0x550] ss:$8 sps:$4 sm:$0xff]  }
 0x199   : > { %3364 = vmatprep.subr.bf16.mxu0 %v5819_v46  ;;  %3806 = vmatprep.subr.bf16.mxu1 %v5819_v46  ;;  %v5905_v46 = vld [vmem:[%s7119_s7 + $0x564] ss:$8 sps:$4 sm:$0xff]  }
 0x19c   : > { %3365 = vmatpush1.bf16.msra.mxu0 %v5821_v47  ;;  %3807 = vmatpush1.bf16.msra.mxu1 %v5821_v47  ;;  %v5907_v47 = vld [vmem:[%s7119_s7 + $0x560] ss:$8 sps:$4 sm:$0xff]  }
 0x19d   : > { %3366 = vmatprep.subr.bf16.mxu0 %v5822_v48  ;;  %3808 = vmatprep.subr.bf16.mxu1 %v5822_v48  ;;  %v5908_v48 = vld [vmem:[%s7119_s7 + $0x574] ss:$8 sps:$4 sm:$0xff]  }
 0x1a0   : > { %3367 = vmatpush1.bf16.msra.mxu0 %v5824_v49  ;;  %3809 = vmatpush1.bf16.msra.mxu1 %v5824_v49  ;;  %v5910_v49 = vld [vmem:[%s7119_s7 + $0x570] ss:$8 sps:$4 sm:$0xff]  }
 0x1a1   : > { %3368 = vmatprep.subr.bf16.mxu0 %v5825_v50  ;;  %3810 = vmatprep.subr.bf16.mxu1 %v5825_v50  ;;  %v5911_v50 = vld [vmem:[%s7119_s7 + $0x584] ss:$8 sps:$4 sm:$0xff]  }
 0x1a4   : > { %3369 = vmatpush1.bf16.msra.mxu0 %v5827_v51  ;;  %3811 = vmatpush1.bf16.msra.mxu1 %v5827_v51  ;;  %v5913_v51 = vld [vmem:[%s7119_s7 + $0x580] ss:$8 sps:$4 sm:$0xff]  }
 0x1a5   : > { %3370 = vmatprep.subr.bf16.mxu0 %v5828_v52  ;;  %3812 = vmatprep.subr.bf16.mxu1 %v5828_v52  ;;  %v5914_v52 = vld [vmem:[%s7119_s7 + $0x594] ss:$8 sps:$4 sm:$0xff]  }
 0x1a8   : > { %3371 = vmatpush1.bf16.msra.mxu0 %v5830_v53  ;;  %3813 = vmatpush1.bf16.msra.mxu1 %v5830_v53  ;;  %v5916_v53 = vld [vmem:[%s7119_s7 + $0x590] ss:$8 sps:$4 sm:$0xff]  }
 0x1a9   : > { %3381 = vmatprep.subr.bf16.mxu0 %v5833_v54  ;;  %3823 = vmatprep.subr.bf16.mxu1 %v5833_v54  ;;  %v5917_v54 = vld [vmem:[%s7119_s7 + $0x5a4] ss:$8 sps:$4 sm:$0xff]  }
 0x1ab   : > { %3373 = vmatmul.mubr.bf16.vlgmr.msra.gmra.mrb[0].mxu0 %v5071_v55  ;;  %3815 = vmatmul.mubr.bf16.vlgmr.msra.gmra.mrb[0].mxu1 %v5386_v56  ;;  %v5919_v55 = vld [vmem:[%s7119_s7 + $0x5a0] ss:$8 sps:$4 sm:$0xff]   ;;  %v5920_v56 = vld [vmem:[%s7119_s7 + $0x5b4] ss:$8 sps:$4 sm:$0xff]  }
 0x1ac   : > { %3382 = vmatpush1.bf16.msra.mxu0 %v5837_v59  ;;  %3824 = vmatpush1.bf16.msra.mxu1 %v5837_v59  ;;  %v5925_v59 = vld [vmem:[%s7119_s7 + $0x5c0] ss:$8 sps:$4 sm:$0xff]  }
 0x1ad   : > { %3383 = vmatprep.subr.bf16.mxu0 %v5838_v60  ;;  %3825 = vmatprep.subr.bf16.mxu1 %v5838_v60  ;;  %v5926_v60 = vld [vmem:[%s7119_s7 + $0x5d4] ss:$8 sps:$4 sm:$0xff]  }
 0x1ae   : > { %3413 = vmatprep.mubr.bf16.mxu0 %v5074_v61  ;;  %3855 = vmatprep.mubr.bf16.mxu1 %v5389_v62  ;;  %v5928_v61 = vld [vmem:[%s7119_s7 + $0x5d0] ss:$8 sps:$4 sm:$0xff]   ;;  %v5929_v62 = vld [vmem:[%s7119_s7 + $0x5e4] ss:$8 sps:$4 sm:$0xff]  }
 0x1b0   : > { %3384 = vmatpush1.bf16.msra.mxu0 %v5840_v63  ;;  %3826 = vmatpush1.bf16.msra.mxu1 %v5840_v63  ;;  %v5931_v63 = vld [vmem:[%s7119_s7 + $0x5e0] ss:$8 sps:$4 sm:$0xff]  }
 0x1b1   : > { %3385 = vmatprep.subr.bf16.mxu0 %v5841_v0  ;;  %3827 = vmatprep.subr.bf16.mxu1 %v5841_v0  ;;  %v5932_v0 = vld [vmem:[%s7119_s7 + $0x5f4] ss:$8 sps:$4 sm:$0xff]  }
 0x1b4   : > { %3386 = vmatpush1.bf16.msra.mxu0 %v5843_v1  ;;  %3828 = vmatpush1.bf16.msra.mxu1 %v5843_v1  ;;  %v5934_v1 = vld [vmem:[%s7119_s7 + $0x5f0] ss:$8 sps:$4 sm:$0xff]  }
 0x1b5   : > { %3387 = vmatprep.subr.bf16.mxu0 %v5844_v2  ;;  %3829 = vmatprep.subr.bf16.mxu1 %v5844_v2  ;;  %v5937_v2 = vld [vmem:[%s7119_s7 + $0x604] ss:$8 sps:$4 sm:$0xff]  }
 0x1b8   : > { %3388 = vmatpush1.bf16.msra.mxu0 %v5846_v3  ;;  %3830 = vmatpush1.bf16.msra.mxu1 %v5846_v3  ;;  %v5075_v3 = vcombine.low %v7361_v31, %v7361_v31  ;;  %v5974_v31 = vld [vmem:[%s7119_s7 + $0x6b0] ss:$8 sps:$4 sm:$0xff]  }
 0x1b9   : > { %3389 = vmatprep.subr.bf16.mxu0 %v5847_v4  ;;  %3831 = vmatprep.subr.bf16.mxu1 %v5847_v4  ;;  %v5390_v4 = vcombine.low %v7366_v32, %v7366_v32  ;;  %v5975_v32 = vld [vmem:[%s7119_s7 + $0x6c4] ss:$8 sps:$4 sm:$0xff]  }
 0x1bc   : > { %3390 = vmatpush1.bf16.msra.mxu0 %v5849_v5  ;;  %3832 = vmatpush1.bf16.msra.mxu1 %v5849_v5  ;;  %v7411_v5 = vld [vmem:[%s8047_s0 + $0x30] sm:$0xff] }
 0x1bd   : > { %3391 = vmatprep.subr.bf16.mxu0 %v5850_v6  ;;  %3833 = vmatprep.subr.bf16.mxu1 %v5850_v6  ;;  %v7416_v6 = vld [vmem:[%s8047_s0 + $0x78] sm:$0xff] }
 0x1c0   : > { %3392 = vmatpush1.bf16.msra.mxu0 %v5852_v7  ;;  %3834 = vmatpush1.bf16.msra.mxu1 %v5852_v7  ;;  %v5941_v7 = vld [vmem:[%s7119_s7 + $0x600] ss:$8 sps:$4 sm:$0xff]  }
 0x1c1   : > { %3393 = vmatprep.subr.bf16.mxu0 %v5853_v8  ;;  %3835 = vmatprep.subr.bf16.mxu1 %v5853_v8  ;;  %v5942_v8 = vld [vmem:[%s7119_s7 + $0x614] ss:$8 sps:$4 sm:$0xff]  }
 0x1c4   : > { %3394 = vmatpush1.bf16.msra.mxu0 %v5855_v9  ;;  %3836 = vmatpush1.bf16.msra.mxu1 %v5855_v9  ;;  %v5078_v9 = vcombine.high %v7411_v5, %v7411_v5 }
 0x1c5   : > { %3395 = vmatprep.subr.bf16.mxu0 %v5856_v10  ;;  %3837 = vmatprep.subr.bf16.mxu1 %v5856_v10  ;;  %v5393_v10 = vcombine.high %v7416_v6, %v7416_v6 }
 0x1c8   : > { %3396 = vmatpush1.bf16.msra.mxu0 %v5858_v11  ;;  %3838 = vmatpush1.bf16.msra.mxu1 %v5858_v11  ;;  %v5944_v11 = vld [vmem:[%s7119_s7 + $0x610] ss:$8 sps:$4 sm:$0xff]  }
 0x1c9   : > { %3397 = vmatprep.subr.bf16.mxu0 %v5859_v12  ;;  %3839 = vmatprep.subr.bf16.mxu1 %v5859_v12  ;;  %v5945_v12 = vld [vmem:[%s7119_s7 + $0x624] ss:$8 sps:$4 sm:$0xff]  }
 0x1cc   : > { %3398 = vmatpush1.bf16.msra.mxu0 %v5861_v13  ;;  %3840 = vmatpush1.bf16.msra.mxu1 %v5861_v13  ;;  %v5947_v13 = vld [vmem:[%s7119_s7 + $0x620] ss:$8 sps:$4 sm:$0xff]  }
 0x1cd   : > { %3399 = vmatprep.subr.bf16.mxu0 %v5862_v14  ;;  %3841 = vmatprep.subr.bf16.mxu1 %v5862_v14  ;;  %v5948_v14 = vld [vmem:[%s7119_s7 + $0x634] ss:$8 sps:$4 sm:$0xff]  }
 0x1d0   : > { %3400 = vmatpush1.bf16.msra.mxu0 %v5864_v15  ;;  %3842 = vmatpush1.bf16.msra.mxu1 %v5864_v15  ;;  %v5950_v15 = vld [vmem:[%s7119_s7 + $0x630] ss:$8 sps:$4 sm:$0xff]  }
 0x1d1   : > { %3401 = vmatprep.subr.bf16.mxu0 %v5865_v16  ;;  %3843 = vmatprep.subr.bf16.mxu1 %v5865_v16  ;;  %v5951_v16 = vld [vmem:[%s7119_s7 + $0x644] ss:$8 sps:$4 sm:$0xff]  }
 0x1d4   : > { %3402 = vmatpush1.bf16.msra.mxu0 %v5867_v17  ;;  %3844 = vmatpush1.bf16.msra.mxu1 %v5867_v17  ;;  %v5953_v17 = vld [vmem:[%s7119_s7 + $0x640] ss:$8 sps:$4 sm:$0xff]  }
 0x1d5   : > { %3403 = vmatprep.subr.bf16.mxu0 %v5868_v18  ;;  %3845 = vmatprep.subr.bf16.mxu1 %v5868_v18  ;;  %v5954_v18 = vld [vmem:[%s7119_s7 + $0x654] ss:$8 sps:$4 sm:$0xff]  }
 0x1d8   : > { %3404 = vmatpush1.bf16.msra.mxu0 %v5870_v19  ;;  %3846 = vmatpush1.bf16.msra.mxu1 %v5870_v19  ;;  %v5956_v19 = vld [vmem:[%s7119_s7 + $0x650] ss:$8 sps:$4 sm:$0xff]  }
 0x1d9   : > { %3405 = vmatprep.subr.bf16.mxu0 %v5871_v20  ;;  %3847 = vmatprep.subr.bf16.mxu1 %v5871_v20  ;;  %v5957_v20 = vld [vmem:[%s7119_s7 + $0x664] ss:$8 sps:$4 sm:$0xff]  }
 0x1dc   : > { %3406 = vmatpush1.bf16.msra.mxu0 %v5873_v21  ;;  %3848 = vmatpush1.bf16.msra.mxu1 %v5873_v21  ;;  %v5959_v21 = vld [vmem:[%s7119_s7 + $0x660] ss:$8 sps:$4 sm:$0xff]  }
 0x1dd   : > { %3407 = vmatprep.subr.bf16.mxu0 %v5874_v22  ;;  %3849 = vmatprep.subr.bf16.mxu1 %v5874_v22  ;;  %v5960_v22 = vld [vmem:[%s7119_s7 + $0x674] ss:$8 sps:$4 sm:$0xff]  }
 0x1e0   : > { %3408 = vmatpush1.bf16.msra.mxu0 %v5876_v23  ;;  %3850 = vmatpush1.bf16.msra.mxu1 %v5876_v23  ;;  %v5962_v23 = vld [vmem:[%s7119_s7 + $0x670] ss:$8 sps:$4 sm:$0xff]  }
 0x1e1   : > { %3409 = vmatprep.subr.bf16.mxu0 %v5877_v24  ;;  %3851 = vmatprep.subr.bf16.mxu1 %v5877_v24  ;;  %v5963_v24 = vld [vmem:[%s7119_s7 + $0x684] ss:$8 sps:$4 sm:$0xff]  }
 0x1e4   : > { %3410 = vmatpush1.bf16.msra.mxu0 %v5879_v25  ;;  %3852 = vmatpush1.bf16.msra.mxu1 %v5879_v25  ;;  %v5965_v25 = vld [vmem:[%s7119_s7 + $0x680] ss:$8 sps:$4 sm:$0xff]  }
 0x1e5   : > { %3411 = vmatprep.subr.bf16.mxu0 %v5880_v26  ;;  %3853 = vmatprep.subr.bf16.mxu1 %v5880_v26  ;;  %v5966_v26 = vld [vmem:[%s7119_s7 + $0x694] ss:$8 sps:$4 sm:$0xff]  }
 0x1e8   : > { %3412 = vmatpush1.bf16.msra.mxu0 %v5882_v27  ;;  %3854 = vmatpush1.bf16.msra.mxu1 %v5882_v27  ;;  %v5968_v27 = vld [vmem:[%s7119_s7 + $0x690] ss:$8 sps:$4 sm:$0xff]  }
 0x1e9   : > { %3422 = vmatprep.subr.bf16.mxu0 %v5885_v28  ;;  %3864 = vmatprep.subr.bf16.mxu1 %v5885_v28  ;;  %v5969_v28 = vld [vmem:[%s7119_s7 + $0x6a4] ss:$8 sps:$4 sm:$0xff]  }
 0x1eb   : > { %3414 = vmatmul.mubr.bf16.vlgmr.msra.gmra.mrb[0].mxu0 %v5073_v29  ;;  %3856 = vmatmul.mubr.bf16.vlgmr.msra.gmra.mrb[0].mxu1 %v5388_v30  ;;  %v5971_v29 = vld [vmem:[%s7119_s7 + $0x6a0] ss:$8 sps:$4 sm:$0xff]   ;;  %v5972_v30 = vld [vmem:[%s7119_s7 + $0x6b4] ss:$8 sps:$4 sm:$0xff]  }
 0x1ec   : > { %3423 = vmatpush1.bf16.msra.mxu0 %v5889_v33  ;;  %3865 = vmatpush1.bf16.msra.mxu1 %v5889_v33  ;;  %v5977_v33 = vld [vmem:[%s7119_s7 + $0x6c0] ss:$8 sps:$4 sm:$0xff]  }
 0x1ed   : > { %3424 = vmatprep.subr.bf16.mxu0 %v5890_v34  ;;  %3866 = vmatprep.subr.bf16.mxu1 %v5890_v34  ;;  %v5978_v34 = vld [vmem:[%s7119_s7 + $0x6d4] ss:$8 sps:$4 sm:$0xff]  }
 0x1ee   : > { %3454 = vmatprep.mubr.bf16.mxu0 %v5076_v35  ;;  %3896 = vmatprep.mubr.bf16.mxu1 %v5391_v36  ;;  %v5980_v35 = vld [vmem:[%s7119_s7 + $0x6d0] ss:$8 sps:$4 sm:$0xff]   ;;  %v5981_v36 = vld [vmem:[%s7119_s7 + $0x6e4] ss:$8 sps:$4 sm:$0xff]  }
 0x1f0   : > { %3425 = vmatpush1.bf16.msra.mxu0 %v5892_v37  ;;  %3867 = vmatpush1.bf16.msra.mxu1 %v5892_v37  ;;  %v5983_v37 = vld [vmem:[%s7119_s7 + $0x6e0] ss:$8 sps:$4 sm:$0xff]  }
 0x1f1   : > { %3426 = vmatprep.subr.bf16.mxu0 %v5893_v38  ;;  %3868 = vmatprep.subr.bf16.mxu1 %v5893_v38  ;;  %v5984_v38 = vld [vmem:[%s7119_s7 + $0x6f4] ss:$8 sps:$4 sm:$0xff]  }
 0x1f4   : > { %3427 = vmatpush1.bf16.msra.mxu0 %v5895_v39  ;;  %3869 = vmatpush1.bf16.msra.mxu1 %v5895_v39  ;;  %v5986_v39 = vld [vmem:[%s7119_s7 + $0x6f0] ss:$8 sps:$4 sm:$0xff]  }
 0x1f5   : > { %3428 = vmatprep.subr.bf16.mxu0 %v5896_v40  ;;  %3870 = vmatprep.subr.bf16.mxu1 %v5896_v40  ;;  %v5989_v40 = vld [vmem:[%s7119_s7 + $0x704] ss:$8 sps:$4 sm:$0xff]  }
 0x1f8   : > { %3429 = vmatpush1.bf16.msra.mxu0 %v5898_v41  ;;  %3871 = vmatpush1.bf16.msra.mxu1 %v5898_v41  ;;  %v5077_v41 = vcombine.low %v7411_v5, %v7411_v5  ;;  %v6026_v5 = vld [vmem:[%s7119_s7 + $0x7b0] ss:$8 sps:$4 sm:$0xff]  }
 0x1f9   : > { %3430 = vmatprep.subr.bf16.mxu0 %v5899_v42  ;;  %3872 = vmatprep.subr.bf16.mxu1 %v5899_v42  ;;  %v5392_v42 = vcombine.low %v7416_v6, %v7416_v6  ;;  %v6027_v6 = vld [vmem:[%s7119_s7 + $0x7c4] ss:$8 sps:$4 sm:$0xff]  }
 0x1fc   : > { %3431 = vmatpush1.bf16.msra.mxu0 %v5901_v43  ;;  %3873 = vmatpush1.bf16.msra.mxu1 %v5901_v43  ;;  %v7461_v43 = vld [vmem:[%s8047_s0 + $0x38] sm:$0xff] }
 0x1fd   : > { %3432 = vmatprep.subr.bf16.mxu0 %v5902_v44  ;;  %3874 = vmatprep.subr.bf16.mxu1 %v5902_v44  ;;  %v7466_v44 = vld [vmem:[%s8047_s0 + $0x80] sm:$0xff] }
 0x200   : > { %3433 = vmatpush1.bf16.msra.mxu0 %v5904_v45  ;;  %3875 = vmatpush1.bf16.msra.mxu1 %v5904_v45  ;;  %v5993_v45 = vld [vmem:[%s7119_s7 + $0x700] ss:$8 sps:$4 sm:$0xff]  }
 0x201   : > { %3434 = vmatprep.subr.bf16.mxu0 %v5905_v46  ;;  %3876 = vmatprep.subr.bf16.mxu1 %v5905_v46  ;;  %v5994_v46 = vld [vmem:[%s7119_s7 + $0x714] ss:$8 sps:$4 sm:$0xff]  }
 0x204   : > { %3435 = vmatpush1.bf16.msra.mxu0 %v5907_v47  ;;  %3877 = vmatpush1.bf16.msra.mxu1 %v5907_v47  ;;  %v5080_v47 = vcombine.high %v7461_v43, %v7461_v43 }
 0x205   : > { %3436 = vmatprep.subr.bf16.mxu0 %v5908_v48  ;;  %3878 = vmatprep.subr.bf16.mxu1 %v5908_v48  ;;  %v5395_v48 = vcombine.high %v7466_v44, %v7466_v44 }
 0x208   : > { %3437 = vmatpush1.bf16.msra.mxu0 %v5910_v49  ;;  %3879 = vmatpush1.bf16.msra.mxu1 %v5910_v49  ;;  %v5996_v49 = vld [vmem:[%s7119_s7 + $0x710] ss:$8 sps:$4 sm:$0xff]  }
 0x209   : > { %3438 = vmatprep.subr.bf16.mxu0 %v5911_v50  ;;  %3880 = vmatprep.subr.bf16.mxu1 %v5911_v50  ;;  %v5997_v50 = vld [vmem:[%s7119_s7 + $0x724] ss:$8 sps:$4 sm:$0xff]  }
 0x20c   : > { %3439 = vmatpush1.bf16.msra.mxu0 %v5913_v51  ;;  %3881 = vmatpush1.bf16.msra.mxu1 %v5913_v51  ;;  %v5999_v51 = vld [vmem:[%s7119_s7 + $0x720] ss:$8 sps:$4 sm:$0xff]  }
 0x20d   : > { %3440 = vmatprep.subr.bf16.mxu0 %v5914_v52  ;;  %3882 = vmatprep.subr.bf16.mxu1 %v5914_v52  ;;  %v6000_v52 = vld [vmem:[%s7119_s7 + $0x734] ss:$8 sps:$4 sm:$0xff]  }
 0x210   : > { %3441 = vmatpush1.bf16.msra.mxu0 %v5916_v53  ;;  %3883 = vmatpush1.bf16.msra.mxu1 %v5916_v53  ;;  %v6002_v53 = vld [vmem:[%s7119_s7 + $0x730] ss:$8 sps:$4 sm:$0xff]  }
 0x211   : > { %3442 = vmatprep.subr.bf16.mxu0 %v5917_v54  ;;  %3884 = vmatprep.subr.bf16.mxu1 %v5917_v54  ;;  %v6003_v54 = vld [vmem:[%s7119_s7 + $0x744] ss:$8 sps:$4 sm:$0xff]  }
 0x214   : > { %3443 = vmatpush1.bf16.msra.mxu0 %v5919_v55  ;;  %3885 = vmatpush1.bf16.msra.mxu1 %v5919_v55  ;;  %v6005_v55 = vld [vmem:[%s7119_s7 + $0x740] ss:$8 sps:$4 sm:$0xff]  }
 0x215   : > { %3444 = vmatprep.subr.bf16.mxu0 %v5920_v56  ;;  %3886 = vmatprep.subr.bf16.mxu1 %v5920_v56  ;;  %v6006_v56 = vld [vmem:[%s7119_s7 + $0x754] ss:$8 sps:$4 sm:$0xff]  }
 0x218   : > { %3445 = vmatpush1.bf16.msra.mxu0 %v5922_v57  ;;  %3887 = vmatpush1.bf16.msra.mxu1 %v5922_v57  ;;  %v6008_v57 = vld [vmem:[%s7119_s7 + $0x750] ss:$8 sps:$4 sm:$0xff]  }
 0x219   : > { %3446 = vmatprep.subr.bf16.mxu0 %v5923_v58  ;;  %3888 = vmatprep.subr.bf16.mxu1 %v5923_v58  ;;  %v6009_v58 = vld [vmem:[%s7119_s7 + $0x764] ss:$8 sps:$4 sm:$0xff]  }
 0x21c   : > { %3447 = vmatpush1.bf16.msra.mxu0 %v5925_v59  ;;  %3889 = vmatpush1.bf16.msra.mxu1 %v5925_v59  ;;  %v6011_v59 = vld [vmem:[%s7119_s7 + $0x760] ss:$8 sps:$4 sm:$0xff]  }
 0x21d   : > { %3448 = vmatprep.subr.bf16.mxu0 %v5926_v60  ;;  %3890 = vmatprep.subr.bf16.mxu1 %v5926_v60  ;;  %v6012_v60 = vld [vmem:[%s7119_s7 + $0x774] ss:$8 sps:$4 sm:$0xff]  }
 0x220   : > { %3449 = vmatpush1.bf16.msra.mxu0 %v5928_v61  ;;  %3891 = vmatpush1.bf16.msra.mxu1 %v5928_v61  ;;  %v6014_v61 = vld [vmem:[%s7119_s7 + $0x770] ss:$8 sps:$4 sm:$0xff]  }
 0x221   : > { %3450 = vmatprep.subr.bf16.mxu0 %v5929_v62  ;;  %3892 = vmatprep.subr.bf16.mxu1 %v5929_v62  ;;  %v6015_v62 = vld [vmem:[%s7119_s7 + $0x784] ss:$8 sps:$4 sm:$0xff]  }
 0x224   : > { %3451 = vmatpush1.bf16.msra.mxu0 %v5931_v63  ;;  %3893 = vmatpush1.bf16.msra.mxu1 %v5931_v63  ;;  %v6017_v63 = vld [vmem:[%s7119_s7 + $0x780] ss:$8 sps:$4 sm:$0xff]  }
 0x225   : > { %3452 = vmatprep.subr.bf16.mxu0 %v5932_v0  ;;  %3894 = vmatprep.subr.bf16.mxu1 %v5932_v0  ;;  %v6018_v0 = vld [vmem:[%s7119_s7 + $0x794] ss:$8 sps:$4 sm:$0xff]  }
 0x228   : > { %3453 = vmatpush1.bf16.msra.mxu0 %v5934_v1  ;;  %3895 = vmatpush1.bf16.msra.mxu1 %v5934_v1  ;;  %v6020_v1 = vld [vmem:[%s7119_s7 + $0x790] ss:$8 sps:$4 sm:$0xff]  }
 0x229   : > { %3463 = vmatprep.subr.bf16.mxu0 %v5937_v2  ;;  %3905 = vmatprep.subr.bf16.mxu1 %v5937_v2  ;;  %v6021_v2 = vld [vmem:[%s7119_s7 + $0x7a4] ss:$8 sps:$4 sm:$0xff]  }
 0x22b   : > { %3455 = vmatmul.mubr.bf16.vlgmr.msra.gmra.mrb[0].mxu0 %v5075_v3  ;;  %3897 = vmatmul.mubr.bf16.vlgmr.msra.gmra.mrb[0].mxu1 %v5390_v4  ;;  %v6023_v3 = vld [vmem:[%s7119_s7 + $0x7a0] ss:$8 sps:$4 sm:$0xff]   ;;  %v6024_v4 = vld [vmem:[%s7119_s7 + $0x7b4] ss:$8 sps:$4 sm:$0xff]  }
 0x22c   : > { %3464 = vmatpush1.bf16.msra.mxu0 %v5941_v7  ;;  %3906 = vmatpush1.bf16.msra.mxu1 %v5941_v7  ;;  %v6029_v7 = vld [vmem:[%s7119_s7 + $0x7c0] ss:$8 sps:$4 sm:$0xff]  }
 0x22d   : > { %3465 = vmatprep.subr.bf16.mxu0 %v5942_v8  ;;  %3907 = vmatprep.subr.bf16.mxu1 %v5942_v8  ;;  %v6030_v8 = vld [vmem:[%s7119_s7 + $0x7d4] ss:$8 sps:$4 sm:$0xff]  }
 0x22e   : > { %3495 = vmatprep.mubr.bf16.mxu0 %v5078_v9  ;;  %3937 = vmatprep.mubr.bf16.mxu1 %v5393_v10  ;;  %v6032_v9 = vld [vmem:[%s7119_s7 + $0x7d0] ss:$8 sps:$4 sm:$0xff]   ;;  %v6033_v10 = vld [vmem:[%s7119_s7 + $0x7e4] ss:$8 sps:$4 sm:$0xff]  }
 0x230   : > { %3466 = vmatpush1.bf16.msra.mxu0 %v5944_v11  ;;  %3908 = vmatpush1.bf16.msra.mxu1 %v5944_v11  ;;  %v6035_v11 = vld [vmem:[%s7119_s7 + $0x7e0] ss:$8 sps:$4 sm:$0xff]  }
 0x231   : > { %3467 = vmatprep.subr.bf16.mxu0 %v5945_v12  ;;  %3909 = vmatprep.subr.bf16.mxu1 %v5945_v12  ;;  %v6036_v12 = vld [vmem:[%s7119_s7 + $0x7f4] ss:$8 sps:$4 sm:$0xff]  }
 0x234   : > { %3468 = vmatpush1.bf16.msra.mxu0 %v5947_v13  ;;  %3910 = vmatpush1.bf16.msra.mxu1 %v5947_v13  ;;  %v6038_v13 = vld [vmem:[%s7119_s7 + $0x7f0] ss:$8 sps:$4 sm:$0xff]  }
 0x235   : > { %3469 = vmatprep.subr.bf16.mxu0 %v5948_v14  ;;  %3911 = vmatprep.subr.bf16.mxu1 %v5948_v14  ;;  %v6041_v14 = vld [vmem:[%s7119_s7 + $0x804] ss:$8 sps:$4 sm:$0xff]  }
 0x238   : > { %3470 = vmatpush1.bf16.msra.mxu0 %v5950_v15  ;;  %3912 = vmatpush1.bf16.msra.mxu1 %v5950_v15  ;;  %v5079_v15 = vcombine.low %v7461_v43, %v7461_v43  ;;  %v6078_v43 = vld [vmem:[%s7119_s7 + $0x8b0] ss:$8 sps:$4 sm:$0xff]  }
 0x239   : > { %3471 = vmatprep.subr.bf16.mxu0 %v5951_v16  ;;  %3913 = vmatprep.subr.bf16.mxu1 %v5951_v16  ;;  %v5394_v16 = vcombine.low %v7466_v44, %v7466_v44  ;;  %v6079_v44 = vld [vmem:[%s7119_s7 + $0x8c4] ss:$8 sps:$4 sm:$0xff]  }
 0x23c   : > { %3472 = vmatpush1.bf16.msra.mxu0 %v5953_v17  ;;  %3914 = vmatpush1.bf16.msra.mxu1 %v5953_v17  ;;  %v7511_v17 = vld [vmem:[%s8047_s0 + $0x40] sm:$0xff] }
 0x23d   : > { %3473 = vmatprep.subr.bf16.mxu0 %v5954_v18  ;;  %3915 = vmatprep.subr.bf16.mxu1 %v5954_v18  ;;  %v7516_v18 = vld [vmem:[%s8047_s0 + $0x88] sm:$0xff] }
 0x240   : > { %3474 = vmatpush1.bf16.msra.mxu0 %v5956_v19  ;;  %3916 = vmatpush1.bf16.msra.mxu1 %v5956_v19  ;;  %v6045_v19 = vld [vmem:[%s7119_s7 + $0x800] ss:$8 sps:$4 sm:$0xff]  }
 0x241   : > { %3475 = vmatprep.subr.bf16.mxu0 %v5957_v20  ;;  %3917 = vmatprep.subr.bf16.mxu1 %v5957_v20  ;;  %v6046_v20 = vld [vmem:[%s7119_s7 + $0x814] ss:$8 sps:$4 sm:$0xff]  }
 0x244   : > { %3476 = vmatpush1.bf16.msra.mxu0 %v5959_v21  ;;  %3918 = vmatpush1.bf16.msra.mxu1 %v5959_v21  ;;  %v5082_v21 = vcombine.high %v7511_v17, %v7511_v17 }
 0x245   : > { %3477 = vmatprep.subr.bf16.mxu0 %v5960_v22  ;;  %3919 = vmatprep.subr.bf16.mxu1 %v5960_v22  ;;  %v5397_v22 = vcombine.high %v7516_v18, %v7516_v18 }
 0x248   : > { %3478 = vmatpush1.bf16.msra.mxu0 %v5962_v23  ;;  %3920 = vmatpush1.bf16.msra.mxu1 %v5962_v23  ;;  %v6048_v23 = vld [vmem:[%s7119_s7 + $0x810] ss:$8 sps:$4 sm:$0xff]  }
 0x249   : > { %3479 = vmatprep.subr.bf16.mxu0 %v5963_v24  ;;  %3921 = vmatprep.subr.bf16.mxu1 %v5963_v24  ;;  %v6049_v24 = vld [vmem:[%s7119_s7 + $0x824] ss:$8 sps:$4 sm:$0xff]  }
 0x24c   : > { %3480 = vmatpush1.bf16.msra.mxu0 %v5965_v25  ;;  %3922 = vmatpush1.bf16.msra.mxu1 %v5965_v25  ;;  %v6051_v25 = vld [vmem:[%s7119_s7 + $0x820] ss:$8 sps:$4 sm:$0xff]  }
 0x24d   : > { %3481 = vmatprep.subr.bf16.mxu0 %v5966_v26  ;;  %3923 = vmatprep.subr.bf16.mxu1 %v5966_v26  ;;  %v6052_v26 = vld [vmem:[%s7119_s7 + $0x834] ss:$8 sps:$4 sm:$0xff]  }
 0x250   : > { %3482 = vmatpush1.bf16.msra.mxu0 %v5968_v27  ;;  %3924 = vmatpush1.bf16.msra.mxu1 %v5968_v27  ;;  %v6054_v27 = vld [vmem:[%s7119_s7 + $0x830] ss:$8 sps:$4 sm:$0xff]  }
 0x251   : > { %3483 = vmatprep.subr.bf16.mxu0 %v5969_v28  ;;  %3925 = vmatprep.subr.bf16.mxu1 %v5969_v28  ;;  %v6055_v28 = vld [vmem:[%s7119_s7 + $0x844] ss:$8 sps:$4 sm:$0xff]  }
 0x254   : > { %3484 = vmatpush1.bf16.msra.mxu0 %v5971_v29  ;;  %3926 = vmatpush1.bf16.msra.mxu1 %v5971_v29  ;;  %v6057_v29 = vld [vmem:[%s7119_s7 + $0x840] ss:$8 sps:$4 sm:$0xff]  }
 0x255   : > { %3485 = vmatprep.subr.bf16.mxu0 %v5972_v30  ;;  %3927 = vmatprep.subr.bf16.mxu1 %v5972_v30  ;;  %v6058_v30 = vld [vmem:[%s7119_s7 + $0x854] ss:$8 sps:$4 sm:$0xff]  }
 0x258   : > { %3486 = vmatpush1.bf16.msra.mxu0 %v5974_v31  ;;  %3928 = vmatpush1.bf16.msra.mxu1 %v5974_v31  ;;  %v6060_v31 = vld [vmem:[%s7119_s7 + $0x850] ss:$8 sps:$4 sm:$0xff]  }
 0x259   : > { %3487 = vmatprep.subr.bf16.mxu0 %v5975_v32  ;;  %3929 = vmatprep.subr.bf16.mxu1 %v5975_v32  ;;  %v6061_v32 = vld [vmem:[%s7119_s7 + $0x864] ss:$8 sps:$4 sm:$0xff]  }
 0x25c   : > { %3488 = vmatpush1.bf16.msra.mxu0 %v5977_v33  ;;  %3930 = vmatpush1.bf16.msra.mxu1 %v5977_v33  ;;  %v6063_v33 = vld [vmem:[%s7119_s7 + $0x860] ss:$8 sps:$4 sm:$0xff]  }
 0x25d   : > { %3489 = vmatprep.subr.bf16.mxu0 %v5978_v34  ;;  %3931 = vmatprep.subr.bf16.mxu1 %v5978_v34  ;;  %v6064_v34 = vld [vmem:[%s7119_s7 + $0x874] ss:$8 sps:$4 sm:$0xff]  }
 0x260   : > { %3490 = vmatpush1.bf16.msra.mxu0 %v5980_v35  ;;  %3932 = vmatpush1.bf16.msra.mxu1 %v5980_v35  ;;  %v6066_v35 = vld [vmem:[%s7119_s7 + $0x870] ss:$8 sps:$4 sm:$0xff]  }
 0x261   : > { %3491 = vmatprep.subr.bf16.mxu0 %v5981_v36  ;;  %3933 = vmatprep.subr.bf16.mxu1 %v5981_v36  ;;  %v6067_v36 = vld [vmem:[%s7119_s7 + $0x884] ss:$8 sps:$4 sm:$0xff]  }
 0x264   : > { %3492 = vmatpush1.bf16.msra.mxu0 %v5983_v37  ;;  %3934 = vmatpush1.bf16.msra.mxu1 %v5983_v37  ;;  %v6069_v37 = vld [vmem:[%s7119_s7 + $0x880] ss:$8 sps:$4 sm:$0xff]  }
 0x265   : > { %3493 = vmatprep.subr.bf16.mxu0 %v5984_v38  ;;  %3935 = vmatprep.subr.bf16.mxu1 %v5984_v38  ;;  %v6070_v38 = vld [vmem:[%s7119_s7 + $0x894] ss:$8 sps:$4 sm:$0xff]  }
 0x268   : > { %3494 = vmatpush1.bf16.msra.mxu0 %v5986_v39  ;;  %3936 = vmatpush1.bf16.msra.mxu1 %v5986_v39  ;;  %v6072_v39 = vld [vmem:[%s7119_s7 + $0x890] ss:$8 sps:$4 sm:$0xff]  }
 0x269   : > { %3504 = vmatprep.subr.bf16.mxu0 %v5989_v40  ;;  %3946 = vmatprep.subr.bf16.mxu1 %v5989_v40  ;;  %v6073_v40 = vld [vmem:[%s7119_s7 + $0x8a4] ss:$8 sps:$4 sm:$0xff]  }
 0x26b   : > { %3496 = vmatmul.mubr.bf16.vlgmr.msra.gmra.mrb[0].mxu0 %v5077_v41  ;;  %3938 = vmatmul.mubr.bf16.vlgmr.msra.gmra.mrb[0].mxu1 %v5392_v42  ;;  %v6075_v41 = vld [vmem:[%s7119_s7 + $0x8a0] ss:$8 sps:$4 sm:$0xff]   ;;  %v6076_v42 = vld [vmem:[%s7119_s7 + $0x8b4] ss:$8 sps:$4 sm:$0xff]  }
 0x26c   : > { %3505 = vmatpush1.bf16.msra.mxu0 %v5993_v45  ;;  %3947 = vmatpush1.bf16.msra.mxu1 %v5993_v45  ;;  %v6081_v45 = vld [vmem:[%s7119_s7 + $0x8c0] ss:$8 sps:$4 sm:$0xff]  }
 0x26d   : > { %3506 = vmatprep.subr.bf16.mxu0 %v5994_v46  ;;  %3948 = vmatprep.subr.bf16.mxu1 %v5994_v46  ;;  %v6082_v46 = vld [vmem:[%s7119_s7 + $0x8d4] ss:$8 sps:$4 sm:$0xff]  }
 0x26e   : > { %3536 = vmatprep.mubr.bf16.mxu0 %v5080_v47  ;;  %3978 = vmatprep.mubr.bf16.mxu1 %v5395_v48  ;;  %v6084_v47 = vld [vmem:[%s7119_s7 + $0x8d0] ss:$8 sps:$4 sm:$0xff]   ;;  %v6085_v48 = vld [vmem:[%s7119_s7 + $0x8e4] ss:$8 sps:$4 sm:$0xff]  }
 0x270   : > { %3507 = vmatpush1.bf16.msra.mxu0 %v5996_v49  ;;  %3949 = vmatpush1.bf16.msra.mxu1 %v5996_v49  ;;  %v6087_v49 = vld [vmem:[%s7119_s7 + $0x8e0] ss:$8 sps:$4 sm:$0xff]  }
 0x271   : > { %3508 = vmatprep.subr.bf16.mxu0 %v5997_v50  ;;  %3950 = vmatprep.subr.bf16.mxu1 %v5997_v50  ;;  %v6088_v50 = vld [vmem:[%s7119_s7 + $0x8f4] ss:$8 sps:$4 sm:$0xff]  }
 0x274   : > { %3509 = vmatpush1.bf16.msra.mxu0 %v5999_v51  ;;  %3951 = vmatpush1.bf16.msra.mxu1 %v5999_v51  ;;  %v6090_v51 = vld [vmem:[%s7119_s7 + $0x8f0] ss:$8 sps:$4 sm:$0xff]  }
 0x275   : > { %3510 = vmatprep.subr.bf16.mxu0 %v6000_v52  ;;  %3952 = vmatprep.subr.bf16.mxu1 %v6000_v52  ;;  %v5081_v52 = vcombine.low %v7511_v17, %v7511_v17  ;;  %v6154_v17 = vld [vmem:[%s7119_s7 + $0xb0] ss:$8 sps:$4 sm:$0xff]  }
 0x278   : > { %3511 = vmatpush1.bf16.msra.mxu0 %v6002_v53  ;;  %3953 = vmatpush1.bf16.msra.mxu1 %v6002_v53  ;;  %v5396_v53 = vcombine.low %v7516_v18, %v7516_v18  ;;  %v6155_v18 = vld [vmem:[%s7119_s7 + $0xc4] ss:$8 sps:$4 sm:$0xff]  }
 0x279   : > { %3512 = vmatprep.subr.bf16.mxu0 %v6003_v54  ;;  %3954 = vmatprep.subr.bf16.mxu1 %v6003_v54  ;;  %v7560_v54 = vld [vmem:[%s8047_s0 + $0x90] sm:$0xff] }
 0x27c   : > { %3513 = vmatpush1.bf16.msra.mxu0 %v6005_v55  ;;  %3955 = vmatpush1.bf16.msra.mxu1 %v6005_v55  ;;  %v7565_v55 = vld [vmem:[%s8047_s0 + $0xd8] sm:$0xff] }
 0x27d   : > { %3514 = vmatprep.subr.bf16.mxu0 %v6006_v56  ;;  %3956 = vmatprep.subr.bf16.mxu1 %v6006_v56  ;;  %v6131_v56 = vld [vmem:[%s7119_s7 + $0x4] ss:$8 sps:$4 sm:$0xff]  }
 0x280   : > { %3515 = vmatpush1.bf16.msra.mxu0 %v6008_v57  ;;  %3957 = vmatpush1.bf16.msra.mxu1 %v6008_v57  ;;  %v5408_v57 = vcombine.high %v7560_v54, %v7560_v54 }
 0x281   : > { %3516 = vmatprep.subr.bf16.mxu0 %v6009_v58  ;;  %3958 = vmatprep.subr.bf16.mxu1 %v6009_v58  ;;  %v5435_v58 = vcombine.high %v7565_v55, %v7565_v55 }
 0x284   : > { %3517 = vmatpush1.bf16.msra.mxu0 %v6011_v59  ;;  %3959 = vmatpush1.bf16.msra.mxu1 %v6011_v59  ;;  %v6132_v59 = vld [vmem:[%s7119_s7] ss:$8 sps:$4 sm:$0xff]  }
 0x285   : > { %3518 = vmatprep.subr.bf16.mxu0 %v6012_v60  ;;  %3960 = vmatprep.subr.bf16.mxu1 %v6012_v60  ;;  %v6133_v60 = vld [vmem:[%s7119_s7 + $0x14] ss:$8 sps:$4 sm:$0xff]  }
 0x288   : > { %3519 = vmatpush1.bf16.msra.mxu0 %v6014_v61  ;;  %3961 = vmatpush1.bf16.msra.mxu1 %v6014_v61  ;;  %v6134_v61 = vld [vmem:[%s7119_s7 + $0x10] ss:$8 sps:$4 sm:$0xff]  }
 0x289   : > { %3520 = vmatprep.subr.bf16.mxu0 %v6015_v62  ;;  %3962 = vmatprep.subr.bf16.mxu1 %v6015_v62  ;;  %v6135_v62 = vld [vmem:[%s7119_s7 + $0x24] ss:$8 sps:$4 sm:$0xff]  }
 0x28c   : > { %3521 = vmatpush1.bf16.msra.mxu0 %v6017_v63  ;;  %3963 = vmatpush1.bf16.msra.mxu1 %v6017_v63  ;;  %v6136_v63 = vld [vmem:[%s7119_s7 + $0x20] ss:$8 sps:$4 sm:$0xff]  }
 0x28d   : > { %3522 = vmatprep.subr.bf16.mxu0 %v6018_v0  ;;  %3964 = vmatprep.subr.bf16.mxu1 %v6018_v0  ;;  %v6137_v0 = vld [vmem:[%s7119_s7 + $0x34] ss:$8 sps:$4 sm:$0xff]  }
 0x290   : > { %3523 = vmatpush1.bf16.msra.mxu0 %v6020_v1  ;;  %3965 = vmatpush1.bf16.msra.mxu1 %v6020_v1  ;;  %v6138_v1 = vld [vmem:[%s7119_s7 + $0x30] ss:$8 sps:$4 sm:$0xff]  }
 0x291   : > { %3524 = vmatprep.subr.bf16.mxu0 %v6021_v2  ;;  %3966 = vmatprep.subr.bf16.mxu1 %v6021_v2  ;;  %v6139_v2 = vld [vmem:[%s7119_s7 + $0x44] ss:$8 sps:$4 sm:$0xff]  }
 0x294   : > { %3525 = vmatpush1.bf16.msra.mxu0 %v6023_v3  ;;  %3967 = vmatpush1.bf16.msra.mxu1 %v6023_v3  ;;  %v6140_v3 = vld [vmem:[%s7119_s7 + $0x40] ss:$8 sps:$4 sm:$0xff]  }
 0x295   : > { %3526 = vmatprep.subr.bf16.mxu0 %v6024_v4  ;;  %3968 = vmatprep.subr.bf16.mxu1 %v6024_v4  ;;  %v6141_v4 = vld [vmem:[%s7119_s7 + $0x54] ss:$8 sps:$4 sm:$0xff]  }
 0x298   : > { %3527 = vmatpush1.bf16.msra.mxu0 %v6026_v5  ;;  %3969 = vmatpush1.bf16.msra.mxu1 %v6026_v5  ;;  %v6142_v5 = vld [vmem:[%s7119_s7 + $0x50] ss:$8 sps:$4 sm:$0xff]  }
 0x299   : > { %3528 = vmatprep.subr.bf16.mxu0 %v6027_v6  ;;  %3970 = vmatprep.subr.bf16.mxu1 %v6027_v6  ;;  %v6143_v6 = vld [vmem:[%s7119_s7 + $0x64] ss:$8 sps:$4 sm:$0xff]  }
 0x29c   : > { %3529 = vmatpush1.bf16.msra.mxu0 %v6029_v7  ;;  %3971 = vmatpush1.bf16.msra.mxu1 %v6029_v7  ;;  %v6144_v7 = vld [vmem:[%s7119_s7 + $0x60] ss:$8 sps:$4 sm:$0xff]  }
 0x29d   : > { %3530 = vmatprep.subr.bf16.mxu0 %v6030_v8  ;;  %3972 = vmatprep.subr.bf16.mxu1 %v6030_v8  ;;  %v6145_v8 = vld [vmem:[%s7119_s7 + $0x74] ss:$8 sps:$4 sm:$0xff]  }
 0x2a0   : > { %3531 = vmatpush1.bf16.msra.mxu0 %v6032_v9  ;;  %3973 = vmatpush1.bf16.msra.mxu1 %v6032_v9  ;;  %v6146_v9 = vld [vmem:[%s7119_s7 + $0x70] ss:$8 sps:$4 sm:$0xff]  }
 0x2a1   : > { %3532 = vmatprep.subr.bf16.mxu0 %v6033_v10  ;;  %3974 = vmatprep.subr.bf16.mxu1 %v6033_v10  ;;  %v6147_v10 = vld [vmem:[%s7119_s7 + $0x84] ss:$8 sps:$4 sm:$0xff]  }
 0x2a4   : > { %3533 = vmatpush1.bf16.msra.mxu0 %v6035_v11  ;;  %3975 = vmatpush1.bf16.msra.mxu1 %v6035_v11  ;;  %v6148_v11 = vld [vmem:[%s7119_s7 + $0x80] ss:$8 sps:$4 sm:$0xff]  }
 0x2a5   : > { %3534 = vmatprep.subr.bf16.mxu0 %v6036_v12  ;;  %3976 = vmatprep.subr.bf16.mxu1 %v6036_v12  ;;  %v6149_v12 = vld [vmem:[%s7119_s7 + $0x94] ss:$8 sps:$4 sm:$0xff]  }
 0x2a8   : > { %3535 = vmatpush1.bf16.msra.mxu0 %v6038_v13  ;;  %3977 = vmatpush1.bf16.msra.mxu1 %v6038_v13  ;;  %v6150_v13 = vld [vmem:[%s7119_s7 + $0x90] ss:$8 sps:$4 sm:$0xff]  }
 0x2a9   : > { %3545 = vmatprep.subr.bf16.mxu0 %v6041_v14  ;;  %3987 = vmatprep.subr.bf16.mxu1 %v6041_v14  ;;  %v6151_v14 = vld [vmem:[%s7119_s7 + $0xa4] ss:$8 sps:$4 sm:$0xff]  }
 0x2ab   : > { %3537 = vmatmul.mubr.bf16.vlgmr.msra.gmra.mrb[0].mxu0 %v5079_v15  ;;  %3979 = vmatmul.mubr.bf16.vlgmr.msra.gmra.mrb[0].mxu1 %v5394_v16  ;;  %v6152_v15 = vld [vmem:[%s7119_s7 + $0xa0] ss:$8 sps:$4 sm:$0xff]   ;;  %v6153_v16 = vld [vmem:[%s7119_s7 + $0xb4] ss:$8 sps:$4 sm:$0xff]  }
 0x2ac   : > { %3546 = vmatpush1.bf16.msra.mxu0 %v6045_v19  ;;  %3988 = vmatpush1.bf16.msra.mxu1 %v6045_v19  ;;  %v6156_v19 = vld [vmem:[%s7119_s7 + $0xc0] ss:$8 sps:$4 sm:$0xff]  }
 0x2ad   : > { %3547 = vmatprep.subr.bf16.mxu0 %v6046_v20  ;;  %3989 = vmatprep.subr.bf16.mxu1 %v6046_v20  ;;  %v6157_v20 = vld [vmem:[%s7119_s7 + $0xd4] ss:$8 sps:$4 sm:$0xff]  }
 0x2ae   : > { %3577 = vmatprep.mubr.bf16.mxu0 %v5082_v21  ;;  %4019 = vmatprep.mubr.bf16.mxu1 %v5397_v22  ;;  %v6158_v21 = vld [vmem:[%s7119_s7 + $0xd0] ss:$8 sps:$4 sm:$0xff]   ;;  %v6159_v22 = vld [vmem:[%s7119_s7 + $0xe4] ss:$8 sps:$4 sm:$0xff]  }
 0x2b0   : > { %3548 = vmatpush1.bf16.msra.mxu0 %v6048_v23  ;;  %3990 = vmatpush1.bf16.msra.mxu1 %v6048_v23  ;;  %v6160_v23 = vld [vmem:[%s7119_s7 + $0xe0] ss:$8 sps:$4 sm:$0xff]  }
 0x2b1   : > { %3549 = vmatprep.subr.bf16.mxu0 %v6049_v24  ;;  %3991 = vmatprep.subr.bf16.mxu1 %v6049_v24  ;;  %v6161_v24 = vld [vmem:[%s7119_s7 + $0xf4] ss:$8 sps:$4 sm:$0xff]  }
 0x2b4   : > { %3550 = vmatpush1.bf16.msra.mxu0 %v6051_v25  ;;  %3992 = vmatpush1.bf16.msra.mxu1 %v6051_v25  ;;  %v5407_v25 = vcombine.low %v7560_v54, %v7560_v54  ;;  %v6185_v54 = vld [vmem:[%s7119_s7 + $0x1b4] ss:$8 sps:$4 sm:$0xff]  }
 0x2b5   : > { %3551 = vmatprep.subr.bf16.mxu0 %v6052_v26  ;;  %3993 = vmatprep.subr.bf16.mxu1 %v6052_v26  ;;  %v5434_v26 = vcombine.low %v7565_v55, %v7565_v55  ;;  %v6186_v55 = vld [vmem:[%s7119_s7 + $0x1b0] ss:$8 sps:$4 sm:$0xff]  }
 0x2b8   : > { %3552 = vmatpush1.bf16.msra.mxu0 %v6054_v27  ;;  %3994 = vmatpush1.bf16.msra.mxu1 %v6054_v27  ;;  %v7609_v27 = vld [vmem:[%s8047_s0 + $0x98] sm:$0xff] }
 0x2b9   : > { %3553 = vmatprep.subr.bf16.mxu0 %v6055_v28  ;;  %3995 = vmatprep.subr.bf16.mxu1 %v6055_v28  ;;  %v7614_v28 = vld [vmem:[%s8047_s0 + $0xe0] sm:$0xff] }
 0x2bc   : > { %3554 = vmatpush1.bf16.msra.mxu0 %v6057_v29  ;;  %3996 = vmatpush1.bf16.msra.mxu1 %v6057_v29  ;;  %v6162_v29 = vld [vmem:[%s7119_s7 + $0xf0] ss:$8 sps:$4 sm:$0xff]  }
 0x2bd   : > { %3555 = vmatprep.subr.bf16.mxu0 %v6058_v30  ;;  %3997 = vmatprep.subr.bf16.mxu1 %v6058_v30  ;;  %v6163_v30 = vld [vmem:[%s7119_s7 + $0x104] ss:$8 sps:$4 sm:$0xff]  }
 0x2c0   : > { %3556 = vmatpush1.bf16.msra.mxu0 %v6060_v31  ;;  %3998 = vmatpush1.bf16.msra.mxu1 %v6060_v31  ;;  %v5410_v31 = vcombine.high %v7609_v27, %v7609_v27 }
 0x2c1   : > { %3557 = vmatprep.subr.bf16.mxu0 %v6061_v32  ;;  %3999 = vmatprep.subr.bf16.mxu1 %v6061_v32  ;;  %v5437_v32 = vcombine.high %v7614_v28, %v7614_v28 }
 0x2c4   : > { %3558 = vmatpush1.bf16.msra.mxu0 %v6063_v33  ;;  %4000 = vmatpush1.bf16.msra.mxu1 %v6063_v33  ;;  %v6164_v33 = vld [vmem:[%s7119_s7 + $0x100] ss:$8 sps:$4 sm:$0xff]  }
 0x2c5   : > { %3559 = vmatprep.subr.bf16.mxu0 %v6064_v34  ;;  %4001 = vmatprep.subr.bf16.mxu1 %v6064_v34  ;;  %v6165_v34 = vld [vmem:[%s7119_s7 + $0x114] ss:$8 sps:$4 sm:$0xff]  }
 0x2c8   : > { %3560 = vmatpush1.bf16.msra.mxu0 %v6066_v35  ;;  %4002 = vmatpush1.bf16.msra.mxu1 %v6066_v35  ;;  %v6166_v35 = vld [vmem:[%s7119_s7 + $0x110] ss:$8 sps:$4 sm:$0xff]  }
 0x2c9   : > { %3561 = vmatprep.subr.bf16.mxu0 %v6067_v36  ;;  %4003 = vmatprep.subr.bf16.mxu1 %v6067_v36  ;;  %v6167_v36 = vld [vmem:[%s7119_s7 + $0x124] ss:$8 sps:$4 sm:$0xff]  }
 0x2cc   : > { %3562 = vmatpush1.bf16.msra.mxu0 %v6069_v37  ;;  %4004 = vmatpush1.bf16.msra.mxu1 %v6069_v37  ;;  %v6168_v37 = vld [vmem:[%s7119_s7 + $0x120] ss:$8 sps:$4 sm:$0xff]  }
 0x2cd   : > { %3563 = vmatprep.subr.bf16.mxu0 %v6070_v38  ;;  %4005 = vmatprep.subr.bf16.mxu1 %v6070_v38  ;;  %v6169_v38 = vld [vmem:[%s7119_s7 + $0x134] ss:$8 sps:$4 sm:$0xff]  }
 0x2d0   : > { %3564 = vmatpush1.bf16.msra.mxu0 %v6072_v39  ;;  %4006 = vmatpush1.bf16.msra.mxu1 %v6072_v39  ;;  %v6170_v39 = vld [vmem:[%s7119_s7 + $0x130] ss:$8 sps:$4 sm:$0xff]  }
 0x2d1   : > { %3565 = vmatprep.subr.bf16.mxu0 %v6073_v40  ;;  %4007 = vmatprep.subr.bf16.mxu1 %v6073_v40  ;;  %v6171_v40 = vld [vmem:[%s7119_s7 + $0x144] ss:$8 sps:$4 sm:$0xff]  }
 0x2d4   : > { %3566 = vmatpush1.bf16.msra.mxu0 %v6075_v41  ;;  %4008 = vmatpush1.bf16.msra.mxu1 %v6075_v41  ;;  %v6172_v41 = vld [vmem:[%s7119_s7 + $0x140] ss:$8 sps:$4 sm:$0xff]  }
 0x2d5   : > { %3567 = vmatprep.subr.bf16.mxu0 %v6076_v42  ;;  %4009 = vmatprep.subr.bf16.mxu1 %v6076_v42  ;;  %v6173_v42 = vld [vmem:[%s7119_s7 + $0x154] ss:$8 sps:$4 sm:$0xff]  }
 0x2d8   : > { %3568 = vmatpush1.bf16.msra.mxu0 %v6078_v43  ;;  %4010 = vmatpush1.bf16.msra.mxu1 %v6078_v43  ;;  %v6174_v43 = vld [vmem:[%s7119_s7 + $0x150] ss:$8 sps:$4 sm:$0xff]  }
 0x2d9   : > { %3569 = vmatprep.subr.bf16.mxu0 %v6079_v44  ;;  %4011 = vmatprep.subr.bf16.mxu1 %v6079_v44  ;;  %v6175_v44 = vld [vmem:[%s7119_s7 + $0x164] ss:$8 sps:$4 sm:$0xff]  }
 0x2dc   : > { %3570 = vmatpush1.bf16.msra.mxu0 %v6081_v45  ;;  %4012 = vmatpush1.bf16.msra.mxu1 %v6081_v45  ;;  %v6176_v45 = vld [vmem:[%s7119_s7 + $0x160] ss:$8 sps:$4 sm:$0xff]  }
 0x2dd   : > { %3571 = vmatprep.subr.bf16.mxu0 %v6082_v46  ;;  %4013 = vmatprep.subr.bf16.mxu1 %v6082_v46  ;;  %v6177_v46 = vld [vmem:[%s7119_s7 + $0x174] ss:$8 sps:$4 sm:$0xff]  }
 0x2e0   : > { %3572 = vmatpush1.bf16.msra.mxu0 %v6084_v47  ;;  %4014 = vmatpush1.bf16.msra.mxu1 %v6084_v47  ;;  %v6178_v47 = vld [vmem:[%s7119_s7 + $0x170] ss:$8 sps:$4 sm:$0xff]  }
 0x2e1   : > { %3573 = vmatprep.subr.bf16.mxu0 %v6085_v48  ;;  %4015 = vmatprep.subr.bf16.mxu1 %v6085_v48  ;;  %v6179_v48 = vld [vmem:[%s7119_s7 + $0x184] ss:$8 sps:$4 sm:$0xff]  }
 0x2e4   : > { %3574 = vmatpush1.bf16.msra.mxu0 %v6087_v49  ;;  %4016 = vmatpush1.bf16.msra.mxu1 %v6087_v49  ;;  %v6180_v49 = vld [vmem:[%s7119_s7 + $0x180] ss:$8 sps:$4 sm:$0xff]  }
 0x2e5   : > { %3575 = vmatprep.subr.bf16.mxu0 %v6088_v50  ;;  %4017 = vmatprep.subr.bf16.mxu1 %v6088_v50  ;;  %v6181_v50 = vld [vmem:[%s7119_s7 + $0x194] ss:$8 sps:$4 sm:$0xff]  }
 0x2e8   : > { %3576 = vmatpush1.bf16.msra.mxu0 %v6090_v51  ;;  %4018 = vmatpush1.bf16.msra.mxu1 %v6090_v51  ;;  %v6182_v51 = vld [vmem:[%s7119_s7 + $0x190] ss:$8 sps:$4 sm:$0xff]  }
 0x2e9   : > { %4103 = vmatprep.subr.bf16.mxu0 %v6131_v56  ;;  %4547 = vmatprep.subr.bf16.mxu1 %v6131_v56  ;;  %v6187_v56 = vld [vmem:[%s7119_s7 + $0x1c4] ss:$8 sps:$4 sm:$0xff]  }
 0x2eb   : > { %3578 = vmatmul.mubr.bf16.vlgmr.msra.gmra.mrb[0].mxu0 %v5081_v52  ;;  %4020 = vmatmul.mubr.bf16.vlgmr.msra.gmra.mrb[0].mxu1 %v5396_v53  ;;  %v6183_v52 = vld [vmem:[%s7119_s7 + $0x1a4] ss:$8 sps:$4 sm:$0xff]   ;;  %v6184_v53 = vld [vmem:[%s7119_s7 + $0x1a0] ss:$8 sps:$4 sm:$0xff]  }
 0x2ec   : > { %4104 = vmatpush1.bf16.msra.mxu0 %v6132_v59  ;;  %4548 = vmatpush1.bf16.msra.mxu1 %v6132_v59  ;;  %v6190_v59 = vld [vmem:[%s7119_s7 + $0x1d0] ss:$8 sps:$4 sm:$0xff]  }
 0x2ed   : > { %4105 = vmatprep.subr.bf16.mxu0 %v6133_v60  ;;  %4549 = vmatprep.subr.bf16.mxu1 %v6133_v60  ;;  %v6191_v60 = vld [vmem:[%s7119_s7 + $0x1e4] ss:$8 sps:$4 sm:$0xff]  }
 0x2ee   : > { %4135 = vmatprep.mubr.bf16.mxu0 %v5408_v57  ;;  %4579 = vmatprep.mubr.bf16.mxu1 %v5435_v58  ;;  %v6188_v57 = vld [vmem:[%s7119_s7 + $0x1c0] ss:$8 sps:$4 sm:$0xff]   ;;  %v6189_v58 = vld [vmem:[%s7119_s7 + $0x1d4] ss:$8 sps:$4 sm:$0xff]  }
 0x2f0   : > { %4106 = vmatpush1.bf16.msra.mxu0 %v6134_v61  ;;  %4550 = vmatpush1.bf16.msra.mxu1 %v6134_v61  ;;  %v6192_v61 = vld [vmem:[%s7119_s7 + $0x1e0] ss:$8 sps:$4 sm:$0xff]  }
 0x2f1   : > { %4107 = vmatprep.subr.bf16.mxu0 %v6135_v62  ;;  %4551 = vmatprep.subr.bf16.mxu1 %v6135_v62  ;;  %v6193_v62 = vld [vmem:[%s7119_s7 + $0x1f4] ss:$8 sps:$4 sm:$0xff]  }
 0x2f4   : > { %4108 = vmatpush1.bf16.msra.mxu0 %v6136_v63  ;;  %4552 = vmatpush1.bf16.msra.mxu1 %v6136_v63  ;;  %v5409_v63 = vcombine.low %v7609_v27, %v7609_v27  ;;  %v6216_v27 = vld [vmem:[%s7119_s7 + $0x2a0] ss:$8 sps:$4 sm:$0xff]  }
 0x2f5   : > { %4109 = vmatprep.subr.bf16.mxu0 %v6137_v0  ;;  %4553 = vmatprep.subr.bf16.mxu1 %v6137_v0  ;;  %v5436_v0 = vcombine.low %v7614_v28, %v7614_v28  ;;  %v6217_v28 = vld [vmem:[%s7119_s7 + $0x2b4] ss:$8 sps:$4 sm:$0xff]  }
 0x2f8   : > { %4110 = vmatpush1.bf16.msra.mxu0 %v6138_v1  ;;  %4554 = vmatpush1.bf16.msra.mxu1 %v6138_v1  ;;  %v7659_v1 = vld [vmem:[%s8047_s0 + $0xa0] sm:$0xff] }
 0x2f9   : > { %4111 = vmatprep.subr.bf16.mxu0 %v6139_v2  ;;  %4555 = vmatprep.subr.bf16.mxu1 %v6139_v2  ;;  %v7664_v2 = vld [vmem:[%s8047_s0 + $0xe8] sm:$0xff] }
 0x2fc   : > { %4112 = vmatpush1.bf16.msra.mxu0 %v6140_v3  ;;  %4556 = vmatpush1.bf16.msra.mxu1 %v6140_v3  ;;  %v6194_v3 = vld [vmem:[%s7119_s7 + $0x1f0] ss:$8 sps:$4 sm:$0xff]  }
 0x2fd   : > { %4113 = vmatprep.subr.bf16.mxu0 %v6141_v4  ;;  %4557 = vmatprep.subr.bf16.mxu1 %v6141_v4  ;;  %v6195_v4 = vld [vmem:[%s7119_s7 + $0x204] ss:$8 sps:$4 sm:$0xff]  }
 0x300   : > { %4114 = vmatpush1.bf16.msra.mxu0 %v6142_v5  ;;  %4558 = vmatpush1.bf16.msra.mxu1 %v6142_v5  ;;  %v5412_v5 = vcombine.high %v7659_v1, %v7659_v1 }
 0x301   : > { %4115 = vmatprep.subr.bf16.mxu0 %v6143_v6  ;;  %4559 = vmatprep.subr.bf16.mxu1 %v6143_v6  ;;  %v5439_v6 = vcombine.high %v7664_v2, %v7664_v2 }
 0x304   : > { %4116 = vmatpush1.bf16.msra.mxu0 %v6144_v7  ;;  %4560 = vmatpush1.bf16.msra.mxu1 %v6144_v7  ;;  %v6196_v7 = vld [vmem:[%s7119_s7 + $0x200] ss:$8 sps:$4 sm:$0xff]  }
 0x305   : > { %4117 = vmatprep.subr.bf16.mxu0 %v6145_v8  ;;  %4561 = vmatprep.subr.bf16.mxu1 %v6145_v8  ;;  %v6197_v8 = vld [vmem:[%s7119_s7 + $0x214] ss:$8 sps:$4 sm:$0xff]  }
 0x308   : > { %4118 = vmatpush1.bf16.msra.mxu0 %v6146_v9  ;;  %4562 = vmatpush1.bf16.msra.mxu1 %v6146_v9  ;;  %v6198_v9 = vld [vmem:[%s7119_s7 + $0x210] ss:$8 sps:$4 sm:$0xff]  }
 0x309   : > { %4119 = vmatprep.subr.bf16.mxu0 %v6147_v10  ;;  %4563 = vmatprep.subr.bf16.mxu1 %v6147_v10  ;;  %v6199_v10 = vld [vmem:[%s7119_s7 + $0x224] ss:$8 sps:$4 sm:$0xff]  }
 0x30c   : > { %4120 = vmatpush1.bf16.msra.mxu0 %v6148_v11  ;;  %4564 = vmatpush1.bf16.msra.mxu1 %v6148_v11  ;;  %v6200_v11 = vld [vmem:[%s7119_s7 + $0x220] ss:$8 sps:$4 sm:$0xff]  }
 0x30d   : > { %4121 = vmatprep.subr.bf16.mxu0 %v6149_v12  ;;  %4565 = vmatprep.subr.bf16.mxu1 %v6149_v12  ;;  %v6201_v12 = vld [vmem:[%s7119_s7 + $0x234] ss:$8 sps:$4 sm:$0xff]  }
 0x310   : > { %4122 = vmatpush1.bf16.msra.mxu0 %v6150_v13  ;;  %4566 = vmatpush1.bf16.msra.mxu1 %v6150_v13  ;;  %v6202_v13 = vld [vmem:[%s7119_s7 + $0x230] ss:$8 sps:$4 sm:$0xff]  }
 0x311   : > { %4123 = vmatprep.subr.bf16.mxu0 %v6151_v14  ;;  %4567 = vmatprep.subr.bf16.mxu1 %v6151_v14  ;;  %v6203_v14 = vld [vmem:[%s7119_s7 + $0x244] ss:$8 sps:$4 sm:$0xff]  }
 0x314   : > { %4124 = vmatpush1.bf16.msra.mxu0 %v6152_v15  ;;  %4568 = vmatpush1.bf16.msra.mxu1 %v6152_v15  ;;  %v6204_v15 = vld [vmem:[%s7119_s7 + $0x240] ss:$8 sps:$4 sm:$0xff]  }
 0x315   : > { %4125 = vmatprep.subr.bf16.mxu0 %v6153_v16  ;;  %4569 = vmatprep.subr.bf16.mxu1 %v6153_v16  ;;  %v6205_v16 = vld [vmem:[%s7119_s7 + $0x254] ss:$8 sps:$4 sm:$0xff]  }
 0x318   : > { %4126 = vmatpush1.bf16.msra.mxu0 %v6154_v17  ;;  %4570 = vmatpush1.bf16.msra.mxu1 %v6154_v17  ;;  %v6206_v17 = vld [vmem:[%s7119_s7 + $0x250] ss:$8 sps:$4 sm:$0xff]  }
 0x319   : > { %4127 = vmatprep.subr.bf16.mxu0 %v6155_v18  ;;  %4571 = vmatprep.subr.bf16.mxu1 %v6155_v18  ;;  %v6207_v18 = vld [vmem:[%s7119_s7 + $0x264] ss:$8 sps:$4 sm:$0xff]  }
 0x31c   : > { %4128 = vmatpush1.bf16.msra.mxu0 %v6156_v19  ;;  %4572 = vmatpush1.bf16.msra.mxu1 %v6156_v19  ;;  %v6208_v19 = vld [vmem:[%s7119_s7 + $0x260] ss:$8 sps:$4 sm:$0xff]  }
 0x31d   : > { %4129 = vmatprep.subr.bf16.mxu0 %v6157_v20  ;;  %4573 = vmatprep.subr.bf16.mxu1 %v6157_v20  ;;  %v6209_v20 = vld [vmem:[%s7119_s7 + $0x274] ss:$8 sps:$4 sm:$0xff]  }
 0x320   : > { %4130 = vmatpush1.bf16.msra.mxu0 %v6158_v21  ;;  %4574 = vmatpush1.bf16.msra.mxu1 %v6158_v21  ;;  %v6210_v21 = vld [vmem:[%s7119_s7 + $0x270] ss:$8 sps:$4 sm:$0xff]  }
 0x321   : > { %4131 = vmatprep.subr.bf16.mxu0 %v6159_v22  ;;  %4575 = vmatprep.subr.bf16.mxu1 %v6159_v22  ;;  %v6211_v22 = vld [vmem:[%s7119_s7 + $0x284] ss:$8 sps:$4 sm:$0xff]  }
 0x324   : > { %4132 = vmatpush1.bf16.msra.mxu0 %v6160_v23  ;;  %4576 = vmatpush1.bf16.msra.mxu1 %v6160_v23  ;;  %v6212_v23 = vld [vmem:[%s7119_s7 + $0x280] ss:$8 sps:$4 sm:$0xff]  }
 0x325   : > { %4133 = vmatprep.subr.bf16.mxu0 %v6161_v24  ;;  %4577 = vmatprep.subr.bf16.mxu1 %v6161_v24  ;;  %v6213_v24 = vld [vmem:[%s7119_s7 + $0x294] ss:$8 sps:$4 sm:$0xff]  }
 0x328   : > { %4134 = vmatpush1.bf16.msra.mxu0 %v6162_v29  ;;  %4578 = vmatpush1.bf16.msra.mxu1 %v6162_v29  ;;  %v6218_v29 = vld [vmem:[%s7119_s7 + $0x2b0] ss:$8 sps:$4 sm:$0xff]  }
 0x329   : > { %4144 = vmatprep.subr.bf16.mxu0 %v6163_v30  ;;  %4588 = vmatprep.subr.bf16.mxu1 %v6163_v30  ;;  %v6219_v30 = vld [vmem:[%s7119_s7 + $0x2c4] ss:$8 sps:$4 sm:$0xff]  }
 0x32b   : > { %4136 = vmatmul.mubr.bf16.vlgmr.msra.gmra.mrb[4].mxu0 %v5407_v25  ;;  %4580 = vmatmul.mubr.bf16.vlgmr.msra.gmra.mrb[4].mxu1 %v5434_v26  ;;  %v6214_v25 = vld [vmem:[%s7119_s7 + $0x290] ss:$8 sps:$4 sm:$0xff]   ;;  %v6215_v26 = vld [vmem:[%s7119_s7 + $0x2a4] ss:$8 sps:$4 sm:$0xff]  }
 0x32c   : > { %4145 = vmatpush1.bf16.msra.mxu0 %v6164_v33  ;;  %4589 = vmatpush1.bf16.msra.mxu1 %v6164_v33  ;;  %v6222_v33 = vld [vmem:[%s7119_s7 + $0x2d0] ss:$8 sps:$4 sm:$0xff]  }
 0x32d   : > { %4146 = vmatprep.subr.bf16.mxu0 %v6165_v34  ;;  %4590 = vmatprep.subr.bf16.mxu1 %v6165_v34  ;;  %v6223_v34 = vld [vmem:[%s7119_s7 + $0x2e4] ss:$8 sps:$4 sm:$0xff]  }
 0x32e   : > { %4176 = vmatprep.mubr.bf16.mxu0 %v5410_v31  ;;  %4620 = vmatprep.mubr.bf16.mxu1 %v5437_v32  ;;  %v6220_v31 = vld [vmem:[%s7119_s7 + $0x2c0] ss:$8 sps:$4 sm:$0xff]   ;;  %v6221_v32 = vld [vmem:[%s7119_s7 + $0x2d4] ss:$8 sps:$4 sm:$0xff]  }
 0x330   : > { %4147 = vmatpush1.bf16.msra.mxu0 %v6166_v35  ;;  %4591 = vmatpush1.bf16.msra.mxu1 %v6166_v35  ;;  %v6224_v35 = vld [vmem:[%s7119_s7 + $0x2e0] ss:$8 sps:$4 sm:$0xff]  }
 0x331   : > { %4148 = vmatprep.subr.bf16.mxu0 %v6167_v36  ;;  %4592 = vmatprep.subr.bf16.mxu1 %v6167_v36  ;;  %v6225_v36 = vld [vmem:[%s7119_s7 + $0x2f4] ss:$8 sps:$4 sm:$0xff]  }
 0x334   : > { %4149 = vmatpush1.bf16.msra.mxu0 %v6168_v37  ;;  %4593 = vmatpush1.bf16.msra.mxu1 %v6168_v37  ;;  %v5411_v37 = vcombine.low %v7659_v1, %v7659_v1 }
 0x335   : > { %4150 = vmatprep.subr.bf16.mxu0 %v6169_v38  ;;  %4594 = vmatprep.subr.bf16.mxu1 %v6169_v38  ;;  %v5438_v38 = vcombine.low %v7664_v2, %v7664_v2  ;;  %v6239_v2 = vld [vmem:[%s7119_s7 + $0x364] ss:$8 sps:$4 sm:$0xff]  }
 0x338   : > { %4151 = vmatpush1.bf16.msra.mxu0 %v6170_v39  ;;  %4595 = vmatpush1.bf16.msra.mxu1 %v6170_v39  ;;  %v7709_v39 = vld [vmem:[%s8047_s0 + $0xa8] sm:$0xff] }
 0x339   : > { %4152 = vmatprep.subr.bf16.mxu0 %v6171_v40  ;;  %4596 = vmatprep.subr.bf16.mxu1 %v6171_v40  ;;  %v7714_v40 = vld [vmem:[%s8047_s0 + $0xf0] sm:$0xff] }
 0x33c   : > { %4153 = vmatpush1.bf16.msra.mxu0 %v6172_v41  ;;  %4597 = vmatpush1.bf16.msra.mxu1 %v6172_v41  ;;  %v6226_v41 = vld [vmem:[%s7119_s7 + $0x2f0] ss:$8 sps:$4 sm:$0xff]  }
 0x33d   : > { %4154 = vmatprep.subr.bf16.mxu0 %v6173_v42  ;;  %4598 = vmatprep.subr.bf16.mxu1 %v6173_v42  ;;  %v6227_v42 = vld [vmem:[%s7119_s7 + $0x304] ss:$8 sps:$4 sm:$0xff]  }
 0x340   : > { %4155 = vmatpush1.bf16.msra.mxu0 %v6174_v43  ;;  %4599 = vmatpush1.bf16.msra.mxu1 %v6174_v43  ;;  %v5414_v43 = vcombine.high %v7709_v39, %v7709_v39 }
 0x341   : > { %4156 = vmatprep.subr.bf16.mxu0 %v6175_v44  ;;  %4600 = vmatprep.subr.bf16.mxu1 %v6175_v44  ;;  %v5441_v44 = vcombine.high %v7714_v40, %v7714_v40 }
 0x344   : > { %4157 = vmatpush1.bf16.msra.mxu0 %v6176_v45  ;;  %4601 = vmatpush1.bf16.msra.mxu1 %v6176_v45  ;;  %v6228_v45 = vld [vmem:[%s7119_s7 + $0x300] ss:$8 sps:$4 sm:$0xff]  }
 0x345   : > { %4158 = vmatprep.subr.bf16.mxu0 %v6177_v46  ;;  %4602 = vmatprep.subr.bf16.mxu1 %v6177_v46  ;;  %v6229_v46 = vld [vmem:[%s7119_s7 + $0x314] ss:$8 sps:$4 sm:$0xff]  }
 0x348   : > { %4159 = vmatpush1.bf16.msra.mxu0 %v6178_v47  ;;  %4603 = vmatpush1.bf16.msra.mxu1 %v6178_v47  ;;  %v6230_v47 = vld [vmem:[%s7119_s7 + $0x310] ss:$8 sps:$4 sm:$0xff]  }
 0x349   : > { %4160 = vmatprep.subr.bf16.mxu0 %v6179_v48  ;;  %4604 = vmatprep.subr.bf16.mxu1 %v6179_v48  ;;  %v6231_v48 = vld [vmem:[%s7119_s7 + $0x324] ss:$8 sps:$4 sm:$0xff]  }
 0x34c   : > { %4161 = vmatpush1.bf16.msra.mxu0 %v6180_v49  ;;  %4605 = vmatpush1.bf16.msra.mxu1 %v6180_v49  ;;  %v6232_v49 = vld [vmem:[%s7119_s7 + $0x320] ss:$8 sps:$4 sm:$0xff]  }
 0x34d   : > { %4162 = vmatprep.subr.bf16.mxu0 %v6181_v50  ;;  %4606 = vmatprep.subr.bf16.mxu1 %v6181_v50  ;;  %v6233_v50 = vld [vmem:[%s7119_s7 + $0x334] ss:$8 sps:$4 sm:$0xff]  }
 0x350   : > { %4163 = vmatpush1.bf16.msra.mxu0 %v6182_v51  ;;  %4607 = vmatpush1.bf16.msra.mxu1 %v6182_v51  ;;  %v6234_v51 = vld [vmem:[%s7119_s7 + $0x330] ss:$8 sps:$4 sm:$0xff]  }
 0x351   : > { %4164 = vmatprep.subr.bf16.mxu0 %v6183_v52  ;;  %4608 = vmatprep.subr.bf16.mxu1 %v6183_v52  ;;  %v6235_v52 = vld [vmem:[%s7119_s7 + $0x344] ss:$8 sps:$4 sm:$0xff]  }
 0x354   : > { %4165 = vmatpush1.bf16.msra.mxu0 %v6184_v53  ;;  %4609 = vmatpush1.bf16.msra.mxu1 %v6184_v53  ;;  %v6236_v53 = vld [vmem:[%s7119_s7 + $0x340] ss:$8 sps:$4 sm:$0xff]  }
 0x355   : > { %4166 = vmatprep.subr.bf16.mxu0 %v6185_v54  ;;  %4610 = vmatprep.subr.bf16.mxu1 %v6185_v54  ;;  %v6237_v54 = vld [vmem:[%s7119_s7 + $0x354] ss:$8 sps:$4 sm:$0xff]  }
 0x358   : > { %4167 = vmatpush1.bf16.msra.mxu0 %v6186_v55  ;;  %4611 = vmatpush1.bf16.msra.mxu1 %v6186_v55 }
 0x359   : > { %4168 = vmatprep.subr.bf16.mxu0 %v6187_v56  ;;  %4612 = vmatprep.subr.bf16.mxu1 %v6187_v56 }
 0x35c   : > { %4169 = vmatpush1.bf16.msra.mxu0 %v6188_v57  ;;  %4613 = vmatpush1.bf16.msra.mxu1 %v6188_v57 }
 0x35d   : > { %4170 = vmatprep.subr.bf16.mxu0 %v6189_v58  ;;  %4614 = vmatprep.subr.bf16.mxu1 %v6189_v58 }
 0x360   : > { %4171 = vmatpush1.bf16.msra.mxu0 %v6190_v59  ;;  %4615 = vmatpush1.bf16.msra.mxu1 %v6190_v59 }
 0x361   : > { %4172 = vmatprep.subr.bf16.mxu0 %v6191_v60  ;;  %4616 = vmatprep.subr.bf16.mxu1 %v6191_v60 }
 0x364   : > { %4173 = vmatpush1.bf16.msra.mxu0 %v6192_v61  ;;  %4617 = vmatpush1.bf16.msra.mxu1 %v6192_v61 }
 0x365   : > { %4174 = vmatprep.subr.bf16.mxu0 %v6193_v62  ;;  %4618 = vmatprep.subr.bf16.mxu1 %v6193_v62 }
 0x368   : > { %4175 = vmatpush1.bf16.msra.mxu0 %v6194_v3  ;;  %4619 = vmatpush1.bf16.msra.mxu1 %v6194_v3  ;;  %v6240_v3 = vld [vmem:[%s7119_s7 + $0x360] ss:$8 sps:$4 sm:$0xff]  }
 0x369   : > { %4185 = vmatprep.subr.bf16.mxu0 %v6195_v4  ;;  %4629 = vmatprep.subr.bf16.mxu1 %v6195_v4  ;;  %v6241_v4 = vld [vmem:[%s7119_s7 + $0x374] ss:$8 sps:$4 sm:$0xff]  }
 0x36b   : > { %4177 = vmatmul.mubr.bf16.vlgmr.msra.gmra.mrb[4].mxu0 %v5409_v63  ;;  %4621 = vmatmul.mubr.bf16.vlgmr.msra.gmra.mrb[4].mxu1 %v5436_v0  ;;  %v6238_v63 = vld [vmem:[%s7119_s7 + $0x350] ss:$8 sps:$4 sm:$0xff]  }
 0x36c   : > { %4186 = vmatpush1.bf16.msra.mxu0 %v6196_v7  ;;  %4630 = vmatpush1.bf16.msra.mxu1 %v6196_v7  ;;  %v6244_v7 = vld [vmem:[%s7119_s7 + $0x380] ss:$8 sps:$4 sm:$0xff]  }
 0x36d   : > { %4187 = vmatprep.subr.bf16.mxu0 %v6197_v8  ;;  %4631 = vmatprep.subr.bf16.mxu1 %v6197_v8  ;;  %v6245_v8 = vld [vmem:[%s7119_s7 + $0x394] ss:$8 sps:$4 sm:$0xff]  }
 0x36e   : > { %4217 = vmatprep.mubr.bf16.mxu0 %v5412_v5  ;;  %4661 = vmatprep.mubr.bf16.mxu1 %v5439_v6  ;;  %v6242_v5 = vld [vmem:[%s7119_s7 + $0x370] ss:$8 sps:$4 sm:$0xff]   ;;  %v6243_v6 = vld [vmem:[%s7119_s7 + $0x384] ss:$8 sps:$4 sm:$0xff]  }
 0x370   : > { %4188 = vmatpush1.bf16.msra.mxu0 %v6198_v9  ;;  %4632 = vmatpush1.bf16.msra.mxu1 %v6198_v9  ;;  %v6246_v9 = vld [vmem:[%s7119_s7 + $0x390] ss:$8 sps:$4 sm:$0xff]  }
 0x371   : > { %4189 = vmatprep.subr.bf16.mxu0 %v6199_v10  ;;  %4633 = vmatprep.subr.bf16.mxu1 %v6199_v10  ;;  %v6247_v10 = vld [vmem:[%s7119_s7 + $0x3a4] ss:$8 sps:$4 sm:$0xff]  }
 0x374   : > { %4190 = vmatpush1.bf16.msra.mxu0 %v6200_v11  ;;  %4634 = vmatpush1.bf16.msra.mxu1 %v6200_v11  ;;  %v6248_v11 = vld [vmem:[%s7119_s7 + $0x3a0] ss:$8 sps:$4 sm:$0xff]  }
 0x375   : > { %4191 = vmatprep.subr.bf16.mxu0 %v6201_v12  ;;  %4635 = vmatprep.subr.bf16.mxu1 %v6201_v12  ;;  %v6249_v12 = vld [vmem:[%s7119_s7 + $0x3b4] ss:$8 sps:$4 sm:$0xff]  }
 0x378   : > { %4192 = vmatpush1.bf16.msra.mxu0 %v6202_v13  ;;  %4636 = vmatpush1.bf16.msra.mxu1 %v6202_v13  ;;  %v6250_v13 = vld [vmem:[%s7119_s7 + $0x3b0] ss:$8 sps:$4 sm:$0xff]  }
 0x379   : > { %4193 = vmatprep.subr.bf16.mxu0 %v6203_v14  ;;  %4637 = vmatprep.subr.bf16.mxu1 %v6203_v14  ;;  %v6251_v14 = vld [vmem:[%s7119_s7 + $0x3c4] ss:$8 sps:$4 sm:$0xff]  }
 0x37c   : > { %4194 = vmatpush1.bf16.msra.mxu0 %v6204_v15  ;;  %4638 = vmatpush1.bf16.msra.mxu1 %v6204_v15  ;;  %v6252_v15 = vld [vmem:[%s7119_s7 + $0x3c0] ss:$8 sps:$4 sm:$0xff]  }
 0x37d   : > { %4195 = vmatprep.subr.bf16.mxu0 %v6205_v16  ;;  %4639 = vmatprep.subr.bf16.mxu1 %v6205_v16  ;;  %v6253_v16 = vld [vmem:[%s7119_s7 + $0x3d4] ss:$8 sps:$4 sm:$0xff]  }
 0x380   : > { %4196 = vmatpush1.bf16.msra.mxu0 %v6206_v17  ;;  %4640 = vmatpush1.bf16.msra.mxu1 %v6206_v17  ;;  %v6254_v17 = vld [vmem:[%s7119_s7 + $0x3d0] ss:$8 sps:$4 sm:$0xff]  }
 0x381   : > { %4197 = vmatprep.subr.bf16.mxu0 %v6207_v18  ;;  %4641 = vmatprep.subr.bf16.mxu1 %v6207_v18  ;;  %v6255_v18 = vld [vmem:[%s7119_s7 + $0x3e4] ss:$8 sps:$4 sm:$0xff]  }
 0x384   : > { %4198 = vmatpush1.bf16.msra.mxu0 %v6208_v19  ;;  %4642 = vmatpush1.bf16.msra.mxu1 %v6208_v19  ;;  %v6256_v19 = vld [vmem:[%s7119_s7 + $0x3e0] ss:$8 sps:$4 sm:$0xff]  }
 0x385   : > { %4199 = vmatprep.subr.bf16.mxu0 %v6209_v20  ;;  %4643 = vmatprep.subr.bf16.mxu1 %v6209_v20  ;;  %v6257_v20 = vld [vmem:[%s7119_s7 + $0x3f4] ss:$8 sps:$4 sm:$0xff]  }
 0x388   : > { %4200 = vmatpush1.bf16.msra.mxu0 %v6210_v21  ;;  %4644 = vmatpush1.bf16.msra.mxu1 %v6210_v21  ;;  %v5413_v21 = vcombine.low %v7709_v39, %v7709_v39  ;;  %v6270_v39 = vld [vmem:[%s7119_s7 + $0x450] ss:$8 sps:$4 sm:$0xff]  }
 0x389   : > { %4201 = vmatprep.subr.bf16.mxu0 %v6211_v22  ;;  %4645 = vmatprep.subr.bf16.mxu1 %v6211_v22  ;;  %v5440_v22 = vcombine.low %v7714_v40, %v7714_v40  ;;  %v6271_v40 = vld [vmem:[%s7119_s7 + $0x464] ss:$8 sps:$4 sm:$0xff]  }
 0x38c   : > { %4202 = vmatpush1.bf16.msra.mxu0 %v6212_v23  ;;  %4646 = vmatpush1.bf16.msra.mxu1 %v6212_v23  ;;  %v7771_v23 = vld [vmem:[%s8047_s0 + $0xb0] sm:$0xff] }
 0x38d   : > { %4203 = vmatprep.subr.bf16.mxu0 %v6213_v24  ;;  %4647 = vmatprep.subr.bf16.mxu1 %v6213_v24  ;;  %v7776_v24 = vld [vmem:[%s8047_s0 + $0xf8] sm:$0xff] }
 0x390   : > { %4204 = vmatpush1.bf16.msra.mxu0 %v6214_v25  ;;  %4648 = vmatpush1.bf16.msra.mxu1 %v6214_v25  ;;  %v6258_v25 = vld [vmem:[%s7119_s7 + $0x3f0] ss:$8 sps:$4 sm:$0xff]  }
 0x391   : > { %4205 = vmatprep.subr.bf16.mxu0 %v6215_v26  ;;  %4649 = vmatprep.subr.bf16.mxu1 %v6215_v26  ;;  %v6259_v26 = vld [vmem:[%s7119_s7 + $0x404] ss:$8 sps:$4 sm:$0xff]  }
 0x394   : > { %4206 = vmatpush1.bf16.msra.mxu0 %v6216_v27  ;;  %4650 = vmatpush1.bf16.msra.mxu1 %v6216_v27  ;;  %v5416_v27 = vcombine.high %v7771_v23, %v7771_v23 }
 0x395   : > { %4207 = vmatprep.subr.bf16.mxu0 %v6217_v28  ;;  %4651 = vmatprep.subr.bf16.mxu1 %v6217_v28  ;;  %v5443_v28 = vcombine.high %v7776_v24, %v7776_v24 }
 0x398   : > { %4208 = vmatpush1.bf16.msra.mxu0 %v6218_v29  ;;  %4652 = vmatpush1.bf16.msra.mxu1 %v6218_v29  ;;  %v6260_v29 = vld [vmem:[%s7119_s7 + $0x400] ss:$8 sps:$4 sm:$0xff]  }
 0x399   : > { %4209 = vmatprep.subr.bf16.mxu0 %v6219_v30  ;;  %4653 = vmatprep.subr.bf16.mxu1 %v6219_v30  ;;  %v6261_v30 = vld [vmem:[%s7119_s7 + $0x414] ss:$8 sps:$4 sm:$0xff]  }
 0x39c   : > { %4210 = vmatpush1.bf16.msra.mxu0 %v6220_v31  ;;  %4654 = vmatpush1.bf16.msra.mxu1 %v6220_v31  ;;  %v6262_v31 = vld [vmem:[%s7119_s7 + $0x410] ss:$8 sps:$4 sm:$0xff]  }
 0x39d   : > { %4211 = vmatprep.subr.bf16.mxu0 %v6221_v32  ;;  %4655 = vmatprep.subr.bf16.mxu1 %v6221_v32  ;;  %v6263_v32 = vld [vmem:[%s7119_s7 + $0x424] ss:$8 sps:$4 sm:$0xff]  }
 0x3a0   : > { %4212 = vmatpush1.bf16.msra.mxu0 %v6222_v33  ;;  %4656 = vmatpush1.bf16.msra.mxu1 %v6222_v33  ;;  %v6264_v33 = vld [vmem:[%s7119_s7 + $0x420] ss:$8 sps:$4 sm:$0xff]  }
 0x3a1   : > { %4213 = vmatprep.subr.bf16.mxu0 %v6223_v34  ;;  %4657 = vmatprep.subr.bf16.mxu1 %v6223_v34  ;;  %v6265_v34 = vld [vmem:[%s7119_s7 + $0x434] ss:$8 sps:$4 sm:$0xff]  }
 0x3a4   : > { %4214 = vmatpush1.bf16.msra.mxu0 %v6224_v35  ;;  %4658 = vmatpush1.bf16.msra.mxu1 %v6224_v35  ;;  %v6266_v35 = vld [vmem:[%s7119_s7 + $0x430] ss:$8 sps:$4 sm:$0xff]  }
 0x3a5   : > { %4215 = vmatprep.subr.bf16.mxu0 %v6225_v36  ;;  %4659 = vmatprep.subr.bf16.mxu1 %v6225_v36  ;;  %v6267_v36 = vld [vmem:[%s7119_s7 + $0x444] ss:$8 sps:$4 sm:$0xff]  }
 0x3a8   : > { %4216 = vmatpush1.bf16.msra.mxu0 %v6226_v41  ;;  %4660 = vmatpush1.bf16.msra.mxu1 %v6226_v41  ;;  %v6272_v41 = vld [vmem:[%s7119_s7 + $0x460] ss:$8 sps:$4 sm:$0xff]  }
 0x3a9   : > { %4226 = vmatprep.subr.bf16.mxu0 %v6227_v42  ;;  %4670 = vmatprep.subr.bf16.mxu1 %v6227_v42  ;;  %v6273_v42 = vld [vmem:[%s7119_s7 + $0x474] ss:$8 sps:$4 sm:$0xff]  }
 0x3ab   : > { %4218 = vmatmul.mubr.bf16.vlgmr.msra.gmra.mrb[4].mxu0 %v5411_v37  ;;  %4662 = vmatmul.mubr.bf16.vlgmr.msra.gmra.mrb[4].mxu1 %v5438_v38  ;;  %v6268_v37 = vld [vmem:[%s7119_s7 + $0x440] ss:$8 sps:$4 sm:$0xff]   ;;  %v6269_v38 = vld [vmem:[%s7119_s7 + $0x454] ss:$8 sps:$4 sm:$0xff]  }
 0x3ac   : > { %4227 = vmatpush1.bf16.msra.mxu0 %v6228_v45  ;;  %4671 = vmatpush1.bf16.msra.mxu1 %v6228_v45  ;;  %v6276_v45 = vld [vmem:[%s7119_s7 + $0x480] ss:$8 sps:$4 sm:$0xff]  }
 0x3ad   : > { %4228 = vmatprep.subr.bf16.mxu0 %v6229_v46  ;;  %4672 = vmatprep.subr.bf16.mxu1 %v6229_v46  ;;  %v6277_v46 = vld [vmem:[%s7119_s7 + $0x494] ss:$8 sps:$4 sm:$0xff]  }
 0x3ae   : > { %4258 = vmatprep.mubr.bf16.mxu0 %v5414_v43  ;;  %4702 = vmatprep.mubr.bf16.mxu1 %v5441_v44  ;;  %v6274_v43 = vld [vmem:[%s7119_s7 + $0x470] ss:$8 sps:$4 sm:$0xff]   ;;  %v6275_v44 = vld [vmem:[%s7119_s7 + $0x484] ss:$8 sps:$4 sm:$0xff]  }
 0x3b0   : > { %4229 = vmatpush1.bf16.msra.mxu0 %v6230_v47  ;;  %4673 = vmatpush1.bf16.msra.mxu1 %v6230_v47  ;;  %v6278_v47 = vld [vmem:[%s7119_s7 + $0x490] ss:$8 sps:$4 sm:$0xff]  }
 0x3b1   : > { %4230 = vmatprep.subr.bf16.mxu0 %v6231_v48  ;;  %4674 = vmatprep.subr.bf16.mxu1 %v6231_v48  ;;  %v6279_v48 = vld [vmem:[%s7119_s7 + $0x4a4] ss:$8 sps:$4 sm:$0xff]  }
 0x3b4   : > { %4231 = vmatpush1.bf16.msra.mxu0 %v6232_v49  ;;  %4675 = vmatpush1.bf16.msra.mxu1 %v6232_v49  ;;  %v6280_v49 = vld [vmem:[%s7119_s7 + $0x4a0] ss:$8 sps:$4 sm:$0xff]  }
 0x3b5   : > { %4232 = vmatprep.subr.bf16.mxu0 %v6233_v50  ;;  %4676 = vmatprep.subr.bf16.mxu1 %v6233_v50  ;;  %v6281_v50 = vld [vmem:[%s7119_s7 + $0x4b4] ss:$8 sps:$4 sm:$0xff]  }
 0x3b8   : > { %4233 = vmatpush1.bf16.msra.mxu0 %v6234_v51  ;;  %4677 = vmatpush1.bf16.msra.mxu1 %v6234_v51  ;;  %v6282_v51 = vld [vmem:[%s7119_s7 + $0x4b0] ss:$8 sps:$4 sm:$0xff]  }
 0x3b9   : > { %4234 = vmatprep.subr.bf16.mxu0 %v6235_v52  ;;  %4678 = vmatprep.subr.bf16.mxu1 %v6235_v52  ;;  %v6283_v52 = vld [vmem:[%s7119_s7 + $0x4c4] ss:$8 sps:$4 sm:$0xff]  }
 0x3bc   : > { %4235 = vmatpush1.bf16.msra.mxu0 %v6236_v53  ;;  %4679 = vmatpush1.bf16.msra.mxu1 %v6236_v53  ;;  %v6284_v53 = vld [vmem:[%s7119_s7 + $0x4c0] ss:$8 sps:$4 sm:$0xff]  }
 0x3bd   : > { %4236 = vmatprep.subr.bf16.mxu0 %v6237_v54  ;;  %4680 = vmatprep.subr.bf16.mxu1 %v6237_v54  ;;  %v6285_v54 = vld [vmem:[%s7119_s7 + $0x4d4] ss:$8 sps:$4 sm:$0xff]  }
 0x3be   : > { %v7732_v55 = vpop.f32.mrb[0].mxu0  ;;  %v7734_v56 = vpop.f32.mrb[0].mxu1 }
 0x3bf   : > { %v4028_v57 = vmax.f32 %v7732_v55, %v7734_v56  ;;  %v7738_v58 = vpop.f32.mrb[1].mxu0  ;;  %v7740_v59 = vpop.f32.mrb[1].mxu1 }
 0x3c0   : > { %v4029_v60 = vmax.f32 %v7738_v58, %v7740_v59  ;;  %v3583_v61 = vpop.f32.mrb[2].mxu0  ;;  %v4025_v62 = vpop.f32.mrb[2].mxu1  ;;  %4237 = vmatpush1.bf16.msra.mxu0 %v6238_v63  ;;  %4681 = vmatpush1.bf16.msra.mxu1 %v6238_v63  ;;  %v6288_v63 = vld [vmem:[%s7119_s7 + $0x4e0] ss:$8 sps:$4 sm:$0xff]  }
 0x3c1   : > { %v3584_v0 = vpop.f32.mrb[3].mxu0  ;;  %v4026_v1 = vpop.f32.mrb[3].mxu1  ;;  %4238 = vmatprep.subr.bf16.mxu0 %v6239_v2  ;;  %4682 = vmatprep.subr.bf16.mxu1 %v6239_v2  ;;  %v6286_v61 = vld [vmem:[%s7119_s7 + $0x4d0] ss:$8 sps:$4 sm:$0xff]   ;;  %v6287_v62 = vld [vmem:[%s7119_s7 + $0x4e4] ss:$8 sps:$4 sm:$0xff]   ;;  %v5442_v2 = vcombine.low %v7776_v24, %v7776_v24 }
 0x3c2   : > { %v6289_v0 = vld [vmem:[%s7119_s7 + $0x4f4] ss:$8 sps:$4 sm:$0xff]   ;;  %v5415_v1 = vcombine.low %v7771_v23, %v7771_v23  ;;  %v6306_v23 = vld [vmem:[%s7119_s7 + $0x570] ss:$8 sps:$4 sm:$0xff]   ;;  %v6307_v24 = vld [vmem:[%s7119_s7 + $0x584] ss:$8 sps:$4 sm:$0xff]  }
 0x3c4   : > { %4239 = vmatpush1.bf16.msra.mxu0 %v6240_v3  ;;  %4683 = vmatpush1.bf16.msra.mxu1 %v6240_v3  ;;  %v7821_v3 = vld [vmem:[%s8047_s0 + $0xb8] sm:$0xff] }
 0x3c5   : > { %4240 = vmatprep.subr.bf16.mxu0 %v6241_v4  ;;  %4684 = vmatprep.subr.bf16.mxu1 %v6241_v4  ;;  %v7826_v4 = vld [vmem:[%s8047_s0 + $0x100] sm:$0xff] }
 0x3c8   : > { %4241 = vmatpush1.bf16.msra.mxu0 %v6242_v5  ;;  %4685 = vmatpush1.bf16.msra.mxu1 %v6242_v5  ;;  %v6290_v5 = vld [vmem:[%s7119_s7 + $0x4f0] ss:$8 sps:$4 sm:$0xff]  }
 0x3c9   : > { %4242 = vmatprep.subr.bf16.mxu0 %v6243_v6  ;;  %4686 = vmatprep.subr.bf16.mxu1 %v6243_v6  ;;  %v6291_v6 = vld [vmem:[%s7119_s7 + $0x504] ss:$8 sps:$4 sm:$0xff]  }
 0x3cc   : > { %4243 = vmatpush1.bf16.msra.mxu0 %v6244_v7  ;;  %4687 = vmatpush1.bf16.msra.mxu1 %v6244_v7  ;;  %v5418_v7 = vcombine.high %v7821_v3, %v7821_v3 }
 0x3cd   : > { %4244 = vmatprep.subr.bf16.mxu0 %v6245_v8  ;;  %4688 = vmatprep.subr.bf16.mxu1 %v6245_v8  ;;  %v5445_v8 = vcombine.high %v7826_v4, %v7826_v4 }
 0x3d0   : > { %4245 = vmatpush1.bf16.msra.mxu0 %v6246_v9  ;;  %4689 = vmatpush1.bf16.msra.mxu1 %v6246_v9  ;;  %v6292_v9 = vld [vmem:[%s7119_s7 + $0x500] ss:$8 sps:$4 sm:$0xff]  }
 0x3d1   : > { %4246 = vmatprep.subr.bf16.mxu0 %v6247_v10  ;;  %4690 = vmatprep.subr.bf16.mxu1 %v6247_v10  ;;  %v6293_v10 = vld [vmem:[%s7119_s7 + $0x514] ss:$8 sps:$4 sm:$0xff]  }
 0x3d4   : > { %4247 = vmatpush1.bf16.msra.mxu0 %v6248_v11  ;;  %4691 = vmatpush1.bf16.msra.mxu1 %v6248_v11  ;;  %v6294_v11 = vld [vmem:[%s7119_s7 + $0x510] ss:$8 sps:$4 sm:$0xff]  }
 0x3d5   : > { %4248 = vmatprep.subr.bf16.mxu0 %v6249_v12  ;;  %4692 = vmatprep.subr.bf16.mxu1 %v6249_v12  ;;  %v6295_v12 = vld [vmem:[%s7119_s7 + $0x524] ss:$8 sps:$4 sm:$0xff]  }
 0x3d8   : > { %4249 = vmatpush1.bf16.msra.mxu0 %v6250_v13  ;;  %4693 = vmatpush1.bf16.msra.mxu1 %v6250_v13  ;;  %v6296_v13 = vld [vmem:[%s7119_s7 + $0x520] ss:$8 sps:$4 sm:$0xff]  }
 0x3d9   : > { %4250 = vmatprep.subr.bf16.mxu0 %v6251_v14  ;;  %4694 = vmatprep.subr.bf16.mxu1 %v6251_v14  ;;  %v6297_v14 = vld [vmem:[%s7119_s7 + $0x534] ss:$8 sps:$4 sm:$0xff]  }
 0x3dc   : > { %4251 = vmatpush1.bf16.msra.mxu0 %v6252_v15  ;;  %4695 = vmatpush1.bf16.msra.mxu1 %v6252_v15  ;;  %v6298_v15 = vld [vmem:[%s7119_s7 + $0x530] ss:$8 sps:$4 sm:$0xff]  }
 0x3dd   : > { %4252 = vmatprep.subr.bf16.mxu0 %v6253_v16  ;;  %4696 = vmatprep.subr.bf16.mxu1 %v6253_v16  ;;  %v6299_v16 = vld [vmem:[%s7119_s7 + $0x544] ss:$8 sps:$4 sm:$0xff]  }
 0x3e0   : > { %4253 = vmatpush1.bf16.msra.mxu0 %v6254_v17  ;;  %4697 = vmatpush1.bf16.msra.mxu1 %v6254_v17  ;;  %v6300_v17 = vld [vmem:[%s7119_s7 + $0x540] ss:$8 sps:$4 sm:$0xff]  }
 0x3e1   : > { %4254 = vmatprep.subr.bf16.mxu0 %v6255_v18  ;;  %4698 = vmatprep.subr.bf16.mxu1 %v6255_v18  ;;  %v6301_v18 = vld [vmem:[%s7119_s7 + $0x554] ss:$8 sps:$4 sm:$0xff]  }
 0x3e4   : > { %4255 = vmatpush1.bf16.msra.mxu0 %v6256_v19  ;;  %4699 = vmatpush1.bf16.msra.mxu1 %v6256_v19  ;;  %v6302_v19 = vld [vmem:[%s7119_s7 + $0x550] ss:$8 sps:$4 sm:$0xff]  }
 0x3e5   : > { %4256 = vmatprep.subr.bf16.mxu0 %v6257_v20  ;;  %4700 = vmatprep.subr.bf16.mxu1 %v6257_v20  ;;  %v6303_v20 = vld [vmem:[%s7119_s7 + $0x564] ss:$8 sps:$4 sm:$0xff]  }
 0x3e8   : > { %4257 = vmatpush1.bf16.msra.mxu0 %v6258_v25  ;;  %4701 = vmatpush1.bf16.msra.mxu1 %v6258_v25  ;;  %v6308_v25 = vld [vmem:[%s7119_s7 + $0x580] ss:$8 sps:$4 sm:$0xff]  }
 0x3e9   : > { %4267 = vmatprep.subr.bf16.mxu0 %v6259_v26  ;;  %4711 = vmatprep.subr.bf16.mxu1 %v6259_v26  ;;  %v6309_v26 = vld [vmem:[%s7119_s7 + $0x594] ss:$8 sps:$4 sm:$0xff]  }
 0x3eb   : > { %4259 = vmatmul.mubr.bf16.vlgmr.msra.gmra.mrb[4].mxu0 %v5413_v21  ;;  %4703 = vmatmul.mubr.bf16.vlgmr.msra.gmra.mrb[4].mxu1 %v5440_v22  ;;  %v6304_v21 = vld [vmem:[%s7119_s7 + $0x560] ss:$8 sps:$4 sm:$0xff]   ;;  %v6305_v22 = vld [vmem:[%s7119_s7 + $0x574] ss:$8 sps:$4 sm:$0xff]  }
 0x3ec   : > { %4268 = vmatpush1.bf16.msra.mxu0 %v6260_v29  ;;  %4712 = vmatpush1.bf16.msra.mxu1 %v6260_v29  ;;  %v6312_v29 = vld [vmem:[%s7119_s7 + $0x5a0] ss:$8 sps:$4 sm:$0xff]  }
 0x3ed   : > { %4269 = vmatprep.subr.bf16.mxu0 %v6261_v30  ;;  %4713 = vmatprep.subr.bf16.mxu1 %v6261_v30  ;;  %v6313_v30 = vld [vmem:[%s7119_s7 + $0x5b4] ss:$8 sps:$4 sm:$0xff]  }
 0x3ee   : > { %4299 = vmatprep.mubr.bf16.mxu0 %v5416_v27  ;;  %4743 = vmatprep.mubr.bf16.mxu1 %v5443_v28  ;;  %v6310_v27 = vld [vmem:[%s7119_s7 + $0x590] ss:$8 sps:$4 sm:$0xff]   ;;  %v6311_v28 = vld [vmem:[%s7119_s7 + $0x5a4] ss:$8 sps:$4 sm:$0xff]  }
 0x3f0   : > { %4270 = vmatpush1.bf16.msra.mxu0 %v6262_v31  ;;  %4714 = vmatpush1.bf16.msra.mxu1 %v6262_v31  ;;  %v6314_v31 = vld [vmem:[%s7119_s7 + $0x5b0] ss:$8 sps:$4 sm:$0xff]  }
 0x3f1   : > { %4271 = vmatprep.subr.bf16.mxu0 %v6263_v32  ;;  %4715 = vmatprep.subr.bf16.mxu1 %v6263_v32  ;;  %v6315_v32 = vld [vmem:[%s7119_s7 + $0x5c4] ss:$8 sps:$4 sm:$0xff]  }
 0x3f4   : > { %4272 = vmatpush1.bf16.msra.mxu0 %v6264_v33  ;;  %4716 = vmatpush1.bf16.msra.mxu1 %v6264_v33  ;;  %v6316_v33 = vld [vmem:[%s7119_s7 + $0x5c0] ss:$8 sps:$4 sm:$0xff]  }
 0x3f5   : > { %4273 = vmatprep.subr.bf16.mxu0 %v6265_v34  ;;  %4717 = vmatprep.subr.bf16.mxu1 %v6265_v34  ;;  %v6317_v34 = vld [vmem:[%s7119_s7 + $0x5d4] ss:$8 sps:$4 sm:$0xff]  }
 0x3f8   : > { %4274 = vmatpush1.bf16.msra.mxu0 %v6266_v35  ;;  %4718 = vmatpush1.bf16.msra.mxu1 %v6266_v35  ;;  %v6318_v35 = vld [vmem:[%s7119_s7 + $0x5d0] ss:$8 sps:$4 sm:$0xff]  }
 0x3f9   : > { %4275 = vmatprep.subr.bf16.mxu0 %v6267_v36  ;;  %4719 = vmatprep.subr.bf16.mxu1 %v6267_v36  ;;  %v6319_v36 = vld [vmem:[%s7119_s7 + $0x5e4] ss:$8 sps:$4 sm:$0xff]  }
 0x3fc   : > { %4276 = vmatpush1.bf16.msra.mxu0 %v6268_v37  ;;  %4720 = vmatpush1.bf16.msra.mxu1 %v6268_v37  ;;  %v6320_v37 = vld [vmem:[%s7119_s7 + $0x5e0] ss:$8 sps:$4 sm:$0xff]  }
 0x3fd   : > { %4277 = vmatprep.subr.bf16.mxu0 %v6269_v38  ;;  %4721 = vmatprep.subr.bf16.mxu1 %v6269_v38  ;;  %v6321_v38 = vld [vmem:[%s7119_s7 + $0x5f4] ss:$8 sps:$4 sm:$0xff]  }
 0x400   : > { %4278 = vmatpush1.bf16.msra.mxu0 %v6270_v39  ;;  %4722 = vmatpush1.bf16.msra.mxu1 %v6270_v39  ;;  %v5417_v39 = vcombine.low %v7821_v3, %v7821_v3  ;;  %v6338_v3 = vld [vmem:[%s7119_s7 + $0x670] ss:$8 sps:$4 sm:$0xff]  }
 0x401   : > { %4279 = vmatprep.subr.bf16.mxu0 %v6271_v40  ;;  %4723 = vmatprep.subr.bf16.mxu1 %v6271_v40  ;;  %v5444_v40 = vcombine.low %v7826_v4, %v7826_v4  ;;  %v6339_v4 = vld [vmem:[%s7119_s7 + $0x684] ss:$8 sps:$4 sm:$0xff]  }
 0x404   : > { %4280 = vmatpush1.bf16.msra.mxu0 %v6272_v41  ;;  %4724 = vmatpush1.bf16.msra.mxu1 %v6272_v41  ;;  %v7871_v41 = vld [vmem:[%s8047_s0 + $0xc0] sm:$0xff] }
 0x405   : > { %4281 = vmatprep.subr.bf16.mxu0 %v6273_v42  ;;  %4725 = vmatprep.subr.bf16.mxu1 %v6273_v42  ;;  %v7876_v42 = vld [vmem:[%s8047_s0 + $0x108] sm:$0xff] }
 0x408   : > { %4282 = vmatpush1.bf16.msra.mxu0 %v6274_v43  ;;  %4726 = vmatpush1.bf16.msra.mxu1 %v6274_v43  ;;  %v6322_v43 = vld [vmem:[%s7119_s7 + $0x5f0] ss:$8 sps:$4 sm:$0xff]  }
 0x409   : > { %4283 = vmatprep.subr.bf16.mxu0 %v6275_v44  ;;  %4727 = vmatprep.subr.bf16.mxu1 %v6275_v44  ;;  %v6323_v44 = vld [vmem:[%s7119_s7 + $0x604] ss:$8 sps:$4 sm:$0xff]  }
 0x40c   : > { %4284 = vmatpush1.bf16.msra.mxu0 %v6276_v45  ;;  %4728 = vmatpush1.bf16.msra.mxu1 %v6276_v45  ;;  %v5420_v45 = vcombine.high %v7871_v41, %v7871_v41 }
 0x40d   : > { %4285 = vmatprep.subr.bf16.mxu0 %v6277_v46  ;;  %4729 = vmatprep.subr.bf16.mxu1 %v6277_v46  ;;  %v5447_v46 = vcombine.high %v7876_v42, %v7876_v42 }
 0x410   : > { %4286 = vmatpush1.bf16.msra.mxu0 %v6278_v47  ;;  %4730 = vmatpush1.bf16.msra.mxu1 %v6278_v47  ;;  %v6324_v47 = vld [vmem:[%s7119_s7 + $0x600] ss:$8 sps:$4 sm:$0xff]  }
 0x411   : > { %4287 = vmatprep.subr.bf16.mxu0 %v6279_v48  ;;  %4731 = vmatprep.subr.bf16.mxu1 %v6279_v48  ;;  %v6325_v48 = vld [vmem:[%s7119_s7 + $0x614] ss:$8 sps:$4 sm:$0xff]  }
 0x414   : > { %4288 = vmatpush1.bf16.msra.mxu0 %v6280_v49  ;;  %4732 = vmatpush1.bf16.msra.mxu1 %v6280_v49  ;;  %v6326_v49 = vld [vmem:[%s7119_s7 + $0x610] ss:$8 sps:$4 sm:$0xff]  }
 0x415   : > { %4289 = vmatprep.subr.bf16.mxu0 %v6281_v50  ;;  %4733 = vmatprep.subr.bf16.mxu1 %v6281_v50  ;;  %v6327_v50 = vld [vmem:[%s7119_s7 + $0x624] ss:$8 sps:$4 sm:$0xff]  }
 0x418   : > { %4290 = vmatpush1.bf16.msra.mxu0 %v6282_v51  ;;  %4734 = vmatpush1.bf16.msra.mxu1 %v6282_v51  ;;  %v6328_v51 = vld [vmem:[%s7119_s7 + $0x620] ss:$8 sps:$4 sm:$0xff]  }
 0x419   : > { %4291 = vmatprep.subr.bf16.mxu0 %v6283_v52  ;;  %4735 = vmatprep.subr.bf16.mxu1 %v6283_v52  ;;  %v6329_v52 = vld [vmem:[%s7119_s7 + $0x634] ss:$8 sps:$4 sm:$0xff]  }
 0x41c   : > { %4292 = vmatpush1.bf16.msra.mxu0 %v6284_v53  ;;  %4736 = vmatpush1.bf16.msra.mxu1 %v6284_v53  ;;  %v6330_v53 = vld [vmem:[%s7119_s7 + $0x630] ss:$8 sps:$4 sm:$0xff]  }
 0x41d   : > { %4293 = vmatprep.subr.bf16.mxu0 %v6285_v54  ;;  %4737 = vmatprep.subr.bf16.mxu1 %v6285_v54  ;;  %v6331_v54 = vld [vmem:[%s7119_s7 + $0x644] ss:$8 sps:$4 sm:$0xff]  }
 0x420   : > { %4294 = vmatpush1.bf16.msra.mxu0 %v6286_v61  ;;  %4738 = vmatpush1.bf16.msra.mxu1 %v6286_v61  ;;  %v6332_v61 = vld [vmem:[%s7119_s7 + $0x640] ss:$8 sps:$4 sm:$0xff]  }
 0x421   : > { %4295 = vmatprep.subr.bf16.mxu0 %v6287_v62  ;;  %4739 = vmatprep.subr.bf16.mxu1 %v6287_v62  ;;  %v6333_v62 = vld [vmem:[%s7119_s7 + $0x654] ss:$8 sps:$4 sm:$0xff]  }
 0x424   : > { %4296 = vmatpush1.bf16.msra.mxu0 %v6288_v63  ;;  %4740 = vmatpush1.bf16.msra.mxu1 %v6288_v63  ;;  %v6334_v63 = vld [vmem:[%s7119_s7 + $0x650] ss:$8 sps:$4 sm:$0xff]  }
 0x425   : > { %4297 = vmatprep.subr.bf16.mxu0 %v6289_v0  ;;  %4741 = vmatprep.subr.bf16.mxu1 %v6289_v0  ;;  %v6335_v0 = vld [vmem:[%s7119_s7 + $0x664] ss:$8 sps:$4 sm:$0xff]  }
 0x428   : > { %4298 = vmatpush1.bf16.msra.mxu0 %v6290_v5  ;;  %4742 = vmatpush1.bf16.msra.mxu1 %v6290_v5  ;;  %v6340_v5 = vld [vmem:[%s7119_s7 + $0x680] ss:$8 sps:$4 sm:$0xff]  }
 0x429   : > { %4308 = vmatprep.subr.bf16.mxu0 %v6291_v6  ;;  %4752 = vmatprep.subr.bf16.mxu1 %v6291_v6  ;;  %v6341_v6 = vld [vmem:[%s7119_s7 + $0x694] ss:$8 sps:$4 sm:$0xff]  }
 0x42b   : > { %4300 = vmatmul.mubr.bf16.vlgmr.msra.gmra.mrb[4].mxu0 %v5415_v1  ;;  %4744 = vmatmul.mubr.bf16.vlgmr.msra.gmra.mrb[4].mxu1 %v5442_v2  ;;  %v6336_v1 = vld [vmem:[%s7119_s7 + $0x660] ss:$8 sps:$4 sm:$0xff]   ;;  %v6337_v2 = vld [vmem:[%s7119_s7 + $0x674] ss:$8 sps:$4 sm:$0xff]  }
 0x42c   : > { %4309 = vmatpush1.bf16.msra.mxu0 %v6292_v9  ;;  %4753 = vmatpush1.bf16.msra.mxu1 %v6292_v9  ;;  %v6344_v9 = vld [vmem:[%s7119_s7 + $0x6a0] ss:$8 sps:$4 sm:$0xff]  }
 0x42d   : > { %4310 = vmatprep.subr.bf16.mxu0 %v6293_v10  ;;  %4754 = vmatprep.subr.bf16.mxu1 %v6293_v10  ;;  %v6345_v10 = vld [vmem:[%s7119_s7 + $0x6b4] ss:$8 sps:$4 sm:$0xff]  }
 0x42e   : > { %4340 = vmatprep.mubr.bf16.mxu0 %v5418_v7  ;;  %4784 = vmatprep.mubr.bf16.mxu1 %v5445_v8  ;;  %v6342_v7 = vld [vmem:[%s7119_s7 + $0x690] ss:$8 sps:$4 sm:$0xff]   ;;  %v6343_v8 = vld [vmem:[%s7119_s7 + $0x6a4] ss:$8 sps:$4 sm:$0xff]  }
 0x430   : > { %4311 = vmatpush1.bf16.msra.mxu0 %v6294_v11  ;;  %4755 = vmatpush1.bf16.msra.mxu1 %v6294_v11  ;;  %v6346_v11 = vld [vmem:[%s7119_s7 + $0x6b0] ss:$8 sps:$4 sm:$0xff]  }
 0x431   : > { %4312 = vmatprep.subr.bf16.mxu0 %v6295_v12  ;;  %4756 = vmatprep.subr.bf16.mxu1 %v6295_v12  ;;  %v6347_v12 = vld [vmem:[%s7119_s7 + $0x6c4] ss:$8 sps:$4 sm:$0xff]  }
 0x434   : > { %4313 = vmatpush1.bf16.msra.mxu0 %v6296_v13  ;;  %4757 = vmatpush1.bf16.msra.mxu1 %v6296_v13  ;;  %v6348_v13 = vld [vmem:[%s7119_s7 + $0x6c0] ss:$8 sps:$4 sm:$0xff]  }
 0x435   : > { %4314 = vmatprep.subr.bf16.mxu0 %v6297_v14  ;;  %4758 = vmatprep.subr.bf16.mxu1 %v6297_v14  ;;  %v6349_v14 = vld [vmem:[%s7119_s7 + $0x6d4] ss:$8 sps:$4 sm:$0xff]  }
 0x438   : > { %4315 = vmatpush1.bf16.msra.mxu0 %v6298_v15  ;;  %4759 = vmatpush1.bf16.msra.mxu1 %v6298_v15  ;;  %v6350_v15 = vld [vmem:[%s7119_s7 + $0x6d0] ss:$8 sps:$4 sm:$0xff]  }
 0x439   : > { %4316 = vmatprep.subr.bf16.mxu0 %v6299_v16  ;;  %4760 = vmatprep.subr.bf16.mxu1 %v6299_v16  ;;  %v6351_v16 = vld [vmem:[%s7119_s7 + $0x6e4] ss:$8 sps:$4 sm:$0xff]  }
 0x43c   : > { %4317 = vmatpush1.bf16.msra.mxu0 %v6300_v17  ;;  %4761 = vmatpush1.bf16.msra.mxu1 %v6300_v17  ;;  %v6352_v17 = vld [vmem:[%s7119_s7 + $0x6e0] ss:$8 sps:$4 sm:$0xff]  }
 0x43d   : > { %4318 = vmatprep.subr.bf16.mxu0 %v6301_v18  ;;  %4762 = vmatprep.subr.bf16.mxu1 %v6301_v18  ;;  %v6353_v18 = vld [vmem:[%s7119_s7 + $0x6f4] ss:$8 sps:$4 sm:$0xff]  }
 0x440   : > { %4319 = vmatpush1.bf16.msra.mxu0 %v6302_v19  ;;  %4763 = vmatpush1.bf16.msra.mxu1 %v6302_v19  ;;  %v5419_v19 = vcombine.low %v7871_v41, %v7871_v41  ;;  %v6370_v41 = vld [vmem:[%s7119_s7 + $0x770] ss:$8 sps:$4 sm:$0xff]  }
 0x441   : > { %4320 = vmatprep.subr.bf16.mxu0 %v6303_v20  ;;  %4764 = vmatprep.subr.bf16.mxu1 %v6303_v20  ;;  %v5446_v20 = vcombine.low %v7876_v42, %v7876_v42  ;;  %v6371_v42 = vld [vmem:[%s7119_s7 + $0x784] ss:$8 sps:$4 sm:$0xff]  }
 0x444   : > { %4321 = vmatpush1.bf16.msra.mxu0 %v6304_v21  ;;  %4765 = vmatpush1.bf16.msra.mxu1 %v6304_v21  ;;  %v7921_v21 = vld [vmem:[%s8047_s0 + $0xc8] sm:$0xff] }
 0x445   : > { %4322 = vmatprep.subr.bf16.mxu0 %v6305_v22  ;;  %4766 = vmatprep.subr.bf16.mxu1 %v6305_v22  ;;  %v7926_v22 = vld [vmem:[%s8047_s0 + $0x110] sm:$0xff] }
 0x448   : > { %4323 = vmatpush1.bf16.msra.mxu0 %v6306_v23  ;;  %4767 = vmatpush1.bf16.msra.mxu1 %v6306_v23  ;;  %v6354_v23 = vld [vmem:[%s7119_s7 + $0x6f0] ss:$8 sps:$4 sm:$0xff]  }
 0x449   : > { %4324 = vmatprep.subr.bf16.mxu0 %v6307_v24  ;;  %4768 = vmatprep.subr.bf16.mxu1 %v6307_v24  ;;  %v6355_v24 = vld [vmem:[%s7119_s7 + $0x704] ss:$8 sps:$4 sm:$0xff]  }
 0x44c   : > { %4325 = vmatpush1.bf16.msra.mxu0 %v6308_v25  ;;  %4769 = vmatpush1.bf16.msra.mxu1 %v6308_v25  ;;  %v5422_v25 = vcombine.high %v7921_v21, %v7921_v21 }
 0x44d   : > { %4326 = vmatprep.subr.bf16.mxu0 %v6309_v26  ;;  %4770 = vmatprep.subr.bf16.mxu1 %v6309_v26  ;;  %v5449_v26 = vcombine.high %v7926_v22, %v7926_v22 }
 0x450   : > { %4327 = vmatpush1.bf16.msra.mxu0 %v6310_v27  ;;  %4771 = vmatpush1.bf16.msra.mxu1 %v6310_v27  ;;  %v6356_v27 = vld [vmem:[%s7119_s7 + $0x700] ss:$8 sps:$4 sm:$0xff]  }
 0x451   : > { %4328 = vmatprep.subr.bf16.mxu0 %v6311_v28  ;;  %4772 = vmatprep.subr.bf16.mxu1 %v6311_v28  ;;  %v6357_v28 = vld [vmem:[%s7119_s7 + $0x714] ss:$8 sps:$4 sm:$0xff]  }
 0x454   : > { %4329 = vmatpush1.bf16.msra.mxu0 %v6312_v29  ;;  %4773 = vmatpush1.bf16.msra.mxu1 %v6312_v29  ;;  %v6358_v29 = vld [vmem:[%s7119_s7 + $0x710] ss:$8 sps:$4 sm:$0xff]  }
 0x455   : > { %4330 = vmatprep.subr.bf16.mxu0 %v6313_v30  ;;  %4774 = vmatprep.subr.bf16.mxu1 %v6313_v30  ;;  %v6359_v30 = vld [vmem:[%s7119_s7 + $0x724] ss:$8 sps:$4 sm:$0xff]  }
 0x458   : > { %4331 = vmatpush1.bf16.msra.mxu0 %v6314_v31  ;;  %4775 = vmatpush1.bf16.msra.mxu1 %v6314_v31  ;;  %v6360_v31 = vld [vmem:[%s7119_s7 + $0x720] ss:$8 sps:$4 sm:$0xff]  }
 0x459   : > { %4332 = vmatprep.subr.bf16.mxu0 %v6315_v32  ;;  %4776 = vmatprep.subr.bf16.mxu1 %v6315_v32  ;;  %v6361_v32 = vld [vmem:[%s7119_s7 + $0x734] ss:$8 sps:$4 sm:$0xff]  }
 0x45c   : > { %4333 = vmatpush1.bf16.msra.mxu0 %v6316_v33  ;;  %4777 = vmatpush1.bf16.msra.mxu1 %v6316_v33  ;;  %v6362_v33 = vld [vmem:[%s7119_s7 + $0x730] ss:$8 sps:$4 sm:$0xff]  }
 0x45d   : > { %4334 = vmatprep.subr.bf16.mxu0 %v6317_v34  ;;  %4778 = vmatprep.subr.bf16.mxu1 %v6317_v34  ;;  %v6363_v34 = vld [vmem:[%s7119_s7 + $0x744] ss:$8 sps:$4 sm:$0xff]  }
 0x460   : > { %4335 = vmatpush1.bf16.msra.mxu0 %v6318_v35  ;;  %4779 = vmatpush1.bf16.msra.mxu1 %v6318_v35  ;;  %v6364_v35 = vld [vmem:[%s7119_s7 + $0x740] ss:$8 sps:$4 sm:$0xff]  }
 0x461   : > { %4336 = vmatprep.subr.bf16.mxu0 %v6319_v36  ;;  %4780 = vmatprep.subr.bf16.mxu1 %v6319_v36  ;;  %v6365_v36 = vld [vmem:[%s7119_s7 + $0x754] ss:$8 sps:$4 sm:$0xff]  }
 0x464   : > { %4337 = vmatpush1.bf16.msra.mxu0 %v6320_v37  ;;  %4781 = vmatpush1.bf16.msra.mxu1 %v6320_v37  ;;  %v6366_v37 = vld [vmem:[%s7119_s7 + $0x750] ss:$8 sps:$4 sm:$0xff]  }
 0x465   : > { %4338 = vmatprep.subr.bf16.mxu0 %v6321_v38  ;;  %4782 = vmatprep.subr.bf16.mxu1 %v6321_v38  ;;  %v6367_v38 = vld [vmem:[%s7119_s7 + $0x764] ss:$8 sps:$4 sm:$0xff]  }
 0x468   : > { %4339 = vmatpush1.bf16.msra.mxu0 %v6322_v43  ;;  %4783 = vmatpush1.bf16.msra.mxu1 %v6322_v43  ;;  %v6372_v43 = vld [vmem:[%s7119_s7 + $0x780] ss:$8 sps:$4 sm:$0xff]  }
 0x469   : > { %4349 = vmatprep.subr.bf16.mxu0 %v6323_v44  ;;  %4793 = vmatprep.subr.bf16.mxu1 %v6323_v44  ;;  %v6373_v44 = vld [vmem:[%s7119_s7 + $0x794] ss:$8 sps:$4 sm:$0xff]  }
 0x46b   : > { %4341 = vmatmul.mubr.bf16.vlgmr.msra.gmra.mrb[4].mxu0 %v5417_v39  ;;  %4785 = vmatmul.mubr.bf16.vlgmr.msra.gmra.mrb[4].mxu1 %v5444_v40  ;;  %v6368_v39 = vld [vmem:[%s7119_s7 + $0x760] ss:$8 sps:$4 sm:$0xff]   ;;  %v6369_v40 = vld [vmem:[%s7119_s7 + $0x774] ss:$8 sps:$4 sm:$0xff]  }
 0x46c   : > { %4350 = vmatpush1.bf16.msra.mxu0 %v6324_v47  ;;  %4794 = vmatpush1.bf16.msra.mxu1 %v6324_v47  ;;  %v6376_v47 = vld [vmem:[%s7119_s7 + $0x7a0] ss:$8 sps:$4 sm:$0xff]  }
 0x46d   : > { %4351 = vmatprep.subr.bf16.mxu0 %v6325_v48  ;;  %4795 = vmatprep.subr.bf16.mxu1 %v6325_v48  ;;  %v6377_v48 = vld [vmem:[%s7119_s7 + $0x7b4] ss:$8 sps:$4 sm:$0xff]  }
 0x46e   : > { %4381 = vmatprep.mubr.bf16.mxu0 %v5420_v45  ;;  %4825 = vmatprep.mubr.bf16.mxu1 %v5447_v46  ;;  %v6374_v45 = vld [vmem:[%s7119_s7 + $0x790] ss:$8 sps:$4 sm:$0xff]   ;;  %v6375_v46 = vld [vmem:[%s7119_s7 + $0x7a4] ss:$8 sps:$4 sm:$0xff]  }
 0x470   : > { %4352 = vmatpush1.bf16.msra.mxu0 %v6326_v49  ;;  %4796 = vmatpush1.bf16.msra.mxu1 %v6326_v49  ;;  %v6378_v49 = vld [vmem:[%s7119_s7 + $0x7b0] ss:$8 sps:$4 sm:$0xff]  }
 0x471   : > { %4353 = vmatprep.subr.bf16.mxu0 %v6327_v50  ;;  %4797 = vmatprep.subr.bf16.mxu1 %v6327_v50  ;;  %v6379_v50 = vld [vmem:[%s7119_s7 + $0x7c4] ss:$8 sps:$4 sm:$0xff]  }
 0x474   : > { %4354 = vmatpush1.bf16.msra.mxu0 %v6328_v51  ;;  %4798 = vmatpush1.bf16.msra.mxu1 %v6328_v51  ;;  %v6380_v51 = vld [vmem:[%s7119_s7 + $0x7c0] ss:$8 sps:$4 sm:$0xff]  }
 0x475   : > { %4355 = vmatprep.subr.bf16.mxu0 %v6329_v52  ;;  %4799 = vmatprep.subr.bf16.mxu1 %v6329_v52  ;;  %v6381_v52 = vld [vmem:[%s7119_s7 + $0x7d4] ss:$8 sps:$4 sm:$0xff]  }
 0x478   : > { %4356 = vmatpush1.bf16.msra.mxu0 %v6330_v53  ;;  %4800 = vmatpush1.bf16.msra.mxu1 %v6330_v53  ;;  %v6382_v53 = vld [vmem:[%s7119_s7 + $0x7d0] ss:$8 sps:$4 sm:$0xff]  }
 0x479   : > { %4357 = vmatprep.subr.bf16.mxu0 %v6331_v54  ;;  %4801 = vmatprep.subr.bf16.mxu1 %v6331_v54  ;;  %v6383_v54 = vld [vmem:[%s7119_s7 + $0x7e4] ss:$8 sps:$4 sm:$0xff]  }
 0x47c   : > { %4358 = vmatpush1.bf16.msra.mxu0 %v6332_v61  ;;  %4802 = vmatpush1.bf16.msra.mxu1 %v6332_v61  ;;  %v6384_v61 = vld [vmem:[%s7119_s7 + $0x7e0] ss:$8 sps:$4 sm:$0xff]  }
 0x47d   : > { %4359 = vmatprep.subr.bf16.mxu0 %v6333_v62  ;;  %4803 = vmatprep.subr.bf16.mxu1 %v6333_v62  ;;  %v6385_v62 = vld [vmem:[%s7119_s7 + $0x7f4] ss:$8 sps:$4 sm:$0xff]  }
 0x480   : > { %4360 = vmatpush1.bf16.msra.mxu0 %v6334_v63  ;;  %4804 = vmatpush1.bf16.msra.mxu1 %v6334_v63  ;;  %v5421_v63 = vcombine.low %v7921_v21, %v7921_v21  ;;  %v6402_v21 = vld [vmem:[%s7119_s7 + $0x870] ss:$8 sps:$4 sm:$0xff]  }
 0x481   : > { %4361 = vmatprep.subr.bf16.mxu0 %v6335_v0  ;;  %4805 = vmatprep.subr.bf16.mxu1 %v6335_v0  ;;  %v5448_v0 = vcombine.low %v7926_v22, %v7926_v22  ;;  %v6403_v22 = vld [vmem:[%s7119_s7 + $0x884] ss:$8 sps:$4 sm:$0xff]  }
 0x484   : > { %4362 = vmatpush1.bf16.msra.mxu0 %v6336_v1  ;;  %4806 = vmatpush1.bf16.msra.mxu1 %v6336_v1  ;;  %v7971_v1 = vld [vmem:[%s8047_s0 + $0xd0] sm:$0xff] }
 0x485   : > { %4363 = vmatprep.subr.bf16.mxu0 %v6337_v2  ;;  %4807 = vmatprep.subr.bf16.mxu1 %v6337_v2  ;;  %v7976_v2 = vld [vmem:[%s8047_s0 + $0x118] sm:$0xff] }
 0x488   : > { %4364 = vmatpush1.bf16.msra.mxu0 %v6338_v3  ;;  %4808 = vmatpush1.bf16.msra.mxu1 %v6338_v3  ;;  %v6386_v3 = vld [vmem:[%s7119_s7 + $0x7f0] ss:$8 sps:$4 sm:$0xff]  }
 0x489   : > { %4365 = vmatprep.subr.bf16.mxu0 %v6339_v4  ;;  %4809 = vmatprep.subr.bf16.mxu1 %v6339_v4  ;;  %v6387_v4 = vld [vmem:[%s7119_s7 + $0x804] ss:$8 sps:$4 sm:$0xff]  }
 0x48c   : > { %4366 = vmatpush1.bf16.msra.mxu0 %v6340_v5  ;;  %4810 = vmatpush1.bf16.msra.mxu1 %v6340_v5  ;;  %v5424_v5 = vcombine.high %v7971_v1, %v7971_v1 }
 0x48d   : > { %4367 = vmatprep.subr.bf16.mxu0 %v6341_v6  ;;  %4811 = vmatprep.subr.bf16.mxu1 %v6341_v6  ;;  %v5451_v6 = vcombine.high %v7976_v2, %v7976_v2 }
 0x490   : > { %4368 = vmatpush1.bf16.msra.mxu0 %v6342_v7  ;;  %4812 = vmatpush1.bf16.msra.mxu1 %v6342_v7  ;;  %v6388_v7 = vld [vmem:[%s7119_s7 + $0x800] ss:$8 sps:$4 sm:$0xff]  }
 0x491   : > { %4369 = vmatprep.subr.bf16.mxu0 %v6343_v8  ;;  %4813 = vmatprep.subr.bf16.mxu1 %v6343_v8  ;;  %v6389_v8 = vld [vmem:[%s7119_s7 + $0x814] ss:$8 sps:$4 sm:$0xff]  }
 0x494   : > { %4370 = vmatpush1.bf16.msra.mxu0 %v6344_v9  ;;  %4814 = vmatpush1.bf16.msra.mxu1 %v6344_v9  ;;  %v6390_v9 = vld [vmem:[%s7119_s7 + $0x810] ss:$8 sps:$4 sm:$0xff]  }
 0x495   : > { %4371 = vmatprep.subr.bf16.mxu0 %v6345_v10  ;;  %4815 = vmatprep.subr.bf16.mxu1 %v6345_v10  ;;  %v6391_v10 = vld [vmem:[%s7119_s7 + $0x824] ss:$8 sps:$4 sm:$0xff]  }
 0x498   : > { %4372 = vmatpush1.bf16.msra.mxu0 %v6346_v11  ;;  %4816 = vmatpush1.bf16.msra.mxu1 %v6346_v11  ;;  %v6392_v11 = vld [vmem:[%s7119_s7 + $0x820] ss:$8 sps:$4 sm:$0xff]  }
 0x499   : > { %4373 = vmatprep.subr.bf16.mxu0 %v6347_v12  ;;  %4817 = vmatprep.subr.bf16.mxu1 %v6347_v12  ;;  %v6393_v12 = vld [vmem:[%s7119_s7 + $0x834] ss:$8 sps:$4 sm:$0xff]  }
 0x49c   : > { %4374 = vmatpush1.bf16.msra.mxu0 %v6348_v13  ;;  %4818 = vmatpush1.bf16.msra.mxu1 %v6348_v13  ;;  %v6394_v13 = vld [vmem:[%s7119_s7 + $0x830] ss:$8 sps:$4 sm:$0xff]  }
 0x49d   : > { %4375 = vmatprep.subr.bf16.mxu0 %v6349_v14  ;;  %4819 = vmatprep.subr.bf16.mxu1 %v6349_v14  ;;  %v6395_v14 = vld [vmem:[%s7119_s7 + $0x844] ss:$8 sps:$4 sm:$0xff]  }
 0x4a0   : > { %4376 = vmatpush1.bf16.msra.mxu0 %v6350_v15  ;;  %4820 = vmatpush1.bf16.msra.mxu1 %v6350_v15  ;;  %v6396_v15 = vld [vmem:[%s7119_s7 + $0x840] ss:$8 sps:$4 sm:$0xff]  }
 0x4a1   : > { %4377 = vmatprep.subr.bf16.mxu0 %v6351_v16  ;;  %4821 = vmatprep.subr.bf16.mxu1 %v6351_v16  ;;  %v6397_v16 = vld [vmem:[%s7119_s7 + $0x854] ss:$8 sps:$4 sm:$0xff]  }
 0x4a4   : > { %4378 = vmatpush1.bf16.msra.mxu0 %v6352_v17  ;;  %4822 = vmatpush1.bf16.msra.mxu1 %v6352_v17  ;;  %v6398_v17 = vld [vmem:[%s7119_s7 + $0x850] ss:$8 sps:$4 sm:$0xff]  }
 0x4a5   : > { %4379 = vmatprep.subr.bf16.mxu0 %v6353_v18  ;;  %4823 = vmatprep.subr.bf16.mxu1 %v6353_v18  ;;  %v6399_v18 = vld [vmem:[%s7119_s7 + $0x864] ss:$8 sps:$4 sm:$0xff]  }
 0x4a8   : > { %4380 = vmatpush1.bf16.msra.mxu0 %v6354_v23  ;;  %4824 = vmatpush1.bf16.msra.mxu1 %v6354_v23  ;;  %v6404_v23 = vld [vmem:[%s7119_s7 + $0x880] ss:$8 sps:$4 sm:$0xff]  }
 0x4a9   : > { %4390 = vmatprep.subr.bf16.mxu0 %v6355_v24  ;;  %4834 = vmatprep.subr.bf16.mxu1 %v6355_v24  ;;  %v6405_v24 = vld [vmem:[%s7119_s7 + $0x894] ss:$8 sps:$4 sm:$0xff]  }
 0x4ab   : > { %4382 = vmatmul.mubr.bf16.vlgmr.msra.gmra.mrb[4].mxu0 %v5419_v19  ;;  %4826 = vmatmul.mubr.bf16.vlgmr.msra.gmra.mrb[4].mxu1 %v5446_v20  ;;  %v6400_v19 = vld [vmem:[%s7119_s7 + $0x860] ss:$8 sps:$4 sm:$0xff]   ;;  %v6401_v20 = vld [vmem:[%s7119_s7 + $0x874] ss:$8 sps:$4 sm:$0xff]  }
 0x4ac   : > { %4391 = vmatpush1.bf16.msra.mxu0 %v6356_v27  ;;  %4835 = vmatpush1.bf16.msra.mxu1 %v6356_v27  ;;  %v6408_v27 = vld [vmem:[%s7119_s7 + $0x8a0] ss:$8 sps:$4 sm:$0xff]  }
 0x4ad   : > { %4392 = vmatprep.subr.bf16.mxu0 %v6357_v28  ;;  %4836 = vmatprep.subr.bf16.mxu1 %v6357_v28  ;;  %v6409_v28 = vld [vmem:[%s7119_s7 + $0x8b4] ss:$8 sps:$4 sm:$0xff]  }
 0x4ae   : > { %4422 = vmatprep.mubr.bf16.mxu0 %v5422_v25  ;;  %4866 = vmatprep.mubr.bf16.mxu1 %v5449_v26  ;;  %v6406_v25 = vld [vmem:[%s7119_s7 + $0x890] ss:$8 sps:$4 sm:$0xff]   ;;  %v6407_v26 = vld [vmem:[%s7119_s7 + $0x8a4] ss:$8 sps:$4 sm:$0xff]  }
 0x4b0   : > { %4393 = vmatpush1.bf16.msra.mxu0 %v6358_v29  ;;  %4837 = vmatpush1.bf16.msra.mxu1 %v6358_v29  ;;  %v6410_v29 = vld [vmem:[%s7119_s7 + $0x8b0] ss:$8 sps:$4 sm:$0xff]  }
 0x4b1   : > { %4394 = vmatprep.subr.bf16.mxu0 %v6359_v30  ;;  %4838 = vmatprep.subr.bf16.mxu1 %v6359_v30  ;;  %v6411_v30 = vld [vmem:[%s7119_s7 + $0x8c4] ss:$8 sps:$4 sm:$0xff]  }
 0x4b4   : > { %4395 = vmatpush1.bf16.msra.mxu0 %v6360_v31  ;;  %4839 = vmatpush1.bf16.msra.mxu1 %v6360_v31  ;;  %v6412_v31 = vld [vmem:[%s7119_s7 + $0x8c0] ss:$8 sps:$4 sm:$0xff]  }
 0x4b5   : > { %4396 = vmatprep.subr.bf16.mxu0 %v6361_v32  ;;  %4840 = vmatprep.subr.bf16.mxu1 %v6361_v32  ;;  %v6413_v32 = vld [vmem:[%s7119_s7 + $0x8d4] ss:$8 sps:$4 sm:$0xff]  }
 0x4b8   : > { %4397 = vmatpush1.bf16.msra.mxu0 %v6362_v33  ;;  %4841 = vmatpush1.bf16.msra.mxu1 %v6362_v33  ;;  %v6414_v33 = vld [vmem:[%s7119_s7 + $0x8d0] ss:$8 sps:$4 sm:$0xff]  }
 0x4b9   : > { %4398 = vmatprep.subr.bf16.mxu0 %v6363_v34  ;;  %4842 = vmatprep.subr.bf16.mxu1 %v6363_v34  ;;  %v6415_v34 = vld [vmem:[%s7119_s7 + $0x8e4] ss:$8 sps:$4 sm:$0xff]  }
 0x4bc   : > { %4399 = vmatpush1.bf16.msra.mxu0 %v6364_v35  ;;  %4843 = vmatpush1.bf16.msra.mxu1 %v6364_v35  ;;  %v6416_v35 = vld [vmem:[%s7119_s7 + $0x8e0] ss:$8 sps:$4 sm:$0xff]  }
 0x4bd   : > { %4400 = vmatprep.subr.bf16.mxu0 %v6365_v36  ;;  %4844 = vmatprep.subr.bf16.mxu1 %v6365_v36  ;;  %v6417_v36 = vld [vmem:[%s7119_s7 + $0x8f4] ss:$8 sps:$4 sm:$0xff]  }
 0x4c0   : > { %4401 = vmatpush1.bf16.msra.mxu0 %v6366_v37  ;;  %4845 = vmatpush1.bf16.msra.mxu1 %v6366_v37  ;;  %v5423_v37 = vcombine.low %v7971_v1, %v7971_v1 }
 0x4c1   : > { %4402 = vmatprep.subr.bf16.mxu0 %v6367_v38  ;;  %4846 = vmatprep.subr.bf16.mxu1 %v6367_v38  ;;  %v5450_v38 = vcombine.low %v7976_v2, %v7976_v2 }
 0x4c4   : > { %4403 = vmatpush1.bf16.msra.mxu0 %v6368_v39  ;;  %4847 = vmatpush1.bf16.msra.mxu1 %v6368_v39  ;;  %v6418_v39 = vld [vmem:[%s7119_s7 + $0x8f0] ss:$8 sps:$4 sm:$0xff]  }
 0x4c5   : > { %4404 = vmatprep.subr.bf16.mxu0 %v6369_v40  ;;  %4848 = vmatprep.subr.bf16.mxu1 %v6369_v40  ;;  %v4920_v40 = vlaneseq }
 0x4c8   : > { %4405 = vmatpush1.bf16.msra.mxu0 %v6370_v41  ;;  %4849 = vmatpush1.bf16.msra.mxu1 %v6370_v41  ;;  %v4921_v41 = vshrl.u32 %v4920_v40, 7 }
 0x4c9   : > { %4406 = vmatprep.subr.bf16.mxu0 %v6371_v42  ;;  %4850 = vmatprep.subr.bf16.mxu1 %v6371_v42 }
 0x4ca   : > { %v4922_v42 = vsub.s32 0, %v4921_v41 }
 0x4cc   : > { %4407 = vmatpush1.bf16.msra.mxu0 %v6372_v43  ;;  %4851 = vmatpush1.bf16.msra.mxu1 %v6372_v43  ;;  %v4918_v43 = vld [vmem:[%s1405_s25] sm:$0x3] }
 0x4cd   : > { %4408 = vmatprep.subr.bf16.mxu0 %v6373_v44  ;;  %4852 = vmatprep.subr.bf16.mxu1 %v6373_v44  ;;  %v4926_v44 = vsub.s32 1, %v4921_v41 }
 0x4d0   : > { %4409 = vmatpush1.bf16.msra.mxu0 %v6374_v45  ;;  %4853 = vmatpush1.bf16.msra.mxu1 %v6374_v45 }
 0x4d1   : > { %4410 = vmatprep.subr.bf16.mxu0 %v6375_v46  ;;  %4854 = vmatprep.subr.bf16.mxu1 %v6375_v46 }
 0x4d4   : > { %4411 = vmatpush1.bf16.msra.mxu0 %v6376_v47  ;;  %4855 = vmatpush1.bf16.msra.mxu1 %v6376_v47 }
 0x4d5   : > { %4412 = vmatprep.subr.bf16.mxu0 %v6377_v48  ;;  %4856 = vmatprep.subr.bf16.mxu1 %v6377_v48  ;;  %v4923_v48 = vrot.slane %v4918_v43, %v4922_v42 }
 0x4d8   : > { %4413 = vmatpush1.bf16.msra.mxu0 %v6378_v49  ;;  %4857 = vmatpush1.bf16.msra.mxu1 %v6378_v49 }
 0x4d9   : > { %4414 = vmatprep.subr.bf16.mxu0 %v6379_v50  ;;  %4858 = vmatprep.subr.bf16.mxu1 %v6379_v50 }
 0x4dc   : > { %4415 = vmatpush1.bf16.msra.mxu0 %v6380_v51  ;;  %4859 = vmatpush1.bf16.msra.mxu1 %v6380_v51 }
 0x4dd   : > { %4416 = vmatprep.subr.bf16.mxu0 %v6381_v52  ;;  %4860 = vmatprep.subr.bf16.mxu1 %v6381_v52  ;;  %v4927_v52 = vrot.slane %v4918_v43, %v4926_v44 }
 0x4e0   : > { %4417 = vmatpush1.bf16.msra.mxu0 %v6382_v53  ;;  %4861 = vmatpush1.bf16.msra.mxu1 %v6382_v53 }
 0x4e1   : > { %4418 = vmatprep.subr.bf16.mxu0 %v6383_v54  ;;  %4862 = vmatprep.subr.bf16.mxu1 %v6383_v54 }
 0x4e4   : > { %4419 = vmatpush1.bf16.msra.mxu0 %v6384_v61  ;;  %4863 = vmatpush1.bf16.msra.mxu1 %v6384_v61 }
 0x4e5   : > { %4420 = vmatprep.subr.bf16.mxu0 %v6385_v62  ;;  %4864 = vmatprep.subr.bf16.mxu1 %v6385_v62 }
 0x4e8   : > { %4421 = vmatpush1.bf16.msra.mxu0 %v6386_v3  ;;  %4865 = vmatpush1.bf16.msra.mxu1 %v6386_v3 }
 0x4e9   : > { %4431 = vmatprep.subr.bf16.mxu0 %v6387_v4  ;;  %4875 = vmatprep.subr.bf16.mxu1 %v6387_v4 }
 0x4eb   : > { %4423 = vmatmul.mubr.bf16.vlgmr.msra.gmra.mrb[4].mxu0 %v5421_v63  ;;  %4867 = vmatmul.mubr.bf16.vlgmr.msra.gmra.mrb[4].mxu1 %v5448_v0 }
 0x4ec   : > { %4432 = vmatpush1.bf16.msra.mxu0 %v6388_v7  ;;  %4876 = vmatpush1.bf16.msra.mxu1 %v6388_v7 }
 0x4ed   : > { %4433 = vmatprep.subr.bf16.mxu0 %v6389_v8  ;;  %4877 = vmatprep.subr.bf16.mxu1 %v6389_v8 }
 0x4ee   : > { %4463 = vmatprep.mubr.bf16.mxu0 %v5424_v5  ;;  %4907 = vmatprep.mubr.bf16.mxu1 %v5451_v6 }
 0x4f0   : > { %4434 = vmatpush1.bf16.msra.mxu0 %v6390_v9  ;;  %4878 = vmatpush1.bf16.msra.mxu1 %v6390_v9 }
 0x4f1   : > { %4435 = vmatprep.subr.bf16.mxu0 %v6391_v10  ;;  %4879 = vmatprep.subr.bf16.mxu1 %v6391_v10 }
 0x4f4   : > { %4436 = vmatpush1.bf16.msra.mxu0 %v6392_v11  ;;  %4880 = vmatpush1.bf16.msra.mxu1 %v6392_v11 }
 0x4f5   : > { %4437 = vmatprep.subr.bf16.mxu0 %v6393_v12  ;;  %4881 = vmatprep.subr.bf16.mxu1 %v6393_v12 }
 0x4f8   : > { %4438 = vmatpush1.bf16.msra.mxu0 %v6394_v13  ;;  %4882 = vmatpush1.bf16.msra.mxu1 %v6394_v13 }
 0x4f9   : > { %4439 = vmatprep.subr.bf16.mxu0 %v6395_v14  ;;  %4883 = vmatprep.subr.bf16.mxu1 %v6395_v14 }
 0x4fc   : > { %4440 = vmatpush1.bf16.msra.mxu0 %v6396_v15  ;;  %4884 = vmatpush1.bf16.msra.mxu1 %v6396_v15 }
 0x4fd   : > { %4441 = vmatprep.subr.bf16.mxu0 %v6397_v16  ;;  %4885 = vmatprep.subr.bf16.mxu1 %v6397_v16 }
 0x500   : > { %4442 = vmatpush1.bf16.msra.mxu0 %v6398_v17  ;;  %4886 = vmatpush1.bf16.msra.mxu1 %v6398_v17 }
 0x501   : > { %4443 = vmatprep.subr.bf16.mxu0 %v6399_v18  ;;  %4887 = vmatprep.subr.bf16.mxu1 %v6399_v18 }
 0x504   : > { %4444 = vmatpush1.bf16.msra.mxu0 %v6400_v19  ;;  %4888 = vmatpush1.bf16.msra.mxu1 %v6400_v19 }
 0x505   : > { %4445 = vmatprep.subr.bf16.mxu0 %v6401_v20  ;;  %4889 = vmatprep.subr.bf16.mxu1 %v6401_v20 }
 0x508   : > { %4446 = vmatpush1.bf16.msra.mxu0 %v6402_v21  ;;  %4890 = vmatpush1.bf16.msra.mxu1 %v6402_v21 }
 0x509   : > { %4447 = vmatprep.subr.bf16.mxu0 %v6403_v22  ;;  %4891 = vmatprep.subr.bf16.mxu1 %v6403_v22 }
 0x50c   : > { %4448 = vmatpush1.bf16.msra.mxu0 %v6404_v23  ;;  %4892 = vmatpush1.bf16.msra.mxu1 %v6404_v23 }
 0x50d   : > { %4449 = vmatprep.subr.bf16.mxu0 %v6405_v24  ;;  %4893 = vmatprep.subr.bf16.mxu1 %v6405_v24 }
 0x510   : > { %4450 = vmatpush1.bf16.msra.mxu0 %v6406_v25  ;;  %4894 = vmatpush1.bf16.msra.mxu1 %v6406_v25 }
 0x511   : > { %4451 = vmatprep.subr.bf16.mxu0 %v6407_v26  ;;  %4895 = vmatprep.subr.bf16.mxu1 %v6407_v26 }
 0x514   : > { %4452 = vmatpush1.bf16.msra.mxu0 %v6408_v27  ;;  %4896 = vmatpush1.bf16.msra.mxu1 %v6408_v27 }
 0x515   : > { %4453 = vmatprep.subr.bf16.mxu0 %v6409_v28  ;;  %4897 = vmatprep.subr.bf16.mxu1 %v6409_v28 }
 0x518   : > { %4454 = vmatpush1.bf16.msra.mxu0 %v6410_v29  ;;  %4898 = vmatpush1.bf16.msra.mxu1 %v6410_v29 }
 0x519   : > { %4455 = vmatprep.subr.bf16.mxu0 %v6411_v30  ;;  %4899 = vmatprep.subr.bf16.mxu1 %v6411_v30 }
 0x51c   : > { %4456 = vmatpush1.bf16.msra.mxu0 %v6412_v31  ;;  %4900 = vmatpush1.bf16.msra.mxu1 %v6412_v31 }
 0x51d   : > { %4457 = vmatprep.subr.bf16.mxu0 %v6413_v32  ;;  %4901 = vmatprep.subr.bf16.mxu1 %v6413_v32 }
 0x520   : > { %4458 = vmatpush1.bf16.msra.mxu0 %v6414_v33  ;;  %4902 = vmatpush1.bf16.msra.mxu1 %v6414_v33 }
 0x521   : > { %4459 = vmatprep.subr.bf16.mxu0 %v6415_v34  ;;  %4903 = vmatprep.subr.bf16.mxu1 %v6415_v34 }
 0x524   : > { %4460 = vmatpush1.bf16.msra.mxu0 %v6416_v35  ;;  %4904 = vmatpush1.bf16.msra.mxu1 %v6416_v35 }
 0x525   : > { %4461 = vmatprep.subr.bf16.mxu0 %v6417_v36  ;;  %4905 = vmatprep.subr.bf16.mxu1 %v6417_v36 }
 0x528   : > { %4462 = vmatpush1.bf16.msra.mxu0 %v6418_v39  ;;  %4906 = vmatpush1.bf16.msra.mxu1 %v6418_v39 }
 0x52b   : > { %4464 = vmatmul.mubr.bf16.vlgmr.msra.gmra.mrb[4].mxu0 %v5423_v37  ;;  %4908 = vmatmul.mubr.bf16.vlgmr.msra.gmra.mrb[4].mxu1 %v5450_v38 }
 0x5fe   : > { %v4465_v45 = vpop.f32.mrb[4].mxu0  ;;  %v4909_v46 = vpop.f32.mrb[4].mxu1 }
 0x5ff   : > { %v4472_v47 = vmax.f32 %v4028_v57, %v4465_v45  ;;  %v4467_v49 = vpop.f32.mrb[5].mxu0  ;;  %v4911_v50 = vpop.f32.mrb[5].mxu1 }
 0x600   : > { %v4473_v51 = vmax.f32 %v4029_v60, %v4467_v49  ;;  %v4469_v53 = vpop.f32.mrb[6].mxu0  ;;  %v4913_v54 = vpop.f32.mrb[6].mxu1 }
 0x601   : > { %v4916_v61 = vmax.f32 %v4472_v47, %v4909_v46  ;;  %v4470_v62 = vpop.f32.mrb[7].mxu0  ;;  %v4914_v63 = vpop.f32.mrb[7].mxu1 }
 0x602   : > { %v4917_v0 = vmax.f32 %v4473_v51, %v4911_v50 }
 0x603   : > { %v4930_v1 = vadd.f32 %v4923_v48, %v4916_v61 }
 0x604   : > { %v4931_v2 = vadd.f32 %v4927_v52, %v4917_v0 }
 0x605   : > { %v4932_v3 = vmax.f32 %v4930_v1, 0.0 }
 0x606   : > { %v4933_v55 = vmax.f32 %v4931_v2, 0.0 }
 0x608   : > { %v5456_v56 = vpack.c.bf16 %v4933_v55, %v4932_v3 }
 0x60a   : > { %4942 = vst [vmem:[%s1415_s27] sm:$0xff] %v5456_v56 }
 0x60b PF: > { %s13_s16 = sadd.s32 1, %s6457_s16   ;;  %s8051_s12 = smov %s6445_s13 }
 0x60c   : > { %p10_p10 = scmp.ge.s32.totalorder %s13_s16, 4   ;;  %s8052_s13 = smov %s6514_s20 }
 0x60d   : > { %s8053_s14 = smov %s6453_s15  ;;  %s8054_s15 = smov %s8056_s17 }
 0x60e   :  { %12 = sbr.rel (!%p10_p10) target bundleno = 3 (0x3), region = 114 }

</bundles_post_ra>
